<compile_context>
chip_gen: v7x
topology: tpu7x:2x2x1
jax: 0.10.0
libtpu: 0.0.40
codegen_flags: <defaults>
</compile_context>

<pallas_src>
import functools

import jax
import jax.numpy as jnp
from jax.experimental import pallas as pl
from jax.experimental.pallas import tpu as pltpu


_SQRT_HALF = 0.7071067811865476


def _erf_approx(z):
    # Abramowitz & Stegun 7.1.26 (max abs error ~1.5e-7); only mul/add/exp/where.
    a1, a2, a3, a4, a5 = 0.254829592, -0.284496736, 1.421413741, -1.453152027, 1.061405429
    p = 0.3275911
    s = jnp.where(z >= 0.0, 1.0, -1.0)
    az = jnp.abs(z)
    t = 1.0 / (1.0 + p * az)
    poly = ((((a5 * t + a4) * t + a3) * t + a2) * t + a1) * t
    return s * (1.0 - poly * jnp.exp(-az * az))


def _gelu_exact(z):
    # erf-based GELU, matching torch.nn.functional.gelu (default, exact).
    return 0.5 * z * (1.0 + _erf_approx(z * _SQRT_HALF))


def _block_kernel(x_ref,
                  ln1w_ref, ln1b_ref,
                  wqkv_ref, bqkv_ref, wdwa_ref, bdwa_ref,
                  tempv_ref, hmask_ref, wproj_ref, bproj_ref,
                  ln2w_ref, ln2b_ref,
                  wpi_ref, bpi_ref, wdwf_ref, bdwf_ref, wpo_ref, bpo_ref,
                  o_ref,
                  pad_a_ref, acc_a_ref, pad_f_ref, acc_f_ref,
                  *, H, W, C, hidden):
    HW = H * W
    f32 = jnp.float32

    x = x_ref[0].astype(f32)                                        # (HW, C)

    def layernorm(z, w_ref, b_ref):
        # WithBias LayerNorm over the channel (last) dim, eps=1e-5, unbiased=False.
        mu = jnp.mean(z, axis=-1, keepdims=True)
        zc = z - mu
        var = jnp.mean(zc * zc, axis=-1, keepdims=True)
        return zc * jax.lax.rsqrt(var + 1e-5) * w_ref[...] + b_ref[...]

    def dwconv3x3(z, pad_ref, acc_ref, wdw_ref, bdw_ref, ch):
        # Depthwise 3x3 conv, stride 1, zero-pad 1, on a (HW, ch) channels-last tile.
        # Image is stored into the scratch at row offset 1 (major dim) and column
        # offset 8 (sublane-tile aligned); taps are unaligned *reads* only.
        pad_ref[...] = jnp.zeros_like(pad_ref)
        pad_ref[1:H + 1, 8:8 + W, :] = z.reshape(H, W, ch)
        acc_ref[...] = jnp.zeros_like(acc_ref)
        for ky in range(3):
            for kx in range(3):
                idx = 3 * ky + kx
                w_tap = wdw_ref[idx:idx + 1, :]                     # (1, ch)
                acc_ref[...] += pad_ref[ky:ky + H, kx + 7:kx + 7 + W, :] * w_tap
        return acc_ref[...].reshape(HW, ch) + bdw_ref[...]

    # ---------------- attention branch ----------------
    y = layernorm(x, ln1w_ref, ln1b_ref)                            # (HW, C)
    qkv = jnp.dot(y, wqkv_ref[...], preferred_element_type=f32) + bqkv_ref[...]   # (HW, 3C)
    qkv = dwconv3x3(qkv, pad_a_ref, acc_a_ref, wdwa_ref, bdwa_ref, 3 * C)

    q = qkv[:, :C]
    k = qkv[:, C:2 * C]
    v = qkv[:, 2 * C:]

    # L2-normalize q, k over the spatial (HW) axis, like F.normalize(dim=-1).
    qn = q / jnp.maximum(jnp.sqrt(jnp.sum(q * q, axis=0, keepdims=True)), 1e-12)
    kn = k / jnp.maximum(jnp.sqrt(jnp.sum(k * k, axis=0, keepdims=True)), 1e-12)
    qn = qn * tempv_ref[...]                                        # fold per-head temperature

    # All heads at once: (C, C) logits with an additive block-diagonal head mask,
    # so the masked softmax is exactly the per-head softmax.
    logits = jax.lax.dot_general(qn, kn, (((0,), (0,)), ((), ())),
                                 preferred_element_type=f32)        # (C, C)
    logits = logits + hmask_ref[...]
    logits = logits - jnp.max(logits, axis=-1, keepdims=True)
    prob = jnp.exp(logits)
    prob = prob / jnp.sum(prob, axis=-1, keepdims=True)

    attn_out = jax.lax.dot_general(v, prob, (((1,), (1,)), ((), ())),
                                   preferred_element_type=f32)      # (HW, C)
    attn_out = jnp.dot(attn_out, wproj_ref[...], preferred_element_type=f32) + bproj_ref[...]
    x1 = x + attn_out

    # ---------------- feed-forward branch ----------------
    y2 = layernorm(x1, ln2w_ref, ln2b_ref)
    u = jnp.dot(y2, wpi_ref[...], preferred_element_type=f32) + bpi_ref[...]     # (HW, 2*hidden)
    u = dwconv3x3(u, pad_f_ref, acc_f_ref, wdwf_ref, bdwf_ref, 2 * hidden)
    g = _gelu_exact(u[:, :hidden]) * u[:, hidden:]
    ffn = jnp.dot(g, wpo_ref[...], preferred_element_type=f32) + bpo_ref[...]    # (HW, C)

    o_ref[0] = (x1 + ffn).astype(o_ref.dtype)


def transformer_block(x, params, *, num_heads):
    """x: (B, C, H, W) NCHW; params: PyTorch-layout weights.  Returns (B, C, H, W)."""
    B, C, H, W = x.shape
    HW = H * W
    hidden = params["w_po"].shape[1]
    cp = C // num_heads

    # ---- XLA-side layout glue (cheap, small) ----
    x3 = jnp.transpose(x.reshape(B, C, HW), (0, 2, 1)).astype(jnp.float32)       # (B, HW, C)

    ids = jnp.arange(C, dtype=jnp.int32) // cp
    hmask = jnp.where(ids[:, None] == ids[None, :], 0.0, -1e30).astype(jnp.float32)
    temp_vec = jnp.repeat(params["temperature"].astype(jnp.float32), cp).reshape(1, C)

    weights = [
        params["ln1_w"].reshape(1, C),
        params["ln1_b"].reshape(1, C),
        params["w_qkv"].reshape(3 * C, C).T,                        # (C, 3C)
        params["b_qkv"].reshape(1, 3 * C),
        params["w_dwa"].reshape(3 * C, 9).T,                        # (9, 3C), tap = ky*3+kx
        params["b_dwa"].reshape(1, 3 * C),
        temp_vec,                                                   # (1, C)
        hmask,                                                      # (C, C)
        params["w_proj"].reshape(C, C).T,                           # (C, C)
        params["b_proj"].reshape(1, C),
        params["ln2_w"].reshape(1, C),
        params["ln2_b"].reshape(1, C),
        params["w_pi"].reshape(2 * hidden, C).T,                    # (C, 2*hidden)
        params["b_pi"].reshape(1, 2 * hidden),
        params["w_dwf"].reshape(2 * hidden, 9).T,                   # (9, 2*hidden)
        params["b_dwf"].reshape(1, 2 * hidden),
        params["w_po"].reshape(C, hidden).T,                        # (hidden, C)
        params["b_po"].reshape(1, C),
    ]
    weights = [w.astype(jnp.float32) for w in weights]

    w_imap = lambda b: (0, 0)
    in_specs = [pl.BlockSpec((1, HW, C), lambda b: (b, 0, 0))]
    in_specs += [pl.BlockSpec(w.shape, w_imap) for w in weights]

    kernel = functools.partial(_block_kernel, H=H, W=W, C=C, hidden=hidden)

    out3 = pl.pallas_call(
        kernel,
        out_shape=jax.ShapeDtypeStruct((B, HW, C), x.dtype),
        grid_spec=pltpu.PrefetchScalarGridSpec(
            num_scalar_prefetch=0,
            grid=(B,),
            in_specs=in_specs,
            out_specs=pl.BlockSpec((1, HW, C), lambda b: (b, 0, 0)),
            scratch_shapes=[
                pltpu.VMEM((H + 2, W + 16, 3 * C), jnp.float32),     # padded qkv image
                pltpu.VMEM((H, W, 3 * C), jnp.float32),              # dwconv accumulator
                pltpu.VMEM((H + 2, W + 16, 2 * hidden), jnp.float32),
                pltpu.VMEM((H, W, 2 * hidden), jnp.float32),
            ],
        ),
        compiler_params=pltpu.CompilerParams(
            dimension_semantics=("parallel",)),
    )(x3, *weights)

    return jnp.transpose(out3, (0, 2, 1)).reshape(B, C, H, W).astype(x.dtype)


def _reference(x, p, *, num_heads):
    # Pure-JAX reference mirroring the PyTorch TransformerBlock forward.
    B, C, H, W = x.shape
    HW = H * W
    HI = jax.lax.Precision.HIGHEST

    def ln(x4, w, b):
        x3 = jnp.transpose(x4.reshape(B, C, HW), (0, 2, 1))
        mu = jnp.mean(x3, axis=-1, keepdims=True)
        var = jnp.mean((x3 - mu) ** 2, axis=-1, keepdims=True)
        y = (x3 - mu) / jnp.sqrt(var + 1e-5) * w + b
        return jnp.transpose(y, (0, 2, 1)).reshape(B, C, H, W)

    def conv1x1(x4, w, b):
        y = jax.lax.conv_general_dilated(
            x4, w, (1, 1), "VALID",
            dimension_numbers=("NCHW", "OIHW", "NCHW"), precision=HI)
        return y + b[None, :, None, None]

    def dwconv(x4, w, b):
        ch = x4.shape[1]
        y = jax.lax.conv_general_dilated(
            x4, w, (1, 1), ((1, 1), (1, 1)),
            dimension_numbers=("NCHW", "OIHW", "NCHW"),
            feature_group_count=ch, precision=HI)
        return y + b[None, :, None, None]

    # attention branch
    y = ln(x, p["ln1_w"], p["ln1_b"])
    qkv = dwconv(conv1x1(y, p["w_qkv"], p["b_qkv"]), p["w_dwa"], p["b_dwa"])
    q, k, v = jnp.split(qkv, 3, axis=1)
    to_heads = lambda t: t.reshape(B, num_heads, C // num_heads, HW)
    q, k, v = to_heads(q), to_heads(k), to_heads(v)
    qn = q / jnp.maximum(jnp.sqrt(jnp.sum(q * q, axis=-1, keepdims=True)), 1e-12)
    kn = k / jnp.maximum(jnp.sqrt(jnp.sum(k * k, axis=-1, keepdims=True)), 1e-12)
    attn = jnp.einsum("bhcn,bhdn->bhcd", qn, kn, precision=HI)
    attn = attn * p["temperature"][None, :, None, None]
    attn = jax.nn.softmax(attn, axis=-1)
    out = jnp.einsum("bhcd,bhdn->bhcn", attn, v, precision=HI).reshape(B, C, H, W)
    out = conv1x1(out, p["w_proj"], p["b_proj"])
    x = x + out

    # feed-forward branch
    y = ln(x, p["ln2_w"], p["ln2_b"])
    u = dwconv(conv1x1(y, p["w_pi"], p["b_pi"]), p["w_dwf"], p["b_dwf"])
    hidden = p["w_po"].shape[1]
    g = jax.nn.gelu(u[:, :hidden], approximate=False) * u[:, hidden:]
    g = conv1x1(g, p["w_po"], p["b_po"])
    return x + g


if __name__ == "__main__":
    # Small shapes consistent with TransformerBlock(dim=32, num_heads=4, ffn=2.0,
    # bias=True, LayerNorm_type='WithBias') on a 16x16 feature map, batch 2.
    B, C, H, W = 2, 32, 16, 16
    num_heads = 4
    ffn_expansion_factor = 2.0
    hidden = int(C * ffn_expansion_factor)

    keys = jax.random.split(jax.random.PRNGKey(0), 18)
    f32 = jnp.float32
    x = jax.random.normal(keys[0], (B, C, H, W), f32)
    params = {
        "ln1_w": 1.0 + 0.1 * jax.random.normal(keys[1], (C,), f32),
        "ln1_b": 0.1 * jax.random.normal(keys[2], (C,), f32),
        "w_qkv": 0.1 * jax.random.normal(keys[3], (3 * C, C, 1, 1), f32),
        "b_qkv": 0.05 * jax.random.normal(keys[4], (3 * C,), f32),
        "w_dwa": 0.1 * jax.random.normal(keys[5], (3 * C, 1, 3, 3), f32),
        "b_dwa": 0.05 * jax.random.normal(keys[6], (3 * C,), f32),
        "temperature": jax.random.uniform(keys[7], (num_heads,), f32, 0.5, 1.5),
        "w_proj": 0.1 * jax.random.normal(keys[8], (C, C, 1, 1), f32),
        "b_proj": 0.05 * jax.random.normal(keys[9], (C,), f32),
        "ln2_w": 1.0 + 0.1 * jax.random.normal(keys[10], (C,), f32),
        "ln2_b": 0.1 * jax.random.normal(keys[11], (C,), f32),
        "w_pi": 0.1 * jax.random.normal(keys[12], (2 * hidden, C, 1, 1), f32),
        "b_pi": 0.05 * jax.random.normal(keys[13], (2 * hidden,), f32),
        "w_dwf": 0.1 * jax.random.normal(keys[14], (2 * hidden, 1, 3, 3), f32),
        "b_dwf": 0.05 * jax.random.normal(keys[15], (2 * hidden,), f32),
        "w_po": 0.1 * jax.random.normal(keys[16], (C, hidden, 1, 1), f32),
        "b_po": 0.05 * jax.random.normal(keys[17], (C,), f32),
    }

    out = transformer_block(x, params, num_heads=num_heads)
    out = jax.block_until_ready(out)

    ref = _reference(x, params, num_heads=num_heads)
    assert out.shape == (B, C, H, W), out.shape
    err = float(jnp.max(jnp.abs(out - ref)))
    assert err < 5e-3, f"max abs error {err}"

    print("KERNEL_OK")
</pallas_src>

<mosaic_0001>
module attributes {stable_mosaic.version = 11 : i64} {
  func.func @_block_kernel(%arg0: i32, %arg1: memref<1x256x32xf32, #tpu.memory_space<vmem>>, %arg2: memref<1x32xf32, #tpu.memory_space<vmem>>, %arg3: memref<1x32xf32, #tpu.memory_space<vmem>>, %arg4: memref<32x96xf32, #tpu.memory_space<vmem>>, %arg5: memref<1x96xf32, #tpu.memory_space<vmem>>, %arg6: memref<9x96xf32, #tpu.memory_space<vmem>>, %arg7: memref<1x96xf32, #tpu.memory_space<vmem>>, %arg8: memref<1x32xf32, #tpu.memory_space<vmem>>, %arg9: memref<32x32xf32, #tpu.memory_space<vmem>>, %arg10: memref<32x32xf32, #tpu.memory_space<vmem>>, %arg11: memref<1x32xf32, #tpu.memory_space<vmem>>, %arg12: memref<1x32xf32, #tpu.memory_space<vmem>>, %arg13: memref<1x32xf32, #tpu.memory_space<vmem>>, %arg14: memref<32x128xf32, #tpu.memory_space<vmem>>, %arg15: memref<1x128xf32, #tpu.memory_space<vmem>>, %arg16: memref<9x128xf32, #tpu.memory_space<vmem>>, %arg17: memref<1x128xf32, #tpu.memory_space<vmem>>, %arg18: memref<64x32xf32, #tpu.memory_space<vmem>>, %arg19: memref<1x32xf32, #tpu.memory_space<vmem>>, %arg20: memref<1x256x32xf32, #tpu.memory_space<vmem>>, %arg21: memref<18x32x96xf32, #tpu.memory_space<vmem>>, %arg22: memref<16x16x96xf32, #tpu.memory_space<vmem>>, %arg23: memref<18x32x128xf32, #tpu.memory_space<vmem>>, %arg24: memref<16x16x128xf32, #tpu.memory_space<vmem>>) attributes {dimension_semantics = [#tpu.dimension_semantics<parallel>], iteration_bounds = array<i64: 2>, scalar_prefetch = 0 : i64, scratch_operands = 4 : i64, tpu.core_type = #tpu.core_type<tc>, window_params = [{transform_indices = @transform_0, window_bounds = array<i64: 1, 256, 32>}, {pipeline_mode = #tpu.pipeline_mode<synchronous>, transform_indices = @transform_1, window_bounds = array<i64: 1, 32>}, {pipeline_mode = #tpu.pipeline_mode<synchronous>, transform_indices = @transform_2, window_bounds = array<i64: 1, 32>}, {pipeline_mode = #tpu.pipeline_mode<synchronous>, transform_indices = @transform_3, window_bounds = array<i64: 32, 96>}, {pipeline_mode = #tpu.pipeline_mode<synchronous>, transform_indices = @transform_4, window_bounds = array<i64: 1, 96>}, {pipeline_mode = #tpu.pipeline_mode<synchronous>, transform_indices = @transform_5, window_bounds = array<i64: 9, 96>}, {pipeline_mode = #tpu.pipeline_mode<synchronous>, transform_indices = @transform_6, window_bounds = array<i64: 1, 96>}, {pipeline_mode = #tpu.pipeline_mode<synchronous>, transform_indices = @transform_7, window_bounds = array<i64: 1, 32>}, {pipeline_mode = #tpu.pipeline_mode<synchronous>, transform_indices = @transform_8, window_bounds = array<i64: 32, 32>}, {pipeline_mode = #tpu.pipeline_mode<synchronous>, transform_indices = @transform_9, window_bounds = array<i64: 32, 32>}, {pipeline_mode = #tpu.pipeline_mode<synchronous>, transform_indices = @transform_10, window_bounds = array<i64: 1, 32>}, {pipeline_mode = #tpu.pipeline_mode<synchronous>, transform_indices = @transform_11, window_bounds = array<i64: 1, 32>}, {pipeline_mode = #tpu.pipeline_mode<synchronous>, transform_indices = @transform_12, window_bounds = array<i64: 1, 32>}, {pipeline_mode = #tpu.pipeline_mode<synchronous>, transform_indices = @transform_13, window_bounds = array<i64: 32, 128>}, {pipeline_mode = #tpu.pipeline_mode<synchronous>, transform_indices = @transform_14, window_bounds = array<i64: 1, 128>}, {pipeline_mode = #tpu.pipeline_mode<synchronous>, transform_indices = @transform_15, window_bounds = array<i64: 9, 128>}, {pipeline_mode = #tpu.pipeline_mode<synchronous>, transform_indices = @transform_16, window_bounds = array<i64: 1, 128>}, {pipeline_mode = #tpu.pipeline_mode<synchronous>, transform_indices = @transform_17, window_bounds = array<i64: 64, 32>}, {pipeline_mode = #tpu.pipeline_mode<synchronous>, transform_indices = @transform_18, window_bounds = array<i64: 1, 32>}, {transform_indices = @transform_19, window_bounds = array<i64: 1, 256, 32>}]} {
    %c0 = arith.constant 0 : index
    %c0_0 = arith.constant 0 : index
    %c0_1 = arith.constant 0 : index
    %0 = vector.load %arg1[%c0, %c0_0, %c0_1] : memref<1x256x32xf32, #tpu.memory_space<vmem>>, vector<1x256x32xf32>
    %1 = vector.shape_cast %0 : vector<1x256x32xf32> to vector<256x32xf32>
    %cst = arith.constant dense<0.000000e+00> : vector<256xf32>
    %2 = vector.multi_reduction <add>, %1, %cst [1] : vector<256x32xf32> to vector<256xf32>
    %3 = vector.shape_cast %2 : vector<256xf32> to vector<256x1xf32>
    %cst_2 = arith.constant 3.200000e+01 : f32
    %4 = vector.broadcast %cst_2 : f32 to vector<256x1xf32>
    %5 = arith.divf %3, %4 : vector<256x1xf32>
    %6 = vector.broadcast %5 : vector<256x1xf32> to vector<256x32xf32>
    %7 = arith.subf %1, %6 : vector<256x32xf32>
    %8 = arith.mulf %7, %7 : vector<256x32xf32>
    %cst_3 = arith.constant dense<0.000000e+00> : vector<256xf32>
    %9 = vector.multi_reduction <add>, %8, %cst_3 [1] : vector<256x32xf32> to vector<256xf32>
    %10 = vector.shape_cast %9 : vector<256xf32> to vector<256x1xf32>
    %cst_4 = arith.constant 3.200000e+01 : f32
    %11 = vector.broadcast %cst_4 : f32 to vector<256x1xf32>
    %12 = arith.divf %10, %11 : vector<256x1xf32>
    %cst_5 = arith.constant 9.99999974E-6 : f32
    %13 = vector.broadcast %cst_5 : f32 to vector<256x1xf32>
    %14 = arith.addf %12, %13 : vector<256x1xf32>
    %15 = math.rsqrt %14 : vector<256x1xf32>
    %16 = vector.broadcast %15 : vector<256x1xf32> to vector<256x32xf32>
    %17 = arith.mulf %7, %16 : vector<256x32xf32>
    %c0_6 = arith.constant 0 : index
    %c0_7 = arith.constant 0 : index
    %18 = vector.load %arg2[%c0_6, %c0_7] : memref<1x32xf32, #tpu.memory_space<vmem>>, vector<1x32xf32>
    %19 = vector.broadcast %18 : vector<1x32xf32> to vector<256x32xf32>
    %20 = arith.mulf %17, %19 : vector<256x32xf32>
    %c0_8 = arith.constant 0 : index
    %c0_9 = arith.constant 0 : index
    %21 = vector.load %arg3[%c0_8, %c0_9] : memref<1x32xf32, #tpu.memory_space<vmem>>, vector<1x32xf32>
    %22 = vector.broadcast %21 : vector<1x32xf32> to vector<256x32xf32>
    %23 = arith.addf %20, %22 : vector<256x32xf32>
    %c0_10 = arith.constant 0 : index
    %c0_11 = arith.constant 0 : index
    %24 = vector.load %arg4[%c0_10, %c0_11] : memref<32x96xf32, #tpu.memory_space<vmem>>, vector<32x96xf32>
    %cst_12 = arith.constant dense<0.000000e+00> : vector<256x96xf32>
    %25 = tpu.matmul %23, %24, %cst_12 {dimension_numbers = #tpu.dot_dimension_numbers<[1], [0], [0], [1], [0, 0, 1, 1], [], []>} : vector<256x32xf32>, vector<32x96xf32>, vector<256x96xf32> -> vector<256x96xf32>
    %c0_13 = arith.constant 0 : index
    %c0_14 = arith.constant 0 : index
    %26 = vector.load %arg5[%c0_13, %c0_14] : memref<1x96xf32, #tpu.memory_space<vmem>>, vector<1x96xf32>
    %27 = vector.broadcast %26 : vector<1x96xf32> to vector<256x96xf32>
    %28 = arith.addf %25, %27 : vector<256x96xf32>
    %cst_15 = arith.constant 0.000000e+00 : f32
    %29 = vector.broadcast %cst_15 : f32 to vector<18x32x96xf32>
    %c0_16 = arith.constant 0 : index
    %c0_17 = arith.constant 0 : index
    %c0_18 = arith.constant 0 : index
    %30 = vector.load %arg21[%c0_16, %c0_17, %c0_18] : memref<18x32x96xf32, #tpu.memory_space<vmem>>, vector<18x32x96xf32>
    tpu.vector_store %arg21[%c0_16, %c0_17, %c0_18], %29 {strides = array<i32>} : memref<18x32x96xf32, #tpu.memory_space<vmem>>, vector<18x32x96xf32>,
    %31 = vector.shape_cast %28 : vector<256x96xf32> to vector<16x16x96xf32>
    %c1 = arith.constant 1 : index
    %c8 = arith.constant 8 : index
    %c0_19 = arith.constant 0 : index
    %32 = vector.load %arg21[%c1, %c8, %c0_19] : memref<18x32x96xf32, #tpu.memory_space<vmem>>, vector<16x16x96xf32>
    tpu.vector_store %arg21[%c1, %c8, %c0_19], %31 {strides = array<i32>} : memref<18x32x96xf32, #tpu.memory_space<vmem>>, vector<16x16x96xf32>,
    %cst_20 = arith.constant 0.000000e+00 : f32
    %33 = vector.broadcast %cst_20 : f32 to vector<16x16x96xf32>
    %c0_21 = arith.constant 0 : index
    %c0_22 = arith.constant 0 : index
    %c0_23 = arith.constant 0 : index
    %34 = vector.load %arg22[%c0_21, %c0_22, %c0_23] : memref<16x16x96xf32, #tpu.memory_space<vmem>>, vector<16x16x96xf32>
    tpu.vector_store %arg22[%c0_21, %c0_22, %c0_23], %33 {strides = array<i32>} : memref<16x16x96xf32, #tpu.memory_space<vmem>>, vector<16x16x96xf32>,
    %c0_24 = arith.constant 0 : index
    %c0_25 = arith.constant 0 : index
    %35 = vector.load %arg6[%c0_24, %c0_25] : memref<9x96xf32, #tpu.memory_space<vmem>>, vector<1x96xf32>
    %c0_26 = arith.constant 0 : index
    %c0_27 = arith.constant 0 : index
    %c0_28 = arith.constant 0 : index
    %36 = vector.load %arg22[%c0_26, %c0_27, %c0_28] : memref<16x16x96xf32, #tpu.memory_space<vmem>>, vector<16x16x96xf32>
    %c0_29 = arith.constant 0 : index
    %c7 = arith.constant 7 : index
    %c0_30 = arith.constant 0 : index
    %37 = vector.load %arg21[%c0_29, %c7, %c0_30] : memref<18x32x96xf32, #tpu.memory_space<vmem>>, vector<16x16x96xf32>
    %38 = vector.shape_cast %35 : vector<1x96xf32> to vector<1x1x96xf32>
    %39 = vector.broadcast %38 : vector<1x1x96xf32> to vector<16x16x96xf32>
    %40 = arith.mulf %37, %39 : vector<16x16x96xf32>
    %41 = arith.addf %36, %40 : vector<16x16x96xf32>
    %c0_31 = arith.constant 0 : index
    %c0_32 = arith.constant 0 : index
    %c0_33 = arith.constant 0 : index
    %42 = vector.load %arg22[%c0_31, %c0_32, %c0_33] : memref<16x16x96xf32, #tpu.memory_space<vmem>>, vector<16x16x96xf32>
    tpu.vector_store %arg22[%c0_31, %c0_32, %c0_33], %41 {strides = array<i32>} : memref<16x16x96xf32, #tpu.memory_space<vmem>>, vector<16x16x96xf32>,
    %c1_34 = arith.constant 1 : index
    %c0_35 = arith.constant 0 : index
    %43 = vector.load %arg6[%c1_34, %c0_35] : memref<9x96xf32, #tpu.memory_space<vmem>>, vector<1x96xf32>
    %c0_36 = arith.constant 0 : index
    %c0_37 = arith.constant 0 : index
    %c0_38 = arith.constant 0 : index
    %44 = vector.load %arg22[%c0_36, %c0_37, %c0_38] : memref<16x16x96xf32, #tpu.memory_space<vmem>>, vector<16x16x96xf32>
    %c0_39 = arith.constant 0 : index
    %c8_40 = arith.constant 8 : index
    %c0_41 = arith.constant 0 : index
    %45 = vector.load %arg21[%c0_39, %c8_40, %c0_41] : memref<18x32x96xf32, #tpu.memory_space<vmem>>, vector<16x16x96xf32>
    %46 = vector.shape_cast %43 : vector<1x96xf32> to vector<1x1x96xf32>
    %47 = vector.broadcast %46 : vector<1x1x96xf32> to vector<16x16x96xf32>
    %48 = arith.mulf %45, %47 : vector<16x16x96xf32>
    %49 = arith.addf %44, %48 : vector<16x16x96xf32>
    %c0_42 = arith.constant 0 : index
    %c0_43 = arith.constant 0 : index
    %c0_44 = arith.constant 0 : index
    %50 = vector.load %arg22[%c0_42, %c0_43, %c0_44] : memref<16x16x96xf32, #tpu.memory_space<vmem>>, vector<16x16x96xf32>
    tpu.vector_store %arg22[%c0_42, %c0_43, %c0_44], %49 {strides = array<i32>} : memref<16x16x96xf32, #tpu.memory_space<vmem>>, vector<16x16x96xf32>,
    %c2 = arith.constant 2 : index
    %c0_45 = arith.constant 0 : index
    %51 = vector.load %arg6[%c2, %c0_45] : memref<9x96xf32, #tpu.memory_space<vmem>>, vector<1x96xf32>
    %c0_46 = arith.constant 0 : index
    %c0_47 = arith.constant 0 : index
    %c0_48 = arith.constant 0 : index
    %52 = vector.load %arg22[%c0_46, %c0_47, %c0_48] : memref<16x16x96xf32, #tpu.memory_space<vmem>>, vector<16x16x96xf32>
    %c0_49 = arith.constant 0 : index
    %c9 = arith.constant 9 : index
    %c0_50 = arith.constant 0 : index
    %53 = vector.load %arg21[%c0_49, %c9, %c0_50] : memref<18x32x96xf32, #tpu.memory_space<vmem>>, vector<16x16x96xf32>
    %54 = vector.shape_cast %51 : vector<1x96xf32> to vector<1x1x96xf32>
    %55 = vector.broadcast %54 : vector<1x1x96xf32> to vector<16x16x96xf32>
    %56 = arith.mulf %53, %55 : vector<16x16x96xf32>
    %57 = arith.addf %52, %56 : vector<16x16x96xf32>
    %c0_51 = arith.constant 0 : index
    %c0_52 = arith.constant 0 : index
    %c0_53 = arith.constant 0 : index
    %58 = vector.load %arg22[%c0_51, %c0_52, %c0_53] : memref<16x16x96xf32, #tpu.memory_space<vmem>>, vector<16x16x96xf32>
    tpu.vector_store %arg22[%c0_51, %c0_52, %c0_53], %57 {strides = array<i32>} : memref<16x16x96xf32, #tpu.memory_space<vmem>>, vector<16x16x96xf32>,
    %c3 = arith.constant 3 : index
    %c0_54 = arith.constant 0 : index
    %59 = vector.load %arg6[%c3, %c0_54] : memref<9x96xf32, #tpu.memory_space<vmem>>, vector<1x96xf32>
    %c0_55 = arith.constant 0 : index
    %c0_56 = arith.constant 0 : index
    %c0_57 = arith.constant 0 : index
    %60 = vector.load %arg22[%c0_55, %c0_56, %c0_57] : memref<16x16x96xf32, #tpu.memory_space<vmem>>, vector<16x16x96xf32>
    %c1_58 = arith.constant 1 : index
    %c7_59 = arith.constant 7 : index
    %c0_60 = arith.constant 0 : index
    %61 = vector.load %arg21[%c1_58, %c7_59, %c0_60] : memref<18x32x96xf32, #tpu.memory_space<vmem>>, vector<16x16x96xf32>
    %62 = vector.shape_cast %59 : vector<1x96xf32> to vector<1x1x96xf32>
    %63 = vector.broadcast %62 : vector<1x1x96xf32> to vector<16x16x96xf32>
    %64 = arith.mulf %61, %63 : vector<16x16x96xf32>
    %65 = arith.addf %60, %64 : vector<16x16x96xf32>
    %c0_61 = arith.constant 0 : index
    %c0_62 = arith.constant 0 : index
    %c0_63 = arith.constant 0 : index
    %66 = vector.load %arg22[%c0_61, %c0_62, %c0_63] : memref<16x16x96xf32, #tpu.memory_space<vmem>>, vector<16x16x96xf32>
    tpu.vector_store %arg22[%c0_61, %c0_62, %c0_63], %65 {strides = array<i32>} : memref<16x16x96xf32, #tpu.memory_space<vmem>>, vector<16x16x96xf32>,
    %c4 = arith.constant 4 : index
    %c0_64 = arith.constant 0 : index
    %67 = vector.load %arg6[%c4, %c0_64] : memref<9x96xf32, #tpu.memory_space<vmem>>, vector<1x96xf32>
    %c0_65 = arith.constant 0 : index
    %c0_66 = arith.constant 0 : index
    %c0_67 = arith.constant 0 : index
    %68 = vector.load %arg22[%c0_65, %c0_66, %c0_67] : memref<16x16x96xf32, #tpu.memory_space<vmem>>, vector<16x16x96xf32>
    %c1_68 = arith.constant 1 : index
    %c8_69 = arith.constant 8 : index
    %c0_70 = arith.constant 0 : index
    %69 = vector.load %arg21[%c1_68, %c8_69, %c0_70] : memref<18x32x96xf32, #tpu.memory_space<vmem>>, vector<16x16x96xf32>
    %70 = vector.shape_cast %67 : vector<1x96xf32> to vector<1x1x96xf32>
    %71 = vector.broadcast %70 : vector<1x1x96xf32> to vector<16x16x96xf32>
    %72 = arith.mulf %69, %71 : vector<16x16x96xf32>
    %73 = arith.addf %68, %72 : vector<16x16x96xf32>
    %c0_71 = arith.constant 0 : index
    %c0_72 = arith.constant 0 : index
    %c0_73 = arith.constant 0 : index
    %74 = vector.load %arg22[%c0_71, %c0_72, %c0_73] : memref<16x16x96xf32, #tpu.memory_space<vmem>>, vector<16x16x96xf32>
    tpu.vector_store %arg22[%c0_71, %c0_72, %c0_73], %73 {strides = array<i32>} : memref<16x16x96xf32, #tpu.memory_space<vmem>>, vector<16x16x96xf32>,
    %c5 = arith.constant 5 : index
    %c0_74 = arith.constant 0 : index
    %75 = vector.load %arg6[%c5, %c0_74] : memref<9x96xf32, #tpu.memory_space<vmem>>, vector<1x96xf32>
    %c0_75 = arith.constant 0 : index
    %c0_76 = arith.constant 0 : index
    %c0_77 = arith.constant 0 : index
    %76 = vector.load %arg22[%c0_75, %c0_76, %c0_77] : memref<16x16x96xf32, #tpu.memory_space<vmem>>, vector<16x16x96xf32>
    %c1_78 = arith.constant 1 : index
    %c9_79 = arith.constant 9 : index
    %c0_80 = arith.constant 0 : index
    %77 = vector.load %arg21[%c1_78, %c9_79, %c0_80] : memref<18x32x96xf32, #tpu.memory_space<vmem>>, vector<16x16x96xf32>
    %78 = vector.shape_cast %75 : vector<1x96xf32> to vector<1x1x96xf32>
    %79 = vector.broadcast %78 : vector<1x1x96xf32> to vector<16x16x96xf32>
    %80 = arith.mulf %77, %79 : vector<16x16x96xf32>
    %81 = arith.addf %76, %80 : vector<16x16x96xf32>
    %c0_81 = arith.constant 0 : index
    %c0_82 = arith.constant 0 : index
    %c0_83 = arith.constant 0 : index
    %82 = vector.load %arg22[%c0_81, %c0_82, %c0_83] : memref<16x16x96xf32, #tpu.memory_space<vmem>>, vector<16x16x96xf32>
    tpu.vector_store %arg22[%c0_81, %c0_82, %c0_83], %81 {strides = array<i32>} : memref<16x16x96xf32, #tpu.memory_space<vmem>>, vector<16x16x96xf32>,
    %c6 = arith.constant 6 : index
    %c0_84 = arith.constant 0 : index
    %83 = vector.load %arg6[%c6, %c0_84] : memref<9x96xf32, #tpu.memory_space<vmem>>, vector<1x96xf32>
    %c0_85 = arith.constant 0 : index
    %c0_86 = arith.constant 0 : index
    %c0_87 = arith.constant 0 : index
    %84 = vector.load %arg22[%c0_85, %c0_86, %c0_87] : memref<16x16x96xf32, #tpu.memory_space<vmem>>, vector<16x16x96xf32>
    %c2_88 = arith.constant 2 : index
    %c7_89 = arith.constant 7 : index
    %c0_90 = arith.constant 0 : index
    %85 = vector.load %arg21[%c2_88, %c7_89, %c0_90] : memref<18x32x96xf32, #tpu.memory_space<vmem>>, vector<16x16x96xf32>
    %86 = vector.shape_cast %83 : vector<1x96xf32> to vector<1x1x96xf32>
    %87 = vector.broadcast %86 : vector<1x1x96xf32> to vector<16x16x96xf32>
    %88 = arith.mulf %85, %87 : vector<16x16x96xf32>
    %89 = arith.addf %84, %88 : vector<16x16x96xf32>
    %c0_91 = arith.constant 0 : index
    %c0_92 = arith.constant 0 : index
    %c0_93 = arith.constant 0 : index
    %90 = vector.load %arg22[%c0_91, %c0_92, %c0_93] : memref<16x16x96xf32, #tpu.memory_space<vmem>>, vector<16x16x96xf32>
    tpu.vector_store %arg22[%c0_91, %c0_92, %c0_93], %89 {strides = array<i32>} : memref<16x16x96xf32, #tpu.memory_space<vmem>>, vector<16x16x96xf32>,
    %c7_94 = arith.constant 7 : index
    %c0_95 = arith.constant 0 : index
    %91 = vector.load %arg6[%c7_94, %c0_95] : memref<9x96xf32, #tpu.memory_space<vmem>>, vector<1x96xf32>
    %c0_96 = arith.constant 0 : index
    %c0_97 = arith.constant 0 : index
    %c0_98 = arith.constant 0 : index
    %92 = vector.load %arg22[%c0_96, %c0_97, %c0_98] : memref<16x16x96xf32, #tpu.memory_space<vmem>>, vector<16x16x96xf32>
    %c2_99 = arith.constant 2 : index
    %c8_100 = arith.constant 8 : index
    %c0_101 = arith.constant 0 : index
    %93 = vector.load %arg21[%c2_99, %c8_100, %c0_101] : memref<18x32x96xf32, #tpu.memory_space<vmem>>, vector<16x16x96xf32>
    %94 = vector.shape_cast %91 : vector<1x96xf32> to vector<1x1x96xf32>
    %95 = vector.broadcast %94 : vector<1x1x96xf32> to vector<16x16x96xf32>
    %96 = arith.mulf %93, %95 : vector<16x16x96xf32>
    %97 = arith.addf %92, %96 : vector<16x16x96xf32>
    %c0_102 = arith.constant 0 : index
    %c0_103 = arith.constant 0 : index
    %c0_104 = arith.constant 0 : index
    %98 = vector.load %arg22[%c0_102, %c0_103, %c0_104] : memref<16x16x96xf32, #tpu.memory_space<vmem>>, vector<16x16x96xf32>
    tpu.vector_store %arg22[%c0_102, %c0_103, %c0_104], %97 {strides = array<i32>} : memref<16x16x96xf32, #tpu.memory_space<vmem>>, vector<16x16x96xf32>,
    %c8_105 = arith.constant 8 : index
    %c0_106 = arith.constant 0 : index
    %99 = vector.load %arg6[%c8_105, %c0_106] : memref<9x96xf32, #tpu.memory_space<vmem>>, vector<1x96xf32>
    %c0_107 = arith.constant 0 : index
    %c0_108 = arith.constant 0 : index
    %c0_109 = arith.constant 0 : index
    %100 = vector.load %arg22[%c0_107, %c0_108, %c0_109] : memref<16x16x96xf32, #tpu.memory_space<vmem>>, vector<16x16x96xf32>
    %c2_110 = arith.constant 2 : index
    %c9_111 = arith.constant 9 : index
    %c0_112 = arith.constant 0 : index
    %101 = vector.load %arg21[%c2_110, %c9_111, %c0_112] : memref<18x32x96xf32, #tpu.memory_space<vmem>>, vector<16x16x96xf32>
    %102 = vector.shape_cast %99 : vector<1x96xf32> to vector<1x1x96xf32>
    %103 = vector.broadcast %102 : vector<1x1x96xf32> to vector<16x16x96xf32>
    %104 = arith.mulf %101, %103 : vector<16x16x96xf32>
    %105 = arith.addf %100, %104 : vector<16x16x96xf32>
    %c0_113 = arith.constant 0 : index
    %c0_114 = arith.constant 0 : index
    %c0_115 = arith.constant 0 : index
    %106 = vector.load %arg22[%c0_113, %c0_114, %c0_115] : memref<16x16x96xf32, #tpu.memory_space<vmem>>, vector<16x16x96xf32>
    tpu.vector_store %arg22[%c0_113, %c0_114, %c0_115], %105 {strides = array<i32>} : memref<16x16x96xf32, #tpu.memory_space<vmem>>, vector<16x16x96xf32>,
    %c0_116 = arith.constant 0 : index
    %c0_117 = arith.constant 0 : index
    %c0_118 = arith.constant 0 : index
    %107 = vector.load %arg22[%c0_116, %c0_117, %c0_118] : memref<16x16x96xf32, #tpu.memory_space<vmem>>, vector<16x16x96xf32>
    %108 = vector.shape_cast %107 : vector<16x16x96xf32> to vector<256x96xf32>
    %c0_119 = arith.constant 0 : index
    %c0_120 = arith.constant 0 : index
    %109 = vector.load %arg7[%c0_119, %c0_120] : memref<1x96xf32, #tpu.memory_space<vmem>>, vector<1x96xf32>
    %110 = vector.broadcast %109 : vector<1x96xf32> to vector<256x96xf32>
    %111 = arith.addf %108, %110 : vector<256x96xf32>
    %112 = vector.extract_strided_slice %111 {offsets = [0, 0], sizes = [256, 32], strides = [1, 1]} : vector<256x96xf32> to vector<256x32xf32>
    %113 = vector.extract_strided_slice %111 {offsets = [0, 32], sizes = [256, 32], strides = [1, 1]} : vector<256x96xf32> to vector<256x32xf32>
    %114 = vector.extract_strided_slice %111 {offsets = [0, 64], sizes = [256, 32], strides = [1, 1]} : vector<256x96xf32> to vector<256x32xf32>
    %115 = arith.mulf %112, %112 : vector<256x32xf32>
    %cst_121 = arith.constant dense<0.000000e+00> : vector<32xf32>
    %116 = vector.multi_reduction <add>, %115, %cst_121 [0] : vector<256x32xf32> to vector<32xf32>
    %117 = vector.shape_cast %116 : vector<32xf32> to vector<1x32xf32>
    %118 = math.sqrt %117 : vector<1x32xf32>
    %cst_122 = arith.constant 9.99999996E-13 : f32
    %119 = vector.broadcast %cst_122 : f32 to vector<1x32xf32>
    %120 = arith.maximumf %118, %119 : vector<1x32xf32>
    %121 = vector.broadcast %120 : vector<1x32xf32> to vector<256x32xf32>
    %122 = arith.divf %112, %121 : vector<256x32xf32>
    %123 = arith.mulf %113, %113 : vector<256x32xf32>
    %cst_123 = arith.constant dense<0.000000e+00> : vector<32xf32>
    %124 = vector.multi_reduction <add>, %123, %cst_123 [0] : vector<256x32xf32> to vector<32xf32>
    %125 = vector.shape_cast %124 : vector<32xf32> to vector<1x32xf32>
    %126 = math.sqrt %125 : vector<1x32xf32>
    %cst_124 = arith.constant 9.99999996E-13 : f32
    %127 = vector.broadcast %cst_124 : f32 to vector<1x32xf32>
    %128 = arith.maximumf %126, %127 : vector<1x32xf32>
    %129 = vector.broadcast %128 : vector<1x32xf32> to vector<256x32xf32>
    %130 = arith.divf %113, %129 : vector<256x32xf32>
    %c0_125 = arith.constant 0 : index
    %c0_126 = arith.constant 0 : index
    %131 = vector.load %arg8[%c0_125, %c0_126] : memref<1x32xf32, #tpu.memory_space<vmem>>, vector<1x32xf32>
    %132 = vector.broadcast %131 : vector<1x32xf32> to vector<256x32xf32>
    %133 = arith.mulf %122, %132 : vector<256x32xf32>
    %cst_127 = arith.constant dense<0.000000e+00> : vector<32x32xf32>
    %134 = tpu.matmul %133, %130, %cst_127 {dimension_numbers = #tpu.dot_dimension_numbers<[0], [0], [1], [1], [0, 1, 1, 1], [], []>} : vector<256x32xf32>, vector<256x32xf32>, vector<32x32xf32> -> vector<32x32xf32>
    %c0_128 = arith.constant 0 : index
    %c0_129 = arith.constant 0 : index
    %135 = vector.load %arg9[%c0_128, %c0_129] : memref<32x32xf32, #tpu.memory_space<vmem>>, vector<32x32xf32>
    %136 = arith.addf %134, %135 : vector<32x32xf32>
    %cst_130 = arith.constant dense<0xFF800000> : vector<32xf32>
    %137 = vector.multi_reduction <maximumf>, %136, %cst_130 [1] : vector<32x32xf32> to vector<32xf32>
    %138 = vector.shape_cast %137 : vector<32xf32> to vector<32x1xf32>
    %139 = vector.broadcast %138 : vector<32x1xf32> to vector<32x32xf32>
    %140 = arith.subf %136, %139 : vector<32x32xf32>
    %141 = math.exp %140 : vector<32x32xf32>
    %cst_131 = arith.constant dense<0.000000e+00> : vector<32xf32>
    %142 = vector.multi_reduction <add>, %141, %cst_131 [1] : vector<32x32xf32> to vector<32xf32>
    %143 = vector.shape_cast %142 : vector<32xf32> to vector<32x1xf32>
    %144 = vector.broadcast %143 : vector<32x1xf32> to vector<32x32xf32>
    %145 = arith.divf %141, %144 : vector<32x32xf32>
    %cst_132 = arith.constant dense<0.000000e+00> : vector<256x32xf32>
    %146 = tpu.matmul %114, %145, %cst_132 {dimension_numbers = #tpu.dot_dimension_numbers<[1], [1], [0], [0], [0, 0, 1, 0], [], []>} : vector<256x32xf32>, vector<32x32xf32>, vector<256x32xf32> -> vector<256x32xf32>
    %c0_133 = arith.constant 0 : index
    %c0_134 = arith.constant 0 : index
    %147 = vector.load %arg10[%c0_133, %c0_134] : memref<32x32xf32, #tpu.memory_space<vmem>>, vector<32x32xf32>
    %cst_135 = arith.constant dense<0.000000e+00> : vector<256x32xf32>
    %148 = tpu.matmul %146, %147, %cst_135 {dimension_numbers = #tpu.dot_dimension_numbers<[1], [0], [0], [1], [0, 0, 1, 1], [], []>} : vector<256x32xf32>, vector<32x32xf32>, vector<256x32xf32> -> vector<256x32xf32>
    %c0_136 = arith.constant 0 : index
    %c0_137 = arith.constant 0 : index
    %149 = vector.load %arg11[%c0_136, %c0_137] : memref<1x32xf32, #tpu.memory_space<vmem>>, vector<1x32xf32>
    %150 = vector.broadcast %149 : vector<1x32xf32> to vector<256x32xf32>
    %151 = arith.addf %148, %150 : vector<256x32xf32>
    %152 = arith.addf %1, %151 : vector<256x32xf32>
    %cst_138 = arith.constant dense<0.000000e+00> : vector<256xf32>
    %153 = vector.multi_reduction <add>, %152, %cst_138 [1] : vector<256x32xf32> to vector<256xf32>
    %154 = vector.shape_cast %153 : vector<256xf32> to vector<256x1xf32>
    %cst_139 = arith.constant 3.200000e+01 : f32
    %155 = vector.broadcast %cst_139 : f32 to vector<256x1xf32>
    %156 = arith.divf %154, %155 : vector<256x1xf32>
    %157 = vector.broadcast %156 : vector<256x1xf32> to vector<256x32xf32>
    %158 = arith.subf %152, %157 : vector<256x32xf32>
    %159 = arith.mulf %158, %158 : vector<256x32xf32>
    %cst_140 = arith.constant dense<0.000000e+00> : vector<256xf32>
    %160 = vector.multi_reduction <add>, %159, %cst_140 [1] : vector<256x32xf32> to vector<256xf32>
    %161 = vector.shape_cast %160 : vector<256xf32> to vector<256x1xf32>
    %cst_141 = arith.constant 3.200000e+01 : f32
    %162 = vector.broadcast %cst_141 : f32 to vector<256x1xf32>
    %163 = arith.divf %161, %162 : vector<256x1xf32>
    %cst_142 = arith.constant 9.99999974E-6 : f32
    %164 = vector.broadcast %cst_142 : f32 to vector<256x1xf32>
    %165 = arith.addf %163, %164 : vector<256x1xf32>
    %166 = math.rsqrt %165 : vector<256x1xf32>
    %167 = vector.broadcast %166 : vector<256x1xf32> to vector<256x32xf32>
    %168 = arith.mulf %158, %167 : vector<256x32xf32>
    %c0_143 = arith.constant 0 : index
    %c0_144 = arith.constant 0 : index
    %169 = vector.load %arg12[%c0_143, %c0_144] : memref<1x32xf32, #tpu.memory_space<vmem>>, vector<1x32xf32>
    %170 = vector.broadcast %169 : vector<1x32xf32> to vector<256x32xf32>
    %171 = arith.mulf %168, %170 : vector<256x32xf32>
    %c0_145 = arith.constant 0 : index
    %c0_146 = arith.constant 0 : index
    %172 = vector.load %arg13[%c0_145, %c0_146] : memref<1x32xf32, #tpu.memory_space<vmem>>, vector<1x32xf32>
    %173 = vector.broadcast %172 : vector<1x32xf32> to vector<256x32xf32>
    %174 = arith.addf %171, %173 : vector<256x32xf32>
    %c0_147 = arith.constant 0 : index
    %c0_148 = arith.constant 0 : index
    %175 = vector.load %arg14[%c0_147, %c0_148] : memref<32x128xf32, #tpu.memory_space<vmem>>, vector<32x128xf32>
    %cst_149 = arith.constant dense<0.000000e+00> : vector<256x128xf32>
    %176 = tpu.matmul %174, %175, %cst_149 {dimension_numbers = #tpu.dot_dimension_numbers<[1], [0], [0], [1], [0, 0, 1, 1], [], []>} : vector<256x32xf32>, vector<32x128xf32>, vector<256x128xf32> -> vector<256x128xf32>
    %c0_150 = arith.constant 0 : index
    %c0_151 = arith.constant 0 : index
    %177 = vector.load %arg15[%c0_150, %c0_151] : memref<1x128xf32, #tpu.memory_space<vmem>>, vector<1x128xf32>
    %178 = vector.broadcast %177 : vector<1x128xf32> to vector<256x128xf32>
    %179 = arith.addf %176, %178 : vector<256x128xf32>
    %cst_152 = arith.constant 0.000000e+00 : f32
    %180 = vector.broadcast %cst_152 : f32 to vector<18x32x128xf32>
    %c0_153 = arith.constant 0 : index
    %c0_154 = arith.constant 0 : index
    %c0_155 = arith.constant 0 : index
    %181 = vector.load %arg23[%c0_153, %c0_154, %c0_155] : memref<18x32x128xf32, #tpu.memory_space<vmem>>, vector<18x32x128xf32>
    tpu.vector_store %arg23[%c0_153, %c0_154, %c0_155], %180 {strides = array<i32>} : memref<18x32x128xf32, #tpu.memory_space<vmem>>, vector<18x32x128xf32>,
    %182 = vector.shape_cast %179 : vector<256x128xf32> to vector<16x16x128xf32>
    %c1_156 = arith.constant 1 : index
    %c8_157 = arith.constant 8 : index
    %c0_158 = arith.constant 0 : index
    %183 = vector.load %arg23[%c1_156, %c8_157, %c0_158] : memref<18x32x128xf32, #tpu.memory_space<vmem>>, vector<16x16x128xf32>
    tpu.vector_store %arg23[%c1_156, %c8_157, %c0_158], %182 {strides = array<i32>} : memref<18x32x128xf32, #tpu.memory_space<vmem>>, vector<16x16x128xf32>,
    %cst_159 = arith.constant 0.000000e+00 : f32
    %184 = vector.broadcast %cst_159 : f32 to vector<16x16x128xf32>
    %c0_160 = arith.constant 0 : index
    %c0_161 = arith.constant 0 : index
    %c0_162 = arith.constant 0 : index
    %185 = vector.load %arg24[%c0_160, %c0_161, %c0_162] : memref<16x16x128xf32, #tpu.memory_space<vmem>>, vector<16x16x128xf32>
    tpu.vector_store %arg24[%c0_160, %c0_161, %c0_162], %184 {strides = array<i32>} : memref<16x16x128xf32, #tpu.memory_space<vmem>>, vector<16x16x128xf32>,
    %c0_163 = arith.constant 0 : index
    %c0_164 = arith.constant 0 : index
    %186 = vector.load %arg16[%c0_163, %c0_164] : memref<9x128xf32, #tpu.memory_space<vmem>>, vector<1x128xf32>
    %c0_165 = arith.constant 0 : index
    %c0_166 = arith.constant 0 : index
    %c0_167 = arith.constant 0 : index
    %187 = vector.load %arg24[%c0_165, %c0_166, %c0_167] : memref<16x16x128xf32, #tpu.memory_space<vmem>>, vector<16x16x128xf32>
    %c0_168 = arith.constant 0 : index
    %c7_169 = arith.constant 7 : index
    %c0_170 = arith.constant 0 : index
    %188 = vector.load %arg23[%c0_168, %c7_169, %c0_170] : memref<18x32x128xf32, #tpu.memory_space<vmem>>, vector<16x16x128xf32>
    %189 = vector.shape_cast %186 : vector<1x128xf32> to vector<1x1x128xf32>
    %190 = vector.broadcast %189 : vector<1x1x128xf32> to vector<16x16x128xf32>
    %191 = arith.mulf %188, %190 : vector<16x16x128xf32>
    %192 = arith.addf %187, %191 : vector<16x16x128xf32>
    %c0_171 = arith.constant 0 : index
    %c0_172 = arith.constant 0 : index
    %c0_173 = arith.constant 0 : index
    %193 = vector.load %arg24[%c0_171, %c0_172, %c0_173] : memref<16x16x128xf32, #tpu.memory_space<vmem>>, vector<16x16x128xf32>
    tpu.vector_store %arg24[%c0_171, %c0_172, %c0_173], %192 {strides = array<i32>} : memref<16x16x128xf32, #tpu.memory_space<vmem>>, vector<16x16x128xf32>,
    %c1_174 = arith.constant 1 : index
    %c0_175 = arith.constant 0 : index
    %194 = vector.load %arg16[%c1_174, %c0_175] : memref<9x128xf32, #tpu.memory_space<vmem>>, vector<1x128xf32>
    %c0_176 = arith.constant 0 : index
    %c0_177 = arith.constant 0 : index
    %c0_178 = arith.constant 0 : index
    %195 = vector.load %arg24[%c0_176, %c0_177, %c0_178] : memref<16x16x128xf32, #tpu.memory_space<vmem>>, vector<16x16x128xf32>
    %c0_179 = arith.constant 0 : index
    %c8_180 = arith.constant 8 : index
    %c0_181 = arith.constant 0 : index
    %196 = vector.load %arg23[%c0_179, %c8_180, %c0_181] : memref<18x32x128xf32, #tpu.memory_space<vmem>>, vector<16x16x128xf32>
    %197 = vector.shape_cast %194 : vector<1x128xf32> to vector<1x1x128xf32>
    %198 = vector.broadcast %197 : vector<1x1x128xf32> to vector<16x16x128xf32>
    %199 = arith.mulf %196, %198 : vector<16x16x128xf32>
    %200 = arith.addf %195, %199 : vector<16x16x128xf32>
    %c0_182 = arith.constant 0 : index
    %c0_183 = arith.constant 0 : index
    %c0_184 = arith.constant 0 : index
    %201 = vector.load %arg24[%c0_182, %c0_183, %c0_184] : memref<16x16x128xf32, #tpu.memory_space<vmem>>, vector<16x16x128xf32>
    tpu.vector_store %arg24[%c0_182, %c0_183, %c0_184], %200 {strides = array<i32>} : memref<16x16x128xf32, #tpu.memory_space<vmem>>, vector<16x16x128xf32>,
    %c2_185 = arith.constant 2 : index
    %c0_186 = arith.constant 0 : index
    %202 = vector.load %arg16[%c2_185, %c0_186] : memref<9x128xf32, #tpu.memory_space<vmem>>, vector<1x128xf32>
    %c0_187 = arith.constant 0 : index
    %c0_188 = arith.constant 0 : index
    %c0_189 = arith.constant 0 : index
    %203 = vector.load %arg24[%c0_187, %c0_188, %c0_189] : memref<16x16x128xf32, #tpu.memory_space<vmem>>, vector<16x16x128xf32>
    %c0_190 = arith.constant 0 : index
    %c9_191 = arith.constant 9 : index
    %c0_192 = arith.constant 0 : index
    %204 = vector.load %arg23[%c0_190, %c9_191, %c0_192] : memref<18x32x128xf32, #tpu.memory_space<vmem>>, vector<16x16x128xf32>
    %205 = vector.shape_cast %202 : vector<1x128xf32> to vector<1x1x128xf32>
    %206 = vector.broadcast %205 : vector<1x1x128xf32> to vector<16x16x128xf32>
    %207 = arith.mulf %204, %206 : vector<16x16x128xf32>
    %208 = arith.addf %203, %207 : vector<16x16x128xf32>
    %c0_193 = arith.constant 0 : index
    %c0_194 = arith.constant 0 : index
    %c0_195 = arith.constant 0 : index
    %209 = vector.load %arg24[%c0_193, %c0_194, %c0_195] : memref<16x16x128xf32, #tpu.memory_space<vmem>>, vector<16x16x128xf32>
    tpu.vector_store %arg24[%c0_193, %c0_194, %c0_195], %208 {strides = array<i32>} : memref<16x16x128xf32, #tpu.memory_space<vmem>>, vector<16x16x128xf32>,
    %c3_196 = arith.constant 3 : index
    %c0_197 = arith.constant 0 : index
    %210 = vector.load %arg16[%c3_196, %c0_197] : memref<9x128xf32, #tpu.memory_space<vmem>>, vector<1x128xf32>
    %c0_198 = arith.constant 0 : index
    %c0_199 = arith.constant 0 : index
    %c0_200 = arith.constant 0 : index
    %211 = vector.load %arg24[%c0_198, %c0_199, %c0_200] : memref<16x16x128xf32, #tpu.memory_space<vmem>>, vector<16x16x128xf32>
    %c1_201 = arith.constant 1 : index
    %c7_202 = arith.constant 7 : index
    %c0_203 = arith.constant 0 : index
    %212 = vector.load %arg23[%c1_201, %c7_202, %c0_203] : memref<18x32x128xf32, #tpu.memory_space<vmem>>, vector<16x16x128xf32>
    %213 = vector.shape_cast %210 : vector<1x128xf32> to vector<1x1x128xf32>
    %214 = vector.broadcast %213 : vector<1x1x128xf32> to vector<16x16x128xf32>
    %215 = arith.mulf %212, %214 : vector<16x16x128xf32>
    %216 = arith.addf %211, %215 : vector<16x16x128xf32>
    %c0_204 = arith.constant 0 : index
    %c0_205 = arith.constant 0 : index
    %c0_206 = arith.constant 0 : index
    %217 = vector.load %arg24[%c0_204, %c0_205, %c0_206] : memref<16x16x128xf32, #tpu.memory_space<vmem>>, vector<16x16x128xf32>
    tpu.vector_store %arg24[%c0_204, %c0_205, %c0_206], %216 {strides = array<i32>} : memref<16x16x128xf32, #tpu.memory_space<vmem>>, vector<16x16x128xf32>,
    %c4_207 = arith.constant 4 : index
    %c0_208 = arith.constant 0 : index
    %218 = vector.load %arg16[%c4_207, %c0_208] : memref<9x128xf32, #tpu.memory_space<vmem>>, vector<1x128xf32>
    %c0_209 = arith.constant 0 : index
    %c0_210 = arith.constant 0 : index
    %c0_211 = arith.constant 0 : index
    %219 = vector.load %arg24[%c0_209, %c0_210, %c0_211] : memref<16x16x128xf32, #tpu.memory_space<vmem>>, vector<16x16x128xf32>
    %c1_212 = arith.constant 1 : index
    %c8_213 = arith.constant 8 : index
    %c0_214 = arith.constant 0 : index
    %220 = vector.load %arg23[%c1_212, %c8_213, %c0_214] : memref<18x32x128xf32, #tpu.memory_space<vmem>>, vector<16x16x128xf32>
    %221 = vector.shape_cast %218 : vector<1x128xf32> to vector<1x1x128xf32>
    %222 = vector.broadcast %221 : vector<1x1x128xf32> to vector<16x16x128xf32>
    %223 = arith.mulf %220, %222 : vector<16x16x128xf32>
    %224 = arith.addf %219, %223 : vector<16x16x128xf32>
    %c0_215 = arith.constant 0 : index
    %c0_216 = arith.constant 0 : index
    %c0_217 = arith.constant 0 : index
    %225 = vector.load %arg24[%c0_215, %c0_216, %c0_217] : memref<16x16x128xf32, #tpu.memory_space<vmem>>, vector<16x16x128xf32>
    tpu.vector_store %arg24[%c0_215, %c0_216, %c0_217], %224 {strides = array<i32>} : memref<16x16x128xf32, #tpu.memory_space<vmem>>, vector<16x16x128xf32>,
    %c5_218 = arith.constant 5 : index
    %c0_219 = arith.constant 0 : index
    %226 = vector.load %arg16[%c5_218, %c0_219] : memref<9x128xf32, #tpu.memory_space<vmem>>, vector<1x128xf32>
    %c0_220 = arith.constant 0 : index
    %c0_221 = arith.constant 0 : index
    %c0_222 = arith.constant 0 : index
    %227 = vector.load %arg24[%c0_220, %c0_221, %c0_222] : memref<16x16x128xf32, #tpu.memory_space<vmem>>, vector<16x16x128xf32>
    %c1_223 = arith.constant 1 : index
    %c9_224 = arith.constant 9 : index
    %c0_225 = arith.constant 0 : index
    %228 = vector.load %arg23[%c1_223, %c9_224, %c0_225] : memref<18x32x128xf32, #tpu.memory_space<vmem>>, vector<16x16x128xf32>
    %229 = vector.shape_cast %226 : vector<1x128xf32> to vector<1x1x128xf32>
    %230 = vector.broadcast %229 : vector<1x1x128xf32> to vector<16x16x128xf32>
    %231 = arith.mulf %228, %230 : vector<16x16x128xf32>
    %232 = arith.addf %227, %231 : vector<16x16x128xf32>
    %c0_226 = arith.constant 0 : index
    %c0_227 = arith.constant 0 : index
    %c0_228 = arith.constant 0 : index
    %233 = vector.load %arg24[%c0_226, %c0_227, %c0_228] : memref<16x16x128xf32, #tpu.memory_space<vmem>>, vector<16x16x128xf32>
    tpu.vector_store %arg24[%c0_226, %c0_227, %c0_228], %232 {strides = array<i32>} : memref<16x16x128xf32, #tpu.memory_space<vmem>>, vector<16x16x128xf32>,
    %c6_229 = arith.constant 6 : index
    %c0_230 = arith.constant 0 : index
    %234 = vector.load %arg16[%c6_229, %c0_230] : memref<9x128xf32, #tpu.memory_space<vmem>>, vector<1x128xf32>
    %c0_231 = arith.constant 0 : index
    %c0_232 = arith.constant 0 : index
    %c0_233 = arith.constant 0 : index
    %235 = vector.load %arg24[%c0_231, %c0_232, %c0_233] : memref<16x16x128xf32, #tpu.memory_space<vmem>>, vector<16x16x128xf32>
    %c2_234 = arith.constant 2 : index
    %c7_235 = arith.constant 7 : index
    %c0_236 = arith.constant 0 : index
    %236 = vector.load %arg23[%c2_234, %c7_235, %c0_236] : memref<18x32x128xf32, #tpu.memory_space<vmem>>, vector<16x16x128xf32>
    %237 = vector.shape_cast %234 : vector<1x128xf32> to vector<1x1x128xf32>
    %238 = vector.broadcast %237 : vector<1x1x128xf32> to vector<16x16x128xf32>
    %239 = arith.mulf %236, %238 : vector<16x16x128xf32>
    %240 = arith.addf %235, %239 : vector<16x16x128xf32>
    %c0_237 = arith.constant 0 : index
    %c0_238 = arith.constant 0 : index
    %c0_239 = arith.constant 0 : index
    %241 = vector.load %arg24[%c0_237, %c0_238, %c0_239] : memref<16x16x128xf32, #tpu.memory_space<vmem>>, vector<16x16x128xf32>
    tpu.vector_store %arg24[%c0_237, %c0_238, %c0_239], %240 {strides = array<i32>} : memref<16x16x128xf32, #tpu.memory_space<vmem>>, vector<16x16x128xf32>,
    %c7_240 = arith.constant 7 : index
    %c0_241 = arith.constant 0 : index
    %242 = vector.load %arg16[%c7_240, %c0_241] : memref<9x128xf32, #tpu.memory_space<vmem>>, vector<1x128xf32>
    %c0_242 = arith.constant 0 : index
    %c0_243 = arith.constant 0 : index
    %c0_244 = arith.constant 0 : index
    %243 = vector.load %arg24[%c0_242, %c0_243, %c0_244] : memref<16x16x128xf32, #tpu.memory_space<vmem>>, vector<16x16x128xf32>
    %c2_245 = arith.constant 2 : index
    %c8_246 = arith.constant 8 : index
    %c0_247 = arith.constant 0 : index
    %244 = vector.load %arg23[%c2_245, %c8_246, %c0_247] : memref<18x32x128xf32, #tpu.memory_space<vmem>>, vector<16x16x128xf32>
    %245 = vector.shape_cast %242 : vector<1x128xf32> to vector<1x1x128xf32>
    %246 = vector.broadcast %245 : vector<1x1x128xf32> to vector<16x16x128xf32>
    %247 = arith.mulf %244, %246 : vector<16x16x128xf32>
    %248 = arith.addf %243, %247 : vector<16x16x128xf32>
    %c0_248 = arith.constant 0 : index
    %c0_249 = arith.constant 0 : index
    %c0_250 = arith.constant 0 : index
    %249 = vector.load %arg24[%c0_248, %c0_249, %c0_250] : memref<16x16x128xf32, #tpu.memory_space<vmem>>, vector<16x16x128xf32>
    tpu.vector_store %arg24[%c0_248, %c0_249, %c0_250], %248 {strides = array<i32>} : memref<16x16x128xf32, #tpu.memory_space<vmem>>, vector<16x16x128xf32>,
    %c8_251 = arith.constant 8 : index
    %c0_252 = arith.constant 0 : index
    %250 = vector.load %arg16[%c8_251, %c0_252] : memref<9x128xf32, #tpu.memory_space<vmem>>, vector<1x128xf32>
    %c0_253 = arith.constant 0 : index
    %c0_254 = arith.constant 0 : index
    %c0_255 = arith.constant 0 : index
    %251 = vector.load %arg24[%c0_253, %c0_254, %c0_255] : memref<16x16x128xf32, #tpu.memory_space<vmem>>, vector<16x16x128xf32>
    %c2_256 = arith.constant 2 : index
    %c9_257 = arith.constant 9 : index
    %c0_258 = arith.constant 0 : index
    %252 = vector.load %arg23[%c2_256, %c9_257, %c0_258] : memref<18x32x128xf32, #tpu.memory_space<vmem>>, vector<16x16x128xf32>
    %253 = vector.shape_cast %250 : vector<1x128xf32> to vector<1x1x128xf32>
    %254 = vector.broadcast %253 : vector<1x1x128xf32> to vector<16x16x128xf32>
    %255 = arith.mulf %252, %254 : vector<16x16x128xf32>
    %256 = arith.addf %251, %255 : vector<16x16x128xf32>
    %c0_259 = arith.constant 0 : index
    %c0_260 = arith.constant 0 : index
    %c0_261 = arith.constant 0 : index
    %257 = vector.load %arg24[%c0_259, %c0_260, %c0_261] : memref<16x16x128xf32, #tpu.memory_space<vmem>>, vector<16x16x128xf32>
    tpu.vector_store %arg24[%c0_259, %c0_260, %c0_261], %256 {strides = array<i32>} : memref<16x16x128xf32, #tpu.memory_space<vmem>>, vector<16x16x128xf32>,
    %c0_262 = arith.constant 0 : index
    %c0_263 = arith.constant 0 : index
    %c0_264 = arith.constant 0 : index
    %258 = vector.load %arg24[%c0_262, %c0_263, %c0_264] : memref<16x16x128xf32, #tpu.memory_space<vmem>>, vector<16x16x128xf32>
    %259 = vector.shape_cast %258 : vector<16x16x128xf32> to vector<256x128xf32>
    %c0_265 = arith.constant 0 : index
    %c0_266 = arith.constant 0 : index
    %260 = vector.load %arg17[%c0_265, %c0_266] : memref<1x128xf32, #tpu.memory_space<vmem>>, vector<1x128xf32>
    %261 = vector.broadcast %260 : vector<1x128xf32> to vector<256x128xf32>
    %262 = arith.addf %259, %261 : vector<256x128xf32>
    %263 = vector.extract_strided_slice %262 {offsets = [0, 0], sizes = [256, 64], strides = [1, 1]} : vector<256x128xf32> to vector<256x64xf32>
    %cst_267 = arith.constant 5.000000e-01 : f32
    %264 = vector.broadcast %cst_267 : f32 to vector<256x64xf32>
    %265 = arith.mulf %264, %263 : vector<256x64xf32>
    %cst_268 = arith.constant 0.707106769 : f32
    %266 = vector.broadcast %cst_268 : f32 to vector<256x64xf32>
    %267 = arith.mulf %263, %266 : vector<256x64xf32>
    %cst_269 = arith.constant 0.000000e+00 : f32
    %268 = vector.broadcast %cst_269 : f32 to vector<256x64xf32>
    %269 = arith.cmpf oge, %267, %268 : vector<256x64xf32>
    %cst_270 = arith.constant 1.000000e+00 : f32
    %cst_271 = arith.constant -1.000000e+00 : f32
    %270 = vector.broadcast %cst_270 : f32 to vector<256x64xf32>
    %271 = vector.broadcast %cst_271 : f32 to vector<256x64xf32>
    %272 = arith.select %269, %270, %271 : vector<256x64xi1>, vector<256x64xf32>
    %273 = math.absf %267 : vector<256x64xf32>
    %cst_272 = arith.constant 0.327591091 : f32
    %274 = vector.broadcast %cst_272 : f32 to vector<256x64xf32>
    %275 = arith.mulf %274, %273 : vector<256x64xf32>
    %cst_273 = arith.constant 1.000000e+00 : f32
    %276 = vector.broadcast %cst_273 : f32 to vector<256x64xf32>
    %277 = arith.addf %276, %275 : vector<256x64xf32>
    %cst_274 = arith.constant 1.000000e+00 : f32
    %278 = vector.broadcast %cst_274 : f32 to vector<256x64xf32>
    %279 = arith.divf %278, %277 : vector<256x64xf32>
    %cst_275 = arith.constant 1.06140542 : f32
    %280 = vector.broadcast %cst_275 : f32 to vector<256x64xf32>
    %281 = arith.mulf %280, %279 : vector<256x64xf32>
    %cst_276 = arith.constant -1.45315206 : f32
    %282 = vector.broadcast %cst_276 : f32 to vector<256x64xf32>
    %283 = arith.addf %281, %282 : vector<256x64xf32>
    %284 = arith.mulf %283, %279 : vector<256x64xf32>
    %cst_277 = arith.constant 1.42141378 : f32
    %285 = vector.broadcast %cst_277 : f32 to vector<256x64xf32>
    %286 = arith.addf %284, %285 : vector<256x64xf32>
    %287 = arith.mulf %286, %279 : vector<256x64xf32>
    %cst_278 = arith.constant -0.284496725 : f32
    %288 = vector.broadcast %cst_278 : f32 to vector<256x64xf32>
    %289 = arith.addf %287, %288 : vector<256x64xf32>
    %290 = arith.mulf %289, %279 : vector<256x64xf32>
    %cst_279 = arith.constant 0.254829586 : f32
    %291 = vector.broadcast %cst_279 : f32 to vector<256x64xf32>
    %292 = arith.addf %290, %291 : vector<256x64xf32>
    %293 = arith.mulf %292, %279 : vector<256x64xf32>
    %cst_280 = arith.constant 0.000000e+00 : f32
    %294 = vector.broadcast %cst_280 : f32 to vector<256x64xf32>
    %295 = arith.subf %294, %273 : vector<256x64xf32>
    %296 = arith.mulf %295, %273 : vector<256x64xf32>
    %297 = math.exp %296 : vector<256x64xf32>
    %298 = arith.mulf %293, %297 : vector<256x64xf32>
    %cst_281 = arith.constant 1.000000e+00 : f32
    %299 = vector.broadcast %cst_281 : f32 to vector<256x64xf32>
    %300 = arith.subf %299, %298 : vector<256x64xf32>
    %301 = arith.mulf %272, %300 : vector<256x64xf32>
    %cst_282 = arith.constant 1.000000e+00 : f32
    %302 = vector.broadcast %cst_282 : f32 to vector<256x64xf32>
    %303 = arith.addf %302, %301 : vector<256x64xf32>
    %304 = arith.mulf %265, %303 : vector<256x64xf32>
    %305 = vector.extract_strided_slice %262 {offsets = [0, 64], sizes = [256, 64], strides = [1, 1]} : vector<256x128xf32> to vector<256x64xf32>
    %306 = arith.mulf %304, %305 : vector<256x64xf32>
    %c0_283 = arith.constant 0 : index
    %c0_284 = arith.constant 0 : index
    %307 = vector.load %arg18[%c0_283, %c0_284] : memref<64x32xf32, #tpu.memory_space<vmem>>, vector<64x32xf32>
    %cst_285 = arith.constant dense<0.000000e+00> : vector<256x32xf32>
    %308 = tpu.matmul %306, %307, %cst_285 {dimension_numbers = #tpu.dot_dimension_numbers<[1], [0], [0], [1], [0, 0, 1, 1], [], []>} : vector<256x64xf32>, vector<64x32xf32>, vector<256x32xf32> -> vector<256x32xf32>
    %c0_286 = arith.constant 0 : index
    %c0_287 = arith.constant 0 : index
    %309 = vector.load %arg19[%c0_286, %c0_287] : memref<1x32xf32, #tpu.memory_space<vmem>>, vector<1x32xf32>
    %310 = vector.broadcast %309 : vector<1x32xf32> to vector<256x32xf32>
    %311 = arith.addf %308, %310 : vector<256x32xf32>
    %312 = arith.addf %152, %311 : vector<256x32xf32>
    %c0_288 = arith.constant 0 : index
    %c0_289 = arith.constant 0 : index
    %c0_290 = arith.constant 0 : index
    %313 = vector.load %arg20[%c0_288, %c0_289, %c0_290] : memref<1x256x32xf32, #tpu.memory_space<vmem>>, vector<1x256x32xf32>
    %314 = vector.shape_cast %313 : vector<1x256x32xf32> to vector<256x32xf32>
    %315 = vector.shape_cast %312 : vector<256x32xf32> to vector<1x256x32xf32>
    tpu.vector_store %arg20[%c0_288, %c0_289, %c0_290], %315 {strides = array<i32>} : memref<1x256x32xf32, #tpu.memory_space<vmem>>, vector<1x256x32xf32>,
    return
  }
  func.func @transform_0(%arg0: i32) -> (i32, i32, i32) {
    %c0_i32 = arith.constant 0 : i32
    %c0_i32_0 = arith.constant 0 : i32
    %c0_i32_1 = arith.constant 0 : i32
    return %arg0, %c0_i32, %c0_i32_0 : i32, i32, i32
  }
  func.func @transform_1(%arg0: i32) -> (i32, i32) {
    %c0_i32 = arith.constant 0 : i32
    %c0_i32_0 = arith.constant 0 : i32
    %c0_i32_1 = arith.constant 0 : i32
    return %c0_i32, %c0_i32_0 : i32, i32
  }
  func.func @transform_2(%arg0: i32) -> (i32, i32) {
    %c0_i32 = arith.constant 0 : i32
    %c0_i32_0 = arith.constant 0 : i32
    %c0_i32_1 = arith.constant 0 : i32
    return %c0_i32, %c0_i32_0 : i32, i32
  }
  func.func @transform_3(%arg0: i32) -> (i32, i32) {
    %c0_i32 = arith.constant 0 : i32
    %c0_i32_0 = arith.constant 0 : i32
    %c0_i32_1 = arith.constant 0 : i32
    return %c0_i32, %c0_i32_0 : i32, i32
  }
  func.func @transform_4(%arg0: i32) -> (i32, i32) {
    %c0_i32 = arith.constant 0 : i32
    %c0_i32_0 = arith.constant 0 : i32
    %c0_i32_1 = arith.constant 0 : i32
    return %c0_i32, %c0_i32_0 : i32, i32
  }
  func.func @transform_5(%arg0: i32) -> (i32, i32) {
    %c0_i32 = arith.constant 0 : i32
    %c0_i32_0 = arith.constant 0 : i32
    %c0_i32_1 = arith.constant 0 : i32
    return %c0_i32, %c0_i32_0 : i32, i32
  }
  func.func @transform_6(%arg0: i32) -> (i32, i32) {
    %c0_i32 = arith.constant 0 : i32
    %c0_i32_0 = arith.constant 0 : i32
    %c0_i32_1 = arith.constant 0 : i32
    return %c0_i32, %c0_i32_0 : i32, i32
  }
  func.func @transform_7(%arg0: i32) -> (i32, i32) {
    %c0_i32 = arith.constant 0 : i32
    %c0_i32_0 = arith.constant 0 : i32
    %c0_i32_1 = arith.constant 0 : i32
    return %c0_i32, %c0_i32_0 : i32, i32
  }
  func.func @transform_8(%arg0: i32) -> (i32, i32) {
    %c0_i32 = arith.constant 0 : i32
    %c0_i32_0 = arith.constant 0 : i32
    %c0_i32_1 = arith.constant 0 : i32
    return %c0_i32, %c0_i32_0 : i32, i32
  }
  func.func @transform_9(%arg0: i32) -> (i32, i32) {
    %c0_i32 = arith.constant 0 : i32
    %c0_i32_0 = arith.constant 0 : i32
    %c0_i32_1 = arith.constant 0 : i32
    return %c0_i32, %c0_i32_0 : i32, i32
  }
  func.func @transform_10(%arg0: i32) -> (i32, i32) {
    %c0_i32 = arith.constant 0 : i32
    %c0_i32_0 = arith.constant 0 : i32
    %c0_i32_1 = arith.constant 0 : i32
    return %c0_i32, %c0_i32_0 : i32, i32
  }
  func.func @transform_11(%arg0: i32) -> (i32, i32) {
    %c0_i32 = arith.constant 0 : i32
    %c0_i32_0 = arith.constant 0 : i32
    %c0_i32_1 = arith.constant 0 : i32
    return %c0_i32, %c0_i32_0 : i32, i32
  }
  func.func @transform_12(%arg0: i32) -> (i32, i32) {
    %c0_i32 = arith.constant 0 : i32
    %c0_i32_0 = arith.constant 0 : i32
    %c0_i32_1 = arith.constant 0 : i32
    return %c0_i32, %c0_i32_0 : i32, i32
  }
  func.func @transform_13(%arg0: i32) -> (i32, i32) {
    %c0_i32 = arith.constant 0 : i32
    %c0_i32_0 = arith.constant 0 : i32
    %c0_i32_1 = arith.constant 0 : i32
    return %c0_i32, %c0_i32_0 : i32, i32
  }
  func.func @transform_14(%arg0: i32) -> (i32, i32) {
    %c0_i32 = arith.constant 0 : i32
    %c0_i32_0 = arith.constant 0 : i32
    %c0_i32_1 = arith.constant 0 : i32
    return %c0_i32, %c0_i32_0 : i32, i32
  }
  func.func @transform_15(%arg0: i32) -> (i32, i32) {
    %c0_i32 = arith.constant 0 : i32
    %c0_i32_0 = arith.constant 0 : i32
    %c0_i32_1 = arith.constant 0 : i32
    return %c0_i32, %c0_i32_0 : i32, i32
  }
  func.func @transform_16(%arg0: i32) -> (i32, i32) {
    %c0_i32 = arith.constant 0 : i32
    %c0_i32_0 = arith.constant 0 : i32
    %c0_i32_1 = arith.constant 0 : i32
    return %c0_i32, %c0_i32_0 : i32, i32
  }
  func.func @transform_17(%arg0: i32) -> (i32, i32) {
    %c0_i32 = arith.constant 0 : i32
    %c0_i32_0 = arith.constant 0 : i32
    %c0_i32_1 = arith.constant 0 : i32
    return %c0_i32, %c0_i32_0 : i32, i32
  }
  func.func @transform_18(%arg0: i32) -> (i32, i32) {
    %c0_i32 = arith.constant 0 : i32
    %c0_i32_0 = arith.constant 0 : i32
    %c0_i32_1 = arith.constant 0 : i32
    return %c0_i32, %c0_i32_0 : i32, i32
  }
  func.func @transform_19(%arg0: i32) -> (i32, i32, i32) {
    %c0_i32 = arith.constant 0 : i32
    %c0_i32_0 = arith.constant 0 : i32
    %c0_i32_1 = arith.constant 0 : i32
    return %arg0, %c0_i32, %c0_i32_0 : i32, i32, i32
  }
}

</mosaic_0001>

<bundles_post_ra>
// kernel: tpu_custom_call.1
= control target key start
LH: loop header
LB: loop body
LE: loop exit
PB: predicated region body
PF: predicated region fallthrough
CT: control target
= control target key end

     0   :  { %s15241_s0 = inlined_call_operand.vmem [shape: f32[2,256,32], index: 0, kind: input, shape index: {}]   ;;  %s15242_s1 = inlined_call_operand.vmem [shape: f32[1,32], index: 1, kind: input, shape index: {}]   ;;  %s15243_s2 = inlined_call_operand.vmem [shape: f32[1,32], index: 2, kind: input, shape index: {}]   ;;  %s15244_s3 = inlined_call_operand.vmem [shape: f32[32,96], index: 3, kind: input, shape index: {}]   ;;  %s15245_s4 = inlined_call_operand.vmem [shape: f32[1,96], index: 4, kind: input, shape index: {}]   ;;  %s15246_s5 = inlined_call_operand.vmem [shape: f32[9,96], index: 5, kind: input, shape index: {}]   ;;  %s15247_s6 = inlined_call_operand.vmem [shape: f32[1,96], index: 6, kind: input, shape index: {}]   ;;  %s15248_s7 = inlined_call_operand.vmem [shape: f32[1,32], index: 7, kind: input, shape index: {}]   ;;  %s15249_s8 = inlined_call_operand.vmem [shape: f32[32,32], index: 8, kind: input, shape index: {}]   ;;  %s15250_s9 = inlined_call_operand.vmem [shape: f32[32,32], index: 9, kind: input, shape index: {}]   ;;  %s15251_s10 = inlined_call_operand.vmem [shape: f32[1,32], index: 10, kind: input, shape index: {}]   ;;  %s15252_s11 = inlined_call_operand.vmem [shape: f32[1,32], index: 11, kind: input, shape index: {}]   ;;  %s15253_s12 = inlined_call_operand.vmem [shape: f32[1,32], index: 12, kind: input, shape index: {}]   ;;  %s15254_s13 = inlined_call_operand.vmem [shape: f32[32,128], index: 13, kind: input, shape index: {}]   ;;  %s15255_s14 = inlined_call_operand.vmem [shape: f32[1,128], index: 14, kind: input, shape index: {}]   ;;  %s15256_s15 = inlined_call_operand.vmem [shape: f32[9,128], index: 15, kind: input, shape index: {}]   ;;  %s15257_s16 = inlined_call_operand.vmem [shape: f32[1,128], index: 16, kind: input, shape index: {}]   ;;  %s15258_s17 = inlined_call_operand.vmem [shape: f32[64,32], index: 17, kind: input, shape index: {}]   ;;  %s15259_s18 = inlined_call_operand.vmem [shape: f32[1,32], index: 18, kind: input, shape index: {}]   ;;  %s15260_s19 = inlined_call_operand.vmem [shape: f32[2,256,32], index: 19, kind: output, shape index: {}]  }
   0x1   :  { %15363 = sst [smem:[#allocation52_spill]] %s15241_s0  ;;  %s9945_s0 = smov 0  }
   0x2   :  { %15364 = sst [smem:[#allocation53_spill]] %s15242_s1 }
   0x3   :  { %15365 = sst [smem:[#allocation54_spill]] %s15243_s2 }
   0x4   :  { %15366 = sst [smem:[#allocation55_spill]] %s15244_s3 }
   0x5 LB: > { %s8536_s30 = sadd.s32 4294967295, %s9839_s0   ;;  %p8540_p0 = scmp.ge.s32.totalorder %s9839_s0, 1  ;;  %s9839_s0 = sphi %s9945_s0, %s29_s0  }
   0x6   : > { %p537_p1 = scmp.lt.s32.totalorder %s9839_s0, 3 }
   0x8   : > { %p538_p2 = pnand %p8540_p0, %p537_p1 }
   0xa   : > { %541 = sbr.rel (%p538_p2) target bundleno = 3176 (0xc68), region = 96 }
  0x11   : > { %p593_p3 = scmp.lt.s32.totalorder %s8536_s30, 1  ;;  %vm635_vm0 = vcmask 261120   ;;  %s15367_s22 = sld [smem:[#allocation52_spill]]  ;;  %vm1463_vm1 = vcmask 785408   ;;  %vm3300_vm2 = vcmask 523520   ;;  %vm8095_vm13 = vcmask 523264  }
  0x12   : > { %s15368_s25 = sld [smem:[#allocation55_spill]]  ;;  %s15369_s23 = sld [smem:[#allocation53_spill]]  ;;  %vm9299_vm7 = vmpackc.low %vm635_vm0, %vm635_vm0 }
  0x13   : > { %s15543_s30 = smov (!%p593_p3, %s8536_s30), 1  ;;  %s15370_s26 = sld [smem:[#allocation54_spill]] }
  0x14   : > { %s8740_s20 = sshll.u32 %s15543_s30, 8  ;;  %s9842_s27 = smov 96  }
  0x15   : > { %s9843_s21 = smov 64  }
  0x17   : > { %s9961_s2 = scalar_lea.vmem %s15367_s22, %s8740_s20 }
  0x18   : > { %v9964_v0 = vld [vmem:[%s9961_s2] sm:$0xff]  ;;  %v9967_v1 = vld [vmem:[%s9961_s2 + $0x10] sm:$0xff]  ;;  %v9970_v2 = vld [vmem:[%s9961_s2 + $0x8] sm:$0xff] }
  0x19   : > { %v636_v3 = vsel %vm635_vm0, %v9964_v0, 0.0  ;;  %v642_v4 = vsel %vm635_vm0, %v9967_v1, 0.0  ;;  %v9977_v5 = vld [vmem:[%s9961_s2 + $0x18] sm:$0xff]  ;;  %v639_v6 = vsel %vm635_vm0, %v9970_v2, 0.0  ;;  %v9984_v8 = vld [vmem:[%s9961_s2 + $0x20] sm:$0xff]  ;;  %v9987_v9 = vld [vmem:[%s9961_s2 + $0x28] sm:$0xff] }
  0x1a   : > { %637 = vadd.xlane.f32.xlu0 %v636_v3  ;;  %643 = vadd.xlane.f32.xlu1 %v642_v4  ;;  %v645_v7 = vsel %vm635_vm0, %v9977_v5, 0.0  ;;  %v648_v10 = vsel %vm635_vm0, %v9984_v8, 0.0  ;;  %v651_v11 = vsel %vm635_vm0, %v9987_v9, 0.0  ;;  %v9994_v12 = vld [vmem:[%s9961_s2 + $0x30] sm:$0xff]  ;;  %v9997_v13 = vld [vmem:[%s9961_s2 + $0x38] sm:$0xff]  ;;  %v10004_v16 = vld [vmem:[%s9961_s2 + $0x40] sm:$0xff] }
  0x1b   : > { %v654_v14 = vsel %vm635_vm0, %v9994_v12, 0.0  ;;  %v657_v15 = vsel %vm635_vm0, %v9997_v13, 0.0  ;;  %v10007_v17 = vld [vmem:[%s9961_s2 + $0x48] sm:$0xff]  ;;  %v660_v18 = vsel %vm635_vm0, %v10004_v16, 0.0  ;;  %v10014_v20 = vld [vmem:[%s9961_s2 + $0x50] sm:$0xff]  ;;  %v10017_v21 = vld [vmem:[%s9961_s2 + $0x58] sm:$0xff] }
  0x1c   : > { %v663_v19 = vsel %vm635_vm0, %v10007_v17, 0.0  ;;  %v666_v22 = vsel %vm635_vm0, %v10014_v20, 0.0  ;;  %v669_v23 = vsel %vm635_vm0, %v10017_v21, 0.0  ;;  %v10024_v24 = vld [vmem:[%s9961_s2 + $0x60] sm:$0xff]  ;;  %v10027_v25 = vld [vmem:[%s9961_s2 + $0x68] sm:$0xff]  ;;  %v10034_v28 = vld [vmem:[%s9961_s2 + $0x70] sm:$0xff] }
  0x1d   : > { %v672_v26 = vsel %vm635_vm0, %v10024_v24, 0.0  ;;  %v675_v27 = vsel %vm635_vm0, %v10027_v25, 0.0  ;;  %v10037_v29 = vld [vmem:[%s9961_s2 + $0x78] sm:$0xff]  ;;  %v678_v30 = vsel %vm635_vm0, %v10034_v28, 0.0  ;;  %v10044_v32 = vld [vmem:[%s9961_s2 + $0x80] sm:$0xff]  ;;  %v10047_v33 = vld [vmem:[%s9961_s2 + $0x88] sm:$0xff] }
  0x1e   : > { %640 = vadd.xlane.f32.xlu0 %v639_v6  ;;  %646 = vadd.xlane.f32.xlu1 %v645_v7  ;;  %v681_v31 = vsel %vm635_vm0, %v10037_v29, 0.0  ;;  %v684_v34 = vsel %vm635_vm0, %v10044_v32, 0.0  ;;  %v687_v35 = vsel %vm635_vm0, %v10047_v33, 0.0  ;;  %v10054_v36 = vld [vmem:[%s9961_s2 + $0x90] sm:$0xff]  ;;  %v10057_v37 = vld [vmem:[%s9961_s2 + $0x98] sm:$0xff]  ;;  %v10064_v40 = vld [vmem:[%s9961_s2 + $0xa0] sm:$0xff] }
  0x1f   : > { %v690_v38 = vsel %vm635_vm0, %v10054_v36, 0.0  ;;  %v693_v39 = vsel %vm635_vm0, %v10057_v37, 0.0  ;;  %v10067_v41 = vld [vmem:[%s9961_s2 + $0xa8] sm:$0xff]  ;;  %v696_v42 = vsel %vm635_vm0, %v10064_v40, 0.0  ;;  %v10074_v44 = vld [vmem:[%s9961_s2 + $0xb0] sm:$0xff]  ;;  %v10077_v45 = vld [vmem:[%s9961_s2 + $0xb8] sm:$0xff] }
  0x20   : > { %v699_v43 = vsel %vm635_vm0, %v10067_v41, 0.0  ;;  %v702_v46 = vsel %vm635_vm0, %v10074_v44, 0.0  ;;  %v705_v47 = vsel %vm635_vm0, %v10077_v45, 0.0  ;;  %v10084_v48 = vld [vmem:[%s9961_s2 + $0xc0] sm:$0xff]  ;;  %v10087_v49 = vld [vmem:[%s9961_s2 + $0xc8] sm:$0xff]  ;;  %v10094_v52 = vld [vmem:[%s9961_s2 + $0xd0] sm:$0xff] }
  0x21   : > { %v708_v50 = vsel %vm635_vm0, %v10084_v48, 0.0  ;;  %v711_v51 = vsel %vm635_vm0, %v10087_v49, 0.0  ;;  %v10097_v53 = vld [vmem:[%s9961_s2 + $0xd8] sm:$0xff]  ;;  %v714_v54 = vsel %vm635_vm0, %v10094_v52, 0.0  ;;  %v10104_v56 = vld [vmem:[%s9961_s2 + $0xe0] sm:$0xff]  ;;  %v10107_v57 = vld [vmem:[%s9961_s2 + $0xe8] sm:$0xff] }
  0x22   : > { %649 = vadd.xlane.f32.xlu0 %v648_v10  ;;  %652 = vadd.xlane.f32.xlu1 %v651_v11  ;;  %v717_v55 = vsel %vm635_vm0, %v10097_v53, 0.0  ;;  %v720_v58 = vsel %vm635_vm0, %v10104_v56, 0.0  ;;  %v723_v59 = vsel %vm635_vm0, %v10107_v57, 0.0  ;;  %v10114_v60 = vld [vmem:[%s9961_s2 + $0xf0] sm:$0xff]  ;;  %v10117_v61 = vld [vmem:[%s9961_s2 + $0xf8] sm:$0xff] }
  0x23   : > { %v726_v62 = vsel %vm635_vm0, %v10114_v60, 0.0  ;;  %v729_v63 = vsel %vm635_vm0, %v10117_v61, 0.0 }
  0x26   : > { %655 = vadd.xlane.f32.xlu0 %v654_v14  ;;  %658 = vadd.xlane.f32.xlu1 %v657_v15 }
  0x2a   : > { %661 = vadd.xlane.f32.xlu0 %v660_v18  ;;  %664 = vadd.xlane.f32.xlu1 %v663_v19 }
  0x2e   : > { %667 = vadd.xlane.f32.xlu0 %v666_v22  ;;  %670 = vadd.xlane.f32.xlu1 %v669_v23 }
  0x32   : > { %673 = vadd.xlane.f32.xlu0 %v672_v26  ;;  %676 = vadd.xlane.f32.xlu1 %v675_v27 }
  0x36   : > { %679 = vadd.xlane.f32.xlu0 %v678_v30  ;;  %682 = vadd.xlane.f32.xlu1 %v681_v31 }
  0x3a   : > { %685 = vadd.xlane.f32.xlu0 %v684_v34  ;;  %688 = vadd.xlane.f32.xlu1 %v687_v35 }
  0x3e   : > { %691 = vadd.xlane.f32.xlu0 %v690_v38  ;;  %694 = vadd.xlane.f32.xlu1 %v693_v39 }
  0x42   : > { %697 = vadd.xlane.f32.xlu0 %v696_v42  ;;  %700 = vadd.xlane.f32.xlu1 %v699_v43 }
  0x46   : > { %703 = vadd.xlane.f32.xlu0 %v702_v46  ;;  %706 = vadd.xlane.f32.xlu1 %v705_v47 }
  0x4a   : > { %709 = vadd.xlane.f32.xlu0 %v708_v50  ;;  %712 = vadd.xlane.f32.xlu1 %v711_v51 }
  0x4e   : > { %715 = vadd.xlane.f32.xlu0 %v714_v54  ;;  %718 = vadd.xlane.f32.xlu1 %v717_v55 }
  0x52   : > { %721 = vadd.xlane.f32.xlu0 %v720_v58  ;;  %724 = vadd.xlane.f32.xlu1 %v723_v59 }
  0x56   : > { %727 = vadd.xlane.f32.xlu0 %v726_v62  ;;  %730 = vadd.xlane.f32.xlu1 %v729_v63 }
  0xa7   : > { %v638_v3 = vpop.xlane.xlu0 %637  ;;  %v644_v4 = vpop.xlane.xlu1 %643 }
  0xa8   : > { %v733_v6 = vmul.f32 0.03125, %v638_v3  ;;  %v735_v7 = vmul.f32 0.03125, %v644_v4 }
  0xaa   : > { %v10124_v10 = vsub.f32 %v9964_v0, %v733_v6  ;;  %v10127_v11 = vsub.f32 %v9967_v1, %v735_v7 }
  0xab   : > { %v641_v14 = vpop.xlane.xlu0 %640  ;;  %v647_v15 = vpop.xlane.xlu1 %646 }
  0xac   : > { %v734_v18 = vmul.f32 0.03125, %v641_v14  ;;  %v736_v19 = vmul.f32 0.03125, %v647_v15  ;;  %v797_v22 = vmul.f32 %v10124_v10, %v10124_v10  ;;  %v799_v23 = vmul.f32 %v10127_v11, %v10127_v11 }
  0xae   : > { %v10134_v26 = vsub.f32 %v9970_v2, %v734_v18  ;;  %v10137_v27 = vsub.f32 %v9977_v5, %v736_v19  ;;  %v829_v0 = vsel %vm635_vm0, %v797_v22, 0.0  ;;  %v835_v31 = vsel %vm635_vm0, %v799_v23, 0.0 }
  0xaf   : > { %830 = vadd.xlane.f32.xlu0 %v829_v0  ;;  %v650_v1 = vpop.xlane.xlu0 %649  ;;  %v653_v30 = vpop.xlane.xlu1 %652 }
  0xb0   : > { %v737_v34 = vmul.f32 0.03125, %v650_v1  ;;  %v738_v35 = vmul.f32 0.03125, %v653_v30  ;;  %v798_v38 = vmul.f32 %v10134_v26, %v10134_v26  ;;  %v800_v39 = vmul.f32 %v10137_v27, %v10137_v27 }
  0xb2   : > { %v10146_v2 = vsub.f32 %v9984_v8, %v737_v34  ;;  %v10149_v5 = vsub.f32 %v9987_v9, %v738_v35  ;;  %v832_v42 = vsel %vm635_vm0, %v798_v38, 0.0  ;;  %v838_v47 = vsel %vm635_vm0, %v800_v39, 0.0 }
  0xb3   : > { %836 = vadd.xlane.f32.xlu0 %v835_v31  ;;  %833 = vadd.xlane.f32.xlu1 %v832_v42  ;;  %v656_v43 = vpop.xlane.xlu0 %655  ;;  %v659_v46 = vpop.xlane.xlu1 %658 }
  0xb4   : > { %v739_v50 = vmul.f32 0.03125, %v656_v43  ;;  %v740_v51 = vmul.f32 0.03125, %v659_v46  ;;  %v801_v54 = vmul.f32 %v10146_v2, %v10146_v2  ;;  %v802_v8 = vmul.f32 %v10149_v5, %v10149_v5 }
  0xb6   : > { %v10158_v55 = vsub.f32 %v9994_v12, %v739_v50  ;;  %v10161_v9 = vsub.f32 %v9997_v13, %v740_v51  ;;  %v841_v58 = vsel %vm635_vm0, %v801_v54, 0.0  ;;  %v844_v63 = vsel %vm635_vm0, %v802_v8, 0.0 }
  0xb7   : > { %839 = vadd.xlane.f32.xlu1 %v838_v47  ;;  %842 = vadd.xlane.f32.xlu0 %v841_v58  ;;  %v662_v59 = vpop.xlane.xlu0 %661  ;;  %v665_v62 = vpop.xlane.xlu1 %664 }
  0xb8   : > { %v741_v3 = vmul.f32 0.03125, %v662_v59  ;;  %v742_v4 = vmul.f32 0.03125, %v665_v62  ;;  %v803_v6 = vmul.f32 %v10158_v55, %v10158_v55  ;;  %v804_v12 = vmul.f32 %v10161_v9, %v10161_v9 }
  0xba   : > { %v10170_v7 = vsub.f32 %v10004_v16, %v741_v3  ;;  %v10173_v13 = vsub.f32 %v10007_v17, %v742_v4  ;;  %v847_v14 = vsel %vm635_vm0, %v803_v6, 0.0  ;;  %v850_v19 = vsel %vm635_vm0, %v804_v12, 0.0 }
  0xbb   : > { %845 = vadd.xlane.f32.xlu1 %v844_v63  ;;  %848 = vadd.xlane.f32.xlu0 %v847_v14  ;;  %v668_v15 = vpop.xlane.xlu0 %667  ;;  %v671_v18 = vpop.xlane.xlu1 %670 }
  0xbc   : > { %v743_v22 = vmul.f32 0.03125, %v668_v15  ;;  %v744_v23 = vmul.f32 0.03125, %v671_v18  ;;  %v805_v0 = vmul.f32 %v10170_v7, %v10170_v7  ;;  %v806_v16 = vmul.f32 %v10173_v13, %v10173_v13 }
  0xbe   : > { %v10182_v1 = vsub.f32 %v10014_v20, %v743_v22  ;;  %v10185_v17 = vsub.f32 %v10017_v21, %v744_v23  ;;  %v853_v30 = vsel %vm635_vm0, %v805_v0, 0.0  ;;  %v856_v35 = vsel %vm635_vm0, %v806_v16, 0.0 }
  0xbf   : > { %851 = vadd.xlane.f32.xlu1 %v850_v19  ;;  %854 = vadd.xlane.f32.xlu0 %v853_v30  ;;  %v674_v31 = vpop.xlane.xlu0 %673  ;;  %v677_v34 = vpop.xlane.xlu1 %676 }
  0xc0   : > { %v745_v38 = vmul.f32 0.03125, %v674_v31  ;;  %v746_v39 = vmul.f32 0.03125, %v677_v34  ;;  %v807_v42 = vmul.f32 %v10182_v1, %v10182_v1  ;;  %v808_v20 = vmul.f32 %v10185_v17, %v10185_v17  ;;  %v1132_v31 = vld [vmem:[%s15368_s25 + $0x8] sm:$0xff] }
  0xc2   : > { %v10194_v43 = vsub.f32 %v10024_v24, %v745_v38  ;;  %v10197_v21 = vsub.f32 %v10027_v25, %v746_v39  ;;  %v859_v46 = vsel %vm635_vm0, %v807_v42, 0.0  ;;  %v862_v51 = vsel %vm635_vm0, %v808_v20, 0.0 }
  0xc3   : > { %857 = vadd.xlane.f32.xlu1 %v856_v35  ;;  %860 = vadd.xlane.f32.xlu0 %v859_v46  ;;  %v680_v47 = vpop.xlane.xlu0 %679  ;;  %v683_v50 = vpop.xlane.xlu1 %682 }
  0xc4   : > { %v747_v54 = vmul.f32 0.03125, %v680_v47  ;;  %v748_v8 = vmul.f32 0.03125, %v683_v50  ;;  %v809_v58 = vmul.f32 %v10194_v43, %v10194_v43  ;;  %v810_v24 = vmul.f32 %v10197_v21, %v10197_v21 }
  0xc6   : > { %v10206_v59 = vsub.f32 %v10034_v28, %v747_v54  ;;  %v10209_v25 = vsub.f32 %v10037_v29, %v748_v8  ;;  %v865_v62 = vsel %vm635_vm0, %v809_v58, 0.0  ;;  %v868_v4 = vsel %vm635_vm0, %v810_v24, 0.0  ;;  %v1134_v54 = vld [vmem:[%s15368_s25 + $0x18] sm:$0xff] }
  0xc7   : > { %863 = vadd.xlane.f32.xlu1 %v862_v51  ;;  %866 = vadd.xlane.f32.xlu0 %v865_v62  ;;  %v686_v63 = vpop.xlane.xlu0 %685  ;;  %v689_v3 = vpop.xlane.xlu1 %688 }
  0xc8   : > { %v749_v6 = vmul.f32 0.03125, %v686_v63  ;;  %v750_v12 = vmul.f32 0.03125, %v689_v3  ;;  %v811_v14 = vmul.f32 %v10206_v59, %v10206_v59  ;;  %v812_v28 = vmul.f32 %v10209_v25, %v10209_v25 }
  0xca   : > { %v10218_v15 = vsub.f32 %v10044_v32, %v749_v6  ;;  %v10221_v29 = vsub.f32 %v10047_v33, %v750_v12  ;;  %v871_v18 = vsel %vm635_vm0, %v811_v14, 0.0  ;;  %v874_v23 = vsel %vm635_vm0, %v812_v28, 0.0  ;;  %v1131_v33 = vld [vmem:[%s15368_s25] sm:$0xff] }
  0xcb   : > { %869 = vadd.xlane.f32.xlu1 %v868_v4  ;;  %872 = vadd.xlane.f32.xlu0 %v871_v18  ;;  %v692_v19 = vpop.xlane.xlu0 %691  ;;  %v695_v22 = vpop.xlane.xlu1 %694  ;;  %v9258_v34 = vpack.c.bf16 %v1132_v31, %v1131_v33 }
  0xcc   : > { %v751_v0 = vmul.f32 0.03125, %v692_v19  ;;  %v752_v16 = vmul.f32 0.03125, %v695_v22  ;;  %v813_v30 = vmul.f32 %v10218_v15, %v10218_v15  ;;  %v814_v32 = vmul.f32 %v10221_v29, %v10221_v29 }
  0xcd   : > { %9259 = vmatprep.subr.bf16.mxu0 %v9258_v34 }
  0xce   : > { %v10236_v35 = vsub.f32 %v10054_v36, %v751_v0  ;;  %v10239_v38 = vsub.f32 %v10057_v37, %v752_v16  ;;  %v877_v39 = vsel %vm635_vm0, %v813_v30, 0.0  ;;  %v880_v46 = vsel %vm635_vm0, %v814_v32, 0.0  ;;  %v1133_v37 = vld [vmem:[%s15368_s25 + $0x10] sm:$0xff]  ;;  %9261 = vmatpush3.bf16.msra.mxu0 %v9258_v34 }
  0xcf   : > { %875 = vadd.xlane.f32.xlu1 %v874_v23  ;;  %878 = vadd.xlane.f32.xlu0 %v877_v39  ;;  %v698_v42 = vpop.xlane.xlu0 %697  ;;  %v701_v20 = vpop.xlane.xlu1 %700  ;;  %v9262_v8 = vpack.c.bf16 %v1134_v54, %v1133_v37 }
  0xd0   : > { %v753_v47 = vmul.f32 0.03125, %v698_v42  ;;  %v754_v50 = vmul.f32 0.03125, %v701_v20  ;;  %v815_v51 = vmul.f32 %v10236_v35, %v10236_v35  ;;  %v816_v36 = vmul.f32 %v10239_v38, %v10239_v38 }
  0xd1   : > { %9263 = vmatprep.subr.bf16.mxu0 %v9262_v8 }
  0xd2   : > { %v10254_v58 = vsub.f32 %v10064_v40, %v753_v47  ;;  %v10257_v24 = vsub.f32 %v10067_v41, %v754_v50  ;;  %v883_v62 = vsel %vm635_vm0, %v815_v51, 0.0  ;;  %v886_v4 = vsel %vm635_vm0, %v816_v36, 0.0  ;;  %9265 = vmatpush3.bf16.msra.mxu0 %v9262_v8 }
  0xd3   : > { %881 = vadd.xlane.f32.xlu1 %v880_v46  ;;  %884 = vadd.xlane.f32.xlu0 %v883_v62  ;;  %v704_v63 = vpop.xlane.xlu0 %703  ;;  %v707_v3 = vpop.xlane.xlu1 %706 }
  0xd4   : > { %v755_v6 = vmul.f32 0.03125, %v704_v63  ;;  %v756_v12 = vmul.f32 0.03125, %v707_v3  ;;  %v817_v14 = vmul.f32 %v10254_v58, %v10254_v58  ;;  %v818_v40 = vmul.f32 %v10257_v24, %v10257_v24 }
  0xd6   : > { %v10266_v41 = vsub.f32 %v10074_v44, %v755_v6  ;;  %v10269_v28 = vsub.f32 %v10077_v45, %v756_v12  ;;  %v889_v18 = vsel %vm635_vm0, %v817_v14, 0.0  ;;  %v892_v23 = vsel %vm635_vm0, %v818_v40, 0.0 }
  0xd7   : > { %887 = vadd.xlane.f32.xlu1 %v886_v4  ;;  %890 = vadd.xlane.f32.xlu0 %v889_v18  ;;  %v710_v19 = vpop.xlane.xlu0 %709  ;;  %v713_v22 = vpop.xlane.xlu1 %712 }
  0xd8   : > { %v757_v0 = vmul.f32 0.03125, %v710_v19  ;;  %v758_v16 = vmul.f32 0.03125, %v713_v22  ;;  %v819_v30 = vmul.f32 %v10266_v41, %v10266_v41  ;;  %v820_v44 = vmul.f32 %v10269_v28, %v10269_v28 }
  0xda   : > { %v10278_v32 = vsub.f32 %v10084_v48, %v757_v0  ;;  %v10281_v45 = vsub.f32 %v10087_v49, %v758_v16  ;;  %v895_v33 = vsel %vm635_vm0, %v819_v30, 0.0  ;;  %v898_v39 = vsel %vm635_vm0, %v820_v44, 0.0 }
  0xdb   : > { %893 = vadd.xlane.f32.xlu1 %v892_v23  ;;  %896 = vadd.xlane.f32.xlu0 %v895_v33  ;;  %v716_v31 = vpop.xlane.xlu0 %715  ;;  %v719_v34 = vpop.xlane.xlu1 %718 }
  0xdc   : > { %v759_v42 = vmul.f32 0.03125, %v716_v31  ;;  %v760_v20 = vmul.f32 0.03125, %v719_v34  ;;  %v821_v46 = vmul.f32 %v10278_v32, %v10278_v32  ;;  %v822_v48 = vmul.f32 %v10281_v45, %v10281_v45 }
  0xde   : > { %v10290_v47 = vsub.f32 %v10094_v52, %v759_v42  ;;  %v10293_v49 = vsub.f32 %v10097_v53, %v760_v20  ;;  %v901_v50 = vsel %vm635_vm0, %v821_v46, 0.0  ;;  %v904_v37 = vsel %vm635_vm0, %v822_v48, 0.0 }
  0xdf   : > { %899 = vadd.xlane.f32.xlu1 %v898_v39  ;;  %902 = vadd.xlane.f32.xlu0 %v901_v50  ;;  %v722_v51 = vpop.xlane.xlu0 %721  ;;  %v725_v36 = vpop.xlane.xlu1 %724 }
  0xe0   : > { %v761_v54 = vmul.f32 0.03125, %v722_v51  ;;  %v762_v8 = vmul.f32 0.03125, %v725_v36  ;;  %v823_v62 = vmul.f32 %v10290_v47, %v10290_v47  ;;  %v824_v52 = vmul.f32 %v10293_v49, %v10293_v49 }
  0xe2   : > { %v10302_v63 = vsub.f32 %v10104_v56, %v761_v54  ;;  %v10305_v53 = vsub.f32 %v10107_v57, %v762_v8  ;;  %v907_v3 = vsel %vm635_vm0, %v823_v62, 0.0  ;;  %v910_v12 = vsel %vm635_vm0, %v824_v52, 0.0 }
  0xe3   : > { %905 = vadd.xlane.f32.xlu1 %v904_v37  ;;  %908 = vadd.xlane.f32.xlu0 %v907_v3  ;;  %v728_v4 = vpop.xlane.xlu0 %727  ;;  %v731_v6 = vpop.xlane.xlu1 %730 }
  0xe4   : > { %v763_v14 = vmul.f32 0.03125, %v728_v4  ;;  %v764_v40 = vmul.f32 0.03125, %v731_v6  ;;  %v825_v18 = vmul.f32 %v10302_v63, %v10302_v63  ;;  %v826_v56 = vmul.f32 %v10305_v53, %v10305_v53 }
  0xe6   : > { %v10314_v19 = vsub.f32 %v10114_v60, %v763_v14  ;;  %v10317_v57 = vsub.f32 %v10117_v61, %v764_v40  ;;  %v913_v22 = vsel %vm635_vm0, %v825_v18, 0.0  ;;  %v916_v23 = vsel %vm635_vm0, %v826_v56, 0.0  ;;  %v10330_v14 = vld [vmem:[%s15369_s23] ss:$0 sm:$0xff]  ;;  %s15109_s23 = scalar_lea.vmem %s15260_s19, %s8740_s20 }
  0xe7   : > { %911 = vadd.xlane.f32.xlu1 %v910_v12  ;;  %914 = vadd.xlane.f32.xlu0 %v913_v22 }
  0xe8   : > { %v827_v0 = vmul.f32 %v10314_v19, %v10314_v19  ;;  %v828_v16 = vmul.f32 %v10317_v57, %v10317_v57 }
  0xea   : > { %v919_v30 = vsel %vm635_vm0, %v827_v0, 0.0  ;;  %v922_v60 = vsel %vm635_vm0, %v828_v16, 0.0  ;;  %v10336_v0 = vld [vmem:[%s15370_s26] ss:$0 sm:$0xff] }
  0xeb   : > { %917 = vadd.xlane.f32.xlu1 %v916_v23  ;;  %920 = vadd.xlane.f32.xlu0 %v919_v30 }
  0xef   : > { %923 = vadd.xlane.f32.xlu1 %v922_v60 }
 0x13c   : > { %v831_v61 = vpop.xlane.xlu0 %830 }
 0x13d   : > { %v925_v44 = vmul.f32 0.03125, %v831_v61 }
 0x13f   : > { %v957_v33 = vadd.f32 1e-05, %v925_v44 }
 0x140   : > { %v834_v31 = vpop.xlane.xlu1 %833  ;;  %v837_v34 = vpop.xlane.xlu0 %836 }
 0x141   : > { %9490 = vrsqrt.f32 %v957_v33  ;;  %v926_v39 = vmul.f32 0.03125, %v834_v31  ;;  %v927_v42 = vmul.f32 0.03125, %v837_v34 }
 0x143   : > { %v958_v20 = vadd.f32 1e-05, %v926_v39  ;;  %v959_v46 = vadd.f32 1e-05, %v927_v42 }
 0x144   : > { %v840_v48 = vpop.xlane.xlu1 %839  ;;  %v843_v50 = vpop.xlane.xlu0 %842 }
 0x145   : > { %9492 = vrsqrt.f32 %v958_v20  ;;  %v928_v51 = vmul.f32 0.03125, %v840_v48  ;;  %v929_v36 = vmul.f32 0.03125, %v843_v50 }
 0x146   : > { %9494 = vrsqrt.f32 %v959_v46 }
 0x147   : > { %v960_v37 = vadd.f32 1e-05, %v928_v51  ;;  %v961_v54 = vadd.f32 1e-05, %v929_v36 }
 0x148   : > { %v846_v8 = vpop.xlane.xlu1 %845  ;;  %v849_v62 = vpop.xlane.xlu0 %848 }
 0x149   : > { %9496 = vrsqrt.f32 %v960_v37  ;;  %v930_v52 = vmul.f32 0.03125, %v846_v8  ;;  %v931_v3 = vmul.f32 0.03125, %v849_v62 }
 0x14a   : > { %9498 = vrsqrt.f32 %v961_v54 }
 0x14b   : > { %v9491_v4 = vpop.eup %9490  ;;  %v962_v6 = vadd.f32 1e-05, %v930_v52  ;;  %v963_v12 = vadd.f32 1e-05, %v931_v3 }
 0x14c   : > { %v852_v40 = vpop.xlane.xlu1 %851  ;;  %v855_v18 = vpop.xlane.xlu0 %854  ;;  %v1021_v56 = vmul.f32 %v9491_v4, %v10124_v10 }
 0x14d   : > { %9500 = vrsqrt.f32 %v962_v6  ;;  %v932_v22 = vmul.f32 0.03125, %v852_v40  ;;  %v933_v23 = vmul.f32 0.03125, %v855_v18 }
 0x14e   : > { %9502 = vrsqrt.f32 %v963_v12  ;;  %v1060_v16 = vmul.f32 %v10330_v14, %v1021_v56 }
 0x14f   : > { %v9493_v30 = vpop.eup %9492  ;;  %v964_v60 = vadd.f32 1e-05, %v932_v22  ;;  %v965_v61 = vadd.f32 1e-05, %v933_v23 }
 0x150   : > { %v9495_v44 = vpop.eup %9494  ;;  %v858_v33 = vpop.xlane.xlu1 %857  ;;  %v1099_v34 = vadd.f32 %v10336_v0, %v1060_v16  ;;  %v1022_v10 = vmul.f32 %v9493_v30, %v10134_v26 }
 0x151   : > { %v861_v31 = vpop.xlane.xlu0 %860  ;;  %9504 = vrsqrt.f32 %v964_v60  ;;  %v934_v39 = vmul.f32 0.03125, %v858_v33  ;;  %v1023_v20 = vmul.f32 %v9495_v44, %v10127_v11 }
 0x152   : > { %v935_v42 = vmul.f32 0.03125, %v861_v31  ;;  %9506 = vrsqrt.f32 %v965_v61  ;;  %8978 = vmatprep.mubr.msk.f32.mxu0 %vm635_vm0, %v1099_v34  ;;  %v1061_v46 = vmul.f32 %v10330_v14, %v1022_v10 }
 0x153   : > { %v9497_v48 = vpop.eup %9496  ;;  %v966_v50 = vadd.f32 1e-05, %v934_v39  ;;  %v1062_v36 = vmul.f32 %v10330_v14, %v1023_v20 }
 0x154   : > { %v967_v51 = vadd.f32 1e-05, %v935_v42  ;;  %v9499_v37 = vpop.eup %9498  ;;  %v864_v54 = vpop.xlane.xlu1 %863  ;;  %v1100_v26 = vadd.f32 %v10336_v0, %v1061_v46  ;;  %v1024_v62 = vmul.f32 %v9497_v48, %v10137_v27 }
 0x155   : > { %v867_v8 = vpop.xlane.xlu0 %866  ;;  %9508 = vrsqrt.f32 %v966_v50  ;;  %v936_v52 = vmul.f32 0.03125, %v864_v54  ;;  %v1101_v3 = vadd.f32 %v10336_v0, %v1062_v36  ;;  %v1025_v6 = vmul.f32 %v9499_v37, %v10146_v2 }
 0x156   : > { %v937_v11 = vmul.f32 0.03125, %v867_v8  ;;  %9510 = vrsqrt.f32 %v967_v51  ;;  %8979 = vmatmul.mubr.msk.f32.vlgmr.msra.gmra.mrb[0].mxu0 %vm635_vm0, %v1100_v26  ;;  %v1063_v4 = vmul.f32 %v10330_v14, %v1024_v62 }
 0x157   : > { %v9501_v12 = vpop.eup %9500  ;;  %v968_v40 = vadd.f32 1e-05, %v936_v52  ;;  %8981 = vmatprep.mubr.msk.f32.mxu0 %vm635_vm0, %v1101_v3  ;;  %v1064_v16 = vmul.f32 %v10330_v14, %v1025_v6 }
 0x158   : > { %v969_v18 = vadd.f32 1e-05, %v937_v11  ;;  %v9503_v56 = vpop.eup %9502  ;;  %v870_v22 = vpop.xlane.xlu1 %869  ;;  %v1102_v23 = vadd.f32 %v10336_v0, %v1063_v4  ;;  %v1026_v30 = vmul.f32 %v9501_v12, %v10149_v5 }
 0x159   : > { %v873_v27 = vpop.xlane.xlu0 %872  ;;  %9512 = vrsqrt.f32 %v968_v40  ;;  %v938_v60 = vmul.f32 0.03125, %v870_v22  ;;  %v1027_v44 = vmul.f32 %v9503_v56, %v10158_v55  ;;  %v1103_v2 = vadd.f32 %v10336_v0, %v1064_v16 }
 0x15a   : > { %v939_v61 = vmul.f32 0.03125, %v873_v27  ;;  %9514 = vrsqrt.f32 %v969_v18  ;;  %8982 = vmatmul.mubr.msk.f32.gmra.mrb[2].mxu0 %vm635_vm0, %v1102_v23  ;;  %v1065_v33 = vmul.f32 %v10330_v14, %v1026_v30 }
 0x15b   : > { %v9505_v31 = vpop.eup %9504  ;;  %v970_v34 = vadd.f32 1e-05, %v938_v60  ;;  %v1066_v39 = vmul.f32 %v10330_v14, %v1027_v44  ;;  %8984 = vmatprep.mubr.msk.f32.mxu0 %vm635_vm0, %v1103_v2 }
 0x15c   : > { %v971_v10 = vadd.f32 1e-05, %v939_v61  ;;  %v9507_v42 = vpop.eup %9506  ;;  %v876_v5 = vpop.xlane.xlu1 %875  ;;  %v1104_v46 = vadd.f32 %v10336_v0, %v1065_v33  ;;  %v1028_v55 = vmul.f32 %v9505_v31, %v10161_v9 }
 0x15d   : > { %v879_v20 = vpop.xlane.xlu0 %878  ;;  %9516 = vrsqrt.f32 %v970_v34  ;;  %v940_v48 = vmul.f32 0.03125, %v876_v5  ;;  %v1105_v51 = vadd.f32 %v10336_v0, %v1066_v39  ;;  %v1029_v37 = vmul.f32 %v9507_v42, %v10170_v7 }
 0x15e   : > { %v941_v50 = vmul.f32 0.03125, %v879_v20  ;;  %9518 = vrsqrt.f32 %v971_v10  ;;  %8985 = vmatmul.mubr.msk.f32.gmra.mrb[4].mxu0 %vm635_vm0, %v1104_v46  ;;  %v1067_v36 = vmul.f32 %v10330_v14, %v1028_v55 }
 0x15f   : > { %v9509_v54 = vpop.eup %9508  ;;  %v972_v8 = vadd.f32 1e-05, %v940_v48  ;;  %8987 = vmatprep.mubr.msk.f32.mxu0 %vm635_vm0, %v1105_v51  ;;  %v1068_v3 = vmul.f32 %v10330_v14, %v1029_v37 }
 0x160   : > { %v973_v26 = vadd.f32 1e-05, %v941_v50  ;;  %v9511_v62 = vpop.eup %9510  ;;  %v882_v52 = vpop.xlane.xlu1 %881  ;;  %v1106_v11 = vadd.f32 %v10336_v0, %v1067_v36  ;;  %v1030_v4 = vmul.f32 %v9509_v54, %v10173_v13 }
 0x161   : > { %v885_v9 = vpop.xlane.xlu0 %884  ;;  %9520 = vrsqrt.f32 %v972_v8  ;;  %v942_v6 = vmul.f32 0.03125, %v882_v52  ;;  %v1031_v40 = vmul.f32 %v9511_v62, %v10182_v1  ;;  %v1107_v7 = vadd.f32 %v10336_v0, %v1068_v3 }
 0x162   : > { %v943_v12 = vmul.f32 0.03125, %v885_v9  ;;  %9522 = vrsqrt.f32 %v973_v26  ;;  %8988 = vmatmul.mubr.msk.f32.gmra.mrb[6].mxu0 %vm635_vm0, %v1106_v11  ;;  %v1069_v18 = vmul.f32 %v10330_v14, %v1030_v4 }
 0x163   : > { %v9513_v56 = vpop.eup %9512  ;;  %v974_v22 = vadd.f32 1e-05, %v942_v6  ;;  %v1070_v23 = vmul.f32 %v10330_v14, %v1031_v40  ;;  %8990 = vmatprep.mubr.msk.f32.mxu0 %vm635_vm0, %v1107_v7 }
 0x164   : > { %v975_v27 = vadd.f32 1e-05, %v943_v12  ;;  %v9515_v16 = vpop.eup %9514  ;;  %v888_v13 = vpop.xlane.xlu1 %887  ;;  %v1108_v60 = vadd.f32 %v10336_v0, %v1069_v18  ;;  %v1032_v1 = vmul.f32 %v9513_v56, %v10185_v17 }
 0x165   : > { %v891_v30 = vpop.xlane.xlu0 %890  ;;  %9524 = vrsqrt.f32 %v974_v22  ;;  %v944_v61 = vmul.f32 0.03125, %v888_v13  ;;  %v1109_v2 = vadd.f32 %v10336_v0, %v1070_v23  ;;  %v1033_v31 = vmul.f32 %v9515_v16, %v10194_v43 }
 0x166   : > { %v945_v44 = vmul.f32 0.03125, %v891_v30  ;;  %9526 = vrsqrt.f32 %v975_v27  ;;  %8991 = vmatmul.mubr.msk.f32.gmra.mrb[8].mxu0 %vm635_vm0, %v1108_v60  ;;  %v1071_v33 = vmul.f32 %v10330_v14, %v1032_v1 }
 0x167   : > { %v9517_v34 = vpop.eup %9516  ;;  %v976_v10 = vadd.f32 1e-05, %v944_v61  ;;  %8993 = vmatprep.mubr.msk.f32.mxu0 %vm635_vm0, %v1109_v2  ;;  %v1072_v46 = vmul.f32 %v10330_v14, %v1033_v31 }
 0x168   : > { %v977_v39 = vadd.f32 1e-05, %v945_v44  ;;  %v9519_v42 = vpop.eup %9518  ;;  %v894_v5 = vpop.xlane.xlu1 %893  ;;  %v1110_v20 = vadd.f32 %v10336_v0, %v1071_v33  ;;  %v1034_v55 = vmul.f32 %v9517_v34, %v10197_v21 }
 0x169   : > { %v897_v17 = vpop.xlane.xlu0 %896  ;;  %9528 = vrsqrt.f32 %v976_v10  ;;  %v946_v48 = vmul.f32 0.03125, %v894_v5  ;;  %v1035_v51 = vmul.f32 %v9519_v42, %v10206_v59  ;;  %v1111_v43 = vadd.f32 %v10336_v0, %v1072_v46 }
 0x16a   : > { %v947_v50 = vmul.f32 0.03125, %v897_v17  ;;  %9530 = vrsqrt.f32 %v977_v39  ;;  %8994 = vmatmul.mubr.msk.f32.gmra.mrb[10].mxu0 %vm635_vm0, %v1110_v20  ;;  %v1073_v36 = vmul.f32 %v10330_v14, %v1034_v55 }
 0x16b   : > { %v9521_v37 = vpop.eup %9520  ;;  %v978_v54 = vadd.f32 1e-05, %v946_v48  ;;  %v1074_v26 = vmul.f32 %v10330_v14, %v1035_v51  ;;  %8996 = vmatprep.mubr.msk.f32.mxu0 %vm635_vm0, %v1111_v43 }
 0x16c   : > { %v979_v8 = vadd.f32 1e-05, %v947_v50  ;;  %v9523_v62 = vpop.eup %9522  ;;  %v900_v21 = vpop.xlane.xlu1 %899  ;;  %v1112_v9 = vadd.f32 %v10336_v0, %v1073_v36  ;;  %v1036_v59 = vmul.f32 %v9521_v37, %v10209_v25 }
 0x16d   : > { %v903_v52 = vpop.xlane.xlu0 %902  ;;  %9532 = vrsqrt.f32 %v978_v54  ;;  %v948_v11 = vmul.f32 0.03125, %v900_v21  ;;  %v1113_v4 = vadd.f32 %v10336_v0, %v1074_v26  ;;  %v1037_v12 = vmul.f32 %v9523_v62, %v10218_v15 }
 0x16e   : > { %v949_v3 = vmul.f32 0.03125, %v903_v52  ;;  %9534 = vrsqrt.f32 %v979_v8  ;;  %8997 = vmatmul.mubr.msk.f32.gmra.mrb[12].mxu0 %vm635_vm0, %v1112_v9  ;;  %v1075_v6 = vmul.f32 %v10330_v14, %v1036_v59 }
 0x16f   : > { %v9525_v40 = vpop.eup %9524  ;;  %v980_v7 = vadd.f32 1e-05, %v948_v11  ;;  %8999 = vmatprep.mubr.msk.f32.mxu0 %vm635_vm0, %v1113_v4  ;;  %v1076_v23 = vmul.f32 %v10330_v14, %v1037_v12 }
 0x170   : > { %v981_v18 = vadd.f32 1e-05, %v949_v3  ;;  %v9527_v56 = vpop.eup %9526  ;;  %v906_v22 = vpop.xlane.xlu1 %905  ;;  %v1114_v27 = vadd.f32 %v10336_v0, %v1075_v6  ;;  %v1038_v16 = vmul.f32 %v9525_v40, %v10221_v29 }
 0x171   : > { %v909_v25 = vpop.xlane.xlu0 %908  ;;  %9536 = vrsqrt.f32 %v980_v7  ;;  %v950_v13 = vmul.f32 0.03125, %v906_v22  ;;  %v1039_v60 = vmul.f32 %v9527_v56, %v10236_v35  ;;  %v1115_v15 = vadd.f32 %v10336_v0, %v1076_v23 }
 0x172   : > { %v951_v30 = vmul.f32 0.03125, %v909_v25  ;;  %9538 = vrsqrt.f32 %v981_v18  ;;  %9000 = vmatmul.mubr.msk.f32.gmra.mrb[14].mxu0 %vm635_vm0, %v1114_v27  ;;  %v1077_v1 = vmul.f32 %v10330_v14, %v1038_v16 }
 0x173   : > { %v9529_v61 = vpop.eup %9528  ;;  %v982_v44 = vadd.f32 1e-05, %v950_v13  ;;  %v1078_v33 = vmul.f32 %v10330_v14, %v1039_v60  ;;  %9002 = vmatprep.mubr.msk.f32.mxu0 %vm635_vm0, %v1115_v15 }
 0x174   : > { %v983_v2 = vadd.f32 1e-05, %v951_v30  ;;  %v9531_v31 = vpop.eup %9530  ;;  %v912_v29 = vpop.xlane.xlu1 %911  ;;  %v1116_v10 = vadd.f32 %v10336_v0, %v1077_v1  ;;  %v1040_v35 = vmul.f32 %v9529_v61, %v10239_v38 }
 0x175   : > { %v915_v34 = vpop.xlane.xlu0 %914  ;;  %9540 = vrsqrt.f32 %v982_v44  ;;  %v952_v39 = vmul.f32 0.03125, %v912_v29  ;;  %v1117_v5 = vadd.f32 %v10336_v0, %v1078_v33  ;;  %v1041_v20 = vmul.f32 %v9531_v31, %v10254_v58 }
 0x176   : > { %v953_v42 = vmul.f32 0.03125, %v915_v34  ;;  %9542 = vrsqrt.f32 %v983_v2  ;;  %9003 = vmatmul.mubr.msk.f32.gmra.mrb[16].mxu0 %vm635_vm0, %v1116_v10  ;;  %v1079_v17 = vmul.f32 %v10330_v14, %v1040_v35 }
 0x177   : > { %v9533_v46 = vpop.eup %9532  ;;  %v984_v55 = vadd.f32 1e-05, %v952_v39  ;;  %9005 = vmatprep.mubr.msk.f32.mxu0 %vm635_vm0, %v1117_v5  ;;  %v1080_v36 = vmul.f32 %v10330_v14, %v1041_v20  ;;  %v9841_v5 = vmov 0.0  }
 0x178   : > { %v985_v48 = vadd.f32 1e-05, %v953_v42  ;;  %v9535_v50 = vpop.eup %9534  ;;  %v918_v51 = vpop.xlane.xlu1 %917  ;;  %v1118_v43 = vadd.f32 %v10336_v0, %v1079_v17  ;;  %v1042_v37 = vmul.f32 %v9533_v46, %v10257_v24  ;;  %1470 = vst.msk [vmem:[#allocation2 + $0x30] sm:$0xff] %vm1463_vm1, %v9841_v5  ;;  %1471 = vst.msk [vmem:[#allocation2 + $0x38] sm:$0xff] %vm1463_vm1, %v9841_v5 }
 0x179   : > { %v921_v38 = vpop.xlane.xlu0 %920  ;;  %9544 = vrsqrt.f32 %v984_v55  ;;  %v954_v54 = vmul.f32 0.03125, %v918_v51  ;;  %v1043_v26 = vmul.f32 %v9535_v50, %v10266_v41  ;;  %v1119_v58 = vadd.f32 %v10336_v0, %v1080_v36  ;;  %1464 = vst.msk [vmem:[#allocation2] sm:$0xff] %vm1463_vm1, %v9841_v5  ;;  %1465 = vst.msk [vmem:[#allocation2 + $0x8] sm:$0xff] %vm1463_vm1, %v9841_v5  ;;  %v10728_v51 = vld [vmem:[%s15246_s5 + $0x1] ss:$0 sm:$0xff] }
 0x17a   : > { %v955_v8 = vmul.f32 0.03125, %v921_v38  ;;  %9546 = vrsqrt.f32 %v985_v48  ;;  %9006 = vmatmul.mubr.msk.f32.gmra.mrb[18].mxu0 %vm635_vm0, %v1118_v43  ;;  %v1081_v62 = vmul.f32 %v10330_v14, %v1042_v37  ;;  %1466 = vst.msk [vmem:[#allocation2 + $0x10] sm:$0xff] %vm1463_vm1, %v9841_v5  ;;  %1467 = vst.msk [vmem:[#allocation2 + $0x18] sm:$0xff] %vm1463_vm1, %v9841_v5 }
 0x17b   : > { %v9537_v21 = vpop.eup %9536  ;;  %v986_v52 = vadd.f32 1e-05, %v954_v54  ;;  %v1082_v59 = vmul.f32 %v10330_v14, %v1043_v26  ;;  %9008 = vmatprep.mubr.msk.f32.mxu0 %vm635_vm0, %v1119_v58  ;;  %1468 = vst.msk [vmem:[#allocation2 + $0x20] sm:$0xff] %vm1463_vm1, %v9841_v5  ;;  %1469 = vst.msk [vmem:[#allocation2 + $0x28] sm:$0xff] %vm1463_vm1, %v9841_v5 }
 0x17c   : > { %v987_v9 = vadd.f32 1e-05, %v955_v8  ;;  %v9539_v11 = vpop.eup %9538  ;;  %v924_v24 = vpop.xlane.xlu1 %923  ;;  %v1120_v3 = vadd.f32 %v10336_v0, %v1081_v62  ;;  %v1044_v41 = vmul.f32 %v9537_v21, %v10269_v28  ;;  %1472 = vst.msk [vmem:[#allocation2 + $0x40] sm:$0xff] %vm1463_vm1, %v9841_v5  ;;  %1473 = vst.msk [vmem:[#allocation2 + $0x48] sm:$0xff] %vm1463_vm1, %v9841_v5  ;;  %v10737_v62 = vld [vmem:[%s15246_s5 + $0x2] ss:$0 sm:$0xff] }
 0x17d   : > { %9548 = vrsqrt.f32 %v986_v52  ;;  %v956_v4 = vmul.f32 0.03125, %v924_v24  ;;  %v1121_v6 = vadd.f32 %v10336_v0, %v1082_v59  ;;  %v1045_v12 = vmul.f32 %v9539_v11, %v10278_v32  ;;  %1474 = vst.msk [vmem:[#allocation2 + $0x50] sm:$0xff] %vm1463_vm1, %v9841_v5  ;;  %1475 = vst.msk [vmem:[#allocation2 + $0x58] sm:$0xff] %vm1463_vm1, %v9841_v5 }
 0x17e   : > { %9550 = vrsqrt.f32 %v987_v9  ;;  %9009 = vmatmul.mubr.msk.f32.gmra.mrb[20].mxu0 %vm635_vm0, %v1120_v3  ;;  %v1083_v40 = vmul.f32 %v10330_v14, %v1044_v41  ;;  %1476 = vst.msk [vmem:[#allocation2 + $0x60] sm:$0xff] %vm1463_vm1, %v9841_v5  ;;  %1477 = vst.msk [vmem:[#allocation2 + $0x68] sm:$0xff] %vm1463_vm1, %v9841_v5 }
 0x17f   : > { %v9541_v7 = vpop.eup %9540  ;;  %v988_v18 = vadd.f32 1e-05, %v956_v4  ;;  %9011 = vmatprep.mubr.msk.f32.mxu0 %vm635_vm0, %v1121_v6  ;;  %v1084_v56 = vmul.f32 %v10330_v14, %v1045_v12  ;;  %1478 = vst.msk [vmem:[#allocation2 + $0x70] sm:$0xff] %vm1463_vm1, %v9841_v5  ;;  %1479 = vst.msk [vmem:[#allocation2 + $0x78] sm:$0xff] %vm1463_vm1, %v9841_v5  ;;  %v10746_v4 = vld [vmem:[%s15245_s4] ss:$0 sm:$0xff] }
 0x180   : > { %v9543_v22 = vpop.eup %9542  ;;  %v1122_v28 = vadd.f32 %v10336_v0, %v1083_v40  ;;  %v1046_v25 = vmul.f32 %v9541_v7, %v10281_v45  ;;  %1480 = vst.msk [vmem:[#allocation2 + $0x80] sm:$0xff] %vm1463_vm1, %v9841_v5  ;;  %1481 = vst.msk [vmem:[#allocation2 + $0x88] sm:$0xff] %vm1463_vm1, %v9841_v5  ;;  %v1799_v38 = vld [vmem:[#allocation2 + $0x8] sm:$0xff] }
 0x181   : > { %9552 = vrsqrt.f32 %v988_v18  ;;  %v1123_v27 = vadd.f32 %v10336_v0, %v1084_v56  ;;  %v1047_v32 = vmul.f32 %v9543_v22, %v10290_v47  ;;  %1482 = vst.msk [vmem:[#allocation2 + $0x90] sm:$0xff] %vm1463_vm1, %v9841_v5  ;;  %1483 = vst.msk [vmem:[#allocation2 + $0x98] sm:$0xff] %vm1463_vm1, %v9841_v5  ;;  %v1800_v43 = vld [vmem:[#allocation2 + $0x10] sm:$0xff]  ;;  %v1835_v36 = vmul.f32 %v10728_v51, %v1799_v38 }
 0x182   : > { %9012 = vmatmul.mubr.msk.f32.gmra.mrb[22].mxu0 %vm635_vm0, %v1122_v28  ;;  %v1085_v23 = vmul.f32 %v10330_v14, %v1046_v25  ;;  %1484 = vst.msk [vmem:[#allocation2 + $0xa0] sm:$0xff] %vm1463_vm1, %v9841_v5  ;;  %1485 = vst.msk [vmem:[#allocation2 + $0xa8] sm:$0xff] %vm1463_vm1, %v9841_v5  ;;  %v1836_v37 = vmul.f32 %v10728_v51, %v1800_v43  ;;  %v1964_v21 = vld [vmem:[#allocation2 + $0x9] sm:$0xff]  ;;  %v1965_v52 = vld [vmem:[#allocation2 + $0x11] sm:$0xff] }
 0x183   : > { %v9545_v16 = vpop.eup %9544  ;;  %9014 = vmatprep.mubr.msk.f32.mxu0 %vm635_vm0, %v1123_v27  ;;  %v1086_v13 = vmul.f32 %v10330_v14, %v1047_v32  ;;  %1486 = vst.msk [vmem:[#allocation2 + $0xb0] sm:$0xff] %vm1463_vm1, %v9841_v5  ;;  %1487 = vst.msk [vmem:[#allocation2 + $0xb8] sm:$0xff] %vm1463_vm1, %v9841_v5  ;;  %v2000_v9 = vmul.f32 %v10737_v62, %v1964_v21  ;;  %v2001_v59 = vmul.f32 %v10737_v62, %v1965_v52  ;;  %v10759_v27 = vld [vmem:[%s15246_s5 + $0x3] ss:$0 sm:$0xff] }
 0x184   : > { %v9547_v30 = vpop.eup %9546  ;;  %v1124_v60 = vadd.f32 %v10336_v0, %v1085_v23  ;;  %v1048_v15 = vmul.f32 %v9545_v16, %v10293_v49  ;;  %1488 = vst.msk [vmem:[#allocation2 + $0xc0] sm:$0xff] %vm1463_vm1, %v9841_v5  ;;  %1489 = vst.msk [vmem:[#allocation2 + $0xc8] sm:$0xff] %vm1463_vm1, %v9841_v5 }
 0x185   : > { %v1125_v45 = vadd.f32 %v10336_v0, %v1086_v13  ;;  %v1049_v1 = vmul.f32 %v9547_v30, %v10302_v63  ;;  %1490 = vst.msk [vmem:[#allocation2 + $0xd0] sm:$0xff] %vm1463_vm1, %v9841_v5  ;;  %1491 = vst.msk [vmem:[#allocation2 + $0xd8] sm:$0xff] %vm1463_vm1, %v9841_v5 }
 0x186   : > { %9015 = vmatmul.mubr.msk.f32.gmra.mrb[24].mxu0 %vm635_vm0, %v1124_v60  ;;  %v1087_v47 = vmul.f32 %v10330_v14, %v1048_v15  ;;  %1492 = vst.msk [vmem:[#allocation2 + $0xe0] sm:$0xff] %vm1463_vm1, %v9841_v5  ;;  %1493 = vst.msk [vmem:[#allocation2 + $0xe8] sm:$0xff] %vm1463_vm1, %v9841_v5 }
 0x187   : > { %v9549_v61 = vpop.eup %9548  ;;  %9017 = vmatprep.mubr.msk.f32.mxu0 %vm635_vm0, %v1125_v45  ;;  %v1088_v44 = vmul.f32 %v10330_v14, %v1049_v1  ;;  %1494 = vst.msk [vmem:[#allocation2 + $0xf0] sm:$0xff] %vm1463_vm1, %v9841_v5  ;;  %1495 = vst.msk [vmem:[#allocation2 + $0xf8] sm:$0xff] %vm1463_vm1, %v9841_v5 }
 0x188   : > { %v9551_v2 = vpop.eup %9550  ;;  %v1126_v33 = vadd.f32 %v10336_v0, %v1087_v47  ;;  %v1050_v31 = vmul.f32 %v9549_v61, %v10305_v53  ;;  %1496 = vst.msk [vmem:[#allocation2 + $0x100] sm:$0xff] %vm1463_vm1, %v9841_v5  ;;  %1497 = vst.msk [vmem:[#allocation2 + $0x108] sm:$0xff] %vm1463_vm1, %v9841_v5 }
 0x189   : > { %v1127_v49 = vadd.f32 %v10336_v0, %v1088_v44  ;;  %v1051_v29 = vmul.f32 %v9551_v2, %v10314_v19  ;;  %1498 = vst.msk [vmem:[#allocation2 + $0x110] sm:$0xff] %vm1463_vm1, %v9841_v5  ;;  %1499 = vst.msk [vmem:[#allocation2 + $0x118] sm:$0xff] %vm1463_vm1, %v9841_v5 }
 0x18a   : > { %9018 = vmatmul.mubr.msk.f32.gmra.mrb[26].mxu0 %vm635_vm0, %v1126_v33  ;;  %v1089_v63 = vmul.f32 %v10330_v14, %v1050_v31  ;;  %1500 = vst.msk [vmem:[#allocation2 + $0x120] sm:$0xff] %vm1463_vm1, %v9841_v5  ;;  %1501 = vst.msk [vmem:[#allocation2 + $0x128] sm:$0xff] %vm1463_vm1, %v9841_v5 }
 0x18b   : > { %v9553_v34 = vpop.eup %9552  ;;  %9020 = vmatprep.mubr.msk.f32.mxu0 %vm635_vm0, %v1127_v49  ;;  %v1090_v10 = vmul.f32 %v10330_v14, %v1051_v29  ;;  %1502 = vst.msk [vmem:[#allocation2 + $0x130] sm:$0xff] %vm1463_vm1, %v9841_v5  ;;  %1503 = vst.msk [vmem:[#allocation2 + $0x138] sm:$0xff] %vm1463_vm1, %v9841_v5 }
 0x18c   : > { %v1128_v35 = vadd.f32 %v10336_v0, %v1089_v63  ;;  %v1052_v39 = vmul.f32 %v9553_v34, %v10317_v57  ;;  %1504 = vst.msk [vmem:[#allocation2 + $0x140] sm:$0xff] %vm1463_vm1, %v9841_v5  ;;  %1505 = vst.msk [vmem:[#allocation2 + $0x148] sm:$0xff] %vm1463_vm1, %v9841_v5  ;;  %v10719_v57 = vld [vmem:[%s15246_s5] ss:$0 sm:$0xff] }
 0x18d   : > { %v1129_v42 = vadd.f32 %v10336_v0, %v1090_v10  ;;  %1506 = vst.msk [vmem:[#allocation2 + $0x150] sm:$0xff] %vm1463_vm1, %v9841_v5  ;;  %1507 = vst.msk [vmem:[#allocation2 + $0x158] sm:$0xff] %vm1463_vm1, %v9841_v5 }
 0x18e   : > { %9021 = vmatmul.mubr.msk.f32.gmra.mrb[28].mxu0 %vm635_vm0, %v1128_v35  ;;  %v1091_v53 = vmul.f32 %v10330_v14, %v1052_v39  ;;  %1508 = vst.msk [vmem:[#allocation2 + $0x160] sm:$0xff] %vm1463_vm1, %v9841_v5  ;;  %1509 = vst.msk [vmem:[#allocation2 + $0x168] sm:$0xff] %vm1463_vm1, %v9841_v5  ;;  %v1634_v14 = vld [vmem:[#allocation2 + $0x7] sm:$0xff] }
 0x18f   : > { %9023 = vmatprep.mubr.msk.f32.mxu0 %vm635_vm0, %v1129_v42  ;;  %1510 = vst.msk [vmem:[#allocation2 + $0x170] sm:$0xff] %vm1463_vm1, %v9841_v5  ;;  %1511 = vst.msk [vmem:[#allocation2 + $0x178] sm:$0xff] %vm1463_vm1, %v9841_v5  ;;  %v1670_v17 = vmul.f32 %v10719_v57, %v1634_v14 }
 0x190   : > { %v10464_v19 = vadd.f32 %v10336_v0, %v1091_v53  ;;  %1512 = vst.msk [vmem:[#allocation2 + $0x180] sm:$0xff] %vm1463_vm1, %v9841_v5  ;;  %1513 = vst.msk [vmem:[#allocation2 + $0x188] sm:$0xff] %vm1463_vm1, %v9841_v5  ;;  %v1635_v0 = vld [vmem:[#allocation2 + $0xf] sm:$0xff] }
 0x191   : > { %1514 = vst.msk [vmem:[#allocation2 + $0x190] sm:$0xff] %vm1463_vm1, %v9841_v5  ;;  %1515 = vst.msk [vmem:[#allocation2 + $0x198] sm:$0xff] %vm1463_vm1, %v9841_v5  ;;  %v1671_v20 = vmul.f32 %v10719_v57, %v1635_v0 }
 0x192   : > { %1516 = vst.msk [vmem:[#allocation2 + $0x1a0] sm:$0xff] %vm1463_vm1, %v9841_v5  ;;  %1517 = vst.msk [vmem:[#allocation2 + $0x1a8] sm:$0xff] %vm1463_vm1, %v9841_v5  ;;  %9024 = vmatmul.mubr.msk.f32.gmra.mrb[30].mxu0 %vm635_vm0, %v10464_v19 }
 0x193   : > { %1518 = vst.msk [vmem:[#allocation2 + $0x1b0] sm:$0xff] %vm1463_vm1, %v9841_v5  ;;  %1519 = vst.msk [vmem:[#allocation2 + $0x1b8] sm:$0xff] %vm1463_vm1, %v9841_v5 }
 0x194   : > { %1520 = vst.msk [vmem:[#allocation2 + $0x1c0] sm:$0xff] %vm1463_vm1, %v9841_v5  ;;  %1521 = vst.msk [vmem:[#allocation2 + $0x1c8] sm:$0xff] %vm1463_vm1, %v9841_v5 }
 0x195   : > { %1522 = vst.msk [vmem:[#allocation2 + $0x1d0] sm:$0xff] %vm1463_vm1, %v9841_v5  ;;  %1523 = vst.msk [vmem:[#allocation2 + $0x1d8] sm:$0xff] %vm1463_vm1, %v9841_v5 }
 0x196   : > { %1524 = vst.msk [vmem:[#allocation2 + $0x1e0] sm:$0xff] %vm1463_vm1, %v9841_v5  ;;  %1525 = vst.msk [vmem:[#allocation2 + $0x1e8] sm:$0xff] %vm1463_vm1, %v9841_v5 }
 0x197   : > { %1526 = vst.msk [vmem:[#allocation2 + $0x1f0] sm:$0xff] %vm1463_vm1, %v9841_v5  ;;  %1527 = vst.msk [vmem:[#allocation2 + $0x1f8] sm:$0xff] %vm1463_vm1, %v9841_v5 }
 0x198   : > { %1528 = vst.msk [vmem:[#allocation2 + $0x200] sm:$0xff] %vm1463_vm1, %v9841_v5  ;;  %1529 = vst.msk [vmem:[#allocation2 + $0x208] sm:$0xff] %vm1463_vm1, %v9841_v5 }
 0x199   : > { %1530 = vst.msk [vmem:[#allocation2 + $0x210] sm:$0xff] %vm1463_vm1, %v9841_v5  ;;  %1531 = vst.msk [vmem:[#allocation2 + $0x218] sm:$0xff] %vm1463_vm1, %v9841_v5 }
 0x19a   : > { %1532 = vst.msk [vmem:[#allocation2 + $0x220] sm:$0xff] %vm1463_vm1, %v9841_v5  ;;  %1533 = vst.msk [vmem:[#allocation2 + $0x228] sm:$0xff] %vm1463_vm1, %v9841_v5 }
 0x19b   : > { %1534 = vst.msk [vmem:[#allocation2 + $0x230] sm:$0xff] %vm1463_vm1, %v9841_v5  ;;  %1535 = vst.msk [vmem:[#allocation2 + $0x238] sm:$0xff] %vm1463_vm1, %v9841_v5 }
 0x19c   : > { %1569 = vst.msk [vmem:[#allocation3] sm:$0xff] %vm1463_vm1, %v9841_v5  ;;  %1570 = vst.msk [vmem:[#allocation3 + $0x8] sm:$0xff] %vm1463_vm1, %v9841_v5 }
 0x19d   : > { %1571 = vst.msk [vmem:[#allocation3 + $0x10] sm:$0xff] %vm1463_vm1, %v9841_v5  ;;  %1572 = vst.msk [vmem:[#allocation3 + $0x18] sm:$0xff] %vm1463_vm1, %v9841_v5 }
 0x19e   : > { %1573 = vst.msk [vmem:[#allocation3 + $0x20] sm:$0xff] %vm1463_vm1, %v9841_v5  ;;  %1574 = vst.msk [vmem:[#allocation3 + $0x28] sm:$0xff] %vm1463_vm1, %v9841_v5 }
 0x19f   : > { %1575 = vst.msk [vmem:[#allocation3 + $0x30] sm:$0xff] %vm1463_vm1, %v9841_v5  ;;  %1576 = vst.msk [vmem:[#allocation3 + $0x38] sm:$0xff] %vm1463_vm1, %v9841_v5 }
 0x1a0   : > { %1577 = vst.msk [vmem:[#allocation3 + $0x40] sm:$0xff] %vm1463_vm1, %v9841_v5  ;;  %1578 = vst.msk [vmem:[#allocation3 + $0x48] sm:$0xff] %vm1463_vm1, %v9841_v5 }
 0x1a1   : > { %1579 = vst.msk [vmem:[#allocation3 + $0x50] sm:$0xff] %vm1463_vm1, %v9841_v5  ;;  %1580 = vst.msk [vmem:[#allocation3 + $0x58] sm:$0xff] %vm1463_vm1, %v9841_v5 }
 0x1a2   : > { %1581 = vst.msk [vmem:[#allocation3 + $0x60] sm:$0xff] %vm1463_vm1, %v9841_v5  ;;  %1582 = vst.msk [vmem:[#allocation3 + $0x68] sm:$0xff] %vm1463_vm1, %v9841_v5 }
 0x1a3   : > { %1583 = vst.msk [vmem:[#allocation3 + $0x70] sm:$0xff] %vm1463_vm1, %v9841_v5  ;;  %1584 = vst.msk [vmem:[#allocation3 + $0x78] sm:$0xff] %vm1463_vm1, %v9841_v5  ;;  %v1602_v46 = vld [vmem:[#allocation3] sm:$0xff]  ;;  %v1603_v55 = vld [vmem:[#allocation3 + $0x8] sm:$0xff] }
 0x1a4   : > { %1585 = vst.msk [vmem:[#allocation3 + $0x80] sm:$0xff] %vm1463_vm1, %v9841_v5  ;;  %1586 = vst.msk [vmem:[#allocation3 + $0x88] sm:$0xff] %vm1463_vm1, %v9841_v5  ;;  %v1702_v48 = vadd.f32 %v1670_v17, %v1602_v46  ;;  %v1703_v50 = vadd.f32 %v1671_v20, %v1603_v55  ;;  %v1604_v16 = vld [vmem:[#allocation3 + $0x10] sm:$0xff]  ;;  %v1605_v13 = vld [vmem:[#allocation3 + $0x18] sm:$0xff] }
 0x1a5   : > { %1587 = vst.msk [vmem:[#allocation3 + $0x90] sm:$0xff] %vm1463_vm1, %v9841_v5  ;;  %1588 = vst.msk [vmem:[#allocation3 + $0x98] sm:$0xff] %vm1463_vm1, %v9841_v5  ;;  %v1606_v35 = vld [vmem:[#allocation3 + $0x20] sm:$0xff]  ;;  %v1607_v53 = vld [vmem:[#allocation3 + $0x28] sm:$0xff] }
 0x1a6   : > { %1589 = vst.msk [vmem:[#allocation3 + $0xa0] sm:$0xff] %vm1463_vm1, %v9841_v5  ;;  %1590 = vst.msk [vmem:[#allocation3 + $0xa8] sm:$0xff] %vm1463_vm1, %v9841_v5  ;;  %v10786_v20 = vld [vmem:[%s15246_s5 + $0x4] ss:$0 sm:$0xff]  ;;  %v1608_v43 = vld [vmem:[#allocation3 + $0x30] sm:$0xff] }
 0x1a7   : > { %1591 = vst.msk [vmem:[#allocation3 + $0xb0] sm:$0xff] %vm1463_vm1, %v9841_v5  ;;  %1592 = vst.msk [vmem:[#allocation3 + $0xb8] sm:$0xff] %vm1463_vm1, %v9841_v5 }
 0x1a8   : > { %1593 = vst.msk [vmem:[#allocation3 + $0xc0] sm:$0xff] %vm1463_vm1, %v9841_v5  ;;  %1594 = vst.msk [vmem:[#allocation3 + $0xc8] sm:$0xff] %vm1463_vm1, %v9841_v5 }
 0x1a9   : > { %1595 = vst.msk [vmem:[#allocation3 + $0xd0] sm:$0xff] %vm1463_vm1, %v9841_v5  ;;  %1596 = vst.msk [vmem:[#allocation3 + $0xd8] sm:$0xff] %vm1463_vm1, %v9841_v5 }
 0x1aa   : > { %1597 = vst.msk [vmem:[#allocation3 + $0xe0] sm:$0xff] %vm1463_vm1, %v9841_v5  ;;  %1598 = vst.msk [vmem:[#allocation3 + $0xe8] sm:$0xff] %vm1463_vm1, %v9841_v5 }
 0x1ab   : > { %1599 = vst.msk [vmem:[#allocation3 + $0xf0] sm:$0xff] %vm1463_vm1, %v9841_v5  ;;  %1600 = vst.msk [vmem:[#allocation3 + $0xf8] sm:$0xff] %vm1463_vm1, %v9841_v5 }
 0x1ac   : > { %5362 = vst [vmem:[#allocation4] sm:$0xff] %v9841_v5  ;;  %5363 = vst [vmem:[#allocation4 + $0x8] sm:$0xff] %v9841_v5 }
 0x1ad   : > { %5364 = vst [vmem:[#allocation4 + $0x10] sm:$0xff] %v9841_v5  ;;  %5365 = vst [vmem:[#allocation4 + $0x18] sm:$0xff] %v9841_v5 }
 0x1ae   : > { %5366 = vst [vmem:[#allocation4 + $0x20] sm:$0xff] %v9841_v5  ;;  %5369 = vst [vmem:[#allocation4 + $0x38] sm:$0xff] %v9841_v5 }
 0x1af   : > { %5370 = vst [vmem:[#allocation4 + $0x40] sm:$0xff] %v9841_v5  ;;  %5373 = vst [vmem:[#allocation4 + $0x58] sm:$0xff] %v9841_v5 }
 0x1b0   : > { %5374 = vst [vmem:[#allocation4 + $0x60] sm:$0xff] %v9841_v5  ;;  %5377 = vst [vmem:[#allocation4 + $0x78] sm:$0xff] %v9841_v5 }
 0x1b1   : > { %5378 = vst [vmem:[#allocation4 + $0x80] sm:$0xff] %v9841_v5  ;;  %5381 = vst [vmem:[#allocation4 + $0x98] sm:$0xff] %v9841_v5 }
 0x1b2   : > { %5382 = vst [vmem:[#allocation4 + $0xa0] sm:$0xff] %v9841_v5  ;;  %5385 = vst [vmem:[#allocation4 + $0xb8] sm:$0xff] %v9841_v5 }
 0x1b3   : > { %5386 = vst [vmem:[#allocation4 + $0xc0] sm:$0xff] %v9841_v5  ;;  %5389 = vst [vmem:[#allocation4 + $0xd8] sm:$0xff] %v9841_v5 }
 0x1b4   : > { %5390 = vst [vmem:[#allocation4 + $0xe0] sm:$0xff] %v9841_v5  ;;  %5393 = vst [vmem:[#allocation4 + $0xf8] sm:$0xff] %v9841_v5 }
 0x1b5   : > { %5394 = vst [vmem:[#allocation4 + $0x100] sm:$0xff] %v9841_v5  ;;  %5397 = vst [vmem:[#allocation4 + $0x118] sm:$0xff] %v9841_v5 }
 0x1b6   : > { %5398 = vst [vmem:[#allocation4 + $0x120] sm:$0xff] %v9841_v5  ;;  %5401 = vst [vmem:[#allocation4 + $0x138] sm:$0xff] %v9841_v5 }
 0x1b7   : > { %5402 = vst [vmem:[#allocation4 + $0x140] sm:$0xff] %v9841_v5  ;;  %5405 = vst [vmem:[#allocation4 + $0x158] sm:$0xff] %v9841_v5 }
 0x1b8   : > { %5406 = vst [vmem:[#allocation4 + $0x160] sm:$0xff] %v9841_v5  ;;  %5409 = vst [vmem:[#allocation4 + $0x178] sm:$0xff] %v9841_v5 }
 0x1b9   : > { %5410 = vst [vmem:[#allocation4 + $0x180] sm:$0xff] %v9841_v5  ;;  %5413 = vst [vmem:[#allocation4 + $0x198] sm:$0xff] %v9841_v5 }
 0x1ba   : > { %5414 = vst [vmem:[#allocation4 + $0x1a0] sm:$0xff] %v9841_v5  ;;  %5417 = vst [vmem:[#allocation4 + $0x1b8] sm:$0xff] %v9841_v5 }
 0x1bb   : > { %5418 = vst [vmem:[#allocation4 + $0x1c0] sm:$0xff] %v9841_v5  ;;  %5421 = vst [vmem:[#allocation4 + $0x1d8] sm:$0xff] %v9841_v5 }
 0x1bc   : > { %5422 = vst [vmem:[#allocation4 + $0x1e0] sm:$0xff] %v9841_v5  ;;  %5425 = vst [vmem:[#allocation4 + $0x1f8] sm:$0xff] %v9841_v5 }
 0x1bd   : > { %5426 = vst [vmem:[#allocation4 + $0x200] sm:$0xff] %v9841_v5  ;;  %5429 = vst [vmem:[#allocation4 + $0x218] sm:$0xff] %v9841_v5 }
 0x1be   : > { %5430 = vst [vmem:[#allocation4 + $0x220] sm:$0xff] %v9841_v5  ;;  %5431 = vst [vmem:[#allocation4 + $0x228] sm:$0xff] %v9841_v5 }
 0x1bf   : > { %5432 = vst [vmem:[#allocation4 + $0x230] sm:$0xff] %v9841_v5  ;;  %5433 = vst [vmem:[#allocation4 + $0x238] sm:$0xff] %v9841_v5 }
 0x1c0   : > { %1734 = vst.msk [vmem:[#allocation3] sm:$0xff] %vm1463_vm1, %v1702_v48  ;;  %1735 = vst.msk [vmem:[#allocation3 + $0x8] sm:$0xff] %vm1463_vm1, %v1703_v50 }
 0x1c7   : > { %v1767_v54 = vld [vmem:[#allocation3] sm:$0xff]  ;;  %v1768_v8 = vld [vmem:[#allocation3 + $0x8] sm:$0xff] }
 0x1c8   : > { %v1867_v26 = vadd.f32 %v1835_v36, %v1767_v54  ;;  %v1868_v58 = vadd.f32 %v1836_v37, %v1768_v8  ;;  %v1609_v37 = vld [vmem:[#allocation3 + $0x38] sm:$0xff] }
 0x1ca   : > { %1899 = vst.msk [vmem:[#allocation3] sm:$0xff] %vm1463_vm1, %v1867_v26  ;;  %1900 = vst.msk [vmem:[#allocation3 + $0x8] sm:$0xff] %vm1463_vm1, %v1868_v58 }
 0x1d1   : > { %v1932_v11 = vld [vmem:[#allocation3] sm:$0xff]  ;;  %v1933_v24 = vld [vmem:[#allocation3 + $0x8] sm:$0xff] }
 0x1d2   : > { %v2032_v3 = vadd.f32 %v2000_v9, %v1932_v11  ;;  %v2033_v41 = vadd.f32 %v2001_v59, %v1933_v24 }
 0x1d4   : > { %2064 = vst.msk [vmem:[#allocation3] sm:$0xff] %vm1463_vm1, %v2032_v3  ;;  %2065 = vst.msk [vmem:[#allocation3 + $0x8] sm:$0xff] %vm1463_vm1, %v2033_v41 }
 0x1db   : > { %v2097_v45 = vld [vmem:[#allocation3] sm:$0xff]  ;;  %v2098_v61 = vld [vmem:[#allocation3 + $0x8] sm:$0xff] }
 0x229   : > { %v8980_v6 = vpop.f32.mrb[0].mxu0 }
 0x22a   : > { %v1310_v12 = vadd.f32 %v8980_v6, %v10746_v4  ;;  %v1304_v40 = vpop.f32.mrb[1].mxu0 }
 0x22b   : > { %v1305_v7 = vadd.f32 %v10746_v4, %v1304_v40 }
 0x22c   : > { %1538 = vst.msk [vmem:[#allocation2 + $0x30] sm:$0xff] %vm1463_vm1, %v1310_v12 }
 0x22d   : > { %1537 = vst.msk [vmem:[#allocation2 + $0x28] sm:$0xff] %vm1463_vm1, %v1305_v7  ;;  %v8983_v18 = vpop.f32.mrb[2].mxu0 }
 0x22e   : > { %v1320_v56 = vadd.f32 %v8983_v18, %v10746_v4  ;;  %v1314_v22 = vpop.f32.mrb[3].mxu0 }
 0x22f   : > { %v1315_v28 = vadd.f32 %v10746_v4, %v1314_v22 }
 0x230   : > { %1540 = vst.msk [vmem:[#allocation2 + $0x50] sm:$0xff] %vm1463_vm1, %v1320_v56 }
 0x231   : > { %1539 = vst.msk [vmem:[#allocation2 + $0x48] sm:$0xff] %vm1463_vm1, %v1315_v28  ;;  %v8986_v25 = vpop.f32.mrb[4].mxu0 }
 0x232   : > { %v1330_v32 = vadd.f32 %v8986_v25, %v10746_v4  ;;  %v1324_v23 = vpop.f32.mrb[5].mxu0 }
 0x233   : > { %v1325_v30 = vadd.f32 %v10746_v4, %v1324_v23  ;;  %v1802_v17 = vld [vmem:[#allocation2 + $0x30] sm:$0xff] }
 0x234   : > { %v1636_v60 = vld [vmem:[#allocation2 + $0x27] sm:$0xff]  ;;  %v1637_v15 = vld [vmem:[#allocation2 + $0x2f] sm:$0xff]  ;;  %1542 = vst.msk [vmem:[#allocation2 + $0x70] sm:$0xff] %vm1463_vm1, %v1330_v32  ;;  %v1838_v26 = vmul.f32 %v10728_v51, %v1802_v17  ;;  %v2331_v59 = vmul.f32 %v10786_v20, %v1802_v17 }
 0x235   : > { %v1672_v1 = vmul.f32 %v10719_v57, %v1636_v60  ;;  %v1673_v47 = vmul.f32 %v10719_v57, %v1637_v15  ;;  %v2165_v44 = vmul.f32 %v10759_v27, %v1636_v60  ;;  %1541 = vst.msk [vmem:[#allocation2 + $0x68] sm:$0xff] %vm1463_vm1, %v1325_v30  ;;  %v8989_v2 = vpop.f32.mrb[6].mxu0  ;;  %v2166_v33 = vmul.f32 %v10759_v27, %v1637_v15  ;;  %v1801_v55 = vld [vmem:[#allocation2 + $0x28] sm:$0xff] }
 0x236   : > { %v1334_v31 = vpop.f32.mrb[7].mxu0  ;;  %v1340_v34 = vadd.f32 %v8989_v2, %v10746_v4  ;;  %v1837_v58 = vmul.f32 %v10728_v51, %v1801_v55  ;;  %v2330_v21 = vmul.f32 %v10786_v20, %v1801_v55  ;;  %v10825_v2 = vld [vmem:[%s15246_s5 + $0x5] ss:$0 sm:$0xff] }
 0x237   : > { %v1704_v49 = vadd.f32 %v1672_v1, %v1604_v16  ;;  %v1705_v29 = vadd.f32 %v1673_v47, %v1605_v13  ;;  %v2197_v63 = vadd.f32 %v2165_v44, %v2097_v45  ;;  %v2198_v10 = vadd.f32 %v2166_v33, %v2098_v61  ;;  %v10804_v18 = vld [vmem:[#allocation2 + $0x50] sm:$0xff] }
 0x238   : > { %v10770_v39 = vld [vmem:[#allocation2 + $0x47] sm:$0xff]  ;;  %v10772_v42 = vld [vmem:[#allocation2 + $0x4f] sm:$0xff]  ;;  %1544 = vst.msk [vmem:[#allocation2 + $0x90] sm:$0xff] %vm1463_vm1, %v1340_v34  ;;  %v1840_v23 = vmul.f32 %v10728_v51, %v10804_v18  ;;  %v1335_v13 = vadd.f32 %v10746_v4, %v1334_v31 }
 0x239   : > { %1736 = vst.msk [vmem:[#allocation3 + $0x10] sm:$0xff] %vm1463_vm1, %v1704_v49  ;;  %1737 = vst.msk [vmem:[#allocation3 + $0x18] sm:$0xff] %vm1463_vm1, %v1705_v29  ;;  %v1674_v19 = vmul.f32 %v10719_v57, %v10770_v39  ;;  %v8992_v5 = vpop.f32.mrb[8].mxu0  ;;  %v1675_v14 = vmul.f32 %v10719_v57, %v10772_v42  ;;  %v10799_v52 = vld [vmem:[#allocation2 + $0x48] sm:$0xff]  ;;  %v1967_v44 = vld [vmem:[#allocation2 + $0x31] sm:$0xff] }
 0x23a   : > { %2229 = vst.msk [vmem:[#allocation3] sm:$0xff] %vm1463_vm1, %v2197_v63  ;;  %2230 = vst.msk [vmem:[#allocation3 + $0x8] sm:$0xff] %vm1463_vm1, %v2198_v10  ;;  %v1344_v0 = vpop.f32.mrb[9].mxu0  ;;  %v1839_v32 = vmul.f32 %v10728_v51, %v10799_v52  ;;  %v1350_v45 = vadd.f32 %v8992_v5, %v10746_v4  ;;  %v1966_v33 = vld [vmem:[#allocation2 + $0x29] sm:$0xff]  ;;  %v2003_v5 = vmul.f32 %v10737_v62, %v1967_v44 }
 0x23b   : > { %v1706_v46 = vadd.f32 %v1674_v19, %v1606_v35  ;;  %v1707_v48 = vadd.f32 %v1675_v14, %v1607_v53  ;;  %v1345_v1 = vadd.f32 %v10746_v4, %v1344_v0  ;;  %1543 = vst.msk [vmem:[#allocation2 + $0x88] sm:$0xff] %vm1463_vm1, %v1335_v13  ;;  %v10832_v10 = vld [vmem:[#allocation2 + $0x70] sm:$0xff]  ;;  %v2002_v14 = vmul.f32 %v10737_v62, %v1966_v33 }
 0x23c   : > { %v10788_v50 = vld [vmem:[#allocation2 + $0x67] sm:$0xff]  ;;  %v10790_v38 = vld [vmem:[#allocation2 + $0x6f] sm:$0xff]  ;;  %1546 = vst.msk [vmem:[#allocation2 + $0xb0] sm:$0xff] %vm1463_vm1, %v1350_v45  ;;  %v2495_v0 = vmul.f32 %v10825_v2, %v1966_v33 }
 0x23d   : > { %1738 = vst.msk [vmem:[#allocation3 + $0x20] sm:$0xff] %vm1463_vm1, %v1706_v46  ;;  %v8995_v36 = vpop.f32.mrb[10].mxu0  ;;  %1739 = vst.msk [vmem:[#allocation3 + $0x28] sm:$0xff] %vm1463_vm1, %v1707_v48  ;;  %v1676_v54 = vmul.f32 %v10719_v57, %v10788_v50  ;;  %v1677_v9 = vmul.f32 %v10719_v57, %v10790_v38  ;;  %v10817_v15 = vld [vmem:[#allocation2 + $0x68] sm:$0xff]  ;;  %v2496_v48 = vmul.f32 %v10825_v2, %v1967_v44 }
 0x23e   : > { %v1354_v8 = vpop.f32.mrb[11].mxu0  ;;  %v1360_v47 = vadd.f32 %v8995_v36, %v10746_v4  ;;  %1545 = vst.msk [vmem:[#allocation2 + $0xa8] sm:$0xff] %vm1463_vm1, %v1345_v1  ;;  %v1841_v19 = vmul.f32 %v10728_v51, %v10817_v15  ;;  %v10848_v17 = vld [vmem:[#allocation2 + $0x49] sm:$0xff] }
 0x23f   : > { %v1708_v41 = vadd.f32 %v1676_v54, %v1608_v43  ;;  %v1709_v56 = vadd.f32 %v1677_v9, %v1609_v37  ;;  %v1355_v31 = vadd.f32 %v10746_v4, %v1354_v8  ;;  %v1842_v54 = vmul.f32 %v10728_v51, %v10832_v10  ;;  %v10883_v1 = vld [vmem:[#allocation2 + $0x69] sm:$0xff] }
 0x240   : > { %v1769_v11 = vld [vmem:[#allocation3 + $0x10] sm:$0xff]  ;;  %v1770_v24 = vld [vmem:[#allocation3 + $0x18] sm:$0xff]  ;;  %1548 = vst.msk [vmem:[#allocation2 + $0xd0] sm:$0xff] %vm1463_vm1, %v1360_v47  ;;  %v10888_v47 = vld [vmem:[%s15246_s5 + $0x6] ss:$0 sm:$0xff] }
 0x241   : > { %v2262_v3 = vld [vmem:[#allocation3] sm:$0xff]  ;;  %v1869_v6 = vadd.f32 %v1837_v58, %v1769_v11  ;;  %v1870_v12 = vadd.f32 %v1838_v26, %v1770_v24  ;;  %v2263_v40 = vld [vmem:[#allocation3 + $0x8] sm:$0xff]  ;;  %v8998_v22 = vpop.f32.mrb[12].mxu0  ;;  %1740 = vst.msk [vmem:[#allocation3 + $0x30] sm:$0xff] %vm1463_vm1, %v1708_v41  ;;  %1741 = vst.msk [vmem:[#allocation3 + $0x38] sm:$0xff] %vm1463_vm1, %v1709_v56 }
 0x242   : > { %v2362_v7 = vadd.f32 %v2330_v21, %v2262_v3  ;;  %v2363_v28 = vadd.f32 %v2331_v59, %v2263_v40  ;;  %v1364_v25 = vpop.f32.mrb[13].mxu0  ;;  %v1370_v29 = vadd.f32 %v8998_v22, %v10746_v4  ;;  %1547 = vst.msk [vmem:[#allocation2 + $0xc8] sm:$0xff] %vm1463_vm1, %v1355_v31  ;;  %v10856_v59 = vld [vmem:[#allocation2 + $0x51] sm:$0xff]  ;;  %v1610_v40 = vld [vmem:[#allocation3 + $0x40] sm:$0xff]  ;;  %v1611_v56 = vld [vmem:[#allocation3 + $0x48] sm:$0xff] }
 0x243   : > { %1901 = vst.msk [vmem:[#allocation3 + $0x10] sm:$0xff] %vm1463_vm1, %v1869_v6  ;;  %1902 = vst.msk [vmem:[#allocation3 + $0x18] sm:$0xff] %vm1463_vm1, %v1870_v12  ;;  %v1365_v63 = vadd.f32 %v10746_v4, %v1364_v25  ;;  %v10866_v22 = vld [vmem:[#allocation2 + $0x87] sm:$0xff] }
 0x244   : > { %2394 = vst.msk [vmem:[#allocation3] sm:$0xff] %vm1463_vm1, %v2362_v7  ;;  %2395 = vst.msk [vmem:[#allocation3 + $0x8] sm:$0xff] %vm1463_vm1, %v2363_v28  ;;  %v1771_v16 = vld [vmem:[#allocation3 + $0x20] sm:$0xff]  ;;  %v1772_v30 = vld [vmem:[#allocation3 + $0x28] sm:$0xff]  ;;  %v2004_v7 = vmul.f32 %v10737_v62, %v10848_v17 }
 0x245   : > { %v1871_v60 = vadd.f32 %v1839_v32, %v1771_v16  ;;  %v9001_v61 = vpop.f32.mrb[14].mxu0  ;;  %v1872_v49 = vadd.f32 %v1840_v23, %v1772_v30  ;;  %1550 = vst.msk [vmem:[#allocation2 + $0xf0] sm:$0xff] %vm1463_vm1, %v1370_v29  ;;  %1549 = vst.msk [vmem:[#allocation2 + $0xe8] sm:$0xff] %vm1463_vm1, %v1365_v63  ;;  %v10868_v28 = vld [vmem:[#allocation2 + $0x8f] sm:$0xff]  ;;  %v2005_v32 = vmul.f32 %v10737_v62, %v10856_v59 }
 0x246   : > { %v1374_v34 = vpop.f32.mrb[15].mxu0  ;;  %v1380_v35 = vadd.f32 %v9001_v61, %v10746_v4  ;;  %v1678_v16 = vmul.f32 %v10719_v57, %v10866_v22  ;;  %v1679_v13 = vmul.f32 %v10719_v57, %v10868_v28  ;;  %v10892_v31 = vld [vmem:[#allocation2 + $0xaf] sm:$0xff] }
 0x247   : > { %1903 = vst.msk [vmem:[#allocation3 + $0x20] sm:$0xff] %vm1463_vm1, %v1871_v60  ;;  %v1375_v53 = vadd.f32 %v10746_v4, %v1374_v34  ;;  %1904 = vst.msk [vmem:[#allocation3 + $0x28] sm:$0xff] %vm1463_vm1, %v1872_v49  ;;  %v10890_v49 = vld [vmem:[#allocation2 + $0xa7] sm:$0xff]  ;;  %v10895_v29 = vld [vmem:[#allocation2 + $0x71] sm:$0xff]  ;;  %v2167_v34 = vmul.f32 %v10759_v27, %v10770_v39 }
 0x248   : > { %v1773_v46 = vld [vmem:[#allocation3 + $0x30] sm:$0xff]  ;;  %1552 = vst.msk [vmem:[#allocation2 + $0x110] sm:$0xff] %vm1463_vm1, %v1380_v35  ;;  %v1774_v3 = vld [vmem:[#allocation3 + $0x38] sm:$0xff]  ;;  %v1710_v44 = vadd.f32 %v1678_v16, %v1610_v40  ;;  %v1711_v33 = vadd.f32 %v1679_v13, %v1611_v56  ;;  %v2006_v35 = vmul.f32 %v10737_v62, %v10883_v1  ;;  %v2333_v16 = vmul.f32 %v10786_v20, %v10804_v18 }
 0x249   : > { %1551 = vst.msk [vmem:[#allocation2 + $0x108] sm:$0xff] %vm1463_vm1, %v1375_v53  ;;  %v9004_v55 = vpop.f32.mrb[16].mxu0  ;;  %v1873_v8 = vadd.f32 %v1841_v19, %v1773_v46  ;;  %v1874_v12 = vadd.f32 %v1842_v54, %v1774_v3  ;;  %v1612_v53 = vld [vmem:[#allocation3 + $0x50] sm:$0xff] }
 0x24a   : > { %v1934_v43 = vld [vmem:[#allocation3 + $0x10] sm:$0xff]  ;;  %v1935_v37 = vld [vmem:[#allocation3 + $0x18] sm:$0xff]  ;;  %v1390_v26 = vadd.f32 %v9004_v55, %v10746_v4  ;;  %v1384_v58 = vpop.f32.mrb[17].mxu0  ;;  %1742 = vst.msk [vmem:[#allocation3 + $0x40] sm:$0xff] %vm1463_vm1, %v1710_v44  ;;  %1743 = vst.msk [vmem:[#allocation3 + $0x48] sm:$0xff] %vm1463_vm1, %v1711_v33 }
 0x24b   : > { %v2427_v36 = vld [vmem:[#allocation3] sm:$0xff]  ;;  %v2034_v21 = vadd.f32 %v2002_v14, %v1934_v43  ;;  %v2035_v11 = vadd.f32 %v2003_v5, %v1935_v37  ;;  %v2428_v24 = vld [vmem:[#allocation3 + $0x8] sm:$0xff]  ;;  %v1385_v41 = vadd.f32 %v10746_v4, %v1384_v58  ;;  %1905 = vst.msk [vmem:[#allocation3 + $0x30] sm:$0xff] %vm1463_vm1, %v1873_v8  ;;  %1906 = vst.msk [vmem:[#allocation3 + $0x38] sm:$0xff] %vm1463_vm1, %v1874_v12 }
 0x24c   : > { %v2527_v9 = vadd.f32 %v2495_v0, %v2427_v36  ;;  %v2528_v6 = vadd.f32 %v2496_v48, %v2428_v24  ;;  %1554 = vst.msk [vmem:[#allocation2 + $0x130] sm:$0xff] %vm1463_vm1, %v1390_v26  ;;  %v2168_v5 = vmul.f32 %v10759_v27, %v10772_v42  ;;  %v2661_v14 = vmul.f32 %v10888_v47, %v10770_v39  ;;  %v10912_v46 = vld [vmem:[#allocation2 + $0x90] sm:$0xff]  ;;  %v1613_v55 = vld [vmem:[#allocation3 + $0x58] sm:$0xff]  ;;  %v10922_v24 = vld [vmem:[#allocation2 + $0x88] sm:$0xff] }
 0x24d   : > { %2066 = vst.msk [vmem:[#allocation3 + $0x10] sm:$0xff] %vm1463_vm1, %v2034_v21  ;;  %2067 = vst.msk [vmem:[#allocation3 + $0x18] sm:$0xff] %vm1463_vm1, %v2035_v11  ;;  %v10871_v25 = vpop.f32.mrb[18].mxu0  ;;  %v1680_v48 = vmul.f32 %v10719_v57, %v10890_v49  ;;  %v1681_v43 = vmul.f32 %v10719_v57, %v10892_v31  ;;  %v2662_v8 = vmul.f32 %v10888_v47, %v10772_v42  ;;  %v10929_v12 = vld [vmem:[%s15246_s5 + $0x7] ss:$0 sm:$0xff]  ;;  %v10958_v33 = vld [vmem:[#allocation2 + $0xcf] sm:$0xff] }
 0x24e   : > { %2559 = vst.msk [vmem:[#allocation3] sm:$0xff] %vm1463_vm1, %v2527_v9  ;;  %1553 = vst.msk [vmem:[#allocation2 + $0x128] sm:$0xff] %vm1463_vm1, %v1385_v41  ;;  %v1936_v23 = vld [vmem:[#allocation3 + $0x20] sm:$0xff]  ;;  %v10881_v30 = vpop.f32.mrb[19].mxu0  ;;  %v1937_v45 = vld [vmem:[#allocation3 + $0x28] sm:$0xff]  ;;  %v2007_v26 = vmul.f32 %v10737_v62, %v10895_v29 }
 0x24f   : > { %2560 = vst.msk [vmem:[#allocation3 + $0x8] sm:$0xff] %vm1463_vm1, %v2528_v6  ;;  %v2036_v60 = vadd.f32 %v2004_v7, %v1936_v23  ;;  %v2037_v61 = vadd.f32 %v2005_v32, %v1937_v45  ;;  %v1712_v41 = vadd.f32 %v1680_v48, %v1612_v53  ;;  %v10934_v42 = vld [vmem:[%s15246_s5 + $0x8] ss:$0 sm:$0xff]  ;;  %v1713_v56 = vadd.f32 %v1681_v43, %v1613_v55 }
 0x250   : > { %v2169_v23 = vmul.f32 %v10759_v27, %v10788_v50  ;;  %v1844_v45 = vmul.f32 %v10728_v51, %v10912_v46  ;;  %v10956_v44 = vld [vmem:[#allocation2 + $0xc7] sm:$0xff]  ;;  %15371 = vst [vmem:[#allocation6_spill] sm:$0xff] %v10958_v33  ;;  %v10968_v53 = vmul.f32 %v10934_v42, %v10856_v59  ;;  %v2332_v43 = vmul.f32 %v10786_v20, %v10799_v52 }
 0x251   : > { %2068 = vst.msk [vmem:[#allocation3 + $0x20] sm:$0xff] %vm1463_vm1, %v2036_v60  ;;  %v10897_v63 = vpop.f32.mrb[20].mxu0  ;;  %2069 = vst.msk [vmem:[#allocation3 + $0x28] sm:$0xff] %vm1463_vm1, %v2037_v61  ;;  %v2170_v60 = vmul.f32 %v10759_v27, %v10790_v38  ;;  %v1843_v61 = vmul.f32 %v10728_v51, %v10922_v24  ;;  %v1776_v55 = vld [vmem:[#allocation3 + $0x48] sm:$0xff] }
 0x252   : > { %v10906_v19 = vpop.f32.mrb[21].mxu0  ;;  %v1938_v0 = vld [vmem:[#allocation3 + $0x30] sm:$0xff]  ;;  %v1939_v3 = vld [vmem:[#allocation3 + $0x38] sm:$0xff]  ;;  %1744 = vst.msk [vmem:[#allocation3 + $0x50] sm:$0xff] %vm1463_vm1, %v1712_v41  ;;  %1745 = vst.msk [vmem:[#allocation3 + $0x58] sm:$0xff] %vm1463_vm1, %v1713_v56  ;;  %v2171_v41 = vmul.f32 %v10759_v27, %v10866_v22 }
 0x253   : > { %v2038_v39 = vadd.f32 %v2006_v35, %v1938_v0  ;;  %v2039_v7 = vadd.f32 %v2007_v26, %v1939_v3  ;;  %v2827_v35 = vmul.f32 %v10929_v12, %v10804_v18  ;;  %v1775_v0 = vld [vmem:[#allocation3 + $0x40] sm:$0xff]  ;;  %v1615_v26 = vld [vmem:[#allocation3 + $0x68] sm:$0xff]  ;;  %v10978_v18 = vmul.f32 %v10825_v2, %v10848_v17  ;;  %v11016_v56 = vld [vmem:[#allocation2 + $0x91] sm:$0xff] }
 0x254   : > { %v2099_v36 = vld [vmem:[#allocation3 + $0x10] sm:$0xff]  ;;  %v2100_v37 = vld [vmem:[#allocation3 + $0x18] sm:$0xff]  ;;  %v10995_v3 = vmul.f32 %v10786_v20, %v10832_v10 }
 0x255   : > { %v2592_v54 = vld [vmem:[#allocation3] sm:$0xff]  ;;  %v2199_v58 = vadd.f32 %v2167_v34, %v2099_v36  ;;  %v2200_v21 = vadd.f32 %v2168_v5, %v2100_v37  ;;  %v10924_v6 = vpop.f32.mrb[22].mxu0  ;;  %2070 = vst.msk [vmem:[#allocation3 + $0x30] sm:$0xff] %vm1463_vm1, %v2038_v39  ;;  %2071 = vst.msk [vmem:[#allocation3 + $0x38] sm:$0xff] %vm1463_vm1, %v2039_v7  ;;  %v10962_v34 = vmul.f32 %v10825_v2, %v10856_v59 }
 0x256   : > { %v2593_v9 = vld [vmem:[#allocation3 + $0x8] sm:$0xff]  ;;  %v2693_v11 = vadd.f32 %v2661_v14, %v2592_v54  ;;  %v10937_v32 = vpop.f32.mrb[23].mxu0  ;;  %v1875_v37 = vadd.f32 %v1843_v61, %v1775_v0  ;;  %v1876_v54 = vadd.f32 %v1844_v45, %v1776_v55  ;;  %v2826_v59 = vmul.f32 %v10929_v12, %v10799_v52 }
 0x257   : > { %v2694_v40 = vadd.f32 %v2662_v8, %v2593_v9  ;;  %2231 = vst.msk [vmem:[#allocation3 + $0x10] sm:$0xff] %vm1463_vm1, %v2199_v58  ;;  %2232 = vst.msk [vmem:[#allocation3 + $0x18] sm:$0xff] %vm1463_vm1, %v2200_v21  ;;  %v1614_v8 = vld [vmem:[#allocation3 + $0x60] sm:$0xff]  ;;  %v10983_v58 = vld [vmem:[#allocation2 + $0xa8] sm:$0xff]  ;;  %v1682_v21 = vmul.f32 %v10719_v57, %v10956_v44  ;;  %v1683_v9 = vmul.f32 %v10719_v57, %v10958_v33 }
 0x258   : > { %2725 = vst.msk [vmem:[#allocation3] sm:$0xff] %vm1463_vm1, %v2693_v11  ;;  %v2101_v13 = vld [vmem:[#allocation3 + $0x20] sm:$0xff]  ;;  %v2102_v5 = vld [vmem:[#allocation3 + $0x28] sm:$0xff]  ;;  %v10991_v11 = vmul.f32 %v10934_v42, %v10848_v17  ;;  %v10999_v52 = vmul.f32 %v10825_v2, %v10895_v29  ;;  %1907 = vst.msk [vmem:[#allocation3 + $0x40] sm:$0xff] %vm1463_vm1, %v1875_v37  ;;  %v11010_v17 = vmul.f32 %v10929_v12, %v10832_v10 }
 0x259   : > { %2726 = vst.msk [vmem:[#allocation3 + $0x8] sm:$0xff] %vm1463_vm1, %v2694_v40  ;;  %v2201_v14 = vadd.f32 %v2169_v23, %v2101_v13  ;;  %v10970_v48 = vpop.f32.mrb[24].mxu0  ;;  %v2202_v36 = vadd.f32 %v2170_v60, %v2102_v5  ;;  %1908 = vst.msk [vmem:[#allocation3 + $0x48] sm:$0xff] %vm1463_vm1, %v1876_v54  ;;  %v11006_v40 = vld [vmem:[#allocation2 + $0xb0] sm:$0xff]  ;;  %v11014_v7 = vmul.f32 %v10934_v42, %v10895_v29  ;;  %v11020_v61 = vld [vmem:[#allocation2 + $0xe7] sm:$0xff] }
 0x25a   : > { %15372 = vst [vmem:[#allocation7_spill] sm:$0xff] %v10970_v48  ;;  %v10974_v39 = vpop.f32.mrb[25].mxu0  ;;  %15374 = vst [vmem:[#allocation9_spill] sm:$0xff] %v11010_v17  ;;  %v11018_v23 = vld [vmem:[#allocation2 + $0x89] sm:$0xff]  ;;  %v1714_v60 = vadd.f32 %v1682_v21, %v1614_v8  ;;  %v1715_v45 = vadd.f32 %v1683_v9, %v1615_v26  ;;  %v2334_v29 = vmul.f32 %v10786_v20, %v10817_v15 }
 0x25b   : > { %15373 = vst [vmem:[#allocation8_spill] sm:$0xff] %v10974_v39  ;;  %2233 = vst.msk [vmem:[#allocation3 + $0x20] sm:$0xff] %vm1463_vm1, %v2201_v14  ;;  %v11022_v5 = vld [vmem:[#allocation2 + $0xef] sm:$0xff]  ;;  %v1845_v54 = vmul.f32 %v10728_v51, %v10983_v58 }
 0x25c   : > { %2234 = vst.msk [vmem:[#allocation3 + $0x28] sm:$0xff] %vm1463_vm1, %v2202_v36  ;;  %15375 = vst [vmem:[#allocation10_spill] sm:$0xff] %v11014_v7  ;;  %v2103_v13 = vld [vmem:[#allocation3 + $0x30] sm:$0xff]  ;;  %v2172_v36 = vmul.f32 %v10759_v27, %v10868_v28  ;;  %v2104_v17 = vld [vmem:[#allocation3 + $0x38] sm:$0xff] }
 0x25d   : > { %v11024_v14 = vpop.f32.mrb[26].mxu0  ;;  %v2203_v37 = vadd.f32 %v2171_v41, %v2103_v13  ;;  %v1777_v39 = vld [vmem:[#allocation3 + $0x50] sm:$0xff]  ;;  %1746 = vst.msk [vmem:[#allocation3 + $0x60] sm:$0xff] %vm1463_vm1, %v1714_v60  ;;  %1747 = vst.msk [vmem:[#allocation3 + $0x68] sm:$0xff] %vm1463_vm1, %v1715_v45  ;;  %v11040_v41 = vmul.f32 %v10825_v2, %v10883_v1  ;;  %v1617_v45 = vld [vmem:[#allocation3 + $0x78] sm:$0xff] }
 0x25e   : > { %15376 = vst [vmem:[#allocation11_spill] sm:$0xff] %v11024_v14  ;;  %v2264_v0 = vld [vmem:[#allocation3 + $0x10] sm:$0xff]  ;;  %v2265_v10 = vld [vmem:[#allocation3 + $0x18] sm:$0xff]  ;;  %v11032_v8 = vpop.f32.mrb[27].mxu0  ;;  %v1846_v14 = vmul.f32 %v10728_v51, %v11006_v40  ;;  %v2204_v13 = vadd.f32 %v2172_v36, %v2104_v17  ;;  %v11056_v17 = vmul.f32 %v10929_v12, %v10817_v15  ;;  %v11069_v15 = vld [vmem:[#allocation2 + $0xc8] sm:$0xff] }
 0x25f   : > { %v2758_v55 = vld [vmem:[#allocation3] sm:$0xff]  ;;  %v2364_v26 = vadd.f32 %v2332_v43, %v2264_v0  ;;  %v2365_v21 = vadd.f32 %v2333_v16, %v2265_v10  ;;  %2235 = vst.msk [vmem:[#allocation3 + $0x30] sm:$0xff] %vm1463_vm1, %v2203_v37  ;;  %v1778_v16 = vld [vmem:[#allocation3 + $0x58] sm:$0xff]  ;;  %v1877_v43 = vadd.f32 %v1845_v54, %v1777_v39  ;;  %v1616_v39 = vld [vmem:[#allocation3 + $0x70] sm:$0xff]  ;;  %v2008_v10 = vmul.f32 %v10737_v62, %v11018_v23 }
 0x260   : > { %v2759_v9 = vld [vmem:[#allocation3 + $0x8] sm:$0xff]  ;;  %v2858_v7 = vadd.f32 %v2826_v59, %v2758_v55  ;;  %v11048_v59 = vmul.f32 %v10888_v47, %v10788_v50  ;;  %15377 = vst [vmem:[#allocation12_spill] sm:$0xff] %v11056_v17  ;;  %v1878_v60 = vadd.f32 %v1846_v14, %v1778_v16  ;;  %v2009_v50 = vmul.f32 %v10737_v62, %v11016_v56 }
 0x261   : > { %v2859_v48 = vadd.f32 %v2827_v35, %v2759_v9  ;;  %2396 = vst.msk [vmem:[#allocation3 + $0x10] sm:$0xff] %vm1463_vm1, %v2364_v26  ;;  %2397 = vst.msk [vmem:[#allocation3 + $0x18] sm:$0xff] %vm1463_vm1, %v2365_v21  ;;  %v11052_v35 = vmul.f32 %v10888_v47, %v10790_v38  ;;  %v11058_v0 = vpop.f32.mrb[28].mxu0  ;;  %v11067_v38 = vld [vmem:[#allocation2 + $0xd0] sm:$0xff]  ;;  %v1684_v14 = vmul.f32 %v10719_v57, %v11020_v61  ;;  %v1940_v9 = vld [vmem:[#allocation3 + $0x40] sm:$0xff] }
 0x262   : > { %2890 = vst.msk [vmem:[#allocation3] sm:$0xff] %vm1463_vm1, %v2858_v7  ;;  %15378 = vst [vmem:[#allocation13_spill] sm:$0xff] %v11058_v0  ;;  %v2266_v7 = vld [vmem:[#allocation3 + $0x20] sm:$0xff]  ;;  %v11075_v55 = vpop.f32.mrb[29].mxu0  ;;  %v11079_v54 = vmul.f32 %v10934_v42, %v10883_v1  ;;  %v2337_v26 = vmul.f32 %v10786_v20, %v10912_v46  ;;  %v11085_v21 = vmul.f32 %v10825_v2, %v11016_v56 }
 0x263   : > { %2891 = vst.msk [vmem:[#allocation3 + $0x8] sm:$0xff] %vm1463_vm1, %v2859_v48  ;;  %2236 = vst.msk [vmem:[#allocation3 + $0x38] sm:$0xff] %vm1463_vm1, %v2204_v13  ;;  %v1685_v48 = vmul.f32 %v10719_v57, %v11022_v5  ;;  %v2267_v36 = vld [vmem:[#allocation3 + $0x28] sm:$0xff]  ;;  %v2366_v37 = vadd.f32 %v2334_v29, %v2266_v7  ;;  %v1716_v29 = vadd.f32 %v1684_v14, %v1616_v39  ;;  %v11094_v7 = vld [vmem:[#allocation2 + $0xb1] sm:$0xff] }
 0x264   : > { %1909 = vst.msk [vmem:[#allocation3 + $0x50] sm:$0xff] %vm1463_vm1, %v1877_v43  ;;  %15379 = vst [vmem:[#allocation14_spill] sm:$0xff] %v11075_v55  ;;  %v1941_v13 = vld [vmem:[#allocation3 + $0x48] sm:$0xff]  ;;  %v2367_v16 = vadd.f32 %v10995_v3, %v2267_v36  ;;  %v2040_v43 = vadd.f32 %v2008_v10, %v1940_v9  ;;  %v11092_v1 = vmul.f32 %v10929_v12, %v10912_v46 }
 0x265   : > { %15380 = vst [vmem:[#allocation15_spill] sm:$0xff] %v11079_v54  ;;  %1910 = vst.msk [vmem:[#allocation3 + $0x58] sm:$0xff] %vm1463_vm1, %v1878_v60  ;;  %v2041_v17 = vadd.f32 %v2009_v50, %v1941_v13  ;;  %v11096_v54 = vld [vmem:[#allocation2 + $0xa9] sm:$0xff]  ;;  %v1848_v55 = vmul.f32 %v10728_v51, %v11067_v38  ;;  %v1847_v60 = vmul.f32 %v10728_v51, %v11069_v15  ;;  %v11104_v39 = vpop.f32.mrb[30].mxu0 }
 0x266   : > { %2398 = vst.msk [vmem:[#allocation3 + $0x20] sm:$0xff] %vm1463_vm1, %v2366_v37  ;;  %15381 = vst [vmem:[#allocation16_spill] sm:$0xff] %v11092_v1  ;;  %v1717_v3 = vadd.f32 %v1685_v48, %v1617_v45  ;;  %v11102_v10 = vld [vmem:[#allocation2 + $0x107] sm:$0xff]  ;;  %v11109_v46 = vmul.f32 %v10934_v42, %v11016_v56  ;;  %v2336_v50 = vmul.f32 %v10786_v20, %v10922_v24  ;;  %v11124_v56 = vld [vmem:[#allocation2 + $0x10f] sm:$0xff]  ;;  %v11126_v37 = vpop.f32.mrb[31].mxu0 }
 0x267   : > { %15382 = vst [vmem:[#allocation17_spill] sm:$0xff] %v11096_v54  ;;  %15383 = vst [vmem:[#allocation18_spill] sm:$0xff] %v11102_v10  ;;  %v11116_v14 = vmul.f32 %v10825_v2, %v11018_v23  ;;  %v11120_v45 = vmul.f32 %v10888_v47, %v10866_v22  ;;  %v1779_v48 = vld [vmem:[#allocation3 + $0x60] sm:$0xff]  ;;  %v1780_v36 = vld [vmem:[#allocation3 + $0x68] sm:$0xff]  ;;  %v11130_v13 = vmul.f32 %v10888_v47, %v10868_v28 }
 0x268   : > { %15384 = vst [vmem:[#allocation19_spill] sm:$0xff] %v11104_v39  ;;  %2399 = vst.msk [vmem:[#allocation3 + $0x28] sm:$0xff] %vm1463_vm1, %v2367_v16  ;;  %v2268_v9 = vld [vmem:[#allocation3 + $0x30] sm:$0xff]  ;;  %v11134_v16 = vmul.f32 %v10929_v12, %v10922_v24  ;;  %v1879_v22 = vadd.f32 %v1847_v60, %v1779_v48  ;;  %v2430_v39 = vld [vmem:[#allocation3 + $0x18] sm:$0xff]  ;;  %v2010_v28 = vmul.f32 %v10737_v62, %v11096_v54 }
 0x269   : > { %15385 = vst [vmem:[#allocation20_spill] sm:$0xff] %v11109_v46  ;;  %2072 = vst.msk [vmem:[#allocation3 + $0x40] sm:$0xff] %vm1463_vm1, %v2040_v43  ;;  %v1880_v43 = vadd.f32 %v1848_v55, %v1780_v36  ;;  %v1619_v46 = vld [vmem:[#allocation3 + $0x88] sm:$0xff]  ;;  %v2923_v1 = vld [vmem:[#allocation3] sm:$0xff]  ;;  %v2368_v0 = vadd.f32 %v2336_v50, %v2268_v9  ;;  %v1686_v24 = vmul.f32 %v10719_v57, %v11102_v10 }
 0x26a   : > { %2073 = vst.msk [vmem:[#allocation3 + $0x48] sm:$0xff] %vm1463_vm1, %v2041_v17  ;;  %1748 = vst.msk [vmem:[#allocation3 + $0x70] sm:$0xff] %vm1463_vm1, %v1716_v29  ;;  %v1618_v17 = vld [vmem:[#allocation3 + $0x80] sm:$0xff]  ;;  %v2429_v29 = vld [vmem:[#allocation3 + $0x10] sm:$0xff]  ;;  %v2530_v48 = vadd.f32 %v10962_v34, %v2430_v39  ;;  %v1687_v50 = vmul.f32 %v10719_v57, %v11124_v56 }
 0x26b   : > { %15386 = vst [vmem:[#allocation21_spill] sm:$0xff] %v11126_v37  ;;  %15387 = vst [vmem:[#allocation22_spill] sm:$0xff] %v11134_v16  ;;  %v2011_v37 = vmul.f32 %v10737_v62, %v11094_v7  ;;  %v2529_v60 = vadd.f32 %v10978_v18, %v2429_v29  ;;  %v2924_v55 = vld [vmem:[#allocation3 + $0x8] sm:$0xff]  ;;  %v2269_v36 = vld [vmem:[#allocation3 + $0x38] sm:$0xff]  ;;  %v1718_v34 = vadd.f32 %v1686_v24, %v1618_v17 }
 0x26c   : > { %1749 = vst.msk [vmem:[#allocation3 + $0x78] sm:$0xff] %vm1463_vm1, %v1717_v3  ;;  %v3023_v3 = vadd.f32 %v10991_v11, %v2923_v1  ;;  %v1942_v16 = vld [vmem:[#allocation3 + $0x50] sm:$0xff]  ;;  %1911 = vst.msk [vmem:[#allocation3 + $0x60] sm:$0xff] %vm1463_vm1, %v1879_v22  ;;  %v3024_v9 = vadd.f32 %v10968_v53, %v2924_v55  ;;  %v2369_v54 = vadd.f32 %v2337_v26, %v2269_v36  ;;  %v1943_v29 = vld [vmem:[#allocation3 + $0x58] sm:$0xff] }
 0x26d   : > { %1912 = vst.msk [vmem:[#allocation3 + $0x68] sm:$0xff] %vm1463_vm1, %v1880_v43  ;;  %2400 = vst.msk [vmem:[#allocation3 + $0x30] sm:$0xff] %vm1463_vm1, %v2368_v0  ;;  %v2042_v18 = vadd.f32 %v2010_v28, %v1942_v16  ;;  %v11152_v10 = vld [vmem:[#allocation2 + $0xf0] sm:$0xff]  ;;  %v11154_v11 = vld [vmem:[#allocation2 + $0xe8] sm:$0xff]  ;;  %v11161_v1 = vmul.f32 %v10934_v42, %v11018_v23  ;;  %v11165_v53 = vmul.f32 %v10786_v20, %v11006_v40 }
 0x26e   : > { %15388 = vst [vmem:[#allocation23_spill] sm:$0xff] %v11154_v11  ;;  %2561 = vst.msk [vmem:[#allocation3 + $0x10] sm:$0xff] %vm1463_vm1, %v2529_v60  ;;  %v11167_v0 = vld [vmem:[#allocation2 + $0xd1] sm:$0xff]  ;;  %v2043_v26 = vadd.f32 %v2011_v37, %v1943_v29  ;;  %v1719_v39 = vadd.f32 %v1687_v50, %v1619_v46  ;;  %v2431_v16 = vld [vmem:[#allocation3 + $0x20] sm:$0xff]  ;;  %v11173_v22 = vmul.f32 %v10825_v2, %v11094_v7 }
 0x26f   : > { %3055 = vst.msk [vmem:[#allocation3] sm:$0xff] %vm1463_vm1, %v3023_v3  ;;  %2562 = vst.msk [vmem:[#allocation3 + $0x18] sm:$0xff] %vm1463_vm1, %v2530_v48  ;;  %v11177_v23 = vmul.f32 %v10929_v12, %v11006_v40  ;;  %v2173_v43 = vmul.f32 %v10759_v27, %v10890_v49  ;;  %v2174_v46 = vmul.f32 %v10759_v27, %v10892_v31  ;;  %v11184_v37 = vld [vmem:[#allocation2 + $0xc9] sm:$0xff] }
 0x270   : > { %15389 = vst [vmem:[#allocation24_spill] sm:$0xff] %v11161_v1  ;;  %3056 = vst.msk [vmem:[#allocation3 + $0x8] sm:$0xff] %vm1463_vm1, %v3024_v9  ;;  %v2531_v17 = vadd.f32 %v11040_v41, %v2431_v16  ;;  %v2432_v28 = vld [vmem:[#allocation3 + $0x28] sm:$0xff]  ;;  %v11192_v40 = vmul.f32 %v10934_v42, %v11094_v7  ;;  %v2105_v24 = vld [vmem:[#allocation3 + $0x40] sm:$0xff]  ;;  %v1850_v55 = vmul.f32 %v10728_v51, %v11152_v10 }
 0x271   : > { %2401 = vst.msk [vmem:[#allocation3 + $0x38] sm:$0xff] %vm1463_vm1, %v2369_v54  ;;  %15390 = vst [vmem:[#allocation25_spill] sm:$0xff] %v11177_v23  ;;  %v11187_v54 = vld [vmem:[#allocation2 + $0x127] sm:$0xff]  ;;  %v1849_v3 = vmul.f32 %v10728_v51, %v11154_v11  ;;  %v2532_v48 = vadd.f32 %v10999_v52, %v2432_v28  ;;  %v2205_v41 = vadd.f32 %v2173_v43, %v2105_v24  ;;  %v1781_v50 = vld [vmem:[#allocation3 + $0x70] sm:$0xff] }
 0x272   : > { %2074 = vst.msk [vmem:[#allocation3 + $0x50] sm:$0xff] %vm1463_vm1, %v2042_v18  ;;  %1750 = vst.msk [vmem:[#allocation3 + $0x80] sm:$0xff] %vm1463_vm1, %v1718_v34  ;;  %v2106_v60 = vld [vmem:[#allocation3 + $0x48] sm:$0xff]  ;;  %v11203_v7 = vmul.f32 %v10786_v20, %v10983_v58  ;;  %v1620_v18 = vld [vmem:[#allocation3 + $0x90] sm:$0xff]  ;;  %v2013_v34 = vmul.f32 %v10737_v62, %v11167_v0  ;;  %v11225_v28 = vmul.f32 %v10888_v47, %v10892_v31 }
 0x273   : > { %15391 = vst [vmem:[#allocation26_spill] sm:$0xff] %v11187_v54  ;;  %15392 = vst [vmem:[#allocation27_spill] sm:$0xff] %v11192_v40  ;;  %v2206_v36 = vadd.f32 %v2174_v46, %v2106_v60  ;;  %v1782_v9 = vld [vmem:[#allocation3 + $0x78] sm:$0xff]  ;;  %v11205_v29 = vld [vmem:[#allocation2 + $0x12f] sm:$0xff]  ;;  %v1881_v52 = vadd.f32 %v1849_v3, %v1781_v50  ;;  %v11229_v24 = vmul.f32 %v10786_v20, %v11067_v38 }
 0x274   : > { %2075 = vst.msk [vmem:[#allocation3 + $0x58] sm:$0xff] %vm1463_vm1, %v2043_v26  ;;  %1751 = vst.msk [vmem:[#allocation3 + $0x88] sm:$0xff] %vm1463_vm1, %v1719_v39  ;;  %v2012_v26 = vmul.f32 %v10737_v62, %v11184_v37  ;;  %v1882_v39 = vadd.f32 %v1850_v55, %v1782_v9  ;;  %v11212_v16 = vld [vmem:[#allocation2 + $0x110] sm:$0xff]  ;;  %v11214_v43 = vld [vmem:[#allocation2 + $0x108] sm:$0xff]  ;;  %v2175_v55 = vmul.f32 %v10759_v27, %v10956_v44 }
 0x275   : > { %15393 = vst [vmem:[#allocation28_spill] sm:$0xff] %v11205_v29  ;;  %2563 = vst.msk [vmem:[#allocation3 + $0x20] sm:$0xff] %vm1463_vm1, %v2531_v17  ;;  %v1621_v46 = vld [vmem:[#allocation3 + $0x98] sm:$0xff]  ;;  %v11221_v17 = vmul.f32 %v10888_v47, %v10890_v49  ;;  %v1944_v60 = vld [vmem:[#allocation3 + $0x60] sm:$0xff]  ;;  %v1688_v9 = vmul.f32 %v10719_v57, %v11187_v54  ;;  %v1689_v40 = vmul.f32 %v10719_v57, %v11205_v29 }
 0x276   : > { %15394 = vst [vmem:[#allocation29_spill] sm:$0xff] %v11212_v16  ;;  %15395 = vst [vmem:[#allocation30_spill] sm:$0xff] %v11214_v43  ;;  %v11233_v3 = vld [vmem:[#allocation2 + $0xf1] sm:$0xff]  ;;  %v11237_v49 = vld [vmem:[#allocation2 + $0xe9] sm:$0xff] }
 0x277   : > { %2564 = vst.msk [vmem:[#allocation3 + $0x28] sm:$0xff] %vm1463_vm1, %v2532_v48  ;;  %2237 = vst.msk [vmem:[#allocation3 + $0x40] sm:$0xff] %vm1463_vm1, %v2205_v41  ;;  %v1945_v48 = vld [vmem:[#allocation3 + $0x68] sm:$0xff]  ;;  %v2433_v41 = vld [vmem:[#allocation3 + $0x30] sm:$0xff]  ;;  %v1721_v54 = vadd.f32 %v1689_v40, %v1621_v46  ;;  %v2015_v40 = vmul.f32 %v10737_v62, %v11233_v3 }
 0x278   : > { %2238 = vst.msk [vmem:[#allocation3 + $0x48] sm:$0xff] %vm1463_vm1, %v2206_v36  ;;  %v2044_v36 = vadd.f32 %v2012_v26, %v1944_v60  ;;  %1913 = vst.msk [vmem:[#allocation3 + $0x70] sm:$0xff] %vm1463_vm1, %v1881_v52  ;;  %v2045_v31 = vadd.f32 %v2013_v34, %v1945_v48  ;;  %v11239_v50 = vld [vmem:[#allocation2 + $0x111] sm:$0xff]  ;;  %v2533_v11 = vadd.f32 %v11116_v14, %v2433_v41 }
 0x279   : > { %1914 = vst.msk [vmem:[#allocation3 + $0x78] sm:$0xff] %vm1463_vm1, %v1882_v39  ;;  %v2594_v1 = vld [vmem:[#allocation3 + $0x10] sm:$0xff]  ;;  %v2595_v23 = vld [vmem:[#allocation3 + $0x18] sm:$0xff]  ;;  %v2176_v26 = vmul.f32 %v10759_v27, %v10958_v33  ;;  %v1852_v52 = vmul.f32 %v10728_v51, %v11212_v16  ;;  %v1851_v34 = vmul.f32 %v10728_v51, %v11214_v43  ;;  %v11252_v39 = vld [vmem:[#allocation2 + $0x128] sm:$0xff]  ;;  %v1720_v41 = vadd.f32 %v1688_v9, %v1620_v18 }
 0x27a   : > { %v2695_v60 = vadd.f32 %v11048_v59, %v2594_v1  ;;  %v2696_v48 = vadd.f32 %v11052_v35, %v2595_v23  ;;  %v2434_v57 = vld [vmem:[#allocation3 + $0x38] sm:$0xff]  ;;  %2076 = vst.msk [vmem:[#allocation3 + $0x60] sm:$0xff] %vm1463_vm1, %v2044_v36  ;;  %v2107_v29 = vld [vmem:[#allocation3 + $0x50] sm:$0xff]  ;;  %2077 = vst.msk [vmem:[#allocation3 + $0x68] sm:$0xff] %vm1463_vm1, %v2045_v31  ;;  %v11262_v59 = vmul.f32 %v10786_v20, %v11069_v15 }
 0x27b   : > { %v1783_v14 = vld [vmem:[#allocation3 + $0x80] sm:$0xff]  ;;  %2565 = vst.msk [vmem:[#allocation3 + $0x30] sm:$0xff] %vm1463_vm1, %v2533_v11  ;;  %v2534_v16 = vadd.f32 %v11085_v21, %v2434_v57  ;;  %v2108_v43 = vld [vmem:[#allocation3 + $0x58] sm:$0xff]  ;;  %v2207_v33 = vadd.f32 %v2175_v55, %v2107_v29  ;;  %v1784_v35 = vld [vmem:[#allocation3 + $0x88] sm:$0xff]  ;;  %v2014_v11 = vmul.f32 %v10737_v62, %v11237_v49  ;;  %v2177_v18 = vmul.f32 %v10759_v27, %v11020_v61 }
 0x27c   : > { %v1883_v1 = vadd.f32 %v1851_v34, %v1783_v14  ;;  %2727 = vst.msk [vmem:[#allocation3 + $0x10] sm:$0xff] %vm1463_vm1, %v2695_v60  ;;  %2728 = vst.msk [vmem:[#allocation3 + $0x18] sm:$0xff] %vm1463_vm1, %v2696_v48  ;;  %v2208_v23 = vadd.f32 %v2176_v26, %v2108_v43  ;;  %v1884_v21 = vadd.f32 %v1852_v52, %v1784_v35  ;;  %v2596_v20 = vld [vmem:[#allocation3 + $0x20] sm:$0xff]  ;;  %v11302_v34 = vld [vmem:[#allocation2 + $0x109] sm:$0xff] }
 0x27d   : > { %1752 = vst.msk [vmem:[#allocation3 + $0x90] sm:$0xff] %vm1463_vm1, %v1720_v41  ;;  %1753 = vst.msk [vmem:[#allocation3 + $0x98] sm:$0xff] %vm1463_vm1, %v1721_v54  ;;  %v2178_v29 = vmul.f32 %v10759_v27, %v11022_v5  ;;  %v11280_v43 = vmul.f32 %v10737_v62, %v11239_v50  ;;  %v11285_v54 = vmul.f32 %v10728_v51, %v11252_v39  ;;  %v15396_v60 = vld [vmem:[#allocation7_spill] sm:$0xff]  ;;  %v15397_v57 = vld [vmem:[#allocation8_spill] sm:$0xff] }
 0x27e   : > { %2566 = vst.msk [vmem:[#allocation3 + $0x38] sm:$0xff] %vm1463_vm1, %v2534_v16  ;;  %2239 = vst.msk [vmem:[#allocation3 + $0x50] sm:$0xff] %vm1463_vm1, %v2207_v33  ;;  %v2597_v46 = vld [vmem:[#allocation3 + $0x28] sm:$0xff]  ;;  %v2697_v16 = vadd.f32 %v11120_v45, %v2596_v20  ;;  %v2270_v33 = vld [vmem:[#allocation3 + $0x40] sm:$0xff]  ;;  %v1400_v27 = vadd.f32 %v10871_v25, %v10746_v4  ;;  %v1395_v62 = vadd.f32 %v10746_v4, %v10881_v30 }
 0x27f   : > { %1915 = vst.msk [vmem:[#allocation3 + $0x80] sm:$0xff] %vm1463_vm1, %v1883_v1  ;;  %v2271_v55 = vld [vmem:[#allocation3 + $0x48] sm:$0xff]  ;;  %2240 = vst.msk [vmem:[#allocation3 + $0x58] sm:$0xff] %vm1463_vm1, %v2208_v23  ;;  %v1410_v36 = vadd.f32 %v10897_v63, %v10746_v4  ;;  %v2698_v51 = vadd.f32 %v11130_v13, %v2597_v46  ;;  %v2370_v31 = vadd.f32 %v11203_v7, %v2270_v33  ;;  %v1946_v9 = vld [vmem:[#allocation3 + $0x70] sm:$0xff] }
 0x280   : > { %1916 = vst.msk [vmem:[#allocation3 + $0x88] sm:$0xff] %vm1463_vm1, %v1884_v21  ;;  %v2371_v45 = vadd.f32 %v11165_v53, %v2271_v55  ;;  %v1947_v26 = vld [vmem:[#allocation3 + $0x78] sm:$0xff]  ;;  %v1405_v52 = vadd.f32 %v10746_v4, %v10906_v19  ;;  %2729 = vst.msk [vmem:[#allocation3 + $0x20] sm:$0xff] %vm1463_vm1, %v2697_v16  ;;  %v2046_v25 = vadd.f32 %v2014_v11, %v1946_v9  ;;  %v11314_v7 = vld [vmem:[#allocation2 + $0x130] sm:$0xff] }
 0x281   : > { %v2047_v30 = vadd.f32 %v2015_v40, %v1947_v26  ;;  %1556 = vst.msk [vmem:[#allocation2 + $0x150] sm:$0xff] %vm1463_vm1, %v1400_v27  ;;  %1555 = vst.msk [vmem:[#allocation2 + $0x148] sm:$0xff] %vm1463_vm1, %v1395_v62  ;;  %v1420_v63 = vadd.f32 %v10924_v6, %v10746_v4  ;;  %v1415_v13 = vadd.f32 %v10746_v4, %v10937_v32  ;;  %v2109_v19 = vld [vmem:[#allocation3 + $0x60] sm:$0xff]  ;;  %v2110_v53 = vld [vmem:[#allocation3 + $0x68] sm:$0xff] }
 0x282   : > { %1558 = vst.msk [vmem:[#allocation2 + $0x170] sm:$0xff] %vm1463_vm1, %v1410_v36  ;;  %2730 = vst.msk [vmem:[#allocation3 + $0x28] sm:$0xff] %vm1463_vm1, %v2698_v51  ;;  %v1430_v48 = vadd.f32 %v15396_v60, %v10746_v4  ;;  %v1425_v6 = vadd.f32 %v10746_v4, %v15397_v57  ;;  %v15398_v32 = vld [vmem:[#allocation11_spill] sm:$0xff]  ;;  %v1435_v41 = vadd.f32 %v10746_v4, %v11032_v8  ;;  %v2598_v35 = vld [vmem:[#allocation3 + $0x30] sm:$0xff] }
 0x283   : > { %2402 = vst.msk [vmem:[#allocation3 + $0x40] sm:$0xff] %vm1463_vm1, %v2370_v31  ;;  %2403 = vst.msk [vmem:[#allocation3 + $0x48] sm:$0xff] %vm1463_vm1, %v2371_v45  ;;  %v1440_v14 = vadd.f32 %v15398_v32, %v10746_v4  ;;  %v2209_v1 = vadd.f32 %v2177_v18, %v2109_v19  ;;  %v2210_v23 = vadd.f32 %v2178_v29, %v2110_v53  ;;  %v9770_v40 = vld [vmem:[%s15245_s4] ss:$0 sm:$0xff]  ;;  %v15399_v11 = vld [vmem:[#allocation13_spill] sm:$0xff] }
 0x284   : > { %1557 = vst.msk [vmem:[#allocation2 + $0x168] sm:$0xff] %vm1463_vm1, %v1405_v52  ;;  %2078 = vst.msk [vmem:[#allocation3 + $0x70] sm:$0xff] %vm1463_vm1, %v2046_v25  ;;  %v1450_v21 = vadd.f32 %v9770_v40, %v15399_v11  ;;  %v15400_v20 = vld [vmem:[#allocation14_spill] sm:$0xff]  ;;  %v2760_v4 = vld [vmem:[#allocation3 + $0x10] sm:$0xff]  ;;  %v2699_v16 = vadd.f32 %v11221_v17, %v2598_v35 }
 0x285   : > { %2079 = vst.msk [vmem:[#allocation3 + $0x78] sm:$0xff] %vm1463_vm1, %v2047_v30  ;;  %1560 = vst.msk [vmem:[#allocation2 + $0x190] sm:$0xff] %vm1463_vm1, %v1420_v63  ;;  %v1445_v46 = vadd.f32 %v9770_v40, %v15400_v20  ;;  %v2761_v8 = vld [vmem:[#allocation3 + $0x18] sm:$0xff]  ;;  %v11338_v18 = vld [vmem:[%s15246_s5 + $0x2] ss:$0 sm:$0xff] }
 0x286   : > { %1559 = vst.msk [vmem:[#allocation2 + $0x188] sm:$0xff] %vm1463_vm1, %v1415_v13  ;;  %v2016_v29 = vmul.f32 %v11338_v18, %v11302_v34  ;;  %v1785_v33 = vld [vmem:[#allocation3 + $0x90] sm:$0xff]  ;;  %1562 = vst.msk [vmem:[#allocation2 + $0x1b0] sm:$0xff] %vm1463_vm1, %v1430_v48  ;;  %v15401_v55 = vld [vmem:[#allocation19_spill] sm:$0xff] }
 0x287   : > { %1561 = vst.msk [vmem:[#allocation2 + $0x1a8] sm:$0xff] %vm1463_vm1, %v1425_v6  ;;  %1564 = vst.msk [vmem:[#allocation2 + $0x1d0] sm:$0xff] %vm1463_vm1, %v1440_v14  ;;  %v1460_v27 = vadd.f32 %v9770_v40, %v15401_v55  ;;  %v15402_v17 = vld [vmem:[#allocation21_spill] sm:$0xff]  ;;  %v15403_v36 = vld [vmem:[#allocation12_spill] sm:$0xff]  ;;  %v1885_v63 = vadd.f32 %v11285_v54, %v1785_v33  ;;  %v2832_v54 = vmul.f32 %v10929_v12, %v10983_v58 }
 0x288   : > { %1563 = vst.msk [vmem:[#allocation2 + $0x1c8] sm:$0xff] %vm1463_vm1, %v1435_v41  ;;  %v1455_v62 = vadd.f32 %v9770_v40, %v15402_v17  ;;  %v2860_v51 = vadd.f32 %v15403_v36, %v2760_v4  ;;  %v15404_v31 = vld [vmem:[#allocation9_spill] sm:$0xff]  ;;  %v2272_v26 = vld [vmem:[#allocation3 + $0x50] sm:$0xff]  ;;  %2241 = vst.msk [vmem:[#allocation3 + $0x60] sm:$0xff] %vm1463_vm1, %v2209_v1  ;;  %v11383_v1 = vmul.f32 %v10825_v2, %v11167_v0 }
 0x289   : > { %v2861_v45 = vadd.f32 %v15404_v31, %v2761_v8  ;;  %v2599_v9 = vld [vmem:[#allocation3 + $0x38] sm:$0xff]  ;;  %2242 = vst.msk [vmem:[#allocation3 + $0x68] sm:$0xff] %vm1463_vm1, %v2210_v23  ;;  %v1948_v52 = vld [vmem:[#allocation3 + $0x80] sm:$0xff]  ;;  %1566 = vst.msk [vmem:[#allocation2 + $0x1f0] sm:$0xff] %vm1463_vm1, %v1450_v21  ;;  %v2372_v48 = vadd.f32 %v11262_v59, %v2272_v26  ;;  %v11387_v58 = vmul.f32 %v10929_v12, %v11067_v38 }
 0x28a   : > { %v11355_v25 = vld [vmem:[%s15246_s5 + $0x1] ss:$0 sm:$0xff]  ;;  %1565 = vst.msk [vmem:[#allocation2 + $0x1e8] sm:$0xff] %vm1463_vm1, %v1445_v46  ;;  %v15405_v13 = vld [vmem:[#allocation17_spill] sm:$0xff]  ;;  %v2700_v53 = vadd.f32 %v11225_v28, %v2599_v9  ;;  %2731 = vst.msk [vmem:[#allocation3 + $0x30] sm:$0xff] %vm1463_vm1, %v2699_v16  ;;  %v2048_v57 = vadd.f32 %v2016_v29, %v1948_v52  ;;  %v2505_v46 = vmul.f32 %v10825_v2, %v11184_v37 }
 0x28b   : > { %v1854_v30 = vmul.f32 %v11355_v25, %v11314_v7  ;;  %v2503_v19 = vmul.f32 %v10825_v2, %v15405_v13  ;;  %v2273_v60 = vld [vmem:[#allocation3 + $0x58] sm:$0xff]  ;;  %v1949_v32 = vld [vmem:[#allocation3 + $0x88] sm:$0xff]  ;;  %1568 = vst.msk [vmem:[#allocation2 + $0x210] sm:$0xff] %vm1463_vm1, %v1460_v27  ;;  %1567 = vst.msk [vmem:[#allocation2 + $0x208] sm:$0xff] %vm1463_vm1, %v1455_v62  ;;  %v11379_v35 = vmul.f32 %v10934_v42, %v15405_v13 }
 0x28c   : > { %v1786_v6 = vld [vmem:[#allocation3 + $0x98] sm:$0xff]  ;;  %2892 = vst.msk [vmem:[#allocation3 + $0x10] sm:$0xff] %vm1463_vm1, %v2860_v51  ;;  %2893 = vst.msk [vmem:[#allocation3 + $0x18] sm:$0xff] %vm1463_vm1, %v2861_v45  ;;  %v2373_v28 = vadd.f32 %v11229_v24, %v2273_v60  ;;  %v2049_v59 = vadd.f32 %v11280_v43, %v1949_v32  ;;  %v2762_v41 = vld [vmem:[#allocation3 + $0x20] sm:$0xff]  ;;  %v11391_v24 = vmul.f32 %v10934_v42, %v11167_v0 }
 0x28d   : > { %v1886_v14 = vadd.f32 %v1854_v30, %v1786_v6  ;;  %1917 = vst.msk [vmem:[#allocation3 + $0x90] sm:$0xff] %vm1463_vm1, %v1885_v63  ;;  %2732 = vst.msk [vmem:[#allocation3 + $0x38] sm:$0xff] %vm1463_vm1, %v2700_v53  ;;  %v11395_v43 = vld [vmem:[#allocation2 + $0x131] sm:$0xff]  ;;  %v11397_v23 = vld [vmem:[#allocation2 + $0x129] sm:$0xff]  ;;  %v11418_v27 = vmul.f32 %v10888_v47, %v10956_v44 }
 0x28e   : > { %2404 = vst.msk [vmem:[#allocation3 + $0x50] sm:$0xff] %vm1463_vm1, %v2372_v48  ;;  %2080 = vst.msk [vmem:[#allocation3 + $0x80] sm:$0xff] %vm1463_vm1, %v2048_v57  ;;  %v2763_v40 = vld [vmem:[#allocation3 + $0x28] sm:$0xff]  ;;  %v15406_v11 = vld [vmem:[#allocation22_spill] sm:$0xff] }
 0x28f   : > { %v2862_v21 = vadd.f32 %v15406_v11, %v2762_v41  ;;  %v2435_v20 = vld [vmem:[#allocation3 + $0x40] sm:$0xff]  ;;  %2405 = vst.msk [vmem:[#allocation3 + $0x58] sm:$0xff] %vm1463_vm1, %v2373_v28  ;;  %v2436_v38 = vld [vmem:[#allocation3 + $0x48] sm:$0xff]  ;;  %1918 = vst.msk [vmem:[#allocation3 + $0x98] sm:$0xff] %vm1463_vm1, %v1886_v14 }
 0x290   : > { %v11406_v0 = vld [vmem:[%s15246_s5 + $0x3] ss:$0 sm:$0xff]  ;;  %2081 = vst.msk [vmem:[#allocation3 + $0x88] sm:$0xff] %vm1463_vm1, %v2049_v59  ;;  %v15408_v29 = vld [vmem:[#allocation16_spill] sm:$0xff]  ;;  %v2535_v55 = vadd.f32 %v2503_v19, %v2435_v20  ;;  %v2536_v2 = vadd.f32 %v11173_v22, %v2436_v38  ;;  %v2112_v62 = vld [vmem:[#allocation3 + $0x78] sm:$0xff]  ;;  %v11443_v19 = vmul.f32 %v10929_v12, %v11069_v15  ;;  %v2019_v15 = vmul.f32 %v11338_v18, %v11395_v43 }
 0x291   : > { %v15407_v4 = vld [vmem:[#allocation18_spill] sm:$0xff]  ;;  %v2180_v16 = vmul.f32 %v11406_v0, %v11124_v56  ;;  %v2863_v33 = vadd.f32 %v15408_v29, %v2763_v40  ;;  %v2111_v17 = vld [vmem:[#allocation3 + $0x70] sm:$0xff]  ;;  %2894 = vst.msk [vmem:[#allocation3 + $0x20] sm:$0xff] %vm1463_vm1, %v2862_v21  ;;  %v15409_v45 = vld [vmem:[#allocation23_spill] sm:$0xff]  ;;  %v2018_v59 = vmul.f32 %v11338_v18, %v11397_v23 }
 0x292   : > { %v2179_v8 = vmul.f32 %v11406_v0, %v15407_v4  ;;  %v11420_v36 = vld [vmem:[#allocation2 + $0x147] sm:$0xff]  ;;  %v11426_v51 = vld [vmem:[%s15246_s5 + $0x4] ss:$0 sm:$0xff]  ;;  %v11432_v30 = vld [vmem:[#allocation2 + $0x14f] sm:$0xff]  ;;  %2567 = vst.msk [vmem:[#allocation3 + $0x40] sm:$0xff] %vm1463_vm1, %v2535_v55 }
 0x293   : > { %v2343_v31 = vmul.f32 %v11426_v51, %v11152_v10  ;;  %v2342_v22 = vmul.f32 %v11426_v51, %v15409_v45  ;;  %v2212_v44 = vadd.f32 %v2180_v16, %v2112_v62  ;;  %v1622_v26 = vld [vmem:[#allocation3 + $0xa0] sm:$0xff]  ;;  %v1623_v52 = vld [vmem:[#allocation3 + $0xa8] sm:$0xff]  ;;  %2895 = vst.msk [vmem:[#allocation3 + $0x28] sm:$0xff] %vm1463_vm1, %v2863_v33  ;;  %2568 = vst.msk [vmem:[#allocation3 + $0x48] sm:$0xff] %vm1463_vm1, %v2536_v2 }
 0x294   : > { %v2211_v9 = vadd.f32 %v2179_v8, %v2111_v17  ;;  %v15410_v63 = vld [vmem:[#allocation6_spill] sm:$0xff]  ;;  %v2275_v60 = vld [vmem:[#allocation3 + $0x68] sm:$0xff]  ;;  %v2764_v32 = vld [vmem:[#allocation3 + $0x30] sm:$0xff] }
 0x295   : > { %v11439_v13 = vmul.f32 %v10888_v47, %v15410_v63  ;;  %v2274_v53 = vld [vmem:[#allocation3 + $0x60] sm:$0xff]  ;;  %v2375_v14 = vadd.f32 %v2343_v31, %v2275_v60  ;;  %2244 = vst.msk [vmem:[#allocation3 + $0x78] sm:$0xff] %vm1463_vm1, %v2212_v44  ;;  %v2925_v41 = vld [vmem:[#allocation3 + $0x10] sm:$0xff]  ;;  %v2926_v40 = vld [vmem:[#allocation3 + $0x18] sm:$0xff]  ;;  %v2864_v11 = vadd.f32 %v2832_v54, %v2764_v32 }
 0x296   : > { %v11448_v48 = vld [vmem:[%s15246_s5] ss:$0 sm:$0xff]  ;;  %v2374_v28 = vadd.f32 %v2342_v22, %v2274_v53  ;;  %2243 = vst.msk [vmem:[#allocation3 + $0x70] sm:$0xff] %vm1463_vm1, %v2211_v9  ;;  %v1950_v21 = vld [vmem:[#allocation3 + $0x90] sm:$0xff]  ;;  %v15412_v29 = vld [vmem:[#allocation15_spill] sm:$0xff] }
 0x297   : > { %v1690_v57 = vmul.f32 %v11448_v48, %v11420_v36  ;;  %v1691_v6 = vmul.f32 %v11448_v48, %v11432_v30  ;;  %v15411_v20 = vld [vmem:[#allocation26_spill] sm:$0xff]  ;;  %v3025_v33 = vadd.f32 %v15412_v29, %v2925_v41  ;;  %v2765_v17 = vld [vmem:[#allocation3 + $0x38] sm:$0xff]  ;;  %v2437_v62 = vld [vmem:[#allocation3 + $0x50] sm:$0xff]  ;;  %2407 = vst.msk [vmem:[#allocation3 + $0x68] sm:$0xff] %vm1463_vm1, %v2375_v14  ;;  %v2050_v31 = vadd.f32 %v2018_v59, %v1950_v21 }
 0x298   : > { %v2181_v38 = vmul.f32 %v11406_v0, %v15411_v20  ;;  %v15413_v55 = vld [vmem:[#allocation10_spill] sm:$0xff]  ;;  %2406 = vst.msk [vmem:[#allocation3 + $0x60] sm:$0xff] %vm1463_vm1, %v2374_v28  ;;  %v15414_v9 = vld [vmem:[#allocation28_spill] sm:$0xff]  ;;  %v15415_v44 = vld [vmem:[#allocation25_spill] sm:$0xff] }
 0x299   : > { %v1722_v8 = vadd.f32 %v1690_v57, %v1622_v26  ;;  %v1723_v16 = vadd.f32 %v1691_v6, %v1623_v52  ;;  %v3026_v2 = vadd.f32 %v15413_v55, %v2926_v40  ;;  %v2113_v22 = vld [vmem:[#allocation3 + $0x80] sm:$0xff]  ;;  %v2182_v54 = vmul.f32 %v11406_v0, %v15414_v9  ;;  %2896 = vst.msk [vmem:[#allocation3 + $0x30] sm:$0xff] %vm1463_vm1, %v2864_v11  ;;  %v2438_v53 = vld [vmem:[#allocation3 + $0x58] sm:$0xff]  ;;  %v2114_v60 = vld [vmem:[#allocation3 + $0x88] sm:$0xff] }
 0x29a   : > { %v2865_v63 = vadd.f32 %v15415_v44, %v2765_v17  ;;  %v2537_v26 = vadd.f32 %v2505_v46, %v2437_v62  ;;  %v11472_v52 = vmul.f32 %v10934_v42, %v11184_v37  ;;  %v2213_v57 = vadd.f32 %v2181_v38, %v2113_v22  ;;  %v1951_v6 = vld [vmem:[#allocation3 + $0x98] sm:$0xff]  ;;  %3057 = vst.msk [vmem:[#allocation3 + $0x10] sm:$0xff] %vm1463_vm1, %v3025_v33  ;;  %v11481_v46 = vld [vmem:[%s15246_s5 + $0x5] ss:$0 sm:$0xff]  ;;  %v11487_v14 = vld [vmem:[#allocation2 + $0x150] sm:$0xff] }
 0x29b   : > { %1754 = vst.msk [vmem:[#allocation3 + $0xa0] sm:$0xff] %vm1463_vm1, %v1722_v8  ;;  %1755 = vst.msk [vmem:[#allocation3 + $0xa8] sm:$0xff] %vm1463_vm1, %v1723_v16  ;;  %v2508_v37 = vmul.f32 %v11481_v46, %v11233_v3  ;;  %v2538_v32 = vadd.f32 %v11383_v1, %v2438_v53  ;;  %v2214_v28 = vadd.f32 %v2182_v54, %v2114_v60  ;;  %v11489_v59 = vld [vmem:[#allocation2 + $0x148] sm:$0xff]  ;;  %v2927_v40 = vld [vmem:[#allocation3 + $0x20] sm:$0xff] }
 0x29c   : > { %3058 = vst.msk [vmem:[#allocation3 + $0x18] sm:$0xff] %vm1463_vm1, %v3026_v2  ;;  %2082 = vst.msk [vmem:[#allocation3 + $0x90] sm:$0xff] %vm1463_vm1, %v2050_v31  ;;  %v2051_v41 = vadd.f32 %v2019_v15, %v1951_v6  ;;  %v11495_v11 = vmul.f32 %v10929_v12, %v11152_v10  ;;  %v11499_v1 = vmul.f32 %v10934_v42, %v11233_v3  ;;  %v1624_v15 = vld [vmem:[#allocation3 + $0xb0] sm:$0xff]  ;;  %v11508_v8 = vld [vmem:[#allocation2 + $0x167] sm:$0xff] }
 0x29d   : > { %2897 = vst.msk [vmem:[#allocation3 + $0x38] sm:$0xff] %vm1463_vm1, %v2865_v63  ;;  %2569 = vst.msk [vmem:[#allocation3 + $0x50] sm:$0xff] %vm1463_vm1, %v2537_v26  ;;  %v2507_v21 = vmul.f32 %v11481_v46, %v11237_v49  ;;  %v11505_v38 = vmul.f32 %v10888_v47, %v11020_v61  ;;  %v11510_v16 = vld [vmem:[#allocation2 + $0x16f] sm:$0xff]  ;;  %v2600_v55 = vld [vmem:[#allocation3 + $0x40] sm:$0xff]  ;;  %v11516_v2 = vmul.f32 %v10888_v47, %v11022_v5 }
 0x29e   : > { %2245 = vst.msk [vmem:[#allocation3 + $0x80] sm:$0xff] %vm1463_vm1, %v2213_v57  ;;  %v2928_v10 = vld [vmem:[#allocation3 + $0x28] sm:$0xff]  ;;  %v15416_v29 = vld [vmem:[#allocation24_spill] sm:$0xff]  ;;  %2570 = vst.msk [vmem:[#allocation3 + $0x58] sm:$0xff] %vm1463_vm1, %v2538_v32  ;;  %v2701_v44 = vadd.f32 %v11418_v27, %v2600_v55  ;;  %v11529_v47 = vmul.f32 %v10929_v12, %v15409_v45  ;;  %v1692_v6 = vmul.f32 %v11448_v48, %v11508_v8 }
 0x29f   : > { %v3027_v33 = vadd.f32 %v15416_v29, %v2927_v40  ;;  %v2601_v3 = vld [vmem:[#allocation3 + $0x48] sm:$0xff]  ;;  %v15417_v61 = vld [vmem:[#allocation29_spill] sm:$0xff]  ;;  %v15418_v62 = vld [vmem:[#allocation30_spill] sm:$0xff]  ;;  %2246 = vst.msk [vmem:[#allocation3 + $0x88] sm:$0xff] %vm1463_vm1, %v2214_v28  ;;  %v1693_v32 = vmul.f32 %v11448_v48, %v11510_v16  ;;  %v11541_v27 = vmul.f32 %v10934_v42, %v11237_v49  ;;  %v1855_v28 = vmul.f32 %v11355_v25, %v11489_v59 }
 0x2a0   : > { %v2345_v17 = vmul.f32 %v11426_v51, %v15417_v61  ;;  %v2344_v31 = vmul.f32 %v11426_v51, %v15418_v62  ;;  %2083 = vst.msk [vmem:[#allocation3 + $0x98] sm:$0xff] %vm1463_vm1, %v2051_v41  ;;  %v15419_v22 = vld [vmem:[#allocation20_spill] sm:$0xff]  ;;  %v2702_v63 = vadd.f32 %v11439_v13, %v2601_v3  ;;  %v2277_v26 = vld [vmem:[#allocation3 + $0x78] sm:$0xff]  ;;  %2733 = vst.msk [vmem:[#allocation3 + $0x40] sm:$0xff] %vm1463_vm1, %v2701_v44 }
 0x2a1   : > { %v3028_v54 = vadd.f32 %v15419_v22, %v2928_v10  ;;  %v2276_v5 = vld [vmem:[#allocation3 + $0x70] sm:$0xff]  ;;  %v1625_v53 = vld [vmem:[#allocation3 + $0xb8] sm:$0xff]  ;;  %3059 = vst.msk [vmem:[#allocation3 + $0x20] sm:$0xff] %vm1463_vm1, %v3027_v33  ;;  %v2439_v12 = vld [vmem:[#allocation3 + $0x60] sm:$0xff]  ;;  %v1856_v13 = vmul.f32 %v11355_v25, %v11487_v14  ;;  %v2183_v41 = vmul.f32 %v11406_v0, %v11420_v36  ;;  %v1724_v49 = vadd.f32 %v1692_v6, %v1624_v15 }
 0x2a2   : > { %v2376_v60 = vadd.f32 %v2344_v31, %v2276_v5  ;;  %v2377_v57 = vadd.f32 %v2345_v17, %v2277_v26  ;;  %2734 = vst.msk [vmem:[#allocation3 + $0x48] sm:$0xff] %vm1463_vm1, %v2702_v63  ;;  %v2440_v45 = vld [vmem:[#allocation3 + $0x68] sm:$0xff]  ;;  %v2929_v40 = vld [vmem:[#allocation3 + $0x30] sm:$0xff]  ;;  %v2539_v10 = vadd.f32 %v2507_v21, %v2439_v12  ;;  %v1787_v33 = vld [vmem:[#allocation3 + $0xa0] sm:$0xff]  ;;  %v1725_v55 = vadd.f32 %v1693_v32, %v1625_v53 }
 0x2a3   : > { %3060 = vst.msk [vmem:[#allocation3 + $0x28] sm:$0xff] %vm1463_vm1, %v3028_v54  ;;  %v2540_v29 = vadd.f32 %v2508_v37, %v2440_v45  ;;  %v1788_v42 = vld [vmem:[#allocation3 + $0xa8] sm:$0xff]  ;;  %v3029_v3 = vadd.f32 %v11379_v35, %v2929_v40  ;;  %v2346_v17 = vmul.f32 %v11426_v51, %v11252_v39  ;;  %v1887_v31 = vadd.f32 %v1855_v28, %v1787_v33  ;;  %v2115_v54 = vld [vmem:[#allocation3 + $0x90] sm:$0xff]  ;;  %v11574_v12 = vld [vmem:[%s15246_s5 + $0x7] ss:$0 sm:$0xff] }
 0x2a4   : > { %2408 = vst.msk [vmem:[#allocation3 + $0x70] sm:$0xff] %vm1463_vm1, %v2376_v60  ;;  %2409 = vst.msk [vmem:[#allocation3 + $0x78] sm:$0xff] %vm1463_vm1, %v2377_v57  ;;  %v1888_v22 = vadd.f32 %v1856_v13, %v1788_v42  ;;  %v11554_v44 = vld [vmem:[#allocation2 + $0x187] sm:$0xff]  ;;  %v11556_v21 = vld [vmem:[#allocation2 + $0x18f] sm:$0xff]  ;;  %v2510_v15 = vmul.f32 %v11481_v46, %v11239_v50  ;;  %v2347_v35 = vmul.f32 %v11426_v51, %v11314_v7 }
 0x2a5   : > { %v2930_v63 = vld [vmem:[#allocation3 + $0x38] sm:$0xff]  ;;  %2571 = vst.msk [vmem:[#allocation3 + $0x60] sm:$0xff] %vm1463_vm1, %v2539_v10  ;;  %v2602_v37 = vld [vmem:[#allocation3 + $0x50] sm:$0xff]  ;;  %2572 = vst.msk [vmem:[#allocation3 + $0x68] sm:$0xff] %vm1463_vm1, %v2540_v29  ;;  %v2184_v26 = vmul.f32 %v11406_v0, %v11432_v30  ;;  %v2215_v53 = vadd.f32 %v2183_v41, %v2115_v54  ;;  %v11578_v45 = vmul.f32 %v11574_v12, %v15417_v61 }
 0x2a6   : > { %v2278_v5 = vld [vmem:[#allocation3 + $0x80] sm:$0xff]  ;;  %1756 = vst.msk [vmem:[#allocation3 + $0xb0] sm:$0xff] %vm1463_vm1, %v1724_v49  ;;  %1757 = vst.msk [vmem:[#allocation3 + $0xb8] sm:$0xff] %vm1463_vm1, %v1725_v55  ;;  %v15420_v60 = vld [vmem:[#allocation27_spill] sm:$0xff]  ;;  %v2703_v32 = vadd.f32 %v11505_v38, %v2602_v37  ;;  %v1694_v37 = vmul.f32 %v11448_v48, %v11554_v44 }
 0x2a7   : > { %v3030_v57 = vadd.f32 %v15420_v60, %v2930_v63  ;;  %3061 = vst.msk [vmem:[#allocation3 + $0x30] sm:$0xff] %vm1463_vm1, %v3029_v3  ;;  %v2603_v6 = vld [vmem:[#allocation3 + $0x58] sm:$0xff]  ;;  %v2279_v13 = vld [vmem:[#allocation3 + $0x88] sm:$0xff]  ;;  %v2378_v28 = vadd.f32 %v2346_v17, %v2278_v5  ;;  %1919 = vst.msk [vmem:[#allocation3 + $0xa0] sm:$0xff] %vm1463_vm1, %v1887_v31  ;;  %v11610_v3 = vmul.f32 %v11574_v12, %v15418_v62 }
 0x2a8   : > { %1920 = vst.msk [vmem:[#allocation3 + $0xa8] sm:$0xff] %vm1463_vm1, %v1888_v22  ;;  %v2116_v41 = vld [vmem:[#allocation3 + $0x98] sm:$0xff]  ;;  %v2704_v40 = vadd.f32 %v11516_v2, %v2603_v6  ;;  %v11586_v38 = vld [vmem:[%s15246_s5 + $0x8] ss:$0 sm:$0xff]  ;;  %v2379_v61 = vadd.f32 %v2347_v35, %v2279_v13  ;;  %2247 = vst.msk [vmem:[#allocation3 + $0x90] sm:$0xff] %vm1463_vm1, %v2215_v53  ;;  %v2509_v2 = vmul.f32 %v11481_v46, %v11302_v34 }
 0x2a9   : > { %v11590_v10 = vmul.f32 %v11586_v38, %v11239_v50  ;;  %v2216_v29 = vadd.f32 %v2184_v26, %v2116_v41  ;;  %v11593_v33 = vld [vmem:[#allocation2 + $0x168] sm:$0xff]  ;;  %v1626_v42 = vld [vmem:[#allocation3 + $0xc0] sm:$0xff]  ;;  %3062 = vst.msk [vmem:[#allocation3 + $0x38] sm:$0xff] %vm1463_vm1, %v3030_v57  ;;  %2735 = vst.msk [vmem:[#allocation3 + $0x50] sm:$0xff] %vm1463_vm1, %v2703_v32  ;;  %v1695_v35 = vmul.f32 %v11448_v48, %v11556_v21 }
 0x2aa   : > { %v11602_v49 = vld [vmem:[%s15246_s5 + $0x6] ss:$0 sm:$0xff]  ;;  %2410 = vst.msk [vmem:[#allocation3 + $0x80] sm:$0xff] %vm1463_vm1, %v2378_v28  ;;  %v11613_v17 = vld [vmem:[#allocation2 + $0x151] sm:$0xff]  ;;  %v11615_v31 = vld [vmem:[#allocation2 + $0x149] sm:$0xff]  ;;  %v11638_v53 = vmul.f32 %v11574_v12, %v11314_v7  ;;  %v1857_v57 = vmul.f32 %v11355_v25, %v11593_v33  ;;  %v1726_v13 = vadd.f32 %v1694_v37, %v1626_v42 }
 0x2ab   : > { %v2673_v50 = vmul.f32 %v11602_v49, %v15407_v4  ;;  %v2674_v55 = vmul.f32 %v11602_v49, %v11124_v56  ;;  %v1627_v22 = vld [vmem:[#allocation3 + $0xc8] sm:$0xff]  ;;  %v2766_v54 = vld [vmem:[#allocation3 + $0x40] sm:$0xff]  ;;  %2736 = vst.msk [vmem:[#allocation3 + $0x58] sm:$0xff] %vm1463_vm1, %v2704_v40  ;;  %v11620_v4 = vmul.f32 %v11586_v38, %v11302_v34  ;;  %v11624_v56 = vmul.f32 %v11481_v46, %v11395_v43  ;;  %v11628_v62 = vld [vmem:[#allocation2 + $0x170] sm:$0xff] }
 0x2ac   : > { %v2767_v63 = vld [vmem:[#allocation3 + $0x48] sm:$0xff]  ;;  %2411 = vst.msk [vmem:[#allocation3 + $0x88] sm:$0xff] %vm1463_vm1, %v2379_v61  ;;  %2248 = vst.msk [vmem:[#allocation3 + $0x98] sm:$0xff] %vm1463_vm1, %v2216_v29  ;;  %v2866_v5 = vadd.f32 %v11443_v19, %v2766_v54  ;;  %v2441_v26 = vld [vmem:[#allocation3 + $0x70] sm:$0xff]  ;;  %v1727_v28 = vadd.f32 %v1695_v35, %v1627_v22  ;;  %v2021_v7 = vmul.f32 %v11338_v18, %v11613_v17 }
 0x2ad   : > { %v2867_v34 = vadd.f32 %v11387_v58, %v2767_v63  ;;  %v2442_v60 = vld [vmem:[#allocation3 + $0x78] sm:$0xff]  ;;  %v2541_v6 = vadd.f32 %v2509_v2, %v2441_v26  ;;  %v2604_v19 = vld [vmem:[#allocation3 + $0x60] sm:$0xff]  ;;  %v2605_v41 = vld [vmem:[#allocation3 + $0x68] sm:$0xff]  ;;  %v11646_v58 = vmul.f32 %v11586_v38, %v11395_v43  ;;  %v2020_v40 = vmul.f32 %v11338_v18, %v11615_v31  ;;  %1758 = vst.msk [vmem:[#allocation3 + $0xc0] sm:$0xff] %vm1463_vm1, %v1726_v13 }
 0x2ae   : > { %v2542_v32 = vadd.f32 %v2510_v15, %v2442_v60  ;;  %2898 = vst.msk [vmem:[#allocation3 + $0x40] sm:$0xff] %vm1463_vm1, %v2866_v5  ;;  %v1858_v15 = vmul.f32 %v11355_v25, %v11628_v62  ;;  %v1789_v61 = vld [vmem:[#allocation3 + $0xb0] sm:$0xff]  ;;  %v3087_v29 = vld [vmem:[#allocation3] sm:$0xff]  ;;  %v2705_v43 = vadd.f32 %v2673_v50, %v2604_v19  ;;  %v2706_v2 = vadd.f32 %v2674_v55, %v2605_v41  ;;  %v1790_v63 = vld [vmem:[#allocation3 + $0xb8] sm:$0xff] }
 0x2af   : > { %2899 = vst.msk [vmem:[#allocation3 + $0x48] sm:$0xff] %vm1463_vm1, %v2867_v34  ;;  %v11657_v42 = vld [vmem:[%s15247_s6] ss:$0 sm:$0xff]  ;;  %2573 = vst.msk [vmem:[#allocation3 + $0x70] sm:$0xff] %vm1463_vm1, %v2541_v6  ;;  %v2348_v54 = vmul.f32 %v11426_v51, %v11489_v59  ;;  %v1889_v37 = vadd.f32 %v1857_v57, %v1789_v61  ;;  %v1953_v35 = vld [vmem:[#allocation3 + $0xa8] sm:$0xff]  ;;  %v2511_v34 = vmul.f32 %v11481_v46, %v11397_v23 }
 0x2b0   : > { %15421 = vst [vmem:[#allocation7_spill] sm:$0xff] %v11657_v42  ;;  %2574 = vst.msk [vmem:[#allocation3 + $0x78] sm:$0xff] %vm1463_vm1, %v2542_v32  ;;  %v1952_v22 = vld [vmem:[#allocation3 + $0xa0] sm:$0xff]  ;;  %v3088_v5 = vld [vmem:[#allocation3 + $0x8] sm:$0xff]  ;;  %v1890_v55 = vadd.f32 %v1858_v15, %v1790_v63  ;;  %v2053_v60 = vadd.f32 %v2021_v7, %v1953_v35  ;;  %v2676_v41 = vmul.f32 %v11602_v49, %v15414_v9 }
 0x2b1   : > { %1759 = vst.msk [vmem:[#allocation3 + $0xc8] sm:$0xff] %vm1463_vm1, %v1727_v28  ;;  %v2052_v26 = vadd.f32 %v2020_v40, %v1952_v22  ;;  %v2280_v50 = vld [vmem:[#allocation3 + $0x90] sm:$0xff]  ;;  %v11669_v32 = vld [vmem:[#allocation2 + $0x188] sm:$0xff]  ;;  %2737 = vst.msk [vmem:[#allocation3 + $0x60] sm:$0xff] %vm1463_vm1, %v2705_v43  ;;  %v2675_v28 = vmul.f32 %v11602_v49, %v15411_v20  ;;  %v2349_v7 = vmul.f32 %v11426_v51, %v11487_v14 }
 0x2b2   : > { %v11667_v6 = vld [vmem:[#allocation2 + $0x190] sm:$0xff]  ;;  %v11671_v19 = vld [vmem:[#allocation2 + $0x1a7] sm:$0xff]  ;;  %2738 = vst.msk [vmem:[#allocation3 + $0x68] sm:$0xff] %vm1463_vm1, %v2706_v2  ;;  %v2380_v40 = vadd.f32 %v2348_v54, %v2280_v50  ;;  %1921 = vst.msk [vmem:[#allocation3 + $0xb0] sm:$0xff] %vm1463_vm1, %v1889_v37  ;;  %v11687_v2 = vmul.f32 %v11574_v12, %v11252_v39  ;;  %v11691_v20 = vmul.f32 %v11586_v38, %v11397_v23 }
 0x2b3   : > { %v2768_v57 = vld [vmem:[#allocation3 + $0x50] sm:$0xff]  ;;  %v2443_v13 = vld [vmem:[#allocation3 + $0x80] sm:$0xff]  ;;  %v2769_v61 = vld [vmem:[#allocation3 + $0x58] sm:$0xff]  ;;  %2084 = vst.msk [vmem:[#allocation3 + $0xa0] sm:$0xff] %vm1463_vm1, %v2052_v26  ;;  %v11700_v23 = vadd.f32 %v11657_v42, %v3087_v29  ;;  %v11715_v50 = vadd.f32 %v11657_v42, %v3088_v5  ;;  %v1860_v5 = vmul.f32 %v11355_v25, %v11667_v6 }
 0x2b4   : > { %v11682_v15 = vld [vmem:[#allocation2 + $0x1af] sm:$0xff]  ;;  %v2868_v43 = vadd.f32 %v11529_v47, %v2768_v57  ;;  %v2543_v22 = vadd.f32 %v2511_v34, %v2443_v13  ;;  %v2281_v9 = vld [vmem:[#allocation3 + $0x98] sm:$0xff]  ;;  %1922 = vst.msk [vmem:[#allocation3 + $0xb8] sm:$0xff] %vm1463_vm1, %v1890_v55  ;;  %2085 = vst.msk [vmem:[#allocation3 + $0xa8] sm:$0xff] %vm1463_vm1, %v2053_v60  ;;  %v2869_v63 = vadd.f32 %v11495_v11, %v2769_v61 }
 0x2b5   : > { %v2444_v54 = vld [vmem:[#allocation3 + $0x88] sm:$0xff]  ;;  %v2381_v47 = vadd.f32 %v2349_v7, %v2281_v9  ;;  %2412 = vst.msk [vmem:[#allocation3 + $0x90] sm:$0xff] %vm1463_vm1, %v2380_v40  ;;  %v1628_v37 = vld [vmem:[#allocation3 + $0xd0] sm:$0xff]  ;;  %v1629_v35 = vld [vmem:[#allocation3 + $0xd8] sm:$0xff]  ;;  %v11706_v34 = vmul.f32 %v11481_v46, %v11613_v17  ;;  %v1696_v11 = vmul.f32 %v11448_v48, %v11671_v19  ;;  %v11720_v60 = vmul.f32 %v11574_v12, %v11487_v14 }
 0x2b6   : > { %v2544_v39 = vadd.f32 %v11624_v56, %v2444_v54  ;;  %15422 = vst [vmem:[#allocation8_spill] sm:$0xff] %v11700_v23  ;;  %2900 = vst.msk [vmem:[#allocation3 + $0x50] sm:$0xff] %vm1463_vm1, %v2868_v43  ;;  %v11708_v26 = vld [vmem:[#allocation2 + $0x169] sm:$0xff]  ;;  %v1697_v56 = vmul.f32 %v11448_v48, %v11682_v15  ;;  %v2931_v29 = vld [vmem:[#allocation3 + $0x40] sm:$0xff]  ;;  %v11724_v57 = vmul.f32 %v11586_v38, %v11613_v17 }
 0x2b7   : > { %2575 = vst.msk [vmem:[#allocation3 + $0x80] sm:$0xff] %vm1463_vm1, %v2543_v22  ;;  %15423 = vst [vmem:[#allocation11_spill] sm:$0xff] %v11715_v50  ;;  %v2932_v55 = vld [vmem:[#allocation3 + $0x48] sm:$0xff]  ;;  %v11728_v13 = vld [vmem:[#allocation2 + $0x171] sm:$0xff]  ;;  %v1859_v7 = vmul.f32 %v11355_v25, %v11669_v32  ;;  %v3031_v40 = vadd.f32 %v11472_v52, %v2931_v29  ;;  %v1728_v22 = vadd.f32 %v1696_v11, %v1628_v37 }
 0x2b8   : > { %2901 = vst.msk [vmem:[#allocation3 + $0x58] sm:$0xff] %vm1463_vm1, %v2869_v63  ;;  %2413 = vst.msk [vmem:[#allocation3 + $0x98] sm:$0xff] %vm1463_vm1, %v2381_v47  ;;  %v3032_v14 = vadd.f32 %v11391_v24, %v2932_v55  ;;  %v2606_v61 = vld [vmem:[#allocation3 + $0x70] sm:$0xff]  ;;  %v2607_v43 = vld [vmem:[#allocation3 + $0x78] sm:$0xff]  ;;  %v1729_v9 = vadd.f32 %v1697_v56, %v1629_v35  ;;  %v2022_v47 = vmul.f32 %v11338_v18, %v11708_v26 }
 0x2b9   : > { %2576 = vst.msk [vmem:[#allocation3 + $0x88] sm:$0xff] %vm1463_vm1, %v2544_v39  ;;  %v1791_v17 = vld [vmem:[#allocation3 + $0xc0] sm:$0xff]  ;;  %v2707_v54 = vadd.f32 %v2675_v28, %v2606_v61  ;;  %v2708_v63 = vadd.f32 %v2676_v41, %v2607_v43  ;;  %v1792_v39 = vld [vmem:[#allocation3 + $0xc8] sm:$0xff]  ;;  %3063 = vst.msk [vmem:[#allocation3 + $0x40] sm:$0xff] %vm1463_vm1, %v3031_v40  ;;  %v2023_v24 = vmul.f32 %v11338_v18, %v11728_v13 }
 0x2ba   : > { %v1891_v50 = vadd.f32 %v1859_v7, %v1791_v17  ;;  %3064 = vst.msk [vmem:[#allocation3 + $0x48] sm:$0xff] %vm1463_vm1, %v3032_v14  ;;  %v2770_v23 = vld [vmem:[#allocation3 + $0x60] sm:$0xff]  ;;  %v2771_v52 = vld [vmem:[#allocation3 + $0x68] sm:$0xff]  ;;  %v1954_v29 = vld [vmem:[#allocation3 + $0xb0] sm:$0xff]  ;;  %v2185_v37 = vmul.f32 %v11406_v0, %v11508_v8  ;;  %v2186_v28 = vmul.f32 %v11406_v0, %v11510_v16  ;;  %v1892_v41 = vadd.f32 %v1860_v5, %v1792_v39 }
 0x2bb   : > { %1760 = vst.msk [vmem:[#allocation3 + $0xd0] sm:$0xff] %vm1463_vm1, %v1728_v22  ;;  %1761 = vst.msk [vmem:[#allocation3 + $0xd8] sm:$0xff] %vm1463_vm1, %v1729_v9  ;;  %v2870_v35 = vadd.f32 %v11610_v3, %v2770_v23  ;;  %v2871_v11 = vadd.f32 %v11578_v45, %v2771_v52  ;;  %v2513_v56 = vmul.f32 %v11481_v46, %v11615_v31  ;;  %v2117_v7 = vld [vmem:[#allocation3 + $0xa0] sm:$0xff]  ;;  %v2118_v40 = vld [vmem:[#allocation3 + $0xa8] sm:$0xff] }
 0x2bc   : > { %2739 = vst.msk [vmem:[#allocation3 + $0x70] sm:$0xff] %vm1463_vm1, %v2707_v54  ;;  %2740 = vst.msk [vmem:[#allocation3 + $0x78] sm:$0xff] %vm1463_vm1, %v2708_v63  ;;  %v2054_v55 = vadd.f32 %v2022_v47, %v1954_v29  ;;  %v1955_v5 = vld [vmem:[#allocation3 + $0xb8] sm:$0xff]  ;;  %v11755_v14 = vld [vmem:[#allocation2 + $0x1b0] sm:$0xff]  ;;  %v2677_v3 = vmul.f32 %v11602_v49, %v11420_v36  ;;  %v2217_v45 = vadd.f32 %v2185_v37, %v2117_v7 }
 0x2bd   : > { %1923 = vst.msk [vmem:[#allocation3 + $0xc0] sm:$0xff] %vm1463_vm1, %v1891_v50  ;;  %v2445_v61 = vld [vmem:[#allocation3 + $0x90] sm:$0xff]  ;;  %v2218_v23 = vadd.f32 %v2186_v28, %v2118_v40  ;;  %1924 = vst.msk [vmem:[#allocation3 + $0xc8] sm:$0xff] %vm1463_vm1, %v1892_v41  ;;  %v2055_v22 = vadd.f32 %v2023_v24, %v1955_v5  ;;  %v11764_v9 = vld [vmem:[#allocation2 + $0x1a8] sm:$0xff]  ;;  %v2678_v47 = vmul.f32 %v11602_v49, %v11432_v30 }
 0x2be   : > { %v11759_v43 = vld [vmem:[#allocation2 + $0x191] sm:$0xff]  ;;  %v11762_v17 = vld [vmem:[#allocation2 + $0x189] sm:$0xff]  ;;  %2902 = vst.msk [vmem:[#allocation3 + $0x60] sm:$0xff] %vm1463_vm1, %v2870_v35  ;;  %2903 = vst.msk [vmem:[#allocation3 + $0x68] sm:$0xff] %vm1463_vm1, %v2871_v11  ;;  %v2545_v63 = vadd.f32 %v2513_v56, %v2445_v61  ;;  %v11774_v39 = vmul.f32 %v11574_v12, %v11489_v59  ;;  %v11778_v52 = vmul.f32 %v11586_v38, %v11615_v31 }
 0x2bf   : > { %v11766_v54 = vld [vmem:[#allocation2 + $0x1c7] sm:$0xff]  ;;  %v2933_v50 = vld [vmem:[#allocation3 + $0x50] sm:$0xff]  ;;  %2086 = vst.msk [vmem:[#allocation3 + $0xb0] sm:$0xff] %vm1463_vm1, %v2054_v55  ;;  %v2934_v29 = vld [vmem:[#allocation3 + $0x58] sm:$0xff]  ;;  %v11786_v30 = vmul.f32 %v11426_v51, %v11628_v62  ;;  %v11790_v59 = vmul.f32 %v11481_v46, %v11728_v13  ;;  %v11799_v11 = vmul.f32 %v11574_v12, %v11628_v62  ;;  %v1862_v40 = vmul.f32 %v11355_v25, %v11755_v14 }
 0x2c0   : > { %v2608_v36 = vld [vmem:[#allocation3 + $0x80] sm:$0xff]  ;;  %v11781_v24 = vld [vmem:[#allocation2 + $0x1cf] sm:$0xff]  ;;  %v3033_v37 = vadd.f32 %v11541_v27, %v2933_v50  ;;  %2249 = vst.msk [vmem:[#allocation3 + $0xa0] sm:$0xff] %vm1463_vm1, %v2217_v45  ;;  %2250 = vst.msk [vmem:[#allocation3 + $0xa8] sm:$0xff] %vm1463_vm1, %v2218_v23  ;;  %v3034_v35 = vadd.f32 %v11499_v1, %v2934_v29  ;;  %v1861_v1 = vmul.f32 %v11355_v25, %v11764_v9 }
 0x2c1   : > { %15424 = vst [vmem:[#allocation13_spill] sm:$0xff] %v11781_v24  ;;  %v2609_v28 = vld [vmem:[#allocation3 + $0x88] sm:$0xff]  ;;  %v2709_v41 = vadd.f32 %v2677_v3, %v2608_v36  ;;  %v2446_v31 = vld [vmem:[#allocation3 + $0x98] sm:$0xff]  ;;  %2087 = vst.msk [vmem:[#allocation3 + $0xb8] sm:$0xff] %vm1463_vm1, %v2055_v22  ;;  %v1698_v5 = vmul.f32 %v11448_v48, %v11766_v54  ;;  %v1699_v62 = vmul.f32 %v11448_v48, %v11781_v24 }
 0x2c2   : > { %2577 = vst.msk [vmem:[#allocation3 + $0x90] sm:$0xff] %vm1463_vm1, %v2545_v63  ;;  %v2710_v27 = vadd.f32 %v2678_v47, %v2609_v28  ;;  %v2546_v56 = vadd.f32 %v11706_v34, %v2446_v31  ;;  %v1630_v55 = vld [vmem:[#allocation3 + $0xe0] sm:$0xff]  ;;  %v1631_v7 = vld [vmem:[#allocation3 + $0xe8] sm:$0xff]  ;;  %3065 = vst.msk [vmem:[#allocation3 + $0x50] sm:$0xff] %vm1463_vm1, %v3033_v37  ;;  %v11816_v34 = vmul.f32 %v11586_v38, %v11728_v13 }
 0x2c3   : > { %2741 = vst.msk [vmem:[#allocation3 + $0x80] sm:$0xff] %vm1463_vm1, %v2709_v41  ;;  %3066 = vst.msk [vmem:[#allocation3 + $0x58] sm:$0xff] %vm1463_vm1, %v3034_v35  ;;  %v2350_v61 = vmul.f32 %v11426_v51, %v11593_v33  ;;  %v2025_v3 = vmul.f32 %v11338_v18, %v11759_v43  ;;  %v2024_v45 = vmul.f32 %v11338_v18, %v11762_v17  ;;  %v1793_v23 = vld [vmem:[#allocation3 + $0xd0] sm:$0xff]  ;;  %v1794_v22 = vld [vmem:[#allocation3 + $0xd8] sm:$0xff] }
 0x2c4   : > { %2742 = vst.msk [vmem:[#allocation3 + $0x88] sm:$0xff] %vm1463_vm1, %v2710_v27  ;;  %15425 = vst [vmem:[#allocation14_spill] sm:$0xff] %v11816_v34  ;;  %v2772_v50 = vld [vmem:[#allocation3 + $0x70] sm:$0xff]  ;;  %v2773_v63 = vld [vmem:[#allocation3 + $0x78] sm:$0xff]  ;;  %v1893_v47 = vadd.f32 %v1861_v1, %v1793_v23  ;;  %v1894_v29 = vadd.f32 %v1862_v40, %v1794_v22  ;;  %v1730_v13 = vadd.f32 %v1698_v5, %v1630_v55 }
 0x2c5   : > { %2578 = vst.msk [vmem:[#allocation3 + $0x98] sm:$0xff] %vm1463_vm1, %v2546_v56  ;;  %v1956_v36 = vld [vmem:[#allocation3 + $0xc0] sm:$0xff]  ;;  %v1731_v37 = vadd.f32 %v1699_v62, %v1631_v7  ;;  %v2872_v28 = vadd.f32 %v11687_v2, %v2772_v50  ;;  %v2873_v41 = vadd.f32 %v11638_v53, %v2773_v63  ;;  %v2187_v35 = vmul.f32 %v11406_v0, %v11554_v44  ;;  %v1957_v27 = vld [vmem:[#allocation3 + $0xc8] sm:$0xff]  ;;  %v1632_v22 = vld [vmem:[#allocation3 + $0xf0] sm:$0xff] }
 0x2c6   : > { %v2056_v31 = vadd.f32 %v2024_v45, %v1956_v36  ;;  %v11829_v56 = vld [vmem:[#allocation2 + $0x1e7] sm:$0xff]  ;;  %v11831_v34 = vld [vmem:[#allocation2 + $0x1ef] sm:$0xff]  ;;  %v11835_v40 = vmul.f32 %v11481_v46, %v11708_v26  ;;  %v2679_v2 = vmul.f32 %v11602_v49, %v11508_v8  ;;  %v2188_v53 = vmul.f32 %v11406_v0, %v11556_v21  ;;  %1925 = vst.msk [vmem:[#allocation3 + $0xd0] sm:$0xff] %vm1463_vm1, %v1893_v47  ;;  %v1633_v36 = vld [vmem:[#allocation3 + $0xf8] sm:$0xff] }
 0x2c7   : > { %v2935_v42 = vld [vmem:[#allocation3 + $0x60] sm:$0xff]  ;;  %v2936_v24 = vld [vmem:[#allocation3 + $0x68] sm:$0xff]  ;;  %v2119_v55 = vld [vmem:[#allocation3 + $0xb0] sm:$0xff]  ;;  %1926 = vst.msk [vmem:[#allocation3 + $0xd8] sm:$0xff] %vm1463_vm1, %v1894_v29  ;;  %v2057_v7 = vadd.f32 %v2025_v3, %v1957_v27  ;;  %v2680_v45 = vmul.f32 %v11602_v49, %v11510_v16  ;;  %v1701_v27 = vmul.f32 %v11448_v48, %v11831_v34 }
 0x2c8   : > { %1762 = vst.msk [vmem:[#allocation3 + $0xe0] sm:$0xff] %vm1463_vm1, %v1730_v13  ;;  %1763 = vst.msk [vmem:[#allocation3 + $0xe8] sm:$0xff] %vm1463_vm1, %v1731_v37  ;;  %v3035_v1 = vadd.f32 %v11620_v4, %v2935_v42  ;;  %v3036_v5 = vadd.f32 %v11590_v10, %v2936_v24  ;;  %v2282_v8 = vld [vmem:[#allocation3 + $0xa0] sm:$0xff]  ;;  %v2283_v62 = vld [vmem:[#allocation3 + $0xa8] sm:$0xff]  ;;  %v2219_v23 = vadd.f32 %v2187_v35, %v2119_v55 }
 0x2c9   : > { %2904 = vst.msk [vmem:[#allocation3 + $0x70] sm:$0xff] %vm1463_vm1, %v2872_v28  ;;  %2905 = vst.msk [vmem:[#allocation3 + $0x78] sm:$0xff] %vm1463_vm1, %v2873_v41  ;;  %v2120_v3 = vld [vmem:[#allocation3 + $0xb8] sm:$0xff]  ;;  %v2382_v50 = vadd.f32 %v2350_v61, %v2282_v8  ;;  %v2383_v63 = vadd.f32 %v11786_v30, %v2283_v62  ;;  %v2610_v4 = vld [vmem:[#allocation3 + $0x90] sm:$0xff]  ;;  %v11855_v10 = vmul.f32 %v11574_v12, %v11593_v33 }
 0x2ca   : > { %2088 = vst.msk [vmem:[#allocation3 + $0xc0] sm:$0xff] %vm1463_vm1, %v2056_v31  ;;  %v2220_v42 = vadd.f32 %v2188_v53, %v2120_v3  ;;  %v11857_v24 = vld [vmem:[#allocation2 + $0x1a9] sm:$0xff]  ;;  %2089 = vst.msk [vmem:[#allocation3 + $0xc8] sm:$0xff] %vm1463_vm1, %v2057_v7  ;;  %v2774_v16 = vld [vmem:[#allocation3 + $0x80] sm:$0xff]  ;;  %v2711_v47 = vadd.f32 %v2679_v2, %v2610_v4  ;;  %v11864_v30 = vmul.f32 %v11586_v38, %v11708_v26 }
 0x2cb   : > { %3067 = vst.msk [vmem:[#allocation3 + $0x60] sm:$0xff] %vm1463_vm1, %v3035_v1  ;;  %3068 = vst.msk [vmem:[#allocation3 + $0x68] sm:$0xff] %vm1463_vm1, %v3036_v5  ;;  %v11868_v33 = vmul.f32 %v11426_v51, %v11667_v6  ;;  %v11872_v61 = vmul.f32 %v11481_v46, %v11759_v43  ;;  %v11875_v29 = vld [vmem:[#allocation2 + $0x1d0] sm:$0xff]  ;;  %v11877_v13 = vld [vmem:[#allocation2 + $0x1c8] sm:$0xff]  ;;  %v2874_v28 = vadd.f32 %v11774_v39, %v2774_v16 }
 0x2cc   : > { %2251 = vst.msk [vmem:[#allocation3 + $0xb0] sm:$0xff] %vm1463_vm1, %v2219_v23  ;;  %v2775_v37 = vld [vmem:[#allocation3 + $0x88] sm:$0xff]  ;;  %2414 = vst.msk [vmem:[#allocation3 + $0xa0] sm:$0xff] %vm1463_vm1, %v2382_v50  ;;  %v2611_v26 = vld [vmem:[#allocation3 + $0x98] sm:$0xff]  ;;  %v11884_v41 = vmul.f32 %v11574_v12, %v11667_v6  ;;  %v1700_v35 = vmul.f32 %v11448_v48, %v11829_v56  ;;  %v11897_v55 = vmul.f32 %v11586_v38, %v11759_v43 }
 0x2cd   : > { %2415 = vst.msk [vmem:[#allocation3 + $0xa8] sm:$0xff] %vm1463_vm1, %v2383_v63  ;;  %2252 = vst.msk [vmem:[#allocation3 + $0xb8] sm:$0xff] %vm1463_vm1, %v2220_v42  ;;  %v11887_v31 = vld [vmem:[#allocation2 + $0x1b1] sm:$0xff]  ;;  %v2875_v39 = vadd.f32 %v11720_v60, %v2775_v37  ;;  %v2712_v2 = vadd.f32 %v2680_v45, %v2611_v26  ;;  %v2026_v6 = vmul.f32 %v11338_v18, %v11857_v24 }
 0x2ce   : > { %2743 = vst.msk [vmem:[#allocation3 + $0x90] sm:$0xff] %vm1463_vm1, %v2711_v47  ;;  %2906 = vst.msk [vmem:[#allocation3 + $0x80] sm:$0xff] %vm1463_vm1, %v2874_v28  ;;  %v1864_v53 = vmul.f32 %v11355_v25, %v11875_v29  ;;  %v1863_v48 = vmul.f32 %v11355_v25, %v11877_v13  ;;  %v1732_v7 = vadd.f32 %v1700_v35, %v1632_v22  ;;  %v1958_v8 = vld [vmem:[#allocation3 + $0xd0] sm:$0xff]  ;;  %v1959_v28 = vld [vmem:[#allocation3 + $0xd8] sm:$0xff] }
 0x2cf   : > { %v1733_v60 = vadd.f32 %v1701_v27, %v1633_v36  ;;  %2907 = vst.msk [vmem:[#allocation3 + $0x88] sm:$0xff] %vm1463_vm1, %v2875_v39  ;;  %2744 = vst.msk [vmem:[#allocation3 + $0x98] sm:$0xff] %vm1463_vm1, %v2712_v2  ;;  %v2352_v43 = vmul.f32 %v11426_v51, %v11669_v32  ;;  %v11912_v1 = vmul.f32 %v11481_v46, %v11762_v17  ;;  %v1795_v62 = vld [vmem:[#allocation3 + $0xe0] sm:$0xff]  ;;  %v1796_v45 = vld [vmem:[#allocation3 + $0xe8] sm:$0xff] }
 0x2d0   : > { %v2027_v5 = vmul.f32 %v11338_v18, %v11887_v31  ;;  %v2189_v25 = vmul.f32 %v11406_v0, %v11671_v19  ;;  %v2937_v3 = vld [vmem:[#allocation3 + $0x70] sm:$0xff]  ;;  %v2938_v23 = vld [vmem:[#allocation3 + $0x78] sm:$0xff]  ;;  %v2058_v22 = vadd.f32 %v2026_v6, %v1958_v8  ;;  %v2190_v63 = vmul.f32 %v11406_v0, %v11682_v15  ;;  %1764 = vst.msk [vmem:[#allocation3 + $0xf0] sm:$0xff] %vm1463_vm1, %v1732_v7  ;;  %v11941_v39 = vld [vmem:[#allocation2 + $0x1e8] sm:$0xff] }
 0x2d1   : > { %v2121_v50 = vld [vmem:[#allocation3 + $0xc0] sm:$0xff]  ;;  %v1895_v4 = vadd.f32 %v1863_v48, %v1795_v62  ;;  %v1896_v42 = vadd.f32 %v1864_v53, %v1796_v45  ;;  %1765 = vst.msk [vmem:[#allocation3 + $0xf8] sm:$0xff] %vm1463_vm1, %v1733_v60  ;;  %v3037_v18 = vadd.f32 %v11691_v20, %v2937_v3  ;;  %v3038_v36 = vadd.f32 %v11646_v58, %v2938_v23  ;;  %v2122_v47 = vld [vmem:[#allocation3 + $0xc8] sm:$0xff]  ;;  %v11939_v58 = vld [vmem:[#allocation2 + $0x1f0] sm:$0xff] }
 0x2d2   : > { %v11926_v16 = vmul.f32 %v11602_v49, %v11554_v44  ;;  %v2221_v37 = vadd.f32 %v2189_v25, %v2121_v50  ;;  %v11930_v35 = vmul.f32 %v11602_v49, %v11556_v21  ;;  %v11934_v27 = vmul.f32 %v11574_v12, %v11669_v32  ;;  %2090 = vst.msk [vmem:[#allocation3 + $0xd0] sm:$0xff] %vm1463_vm1, %v2058_v22  ;;  %v1993_v25 = vld [vmem:[#allocation2 + $0x1d1] sm:$0xff]  ;;  %v9780_v23 = vld [vmem:[%s15246_s5 + $0x1] ss:$0 sm:$0xff] }
 0x2d3   : > { %v2284_v26 = vld [vmem:[#allocation3 + $0xb0] sm:$0xff]  ;;  %v2222_v20 = vadd.f32 %v2190_v63, %v2122_v47  ;;  %1927 = vst.msk [vmem:[#allocation3 + $0xe0] sm:$0xff] %vm1463_vm1, %v1895_v4  ;;  %1928 = vst.msk [vmem:[#allocation3 + $0xe8] sm:$0xff] %vm1463_vm1, %v1896_v42  ;;  %v2059_v44 = vadd.f32 %v2027_v5, %v1959_v28  ;;  %v2447_v21 = vld [vmem:[#allocation3 + $0xa0] sm:$0xff]  ;;  %v11947_v53 = vmul.f32 %v11586_v38, %v11762_v17 }
 0x2d4   : > { %3069 = vst.msk [vmem:[#allocation3 + $0x70] sm:$0xff] %vm1463_vm1, %v3037_v18  ;;  %3070 = vst.msk [vmem:[#allocation3 + $0x78] sm:$0xff] %vm1463_vm1, %v3038_v36  ;;  %v2285_v2 = vld [vmem:[#allocation3 + $0xb8] sm:$0xff]  ;;  %v2384_v32 = vadd.f32 %v2352_v43, %v2284_v26  ;;  %v2448_v6 = vld [vmem:[#allocation3 + $0xa8] sm:$0xff]  ;;  %v11951_v48 = vmul.f32 %v11426_v51, %v11755_v14  ;;  %v11955_v7 = vmul.f32 %v11481_v46, %v11887_v31 }
 0x2d5   : > { %2253 = vst.msk [vmem:[#allocation3 + $0xc0] sm:$0xff] %vm1463_vm1, %v2221_v37  ;;  %v2547_v60 = vadd.f32 %v11835_v40, %v2447_v21  ;;  %v2776_v5 = vld [vmem:[#allocation3 + $0x90] sm:$0xff]  ;;  %v2385_v43 = vadd.f32 %v11868_v33, %v2285_v2  ;;  %v2548_v8 = vadd.f32 %v11790_v59, %v2448_v6  ;;  %v11963_v17 = vmul.f32 %v11574_v12, %v11755_v14  ;;  %v2939_v62 = vld [vmem:[#allocation3 + $0x80] sm:$0xff] }
 0x2d6   : > { %2254 = vst.msk [vmem:[#allocation3 + $0xc8] sm:$0xff] %vm1463_vm1, %v2222_v20  ;;  %2091 = vst.msk [vmem:[#allocation3 + $0xd8] sm:$0xff] %vm1463_vm1, %v2059_v44  ;;  %v2876_v45 = vadd.f32 %v11855_v10, %v2776_v5  ;;  %v11971_v40 = vmul.f32 %v11586_v38, %v11887_v31  ;;  %v2354_v59 = vmul.f32 %v11426_v51, %v11764_v9  ;;  %v11979_v33 = vld [vmem:[#allocation2 + $0x1c9] sm:$0xff]  ;;  %v2777_v10 = vld [vmem:[#allocation3 + $0x98] sm:$0xff] }
 0x2d7   : > { %2416 = vst.msk [vmem:[#allocation3 + $0xb0] sm:$0xff] %vm1463_vm1, %v2384_v32  ;;  %v11977_v14 = vmul.f32 %v11481_v46, %v11857_v24  ;;  %v3039_v3 = vadd.f32 %v11778_v52, %v2939_v62  ;;  %2579 = vst.msk [vmem:[#allocation3 + $0xa0] sm:$0xff] %vm1463_vm1, %v2547_v60  ;;  %v11987_v31 = vmul.f32 %v11602_v49, %v11671_v19  ;;  %v2940_v52 = vld [vmem:[#allocation3 + $0x88] sm:$0xff]  ;;  %v12003_v19 = vld [vmem:[%s15246_s5 + $0x2] ss:$0 sm:$0xff] }
 0x2d8   : > { %2417 = vst.msk [vmem:[#allocation3 + $0xb8] sm:$0xff] %vm1463_vm1, %v2385_v43  ;;  %2580 = vst.msk [vmem:[#allocation3 + $0xa8] sm:$0xff] %vm1463_vm1, %v2548_v8  ;;  %v1866_v22 = vmul.f32 %v9780_v23, %v11939_v58  ;;  %v1865_v50 = vmul.f32 %v9780_v23, %v11941_v39  ;;  %v2877_v63 = vadd.f32 %v11799_v11, %v2777_v10  ;;  %v1797_v18 = vld [vmem:[#allocation3 + $0xf0] sm:$0xff]  ;;  %v1798_v36 = vld [vmem:[#allocation3 + $0xf8] sm:$0xff] }
 0x2d9   : > { %2908 = vst.msk [vmem:[#allocation3 + $0x90] sm:$0xff] %vm1463_vm1, %v2876_v45  ;;  %v11998_v4 = vmul.f32 %v11602_v49, %v11682_v15  ;;  %v2029_v42 = vmul.f32 %v12003_v19, %v1993_v25  ;;  %v3040_v47 = vadd.f32 %v11724_v57, %v2940_v52  ;;  %3071 = vst.msk [vmem:[#allocation3 + $0x80] sm:$0xff] %vm1463_vm1, %v3039_v3  ;;  %v2123_v21 = vld [vmem:[#allocation3 + $0xd0] sm:$0xff] }
 0x2da   : > { %v2028_v11 = vmul.f32 %v12003_v19, %v11979_v33  ;;  %v2191_v15 = vmul.f32 %v11406_v0, %v11766_v54  ;;  %v1897_v37 = vadd.f32 %v1865_v50, %v1797_v18  ;;  %v1898_v28 = vadd.f32 %v1866_v22, %v1798_v36  ;;  %2909 = vst.msk [vmem:[#allocation3 + $0x98] sm:$0xff] %vm1463_vm1, %v2877_v63  ;;  %v1960_v0 = vld [vmem:[#allocation3 + $0xe0] sm:$0xff]  ;;  %v1961_v2 = vld [vmem:[#allocation3 + $0xe8] sm:$0xff]  ;;  %v12036_v43 = vld [vmem:[#allocation2 + $0x1f1] sm:$0xff] }
 0x2db   : > { %v12015_v26 = vmul.f32 %v11574_v12, %v11764_v9  ;;  %v12019_v20 = vmul.f32 %v11586_v38, %v11857_v24  ;;  %v12023_v57 = vmul.f32 %v11426_v51, %v11875_v29  ;;  %v12026_v44 = vmul.f32 %v11481_v46, %v1993_v25  ;;  %3072 = vst.msk [vmem:[#allocation3 + $0x88] sm:$0xff] %vm1463_vm1, %v3040_v47  ;;  %v12032_v9 = vld [vmem:[%s15246_s5 + $0x3] ss:$0 sm:$0xff]  ;;  %v15426_v24 = vld [vmem:[#allocation13_spill] sm:$0xff]  ;;  %v3089_v50 = vld [vmem:[#allocation3 + $0x10] sm:$0xff] }
 0x2dc   : > { %v2286_v32 = vld [vmem:[#allocation3 + $0xc0] sm:$0xff]  ;;  %v2060_v6 = vadd.f32 %v2028_v11, %v1960_v0  ;;  %v2192_v60 = vmul.f32 %v12032_v9, %v15426_v24  ;;  %v2223_v5 = vadd.f32 %v2191_v15, %v2123_v21  ;;  %1929 = vst.msk [vmem:[#allocation3 + $0xf0] sm:$0xff] %vm1463_vm1, %v1897_v37  ;;  %1930 = vst.msk [vmem:[#allocation3 + $0xf8] sm:$0xff] %vm1463_vm1, %v1898_v28 }
 0x2dd   : > { %v2061_v8 = vadd.f32 %v2029_v42, %v1961_v2  ;;  %v2287_v62 = vld [vmem:[#allocation3 + $0xc8] sm:$0xff]  ;;  %v2386_v45 = vadd.f32 %v2354_v59, %v2286_v32  ;;  %v12042_v3 = vmul.f32 %v11574_v12, %v11875_v29  ;;  %v12045_v10 = vmul.f32 %v11586_v38, %v1993_v25  ;;  %v2124_v23 = vld [vmem:[#allocation3 + $0xd8] sm:$0xff]  ;;  %v3091_v21 = vld [vmem:[#allocation3 + $0x20] sm:$0xff] }
 0x2de   : > { %v12049_v22 = vmul.f32 %v11426_v51, %v11877_v13  ;;  %v2449_v52 = vld [vmem:[#allocation3 + $0xb0] sm:$0xff]  ;;  %v2387_v63 = vadd.f32 %v11951_v48, %v2287_v62  ;;  %2092 = vst.msk [vmem:[#allocation3 + $0xe0] sm:$0xff] %vm1463_vm1, %v2060_v6  ;;  %v2224_v42 = vadd.f32 %v2192_v60, %v2124_v23  ;;  %2255 = vst.msk [vmem:[#allocation3 + $0xd0] sm:$0xff] %vm1463_vm1, %v2223_v5  ;;  %v3090_v51 = vld [vmem:[#allocation3 + $0x18] sm:$0xff] }
 0x2df   : > { %v12056_v29 = vmul.f32 %v11481_v46, %v11979_v33  ;;  %v12060_v25 = vmul.f32 %v11602_v49, %v11766_v54  ;;  %v12062_v59 = vld [vmem:[#allocation2 + $0x1e9] sm:$0xff]  ;;  %2093 = vst.msk [vmem:[#allocation3 + $0xe8] sm:$0xff] %vm1463_vm1, %v2061_v8  ;;  %v2549_v48 = vadd.f32 %v11912_v1, %v2449_v52  ;;  %v2612_v18 = vld [vmem:[#allocation3 + $0xa0] sm:$0xff]  ;;  %2418 = vst.msk [vmem:[#allocation3 + $0xc0] sm:$0xff] %vm1463_vm1, %v2386_v45 }
 0x2e0   : > { %v2613_v36 = vld [vmem:[#allocation3 + $0xa8] sm:$0xff]  ;;  %v2450_v47 = vld [vmem:[#allocation3 + $0xb8] sm:$0xff]  ;;  %v12069_v11 = vmul.f32 %v11602_v49, %v15426_v24  ;;  %v12073_v54 = vmul.f32 %v11574_v12, %v11877_v13  ;;  %v12077_v15 = vmul.f32 %v11586_v38, %v11979_v33  ;;  %v2941_v37 = vld [vmem:[#allocation3 + $0x90] sm:$0xff]  ;;  %v2713_v1 = vadd.f32 %v11926_v16, %v2612_v18  ;;  %2419 = vst.msk [vmem:[#allocation3 + $0xc8] sm:$0xff] %vm1463_vm1, %v2387_v63 }
 0x2e1   : > { %v2714_v28 = vadd.f32 %v11930_v35, %v2613_v36  ;;  %v2550_v0 = vadd.f32 %v11872_v61, %v2450_v47  ;;  %2256 = vst.msk [vmem:[#allocation3 + $0xd8] sm:$0xff] %vm1463_vm1, %v2224_v42  ;;  %v15427_v2 = vld [vmem:[#allocation7_spill] sm:$0xff]  ;;  %v3041_v12 = vadd.f32 %v11864_v30, %v2941_v37  ;;  %2581 = vst.msk [vmem:[#allocation3 + $0xb0] sm:$0xff] %vm1463_vm1, %v2549_v48  ;;  %v12094_v13 = vld [vmem:[%s15246_s5 + $0x4] ss:$0 sm:$0xff] }
 0x2e2   : > { %v12085_v32 = vadd.f32 %v15427_v2, %v3089_v50  ;;  %v2031_v38 = vmul.f32 %v12003_v19, %v12036_v43  ;;  %v12098_v61 = vmul.f32 %v12094_v13, %v11939_v58  ;;  %v12102_v16 = vmul.f32 %v11481_v46, %v12036_v43  ;;  %v2942_v35 = vld [vmem:[#allocation3 + $0x98] sm:$0xff]  ;;  %2745 = vst.msk [vmem:[#allocation3 + $0xa0] sm:$0xff] %vm1463_vm1, %v2713_v1  ;;  %v3092_v24 = vld [vmem:[#allocation3 + $0x28] sm:$0xff]  ;;  %v3093_v60 = vld [vmem:[#allocation3 + $0x30] sm:$0xff] }
 0x2e3   : > { %2746 = vst.msk [vmem:[#allocation3 + $0xa8] sm:$0xff] %vm1463_vm1, %v2714_v28  ;;  %2582 = vst.msk [vmem:[#allocation3 + $0xb8] sm:$0xff] %vm1463_vm1, %v2550_v0  ;;  %v2030_v30 = vmul.f32 %v12003_v19, %v12062_v59  ;;  %v2193_v33 = vmul.f32 %v12032_v9, %v11829_v56  ;;  %v2194_v6 = vmul.f32 %v12032_v9, %v11831_v34  ;;  %v15430_v5 = vld [vmem:[#allocation14_spill] sm:$0xff]  ;;  %v1962_v62 = vld [vmem:[#allocation3 + $0xf0] sm:$0xff] }
 0x2e4   : > { %15428 = vst [vmem:[#allocation19_spill] sm:$0xff] %v12085_v32  ;;  %v12114_v46 = vadd.f32 %v15427_v2, %v3090_v51  ;;  %v3042_v8 = vadd.f32 %v15430_v5, %v2942_v35  ;;  %3073 = vst.msk [vmem:[#allocation3 + $0x90] sm:$0xff] %vm1463_vm1, %v3041_v12  ;;  %v1963_v45 = vld [vmem:[#allocation3 + $0xf8] sm:$0xff]  ;;  %v12119_v23 = vadd.f32 %v15427_v2, %v3091_v21  ;;  %v15432_v19 = vld [vmem:[#allocation8_spill] sm:$0xff] }
 0x2e5   : > { %v12123_v50 = vmul.f32 %v15432_v19, %v15432_v19  ;;  %v15433_v52 = vld [vmem:[#allocation11_spill] sm:$0xff]  ;;  %v2062_v42 = vadd.f32 %v2030_v30, %v1962_v62  ;;  %v12131_v51 = vmul.f32 %v12094_v13, %v11941_v39  ;;  %v2063_v48 = vadd.f32 %v2031_v38, %v1963_v45  ;;  %v3094_v18 = vld [vmem:[#allocation3 + $0x38] sm:$0xff]  ;;  %v2288_v47 = vld [vmem:[#allocation3 + $0xd0] sm:$0xff] }
 0x2e6   : > { %15429 = vst [vmem:[#allocation21_spill] sm:$0xff] %v12114_v46  ;;  %15431 = vst [vmem:[#allocation12_spill] sm:$0xff] %v12119_v23  ;;  %v12127_v63 = vmul.f32 %v15433_v52, %v15433_v52  ;;  %v12135_v36 = vmul.f32 %v12085_v32, %v12085_v32  ;;  %v2125_v37 = vld [vmem:[#allocation3 + $0xe0] sm:$0xff]  ;;  %v2126_v1 = vld [vmem:[#allocation3 + $0xe8] sm:$0xff]  ;;  %v12149_v21 = vmul.f32 %v11602_v49, %v11829_v56 }
 0x2e7   : > { %3074 = vst.msk [vmem:[#allocation3 + $0x98] sm:$0xff] %vm1463_vm1, %v3042_v8  ;;  %v12141_v28 = vld [vmem:[%s15246_s5 + $0x5] ss:$0 sm:$0xff]  ;;  %v12152_v12 = vadd.f32 %v15427_v2, %v3092_v24  ;;  %v12155_v38 = vadd.f32 %v15427_v2, %v3093_v60  ;;  %v2388_v30 = vadd.f32 %v12049_v22, %v2288_v47  ;;  %2094 = vst.msk [vmem:[#allocation3 + $0xf0] sm:$0xff] %vm1463_vm1, %v2062_v42  ;;  %v3096_v45 = vld [vmem:[#allocation3 + $0x48] sm:$0xff] }
 0x2e8   : > { %v12145_v0 = vmul.f32 %v12141_v28, %v12062_v59  ;;  %v2451_v35 = vld [vmem:[#allocation3 + $0xc0] sm:$0xff]  ;;  %v2225_v5 = vadd.f32 %v2193_v33, %v2125_v37  ;;  %v2226_v8 = vadd.f32 %v2194_v6, %v2126_v1  ;;  %2095 = vst.msk [vmem:[#allocation3 + $0xf8] sm:$0xff] %vm1463_vm1, %v2063_v48  ;;  %v12162_v56 = vmul.f32 %v12114_v46, %v12114_v46  ;;  %v2289_v60 = vld [vmem:[#allocation3 + $0xd8] sm:$0xff]  ;;  %v2452_v32 = vld [vmem:[#allocation3 + $0xc8] sm:$0xff] }
 0x2e9   : > { %15434 = vst [vmem:[#allocation9_spill] sm:$0xff] %v12155_v38  ;;  %v3095_v62 = vld [vmem:[#allocation3 + $0x40] sm:$0xff]  ;;  %v2551_v24 = vadd.f32 %v11977_v14, %v2451_v35  ;;  %v12167_v22 = vmul.f32 %v12119_v23, %v12119_v23  ;;  %v3190_v33 = vsel %vm635_vm0, %v12123_v50, 0.0  ;;  %v3191_v6 = vsel %vm635_vm0, %v12127_v63, 0.0  ;;  %v2614_v42 = vld [vmem:[#allocation3 + $0xb0] sm:$0xff]  ;;  %2420 = vst.msk [vmem:[#allocation3 + $0xd0] sm:$0xff] %vm1463_vm1, %v2388_v30 }
 0x2ea   : > { %v2389_v48 = vadd.f32 %v12023_v57, %v2289_v60  ;;  %v2552_v47 = vadd.f32 %v11955_v7, %v2452_v32  ;;  %2257 = vst.msk [vmem:[#allocation3 + $0xe0] sm:$0xff] %vm1463_vm1, %v2225_v5  ;;  %2258 = vst.msk [vmem:[#allocation3 + $0xe8] sm:$0xff] %vm1463_vm1, %v2226_v8  ;;  %v12178_v14 = vld [vmem:[#allocation2 + $0x207] sm:$0xff]  ;;  %v12180_v37 = vld [vmem:[#allocation2 + $0x20f] sm:$0xff]  ;;  %v3192_v1 = vadd.f32 %v3191_v6, %v3190_v33  ;;  %v3193_v35 = vsel %vm635_vm0, %v12135_v36, 0.0 }
 0x2eb   : > { %v2778_v23 = vld [vmem:[#allocation3 + $0xa0] sm:$0xff]  ;;  %v2779_v46 = vld [vmem:[#allocation3 + $0xa8] sm:$0xff]  ;;  %2583 = vst.msk [vmem:[#allocation3 + $0xc0] sm:$0xff] %vm1463_vm1, %v2551_v24  ;;  %v2615_v57 = vld [vmem:[#allocation3 + $0xb8] sm:$0xff]  ;;  %v2715_v30 = vadd.f32 %v11987_v31, %v2614_v42  ;;  %v12187_v7 = vadd.f32 %v15427_v2, %v3094_v18  ;;  %v12190_v32 = vadd.f32 %v15427_v2, %v3095_v62  ;;  %v12193_v5 = vadd.f32 %v15427_v2, %v3096_v45 }
 0x2ec   : > { %v2878_v8 = vadd.f32 %v11934_v27, %v2778_v23  ;;  %v2879_v60 = vadd.f32 %v11884_v41, %v2779_v46  ;;  %v2716_v33 = vadd.f32 %v11998_v4, %v2615_v57  ;;  %2421 = vst.msk [vmem:[#allocation3 + $0xd8] sm:$0xff] %vm1463_vm1, %v2389_v48  ;;  %2584 = vst.msk [vmem:[#allocation3 + $0xc8] sm:$0xff] %vm1463_vm1, %v2552_v47  ;;  %v3097_v31 = vld [vmem:[#allocation3 + $0x50] sm:$0xff]  ;;  %v3098_v24 = vld [vmem:[#allocation3 + $0x58] sm:$0xff]  ;;  %v3195_v27 = vsel %vm635_vm0, %v12162_v56, 0.0 }
 0x2ed   : > { %15435 = vst [vmem:[#allocation17_spill] sm:$0xff] %v12187_v7  ;;  %15436 = vst [vmem:[#allocation22_spill] sm:$0xff] %v12190_v32  ;;  %v3099_v18 = vld [vmem:[#allocation3 + $0x60] sm:$0xff]  ;;  %v3194_v6 = vadd.f32 %v3193_v35, %v3192_v1  ;;  %v3100_v62 = vld [vmem:[#allocation3 + $0x68] sm:$0xff]  ;;  %v12203_v45 = vmul.f32 %v12152_v12, %v12152_v12  ;;  %v12207_v41 = vmul.f32 %v12155_v38, %v12155_v38  ;;  %v3197_v4 = vsel %vm635_vm0, %v12167_v22, 0.0 }
 0x2ee   : > { %15437 = vst [vmem:[#allocation18_spill] sm:$0xff] %v12193_v5  ;;  %2747 = vst.msk [vmem:[#allocation3 + $0xb0] sm:$0xff] %vm1463_vm1, %v2715_v30  ;;  %v12218_v46 = vmul.f32 %v11602_v49, %v11831_v34  ;;  %v2195_v23 = vmul.f32 %v12032_v9, %v12178_v14  ;;  %v2196_v42 = vmul.f32 %v12032_v9, %v12180_v37  ;;  %v2127_v47 = vld [vmem:[#allocation3 + $0xf0] sm:$0xff] }
 0x2ef   : > { %2910 = vst.msk [vmem:[#allocation3 + $0xa0] sm:$0xff] %vm1463_vm1, %v2878_v8  ;;  %2911 = vst.msk [vmem:[#allocation3 + $0xa8] sm:$0xff] %vm1463_vm1, %v2879_v60  ;;  %v3196_v48 = vadd.f32 %v3195_v27, %v3194_v6  ;;  %v2128_v1 = vld [vmem:[#allocation3 + $0xf8] sm:$0xff]  ;;  %v12225_v35 = vadd.f32 %v15427_v2, %v3097_v31  ;;  %v12228_v57 = vadd.f32 %v15427_v2, %v3098_v24  ;;  %v3199_v27 = vsel %vm635_vm0, %v12203_v45, 0.0 }
 0x2f0   : > { %2748 = vst.msk [vmem:[#allocation3 + $0xb8] sm:$0xff] %vm1463_vm1, %v2716_v33  ;;  %v12231_v30 = vadd.f32 %v15427_v2, %v3099_v18  ;;  %v12235_v49 = vmul.f32 %v12187_v7, %v12187_v7  ;;  %v2227_v34 = vadd.f32 %v2195_v23, %v2127_v47  ;;  %v2228_v8 = vadd.f32 %v2196_v42, %v2128_v1  ;;  %v2453_v33 = vld [vmem:[#allocation3 + $0xd0] sm:$0xff] }
 0x2f1   : > { %v12238_v9 = vadd.f32 %v15427_v2, %v3100_v62  ;;  %v3198_v60 = vadd.f32 %v3197_v4, %v3196_v48  ;;  %v2290_v6 = vld [vmem:[#allocation3 + $0xe0] sm:$0xff]  ;;  %v2291_v31 = vld [vmem:[#allocation3 + $0xe8] sm:$0xff]  ;;  %v12242_v24 = vmul.f32 %v12190_v32, %v12190_v32  ;;  %v12246_v18 = vmul.f32 %v12193_v5, %v12193_v5  ;;  %v12258_v7 = vld [vmem:[#allocation2 + $0x210] sm:$0xff] }
 0x2f2   : > { %v3201_v23 = vsel %vm635_vm0, %v12207_v41, 0.0  ;;  %v2553_v62 = vadd.f32 %v12056_v29, %v2453_v33  ;;  %v2616_v4 = vld [vmem:[#allocation3 + $0xc0] sm:$0xff]  ;;  %v2390_v42 = vadd.f32 %v12131_v51, %v2290_v6  ;;  %v2391_v48 = vadd.f32 %v12098_v61, %v2291_v31  ;;  %2259 = vst.msk [vmem:[#allocation3 + $0xf0] sm:$0xff] %vm1463_vm1, %v2227_v34  ;;  %2260 = vst.msk [vmem:[#allocation3 + $0xf8] sm:$0xff] %vm1463_vm1, %v2228_v8  ;;  %v12273_v8 = vld [vmem:[#allocation2 + $0x208] sm:$0xff] }
 0x2f3   : > { %v3200_v47 = vadd.f32 %v3199_v27, %v3198_v60  ;;  %v2617_v1 = vld [vmem:[#allocation3 + $0xc8] sm:$0xff]  ;;  %v2717_v5 = vadd.f32 %v12060_v25, %v2616_v4  ;;  %v2454_v32 = vld [vmem:[#allocation3 + $0xd8] sm:$0xff]  ;;  %v12262_v38 = vmul.f32 %v12225_v35, %v12225_v35  ;;  %v3203_v29 = vsel %vm635_vm0, %v12235_v49, 0.0  ;;  %v3101_v60 = vld [vmem:[#allocation3 + $0x70] sm:$0xff] }
 0x2f4   : > { %v3301_v61 = vsel %vm3300_vm2, %v12123_v50, 0.0  ;;  %2585 = vst.msk [vmem:[#allocation3 + $0xd0] sm:$0xff] %vm1463_vm1, %v2553_v62  ;;  %v2718_v34 = vadd.f32 %v12069_v11, %v2617_v1  ;;  %2422 = vst.msk [vmem:[#allocation3 + $0xe0] sm:$0xff] %vm1463_vm1, %v2390_v42  ;;  %v2554_v25 = vadd.f32 %v12026_v44, %v2454_v32  ;;  %v3302_v6 = vsel %vm3300_vm2, %v12127_v63, 0.0 }
 0x2f5   : > { %v2780_v51 = vld [vmem:[#allocation3 + $0xb0] sm:$0xff]  ;;  %2423 = vst.msk [vmem:[#allocation3 + $0xe8] sm:$0xff] %vm1463_vm1, %v2391_v48  ;;  %v3202_v33 = vadd.f32 %v3201_v23, %v3200_v47  ;;  %2749 = vst.msk [vmem:[#allocation3 + $0xc0] sm:$0xff] %vm1463_vm1, %v2717_v5  ;;  %v3205_v11 = vsel %vm635_vm0, %v12242_v24, 0.0  ;;  %v3303_v4 = vadd.f32 %v3302_v6, %v3301_v61  ;;  %v3304_v44 = vsel %vm3300_vm2, %v12135_v36, 0.0 }
 0x2f6   : > { %v2943_v31 = vld [vmem:[#allocation3 + $0xa0] sm:$0xff]  ;;  %v2944_v50 = vld [vmem:[#allocation3 + $0xa8] sm:$0xff]  ;;  %v2880_v62 = vadd.f32 %v12015_v26, %v2780_v51  ;;  %2750 = vst.msk [vmem:[#allocation3 + $0xc8] sm:$0xff] %vm1463_vm1, %v2718_v34  ;;  %2586 = vst.msk [vmem:[#allocation3 + $0xd8] sm:$0xff] %vm1463_vm1, %v2554_v25  ;;  %v2361_v5 = vmul.f32 %v12094_v13, %v12258_v7  ;;  %v2360_v42 = vmul.f32 %v12094_v13, %v12273_v8  ;;  %v3306_v48 = vsel %vm3300_vm2, %v12162_v56, 0.0 }
 0x2f7   : > { %v2781_v27 = vld [vmem:[#allocation3 + $0xb8] sm:$0xff]  ;;  %v3043_v32 = vadd.f32 %v11947_v53, %v2943_v31  ;;  %v3044_v23 = vadd.f32 %v11897_v55, %v2944_v50  ;;  %v3204_v26 = vadd.f32 %v3203_v29, %v3202_v33  ;;  %v12294_v36 = vadd.f32 %v15427_v2, %v3101_v60 }
 0x2f8   : > { %v2881_v63 = vadd.f32 %v11963_v17, %v2781_v27  ;;  %2912 = vst.msk [vmem:[#allocation3 + $0xb0] sm:$0xff] %vm1463_vm1, %v2880_v62  ;;  %v3305_v53 = vadd.f32 %v3304_v44, %v3303_v4  ;;  %v12301_v55 = vmul.f32 %v12228_v57, %v12228_v57  ;;  %v3308_v13 = vsel %vm3300_vm2, %v12167_v22, 0.0  ;;  %v3102_v60 = vld [vmem:[#allocation3 + $0x78] sm:$0xff] }
 0x2f9   : > { %3075 = vst.msk [vmem:[#allocation3 + $0xa0] sm:$0xff] %vm1463_vm1, %v3043_v32  ;;  %3076 = vst.msk [vmem:[#allocation3 + $0xa8] sm:$0xff] %vm1463_vm1, %v3044_v23  ;;  %v3206_v17 = vadd.f32 %v3205_v11, %v3204_v26  ;;  %v2292_v2 = vld [vmem:[#allocation3 + $0xf0] sm:$0xff]  ;;  %v2293_v47 = vld [vmem:[#allocation3 + $0xf8] sm:$0xff]  ;;  %v12309_v1 = vmul.f32 %v12231_v30, %v12231_v30  ;;  %v3207_v29 = vsel %vm635_vm0, %v12246_v18, 0.0  ;;  %v3209_v61 = vsel %vm635_vm0, %v12262_v38, 0.0 }
 0x2fa   : > { %2913 = vst.msk [vmem:[#allocation3 + $0xb8] sm:$0xff] %vm1463_vm1, %v2881_v63  ;;  %v3307_v51 = vadd.f32 %v3306_v48, %v3305_v53  ;;  %v2392_v34 = vadd.f32 %v2360_v42, %v2292_v2  ;;  %v2393_v25 = vadd.f32 %v2361_v5, %v2293_v47  ;;  %v12317_v56 = vmul.f32 %v12238_v9, %v12238_v9  ;;  %v3103_v63 = vld [vmem:[#allocation3 + $0x80] sm:$0xff]  ;;  %v12341_v48 = vld [vmem:[#allocation2 + $0x211] sm:$0xff] }
 0x2fb   : > { %v3208_v22 = vadd.f32 %v3207_v29, %v3206_v17  ;;  %v2455_v33 = vld [vmem:[#allocation3 + $0xe0] sm:$0xff]  ;;  %v2618_v6 = vld [vmem:[#allocation3 + $0xd0] sm:$0xff]  ;;  %v12321_v50 = vmul.f32 %v12294_v36, %v12294_v36  ;;  %v3310_v62 = vsel %vm3300_vm2, %v12203_v45, 0.0  ;;  %v3312_v11 = vsel %vm3300_vm2, %v12207_v41, 0.0 }
 0x2fc   : > { %v2456_v31 = vld [vmem:[#allocation3 + $0xe8] sm:$0xff]  ;;  %v3309_v27 = vadd.f32 %v3308_v13, %v3307_v51  ;;  %v2782_v4 = vld [vmem:[#allocation3 + $0xc0] sm:$0xff]  ;;  %v2555_v44 = vadd.f32 %v12145_v0, %v2455_v33  ;;  %v2719_v32 = vadd.f32 %v12149_v21, %v2618_v6  ;;  %2424 = vst.msk [vmem:[#allocation3 + $0xf0] sm:$0xff] %vm1463_vm1, %v2392_v34  ;;  %2425 = vst.msk [vmem:[#allocation3 + $0xf8] sm:$0xff] %vm1463_vm1, %v2393_v25  ;;  %v3211_v41 = vsel %vm635_vm0, %v12301_v55, 0.0 }
 0x2fd   : > { %v2556_v23 = vadd.f32 %v12102_v16, %v2456_v31  ;;  %v3210_v26 = vadd.f32 %v3209_v61, %v3208_v22  ;;  %v2783_v5 = vld [vmem:[#allocation3 + $0xc8] sm:$0xff]  ;;  %v2882_v42 = vadd.f32 %v12073_v54, %v2782_v4  ;;  %v2619_v45 = vld [vmem:[#allocation3 + $0xd8] sm:$0xff]  ;;  %v3213_v0 = vsel %vm635_vm0, %v12309_v1, 0.0  ;;  %v12347_v54 = vld [vmem:[%s15247_s6] ss:$0 sm:$0xff] }
 0x2fe   : > { %v3311_v53 = vadd.f32 %v3310_v62, %v3309_v27  ;;  %v2883_v17 = vadd.f32 %v12042_v3, %v2783_v5  ;;  %2587 = vst.msk [vmem:[#allocation3 + $0xe0] sm:$0xff] %vm1463_vm1, %v2555_v44  ;;  %v2720_v16 = vadd.f32 %v12218_v46, %v2619_v45  ;;  %2751 = vst.msk [vmem:[#allocation3 + $0xd0] sm:$0xff] %vm1463_vm1, %v2719_v32  ;;  %v12357_v46 = vld [vmem:[%s15246_s5 + $0x7] ss:$0 sm:$0xff]  ;;  %v12361_v61 = vld [vmem:[#allocation2 + $0x209] sm:$0xff]  ;;  %v3316_v22 = vsel %vm3300_vm2, %v12242_v24, 0.0 }
 0x2ff   : > { %v2945_v21 = vld [vmem:[#allocation3 + $0xb0] sm:$0xff]  ;;  %2588 = vst.msk [vmem:[#allocation3 + $0xe8] sm:$0xff] %vm1463_vm1, %v2556_v23  ;;  %v12350_v13 = vadd.f32 %v12347_v54, %v3102_v60  ;;  %v3212_v2 = vadd.f32 %v3211_v41, %v3210_v26  ;;  %2914 = vst.msk [vmem:[#allocation3 + $0xc0] sm:$0xff] %vm1463_vm1, %v2882_v42  ;;  %v2852_v29 = vmul.f32 %v12357_v46, %v11941_v39  ;;  %v3314_v60 = vsel %vm3300_vm2, %v12235_v49, 0.0  ;;  %v9787_v24 = vld [vmem:[%s15246_s5 + $0x6] ss:$0 sm:$0xff] }
 0x300   : > { %v3045_v47 = vadd.f32 %v12019_v20, %v2945_v21  ;;  %v12364_v51 = vadd.f32 %v12347_v54, %v3103_v63  ;;  %v3313_v34 = vadd.f32 %v3312_v11, %v3311_v53  ;;  %2915 = vst.msk [vmem:[#allocation3 + $0xc8] sm:$0xff] %vm1463_vm1, %v2883_v17  ;;  %2752 = vst.msk [vmem:[#allocation3 + $0xd8] sm:$0xff] %vm1463_vm1, %v2720_v16  ;;  %v3215_v33 = vsel %vm635_vm0, %v12317_v56, 0.0  ;;  %v3104_v27 = vld [vmem:[#allocation3 + $0x88] sm:$0xff]  ;;  %v3105_v62 = vld [vmem:[#allocation3 + $0x90] sm:$0xff] }
 0x301   : > { %v2946_v3 = vld [vmem:[#allocation3 + $0xb8] sm:$0xff]  ;;  %v3214_v20 = vadd.f32 %v3213_v0, %v3212_v2  ;;  %v2526_v39 = vmul.f32 %v12141_v28, %v12341_v48  ;;  %v2525_v49 = vmul.f32 %v12141_v28, %v12361_v61  ;;  %v2689_v31 = vmul.f32 %v9787_v24, %v12178_v14 }
 0x302   : > { %v3046_v25 = vadd.f32 %v11971_v40, %v2946_v3  ;;  %3077 = vst.msk [vmem:[#allocation3 + $0xb0] sm:$0xff] %vm1463_vm1, %v3045_v47  ;;  %v3217_v40 = vsel %vm635_vm0, %v12321_v50, 0.0  ;;  %v3315_v6 = vadd.f32 %v3314_v60, %v3313_v34  ;;  %v12389_v11 = vmul.f32 %v12350_v13, %v12350_v13  ;;  %v2656_v60 = vld [vmem:[#allocation2 + $0x22f] sm:$0xff] }
 0x303   : > { %v3216_v4 = vadd.f32 %v3215_v33, %v3214_v20  ;;  %v2457_v44 = vld [vmem:[#allocation3 + $0xf0] sm:$0xff]  ;;  %v2458_v32 = vld [vmem:[#allocation3 + $0xf8] sm:$0xff]  ;;  %v2690_v23 = vmul.f32 %v9787_v24, %v12180_v37  ;;  %v12394_v28 = vmul.f32 %v12364_v51, %v12364_v51  ;;  %v3318_v26 = vsel %vm3300_vm2, %v12246_v18, 0.0 }
 0x304   : > { %3078 = vst.msk [vmem:[#allocation3 + $0xb8] sm:$0xff] %vm1463_vm1, %v3046_v25  ;;  %v3317_v63 = vadd.f32 %v3316_v22, %v3315_v6  ;;  %v2557_v14 = vadd.f32 %v2525_v49, %v2457_v44  ;;  %v2558_v5 = vadd.f32 %v2526_v39, %v2458_v32  ;;  %v3320_v45 = vsel %vm3300_vm2, %v12262_v38, 0.0  ;;  %v2655_v38 = vld [vmem:[#allocation2 + $0x227] sm:$0xff] }
 0x305   : > { %v3218_v42 = vadd.f32 %v3217_v40, %v3216_v4  ;;  %v2853_v41 = vmul.f32 %v12357_v46, %v11939_v58  ;;  %v2784_v0 = vld [vmem:[#allocation3 + $0xd0] sm:$0xff]  ;;  %v2620_v53 = vld [vmem:[#allocation3 + $0xe0] sm:$0xff]  ;;  %v12403_v21 = vadd.f32 %v12347_v54, %v3104_v27  ;;  %v12406_v17 = vadd.f32 %v12347_v54, %v3105_v62  ;;  %v3106_v27 = vld [vmem:[#allocation3 + $0x98] sm:$0xff] }
 0x306   : > { %v2621_v37 = vld [vmem:[#allocation3 + $0xe8] sm:$0xff]  ;;  %v3319_v16 = vadd.f32 %v3318_v26, %v3317_v63  ;;  %v2947_v18 = vld [vmem:[#allocation3 + $0xc0] sm:$0xff]  ;;  %v2884_v2 = vadd.f32 %v2852_v29, %v2784_v0  ;;  %2589 = vst.msk [vmem:[#allocation3 + $0xf0] sm:$0xff] %vm1463_vm1, %v2557_v14  ;;  %2590 = vst.msk [vmem:[#allocation3 + $0xf8] sm:$0xff] %vm1463_vm1, %v2558_v5  ;;  %v2721_v3 = vadd.f32 %v2689_v31, %v2620_v53  ;;  %v3219_v58 = vsel %vm635_vm0, %v12389_v11, 0.0 }
 0x307   : > { %v2722_v47 = vadd.f32 %v2690_v23, %v2621_v37  ;;  %v2948_v34 = vld [vmem:[#allocation3 + $0xc8] sm:$0xff]  ;;  %v3047_v25 = vadd.f32 %v12077_v15, %v2947_v18  ;;  %v2785_v20 = vld [vmem:[#allocation3 + $0xd8] sm:$0xff]  ;;  %v3220_v22 = vadd.f32 %v3219_v58, %v3218_v42  ;;  %v3221_v39 = vsel %vm635_vm0, %v12394_v28, 0.0  ;;  %v3107_v4 = vld [vmem:[#allocation3 + $0xa0] sm:$0xff] }
 0x308   : > { %v3321_v29 = vadd.f32 %v3320_v45, %v3319_v16  ;;  %v3048_v33 = vadd.f32 %v12045_v10, %v2948_v34  ;;  %v2885_v40 = vadd.f32 %v2853_v41, %v2785_v20  ;;  %2916 = vst.msk [vmem:[#allocation3 + $0xd0] sm:$0xff] %vm1463_vm1, %v2884_v2  ;;  %2753 = vst.msk [vmem:[#allocation3 + $0xe0] sm:$0xff] %vm1463_vm1, %v2721_v3  ;;  %v3322_v6 = vsel %vm3300_vm2, %v12301_v55, 0.0  ;;  %v3108_v53 = vld [vmem:[#allocation3 + $0xa8] sm:$0xff] }
 0x309   : > { %2754 = vst.msk [vmem:[#allocation3 + $0xe8] sm:$0xff] %vm1463_vm1, %v2722_v47  ;;  %v3324_v15 = vsel %vm3300_vm2, %v12309_v1, 0.0  ;;  %3079 = vst.msk [vmem:[#allocation3 + $0xc0] sm:$0xff] %vm1463_vm1, %v3047_v25  ;;  %v2691_v10 = vmul.f32 %v9787_v24, %v2655_v38  ;;  %v2692_v31 = vmul.f32 %v9787_v24, %v2656_v60  ;;  %v3175_v62 = vmul.f32 %v12403_v21, %v12403_v21  ;;  %v12433_v1 = vld [vmem:[%s15246_s5 + $0x8] ss:$0 sm:$0xff]  ;;  %v2821_v60 = vld [vmem:[#allocation2 + $0x230] sm:$0xff] }
 0x30a   : > { %v3323_v49 = vadd.f32 %v3322_v6, %v3321_v29  ;;  %3080 = vst.msk [vmem:[#allocation3 + $0xc8] sm:$0xff] %vm1463_vm1, %v3048_v33  ;;  %2917 = vst.msk [vmem:[#allocation3 + $0xd8] sm:$0xff] %vm1463_vm1, %v2885_v40  ;;  %v3176_v55 = vmul.f32 %v12406_v17, %v12406_v17  ;;  %v3222_v44 = vadd.f32 %v3221_v39, %v3220_v22  ;;  %v3326_v63 = vsel %vm3300_vm2, %v12317_v56, 0.0  ;;  %v2820_v47 = vld [vmem:[#allocation2 + $0x228] sm:$0xff]  ;;  %v3109_v22 = vld [vmem:[#allocation3 + $0xb0] sm:$0xff] }
 0x30b   : > { %v3018_v23 = vmul.f32 %v12433_v1, %v12036_v43  ;;  %v3017_v24 = vmul.f32 %v12433_v1, %v12062_v59  ;;  %v3328_v26 = vsel %vm3300_vm2, %v12321_v50, 0.0  ;;  %v2855_v14 = vmul.f32 %v12357_v46, %v12258_v7 }
 0x30c   : > { %v3325_v32 = vadd.f32 %v3324_v15, %v3323_v49  ;;  %v2854_v45 = vmul.f32 %v12357_v46, %v12273_v8  ;;  %v12448_v41 = vadd.f32 %v12347_v54, %v3106_v27  ;;  %v12451_v56 = vadd.f32 %v12347_v54, %v3107_v4 }
 0x30d   : > { %v2622_v5 = vld [vmem:[#allocation3 + $0xf0] sm:$0xff]  ;;  %v2623_v42 = vld [vmem:[#allocation3 + $0xf8] sm:$0xff]  ;;  %v3223_v50 = vsel %vm635_vm0, %v3175_v62, 0.0  ;;  %v3225_v2 = vsel %vm635_vm0, %v3176_v55, 0.0  ;;  %v3330_v8 = vsel %vm3300_vm2, %v12389_v11, 0.0  ;;  %v3332_v25 = vsel %vm3300_vm2, %v12394_v28, 0.0 }
 0x30e   : > { %v3327_v43 = vadd.f32 %v3326_v63, %v3325_v32  ;;  %v2723_v0 = vadd.f32 %v2691_v10, %v2622_v5  ;;  %v2724_v59 = vadd.f32 %v2692_v31, %v2623_v42  ;;  %v3224_v18 = vadd.f32 %v3223_v50, %v3222_v44  ;;  %v3110_v10 = vld [vmem:[#allocation3 + $0xb8] sm:$0xff] }
 0x30f   : > { %v2949_v37 = vld [vmem:[#allocation3 + $0xd0] sm:$0xff]  ;;  %v2786_v16 = vld [vmem:[#allocation3 + $0xe0] sm:$0xff]  ;;  %v12465_v11 = vadd.f32 %v12347_v54, %v3108_v53  ;;  %v3177_v33 = vmul.f32 %v12448_v41, %v12448_v41  ;;  %v3178_v28 = vmul.f32 %v12451_v56, %v12451_v56  ;;  %v2856_v40 = vmul.f32 %v12357_v46, %v2820_v47 }
 0x310   : > { %v2787_v7 = vld [vmem:[#allocation3 + $0xe8] sm:$0xff]  ;;  %v3329_v38 = vadd.f32 %v3328_v26, %v3327_v43  ;;  %v3049_v3 = vadd.f32 %v3017_v24, %v2949_v37  ;;  %2755 = vst.msk [vmem:[#allocation3 + $0xf0] sm:$0xff] %vm1463_vm1, %v2723_v0  ;;  %2756 = vst.msk [vmem:[#allocation3 + $0xf8] sm:$0xff] %vm1463_vm1, %v2724_v59  ;;  %v2886_v58 = vadd.f32 %v2854_v45, %v2786_v16  ;;  %v3334_v27 = vsel %vm3300_vm2, %v3175_v62, 0.0 }
 0x311   : > { %v2887_v34 = vadd.f32 %v2855_v14, %v2787_v7  ;;  %v2950_v20 = vld [vmem:[#allocation3 + $0xd8] sm:$0xff]  ;;  %v3226_v6 = vadd.f32 %v3225_v2, %v3224_v18  ;;  %v2857_v49 = vmul.f32 %v12357_v46, %v2821_v60  ;;  %v12475_v31 = vadd.f32 %v12347_v54, %v3109_v22  ;;  %v3112_v0 = vld [vmem:[#allocation3 + $0xc8] sm:$0xff] }
 0x312   : > { %v3331_v39 = vadd.f32 %v3330_v8, %v3329_v38  ;;  %v3050_v29 = vadd.f32 %v3018_v23, %v2950_v20  ;;  %3081 = vst.msk [vmem:[#allocation3 + $0xd0] sm:$0xff] %vm1463_vm1, %v3049_v3  ;;  %2918 = vst.msk [vmem:[#allocation3 + $0xe0] sm:$0xff] %vm1463_vm1, %v2886_v58  ;;  %v3336_v4 = vsel %vm3300_vm2, %v3176_v55, 0.0  ;;  %v3020_v44 = vmul.f32 %v12433_v1, %v12341_v48  ;;  %v3111_v23 = vld [vmem:[#allocation3 + $0xc0] sm:$0xff]  ;;  %v2985_v38 = vld [vmem:[#allocation2 + $0x229] sm:$0xff] }
 0x313   : > { %2919 = vst.msk [vmem:[#allocation3 + $0xe8] sm:$0xff] %vm1463_vm1, %v2887_v34  ;;  %v3019_v32 = vmul.f32 %v12433_v1, %v12361_v61  ;;  %v3179_v63 = vmul.f32 %v12465_v11, %v12465_v11  ;;  %v3227_v46 = vsel %vm635_vm0, %v3177_v33, 0.0  ;;  %v3229_v26 = vsel %vm635_vm0, %v3178_v28, 0.0  ;;  %v2986_v8 = vld [vmem:[#allocation2 + $0x231] sm:$0xff] }
 0x314   : > { %v3333_v15 = vadd.f32 %v3332_v25, %v3331_v39  ;;  %3082 = vst.msk [vmem:[#allocation3 + $0xd8] sm:$0xff] %vm1463_vm1, %v3050_v29  ;;  %v3338_v14 = vsel %vm3300_vm2, %v3177_v33, 0.0  ;;  %v12489_v55 = vadd.f32 %v12347_v54, %v3110_v10  ;;  %v3228_v48 = vadd.f32 %v3227_v46, %v3226_v6 }
 0x315   : > { %v3340_v61 = vsel %vm3300_vm2, %v3178_v28, 0.0  ;;  %v12493_v59 = vadd.f32 %v12347_v54, %v3111_v23  ;;  %v3180_v53 = vmul.f32 %v12475_v31, %v12475_v31  ;;  %v12500_v3 = vadd.f32 %v12347_v54, %v3112_v0 }
 0x316   : > { %v3335_v24 = vadd.f32 %v3334_v27, %v3333_v15  ;;  %v3230_v47 = vadd.f32 %v3229_v26, %v3228_v48  ;;  %v3342_v34 = vsel %vm3300_vm2, %v3179_v63, 0.0  ;;  %v3181_v20 = vmul.f32 %v12489_v55, %v12489_v55 }
 0x317   : > { %v2788_v62 = vld [vmem:[#allocation3 + $0xf0] sm:$0xff]  ;;  %v2789_v5 = vld [vmem:[#allocation3 + $0xf8] sm:$0xff]  ;;  %v3182_v60 = vmul.f32 %v12493_v59, %v12493_v59  ;;  %v3344_v22 = vsel %vm3300_vm2, %v3180_v53, 0.0  ;;  %v3021_v33 = vmul.f32 %v12433_v1, %v2985_v38  ;;  %v3022_v28 = vmul.f32 %v12433_v1, %v2986_v8 }
 0x318   : > { %v3337_v42 = vadd.f32 %v3336_v4, %v3335_v24  ;;  %v2888_v45 = vadd.f32 %v2856_v40, %v2788_v62  ;;  %v2889_v43 = vadd.f32 %v2857_v49, %v2789_v5  ;;  %v3231_v40 = vsel %vm635_vm0, %v3179_v63, 0.0 }
 0x319   : > { %v2951_v50 = vld [vmem:[#allocation3 + $0xe0] sm:$0xff]  ;;  %v3113_v16 = vld [vmem:[#allocation3 + $0xd0] sm:$0xff]  ;;  %v3183_v6 = vmul.f32 %v12500_v3, %v12500_v3  ;;  %v3232_v15 = vadd.f32 %v3231_v40, %v3230_v47  ;;  %v3233_v49 = vsel %vm635_vm0, %v3180_v53, 0.0  ;;  %v3237_v38 = vsel %vm635_vm0, %v3182_v60, 0.0 }
 0x31a   : > { %v2952_v37 = vld [vmem:[#allocation3 + $0xe8] sm:$0xff]  ;;  %v3339_v7 = vadd.f32 %v3338_v14, %v3337_v42  ;;  %2920 = vst.msk [vmem:[#allocation3 + $0xf0] sm:$0xff] %vm1463_vm1, %v2888_v45  ;;  %2921 = vst.msk [vmem:[#allocation3 + $0xf8] sm:$0xff] %vm1463_vm1, %v2889_v43  ;;  %v3051_v18 = vadd.f32 %v3019_v32, %v2951_v50  ;;  %v12506_v25 = vadd.f32 %v12347_v54, %v3113_v16  ;;  %v3348_v32 = vsel %vm3300_vm2, %v3182_v60, 0.0 }
 0x31b   : > { %v3052_v2 = vadd.f32 %v3020_v44, %v2952_v37  ;;  %v3114_v39 = vld [vmem:[#allocation3 + $0xd8] sm:$0xff]  ;;  %v3346_v44 = vsel %vm3300_vm2, %v3181_v20, 0.0  ;;  %v3234_v62 = vadd.f32 %v3233_v49, %v3232_v15  ;;  %v3350_v48 = vsel %vm3300_vm2, %v3183_v6, 0.0 }
 0x31c   : > { %v3341_v58 = vadd.f32 %v3340_v61, %v3339_v7  ;;  %3083 = vst.msk [vmem:[#allocation3 + $0xe0] sm:$0xff] %vm1463_vm1, %v3051_v18  ;;  %v12520_v27 = vadd.f32 %v12347_v54, %v3114_v39  ;;  %v3184_v4 = vmul.f32 %v12506_v25, %v12506_v25  ;;  %v3235_v50 = vsel %vm635_vm0, %v3181_v20, 0.0 }
 0x31d   : > { %3084 = vst.msk [vmem:[#allocation3 + $0xe8] sm:$0xff] %vm1463_vm1, %v3052_v2  ;;  %v3236_v7 = vadd.f32 %v3235_v50, %v3234_v62  ;;  %v3239_v40 = vsel %vm635_vm0, %v3183_v6, 0.0 }
 0x31e   : > { %v3343_v29 = vadd.f32 %v3342_v34, %v3341_v58  ;;  %v3185_v45 = vmul.f32 %v12520_v27, %v12520_v27  ;;  %v3352_v43 = vsel %vm3300_vm2, %v3184_v4, 0.0 }
 0x31f   : > { %v3238_v39 = vadd.f32 %v3237_v38, %v3236_v7 }
 0x320   : > { %v3345_v10 = vadd.f32 %v3344_v22, %v3343_v29  ;;  %v3354_v18 = vsel %vm3300_vm2, %v3185_v45, 0.0 }
 0x321   : > { %v2953_v1 = vld [vmem:[#allocation3 + $0xf0] sm:$0xff]  ;;  %v2954_v23 = vld [vmem:[#allocation3 + $0xf8] sm:$0xff]  ;;  %v3240_v15 = vadd.f32 %v3239_v40, %v3238_v39 }
 0x322   : > { %v3347_v24 = vadd.f32 %v3346_v44, %v3345_v10  ;;  %v3053_v63 = vadd.f32 %v3021_v33, %v2953_v1  ;;  %v3054_v46 = vadd.f32 %v3022_v28, %v2954_v23  ;;  %v3241_v10 = vsel %vm635_vm0, %v3184_v4, 0.0 }
 0x323   : > { %v3115_v26 = vld [vmem:[#allocation3 + $0xe0] sm:$0xff]  ;;  %v3242_v1 = vadd.f32 %v3241_v10, %v3240_v15 }
 0x324   : > { %v3116_v14 = vld [vmem:[#allocation3 + $0xe8] sm:$0xff]  ;;  %v3349_v5 = vadd.f32 %v3348_v32, %v3347_v24  ;;  %3085 = vst.msk [vmem:[#allocation3 + $0xf0] sm:$0xff] %vm1463_vm1, %v3053_v63  ;;  %3086 = vst.msk [vmem:[#allocation3 + $0xf8] sm:$0xff] %vm1463_vm1, %v3054_v46  ;;  %v12530_v42 = vadd.f32 %v12347_v54, %v3115_v26  ;;  %v3243_v24 = vsel %vm635_vm0, %v3185_v45, 0.0 }
 0x325   : > { %v12533_v61 = vadd.f32 %v12347_v54, %v3116_v14  ;;  %v3244_v46 = vadd.f32 %v3243_v24, %v3242_v1 }
 0x326   : > { %v3351_v0 = vadd.f32 %v3350_v48, %v3349_v5  ;;  %v3186_v53 = vmul.f32 %v12530_v42, %v12530_v42 }
 0x327   : > { %v3187_v16 = vmul.f32 %v12533_v61, %v12533_v61 }
 0x328   : > { %v3353_v37 = vadd.f32 %v3352_v43, %v3351_v0  ;;  %v3356_v2 = vsel %vm3300_vm2, %v3186_v53, 0.0  ;;  %v3245_v26 = vsel %vm635_vm0, %v3186_v53, 0.0 }
 0x329   : > { %v3358_v29 = vsel %vm3300_vm2, %v3187_v16, 0.0  ;;  %v3246_v6 = vadd.f32 %v3245_v26, %v3244_v46  ;;  %v3247_v48 = vsel %vm635_vm0, %v3187_v16, 0.0  ;;  %v15438_v26 = vld [vmem:[#allocation19_spill] sm:$0xff] }
 0x32a   : > { %v3355_v8 = vadd.f32 %v3354_v18, %v3353_v37 }
 0x32b   : > { %v3117_v47 = vld [vmem:[#allocation3 + $0xf0] sm:$0xff]  ;;  %v3118_v58 = vld [vmem:[#allocation3 + $0xf8] sm:$0xff]  ;;  %v3248_v4 = vadd.f32 %v3247_v48, %v3246_v6 }
 0x32c   : > { %v3357_v34 = vadd.f32 %v3356_v2, %v3355_v8  ;;  %v12547_v22 = vadd.f32 %v12347_v54, %v3117_v47  ;;  %v12550_v20 = vadd.f32 %v12347_v54, %v3118_v58 }
 0x32e   : > { %v3359_v33 = vadd.f32 %v3358_v29, %v3357_v34  ;;  %v3188_v28 = vmul.f32 %v12547_v22, %v12547_v22  ;;  %v3189_v60 = vmul.f32 %v12550_v20, %v12550_v20 }
 0x330   : > { %v3360_v49 = vsel %vm3300_vm2, %v3188_v28, 0.0  ;;  %v3362_v54 = vsel %vm3300_vm2, %v3189_v60, 0.0  ;;  %v3249_v0 = vsel %vm635_vm0, %v3188_v28, 0.0  ;;  %v3251_v37 = vsel %vm635_vm0, %v3189_v60, 0.0 }
 0x331   : > { %v3361_v44 = vadd.f32 %v3360_v49, %v3359_v33  ;;  %v3250_v50 = vadd.f32 %v3249_v0, %v3248_v4  ;;  %v15440_v0 = vld [vmem:[#allocation12_spill] sm:$0xff] }
 0x333   : > { %v3363_v32 = vadd.f32 %v3362_v54, %v3361_v44  ;;  %v3252_v7 = vadd.f32 %v3251_v37, %v3250_v50 }
 0x335   : > { %v3364_v23 = vrot.slane %v3363_v32, 4  ;;  %v3253_v2 = vrot.slane %v3252_v7, 4 }
 0x337   : > { %v3365_v63 = vadd.f32 %v3364_v23, %v3363_v32  ;;  %v3254_v58 = vadd.f32 %v3253_v2, %v3252_v7 }
 0x339   : > { %v3366_v14 = vrot.slane %v3365_v63, 2  ;;  %v3255_v16 = vrot.slane %v3254_v58, 2 }
 0x33b   : > { %v3367_v62 = vadd.f32 %v3366_v14, %v3365_v63  ;;  %v3256_v34 = vadd.f32 %v3255_v16, %v3254_v58 }
 0x33d   : > { %v3368_v5 = vrot.slane %v3367_v62, 1  ;;  %v3257_v29 = vrot.slane %v3256_v34, 1 }
 0x33f   : > { %v3369_v43 = vadd.f32 %v3368_v5, %v3367_v62  ;;  %v3258_v1 = vadd.f32 %v3257_v29, %v3256_v34  ;;  %v15439_v62 = vld [vmem:[#allocation21_spill] sm:$0xff] }
 0x341   : > { %9554 = vrsqrt.f32 %v3369_v43  ;;  %vm3372_vm3 = vcmp.eq.f32.partialorder %v3369_v43, inf  ;;  %v3375_v53 = vand.u32 2147483648, %v3369_v43  ;;  %vm3374_vm4 = vcmp.eq.f32.partialorder %v3369_v43, 0.0 }
 0x342   : > { %vm3261_vm5 = vcmp.eq.f32.partialorder %v3258_v1, inf  ;;  %vm3263_vm6 = vcmp.eq.f32.partialorder %v3258_v1, 0.0 }
 0x34b   : > { %v9555_v45 = vpop.eup %9554 }
 0x34c   : > { %v3371_v18 = vmul.f32 %v9555_v45, %v3369_v43 }
 0x34e   : > { %v3373_v38 = vsel %vm3372_vm3, %v3369_v43, %v3371_v18 }
 0x34f   : > { %v3376_v8 = vsel %vm3374_vm4, %v3375_v53, %v3373_v38  ;;  %v15441_v53 = vld [vmem:[#allocation9_spill] sm:$0xff] }
 0x350   : > { %v3377_v47 = vmax.f32 %v3376_v8, 1e-12  ;;  %v15442_v8 = vld [vmem:[#allocation17_spill] sm:$0xff] }
 0x352   : > { %9556 = vrcp.f32 %v3377_v47 }
 0x353   : > { %9558 = vrsqrt.f32 %v3258_v1 }
 0x35c   : > { %v12566_v39 = vpop.eup %9556 }
 0x35d   : > { %v3395_v33 = vmul.f32 %v12566_v39, %v12364_v51  ;;  %v3396_v28 = vmul.f32 %v12566_v39, %v12403_v21  ;;  %v3379_v60 = vmul.f32 %v12566_v39, %v15432_v19  ;;  %v3380_v40 = vmul.f32 %v12566_v39, %v15433_v52  ;;  %v9559_v34 = vpop.eup %9558 }
 0x35e   : > { %v3399_v15 = vmul.f32 %v12566_v39, %v12451_v56  ;;  %v3400_v49 = vmul.f32 %v12566_v39, %v12465_v11  ;;  %v3397_v54 = vmul.f32 %v12566_v39, %v12406_v17  ;;  %v3398_v32 = vmul.f32 %v12566_v39, %v12448_v41 }
 0x35f   : > { %v9358_v10 = vpack.i.bf16 %v3396_v28, %v3395_v33  ;;  %v9363_v44 = vpack.i.bf16 %v3380_v40, %v3379_v60  ;;  %v3401_v23 = vmul.f32 %v12566_v39, %v12475_v31  ;;  %v3402_v24 = vmul.f32 %v12566_v39, %v12489_v55  ;;  %v15443_v28 = vld [vmem:[#allocation22_spill] sm:$0xff] }
 0x360   : > { %v9378_v63 = vpack.i.bf16 %v3400_v49, %v3399_v15  ;;  %v9368_v46 = vpack.i.bf16 %v3398_v32, %v3397_v54  ;;  %v3381_v14 = vmul.f32 %v12566_v39, %v15438_v26  ;;  %v3382_v6 = vmul.f32 %v12566_v39, %v15439_v62  ;;  %v15444_v40 = vld [vmem:[#allocation18_spill] sm:$0xff] }
 0x361   : > { %9359 = vrot.lane.b32.xlu0 %v9358_v10, %s9842_s27  ;;  %9364 = vrot.lane.b32.xlu1 %v9363_v44, %s9842_s27  ;;  %v3403_v5 = vmul.f32 %v12566_v39, %v12493_v59  ;;  %v3404_v48 = vmul.f32 %v12566_v39, %v12500_v3  ;;  %v9388_v43 = vpack.i.bf16 %v3402_v24, %v3401_v23 }
 0x362   : > { %v9373_v4 = vpack.i.bf16 %v3382_v6, %v3381_v14  ;;  %v3383_v50 = vmul.f32 %v12566_v39, %v15440_v0  ;;  %v3384_v37 = vmul.f32 %v12566_v39, %v12152_v12  ;;  %v3405_v45 = vmul.f32 %v12566_v39, %v12506_v25 }
 0x363   : > { %v9398_v7 = vpack.i.bf16 %v3404_v48, %v3403_v5  ;;  %v3406_v2 = vmul.f32 %v12566_v39, %v12520_v27  ;;  %v3385_v38 = vmul.f32 %v12566_v39, %v15441_v53  ;;  %v3386_v47 = vmul.f32 %v12566_v39, %v15442_v8 }
 0x364   : > { %v9383_v18 = vpack.i.bf16 %v3384_v37, %v3383_v50  ;;  %v3407_v58 = vmul.f32 %v12566_v39, %v12530_v42  ;;  %v3408_v16 = vmul.f32 %v12566_v39, %v12533_v61  ;;  %v3387_v60 = vmul.f32 %v12566_v39, %v15443_v28 }
 0x365   : > { %9379 = vrot.lane.b32.xlu0 %v9378_v63, %s9842_s27  ;;  %9369 = vrot.lane.b32.xlu1 %v9368_v46, %s9842_s27  ;;  %v9408_v29 = vpack.i.bf16 %v3406_v2, %v3405_v45  ;;  %v9393_v33 = vpack.i.bf16 %v3386_v47, %v3385_v38  ;;  %v3388_v15 = vmul.f32 %v12566_v39, %v15444_v40  ;;  %v3264_v46 = vand.u32 2147483648, %v3258_v1  ;;  %v12657_v38 = vld [vmem:[%s15248_s7] ss:$0 sm:$0xff] }
 0x366   : > { %v3260_v49 = vmul.f32 %v9559_v34, %v3258_v1  ;;  %v9418_v10 = vpack.i.bf16 %v3408_v16, %v3407_v58  ;;  %v3409_v44 = vmul.f32 %v12566_v39, %v12547_v22  ;;  %v3410_v32 = vmul.f32 %v12566_v39, %v12550_v20 }
 0x367   : > { %v9403_v54 = vpack.i.bf16 %v3388_v15, %v3387_v60  ;;  %v3389_v23 = vmul.f32 %v12566_v39, %v12225_v35  ;;  %v3390_v24 = vmul.f32 %v12566_v39, %v12228_v57  ;;  %v3391_v5 = vmul.f32 %v12566_v39, %v12231_v30 }
 0x368   : > { %v3262_v63 = vsel %vm3261_vm5, %v3258_v1, %v3260_v49  ;;  %v9428_v14 = vpack.i.bf16 %v3410_v32, %v3409_v44  ;;  %v3392_v48 = vmul.f32 %v12566_v39, %v12238_v9  ;;  %v3393_v50 = vmul.f32 %v12566_v39, %v12294_v36 }
 0x369   : > { %9389 = vrot.lane.b32.xlu0 %v9388_v43, %s9842_s27  ;;  %9374 = vrot.lane.b32.xlu1 %v9373_v4, %s9842_s27  ;;  %v9413_v6 = vpack.i.bf16 %v3390_v24, %v3389_v23  ;;  %v3265_v43 = vsel %vm3263_vm6, %v3264_v46, %v3262_v63  ;;  %v3394_v37 = vmul.f32 %v12566_v39, %v12350_v13 }
 0x36a   : > { %v9423_v4 = vpack.i.bf16 %v3392_v48, %v3391_v5 }
 0x36b   : > { %v9433_v45 = vpack.i.bf16 %v3394_v37, %v3393_v50 }
 0x36d   : > { %9399 = vrot.lane.b32.xlu0 %v9398_v7, %s9842_s27  ;;  %9384 = vrot.lane.b32.xlu1 %v9383_v18, %s9842_s27  ;;  %v3266_v7 = vmax.f32 %v3265_v43, 1e-12 }
 0x36f   : > { %9560 = vrcp.f32 %v3266_v7 }
 0x371   : > { %9409 = vrot.lane.b32.xlu0 %v9408_v29, %s9842_s27  ;;  %9394 = vrot.lane.b32.xlu1 %v9393_v33, %s9842_s27 }
 0x375   : > { %9419 = vrot.lane.b32.xlu0 %v9418_v10, %s9842_s27  ;;  %9404 = vrot.lane.b32.xlu1 %v9403_v54, %s9842_s27 }
 0x379   : > { %9429 = vrot.lane.b32.xlu0 %v9428_v14, %s9842_s27  ;;  %9414 = vrot.lane.b32.xlu1 %v9413_v6, %s9842_s27  ;;  %v12648_v1 = vpop.eup %9560 }
 0x37a   : > { %v3268_v18 = vmul.f32 %v12648_v1, %v15432_v19  ;;  %v3284_v2 = vmul.f32 %v12648_v1, %v12364_v51  ;;  %v3269_v58 = vmul.f32 %v12648_v1, %v15433_v52  ;;  %v3285_v16 = vmul.f32 %v12648_v1, %v12403_v21 }
 0x37b   : > { %v3270_v34 = vmul.f32 %v12648_v1, %v15438_v26  ;;  %v3286_v15 = vmul.f32 %v12648_v1, %v12406_v17  ;;  %v3271_v49 = vmul.f32 %v12648_v1, %v15439_v62  ;;  %v3287_v32 = vmul.f32 %v12648_v1, %v12448_v41 }
 0x37c   : > { %v3418_v39 = vmul.f32 %v12657_v38, %v3268_v18  ;;  %v3434_v47 = vmul.f32 %v12657_v38, %v3284_v2  ;;  %v3419_v33 = vmul.f32 %v12657_v38, %v3269_v58  ;;  %v3435_v60 = vmul.f32 %v12657_v38, %v3285_v16 }
 0x37d   : > { %9424 = vrot.lane.b32.xlu1 %v9423_v4, %s9842_s27  ;;  %v3420_v44 = vmul.f32 %v12657_v38, %v3270_v34  ;;  %v3436_v54 = vmul.f32 %v12657_v38, %v3286_v15  ;;  %v3272_v23 = vmul.f32 %v12648_v1, %v15440_v0  ;;  %v3421_v63 = vmul.f32 %v12657_v38, %v3271_v49 }
 0x37e   : > { %v9438_v29 = vpack.i.bf16 %v3418_v39, %v3434_v47  ;;  %v9440_v10 = vpack.i.bf16 %v3419_v33, %v3435_v60  ;;  %v3437_v46 = vmul.f32 %v12657_v38, %v3287_v32  ;;  %v3288_v14 = vmul.f32 %v12648_v1, %v12451_v56 }
 0x37f   : > { %v9442_v24 = vpack.i.bf16 %v3420_v44, %v3436_v54  ;;  %v3422_v6 = vmul.f32 %v12657_v38, %v3272_v23  ;;  %v3273_v43 = vmul.f32 %v12648_v1, %v12152_v12  ;;  %v3289_v4 = vmul.f32 %v12648_v1, %v12465_v11 }
 0x380   : > { %v9444_v5 = vpack.i.bf16 %v3421_v63, %v3437_v46  ;;  %v3438_v48 = vmul.f32 %v12657_v38, %v3288_v14  ;;  %v3274_v50 = vmul.f32 %v12648_v1, %v15441_v53  ;;  %v3290_v18 = vmul.f32 %v12648_v1, %v12475_v31 }
 0x381   : > { %9434 = vrot.lane.b32.xlu1 %v9433_v45, %s9842_s27  ;;  %v3423_v7 = vmul.f32 %v12657_v38, %v3273_v43  ;;  %v3439_v45 = vmul.f32 %v12657_v38, %v3289_v4  ;;  %v3275_v2 = vmul.f32 %v12648_v1, %v15442_v8  ;;  %v3291_v16 = vmul.f32 %v12648_v1, %v12489_v55 }
 0x382   : > { %v9446_v37 = vpack.i.bf16 %v3422_v6, %v3438_v48  ;;  %v3424_v47 = vmul.f32 %v12657_v38, %v3274_v50  ;;  %v3440_v58 = vmul.f32 %v12657_v38, %v3290_v18  ;;  %v3276_v60 = vmul.f32 %v12648_v1, %v15443_v28 }
 0x383   : > { %v9448_v39 = vpack.i.bf16 %v3423_v7, %v3439_v45  ;;  %v3425_v34 = vmul.f32 %v12657_v38, %v3275_v2  ;;  %v3441_v33 = vmul.f32 %v12657_v38, %v3291_v16  ;;  %v3292_v15 = vmul.f32 %v12648_v1, %v12493_v59 }
 0x384   : > { %v3277_v49 = vmul.f32 %v12648_v1, %v15444_v40  ;;  %v3426_v44 = vmul.f32 %v12657_v38, %v3276_v60  ;;  %v3293_v32 = vmul.f32 %v12648_v1, %v12500_v3  ;;  %v3278_v23 = vmul.f32 %v12648_v1, %v12225_v35 }
 0x385   : > { %v3442_v54 = vmul.f32 %v12657_v38, %v3292_v15  ;;  %v3294_v14 = vmul.f32 %v12648_v1, %v12506_v25  ;;  %v3279_v43 = vmul.f32 %v12648_v1, %v12228_v57  ;;  %v3295_v4 = vmul.f32 %v12648_v1, %v12520_v27 }
 0x386   : > { %v3427_v63 = vmul.f32 %v12657_v38, %v3277_v49  ;;  %v3443_v46 = vmul.f32 %v12657_v38, %v3293_v32  ;;  %v3428_v6 = vmul.f32 %v12657_v38, %v3278_v23  ;;  %v3280_v50 = vmul.f32 %v12648_v1, %v12231_v30 }
 0x387   : > { %v3444_v48 = vmul.f32 %v12657_v38, %v3294_v14  ;;  %v3429_v7 = vmul.f32 %v12657_v38, %v3279_v43  ;;  %v3445_v45 = vmul.f32 %v12657_v38, %v3295_v4  ;;  %v3296_v18 = vmul.f32 %v12648_v1, %v12530_v42 }
 0x388   : > { %v3281_v2 = vmul.f32 %v12648_v1, %v12238_v9  ;;  %v3297_v16 = vmul.f32 %v12648_v1, %v12533_v61  ;;  %v3282_v60 = vmul.f32 %v12648_v1, %v12294_v36  ;;  %v3298_v15 = vmul.f32 %v12648_v1, %v12547_v22 }
 0x389   : > { %v3283_v49 = vmul.f32 %v12648_v1, %v12350_v13  ;;  %v3299_v32 = vmul.f32 %v12648_v1, %v12550_v20 }
 0x397   : > { %9439 = vxpose.xlu0.b32.start [1/16] (narrow) %v9438_v29, 32  ;;  %v9450_v29 = vpack.i.bf16 %v3424_v47, %v3440_v58  ;;  %v3430_v47 = vmul.f32 %v12657_v38, %v3280_v50  ;;  %v3446_v58 = vmul.f32 %v12657_v38, %v3296_v18 }
 0x39b   : > { %9441 = vxpose.xlu0.b32.cont [2/16] (narrow) %v9440_v10, 32  ;;  %v9452_v10 = vpack.i.bf16 %v3425_v34, %v3441_v33  ;;  %v3431_v34 = vmul.f32 %v12657_v38, %v3281_v2  ;;  %v3447_v33 = vmul.f32 %v12657_v38, %v3297_v16 }
 0x39f   : > { %9443 = vxpose.xlu0.b32.cont [3/16] (narrow) %v9442_v24, 32  ;;  %v9454_v24 = vpack.i.bf16 %v3426_v44, %v3442_v54  ;;  %v3432_v44 = vmul.f32 %v12657_v38, %v3282_v60  ;;  %v3448_v54 = vmul.f32 %v12657_v38, %v3298_v15 }
 0x3a1   : > { %v9466_v23 = vpack.i.bf16 %v3432_v44, %v3448_v54 }
 0x3a3   : > { %9445 = vxpose.xlu0.b32.cont [4/16] (narrow) %v9444_v5, 32  ;;  %v9456_v5 = vpack.i.bf16 %v3427_v63, %v3443_v46  ;;  %v3449_v63 = vmul.f32 %v12657_v38, %v3299_v32 }
 0x3a7   : > { %9447 = vxpose.xlu0.b32.cont [5/16] (narrow) %v9446_v37, 32  ;;  %v9458_v37 = vpack.i.bf16 %v3428_v6, %v3444_v48 }
 0x3ab   : > { %9449 = vxpose.xlu0.b32.cont [6/16] (narrow) %v9448_v39, 32  ;;  %v9460_v39 = vpack.i.bf16 %v3429_v7, %v3445_v45 }
 0x3af   : > { %9451 = vxpose.xlu0.b32.cont [7/16] (narrow) %v9450_v29, 32  ;;  %v9462_v29 = vpack.i.bf16 %v3430_v47, %v3446_v58 }
 0x3b3   : > { %9453 = vxpose.xlu0.b32.cont [8/16] (narrow) %v9452_v10, 32  ;;  %v9464_v10 = vpack.i.bf16 %v3431_v34, %v3447_v33 }
 0x3b7   : > { %9455 = vxpose.xlu0.b32.cont [9/16] (narrow) %v9454_v24, 32  ;;  %v3433_v24 = vmul.f32 %v12657_v38, %v3283_v49 }
 0x3b9   : > { %v9468_v46 = vpack.i.bf16 %v3433_v24, %v3449_v63 }
 0x3bb   : > { %9457 = vxpose.xlu0.b32.cont [10/16] (narrow) %v9456_v5, 32 }
 0x3bf   : > { %9459 = vxpose.xlu0.b32.cont [11/16] (narrow) %v9458_v37, 32 }
 0x3c3   : > { %9461 = vxpose.xlu0.b32.cont [12/16] (narrow) %v9460_v39, 32 }
 0x3c7   : > { %9463 = vxpose.xlu0.b32.cont [13/16] (narrow) %v9462_v29, 32 }
 0x3cb   : > { %9465 = vxpose.xlu0.b32.cont [14/16] (narrow) %v9464_v10, 32 }
 0x3cf   : > { %9467 = vxpose.xlu0.b32.cont [15/16] (narrow) %v9466_v23, 32 }
 0x3d3   : > { %v9360_v14 = vpop.permute.xlu0 %9359  ;;  %v9365_v6 = vpop.permute.xlu1 %9364  ;;  %9469 = vxpose.xlu0.b32.end [16/16] (narrow) %v9468_v46, 32 }
 0x3d4   : > { %v9362_v5 = vunpack.i.h.bf16 %v9360_v14  ;;  %v9361_v48 = vunpack.i.l.bf16 %v9360_v14  ;;  %v9367_v43 = vunpack.i.h.bf16 %v9365_v6  ;;  %v9366_v4 = vunpack.i.l.bf16 %v9365_v6 }
 0x3d6   : > { %v9266_v50 = vpack.c.bf16 %v9362_v5, %v9361_v48  ;;  %v9268_v37 = vpack.c.bf16 %v9367_v43, %v9366_v4 }
 0x3d7   : > { %v9380_v7 = vpop.permute.xlu0 %9379  ;;  %v9370_v45 = vpop.permute.xlu1 %9369 }
 0x3d8   : > { %v9372_v1 = vunpack.i.h.bf16 %v9370_v45  ;;  %v9371_v18 = vunpack.i.l.bf16 %v9370_v45  ;;  %9267 = vmatprep.subr.bf16.mxu1 %v9266_v50  ;;  %v9382_v39 = vunpack.i.h.bf16 %v9380_v7  ;;  %v9381_v38 = vunpack.i.l.bf16 %v9380_v7 }
 0x3d9   : > { %9269 = vmatpush3.bf16.msra.mxu1 %v9268_v37 }
 0x3da   : > { %v9270_v2 = vpack.c.bf16 %v9372_v1, %v9371_v18  ;;  %v9274_v10 = vpack.c.bf16 %v9382_v39, %v9381_v38 }
 0x3db   : > { %v9390_v47 = vpop.permute.xlu0 %9389  ;;  %v9375_v58 = vpop.permute.xlu1 %9374 }
 0x3dc   : > { %v9377_v16 = vunpack.i.h.bf16 %v9375_v58  ;;  %v9376_v34 = vunpack.i.l.bf16 %v9375_v58  ;;  %9271 = vmatprep.subr.bf16.mxu1 %v9270_v2  ;;  %v9392_v33 = vunpack.i.h.bf16 %v9390_v47  ;;  %v9391_v60 = vunpack.i.l.bf16 %v9390_v47 }
 0x3de   : > { %v9272_v29 = vpack.c.bf16 %v9377_v16, %v9376_v34  ;;  %v9278_v14 = vpack.c.bf16 %v9392_v33, %v9391_v60 }
 0x3df   : > { %v9400_v15 = vpop.permute.xlu0 %9399  ;;  %v9385_v49 = vpop.permute.xlu1 %9384 }
 0x3e0   : > { %v9387_v44 = vunpack.i.h.bf16 %v9385_v49  ;;  %v9386_v54 = vunpack.i.l.bf16 %v9385_v49  ;;  %9273 = vmatpush3.bf16.msra.mxu1 %v9272_v29  ;;  %v9402_v23 = vunpack.i.h.bf16 %v9400_v15  ;;  %v9401_v24 = vunpack.i.l.bf16 %v9400_v15 }
 0x3e1   : > { %9275 = vmatprep.subr.bf16.mxu1 %v9274_v10 }
 0x3e2   : > { %v9276_v32 = vpack.c.bf16 %v9387_v44, %v9386_v54  ;;  %v9282_v7 = vpack.c.bf16 %v9402_v23, %v9401_v24 }
 0x3e3   : > { %v9410_v63 = vpop.permute.xlu0 %9409  ;;  %v9395_v46 = vpop.permute.xlu1 %9394 }
 0x3e4   : > { %v9397_v6 = vunpack.i.h.bf16 %v9395_v46  ;;  %v9396_v5 = vunpack.i.l.bf16 %v9395_v46  ;;  %9277 = vmatpush3.bf16.msra.mxu1 %v9276_v32  ;;  %v9412_v43 = vunpack.i.h.bf16 %v9410_v63  ;;  %v9411_v4 = vunpack.i.l.bf16 %v9410_v63 }
 0x3e5   : > { %9279 = vmatprep.subr.bf16.mxu1 %v9278_v14 }
 0x3e6   : > { %v9280_v48 = vpack.c.bf16 %v9397_v6, %v9396_v5  ;;  %v9286_v47 = vpack.c.bf16 %v9412_v43, %v9411_v4 }
 0x3e7   : > { %v9420_v50 = vpop.permute.xlu0 %9419  ;;  %v9405_v37 = vpop.permute.xlu1 %9404 }
 0x3e8   : > { %v9407_v45 = vunpack.i.h.bf16 %v9405_v37  ;;  %v9406_v1 = vunpack.i.l.bf16 %v9405_v37  ;;  %9281 = vmatpush3.bf16.msra.mxu1 %v9280_v48  ;;  %v9422_v2 = vunpack.i.h.bf16 %v9420_v50  ;;  %v9421_v39 = vunpack.i.l.bf16 %v9420_v50 }
 0x3e9   : > { %9283 = vmatprep.subr.bf16.mxu1 %v9282_v7 }
 0x3ea   : > { %v9284_v18 = vpack.c.bf16 %v9407_v45, %v9406_v1  ;;  %v9290_v49 = vpack.c.bf16 %v9422_v2, %v9421_v39 }
 0x3eb   : > { %v9415_v38 = vpop.permute.xlu1 %9414  ;;  %v9430_v58 = vpop.permute.xlu0 %9429 }
 0x3ec   : > { %v9417_v16 = vunpack.i.h.bf16 %v9415_v38  ;;  %v9416_v34 = vunpack.i.l.bf16 %v9415_v38  ;;  %9285 = vmatpush3.bf16.msra.mxu1 %v9284_v18  ;;  %v9432_v33 = vunpack.i.h.bf16 %v9430_v58  ;;  %v9431_v60 = vunpack.i.l.bf16 %v9430_v58 }
 0x3ed   : > { %9287 = vmatprep.subr.bf16.mxu1 %v9286_v47  ;;  %v3452_v47 = vld [vmem:[%s15249_s8 + $0x10] sm:$0xff] }
 0x3ee   : > { %v9288_v29 = vpack.c.bf16 %v9417_v16, %v9416_v34  ;;  %v9294_v23 = vpack.c.bf16 %v9432_v33, %v9431_v60  ;;  %v3453_v60 = vld [vmem:[%s15249_s8 + $0x18] sm:$0xff] }
 0x3ef   : > { %v9425_v15 = vpop.permute.xlu1 %9424 }
 0x3f0   : > { %v9427_v10 = vunpack.i.h.bf16 %v9425_v15  ;;  %v9426_v44 = vunpack.i.l.bf16 %v9425_v15  ;;  %9289 = vmatpush3.bf16.msra.mxu1 %v9288_v29 }
 0x3f1   : > { %9291 = vmatprep.subr.bf16.mxu1 %v9290_v49 }
 0x3f2   : > { %v9292_v54 = vpack.c.bf16 %v9427_v10, %v9426_v44 }
 0x3f3   : > { %v9435_v32 = vpop.permute.xlu1 %9434 }
 0x3f4   : > { %v9437_v24 = vunpack.i.h.bf16 %v9435_v32  ;;  %v9436_v63 = vunpack.i.l.bf16 %v9435_v32  ;;  %9293 = vmatpush3.bf16.msra.mxu1 %v9292_v54 }
 0x3f5   : > { %9295 = vmatprep.subr.bf16.mxu1 %v9294_v23 }
 0x3f6   : > { %v9296_v46 = vpack.c.bf16 %v9437_v24, %v9436_v63 }
 0x3f8   : > { %9297 = vmatpush3.bf16.msra.mxu1 %v9296_v46 }
 0x3fc   : > { %3813 = vrot.lane.b32.xlu0 %v15439_v62, %s9843_s21 }
 0x400   : > { %3835 = vrot.lane.b32.xlu0 %v12294_v36, %s9843_s21 }
 0x404   : > { %3839 = vrot.lane.b32.xlu0 %v12364_v51, %s9843_s21 }
 0x408   : > { %3843 = vrot.lane.b32.xlu0 %v12406_v17, %s9843_s21 }
 0x40c   : > { %3847 = vrot.lane.b32.xlu0 %v12451_v56, %s9843_s21 }
 0x410   : > { %3851 = vrot.lane.b32.xlu0 %v12475_v31, %s9843_s21 }
 0x414   : > { %3855 = vrot.lane.b32.xlu0 %v12493_v59, %s9843_s21 }
 0x417   : > { %v9470_v14 = vpop.trf.xlu0 }
 0x418   : > { %3859 = vrot.lane.b32.xlu0 %v12506_v25, %s9843_s21  ;;  %v9471_v36 = vunpack.i.l.bf16 %v9470_v14  ;;  %v9474_v62 = vunpack.i.h.bf16 %v9470_v14 }
 0x41a   : > { %3710 = vmatprep.mubr.f32.mxu1 %v9471_v36 }
 0x41b   : > { %v9475_v51 = vpop.trf.xlu0  ;;  %3711 = vmatmul.mubr.f32.vlgmr.msra.gmra.mrb[0].mxu1 %v9474_v62 }
 0x41c   : > { %3863 = vrot.lane.b32.xlu0 %v12530_v42, %s9843_s21  ;;  %v9476_v17 = vunpack.i.l.bf16 %v9475_v51  ;;  %v9479_v56 = vunpack.i.h.bf16 %v9475_v51  ;;  %v3450_v42 = vld [vmem:[%s15249_s8] sm:$0xff] }
 0x41e   : > { %3715 = vmatprep.mubr.f32.mxu1 %v9476_v17 }
 0x41f   : > { %v9480_v6 = vpop.trf.xlu0  ;;  %3716 = vmatmul.mubr.f32.gmra.mrb[2].mxu1 %v9479_v56 }
 0x420   : > { %3867 = vrot.lane.b32.xlu0 %v12547_v22, %s9843_s21  ;;  %v9481_v31 = vunpack.i.l.bf16 %v9480_v6  ;;  %v9484_v59 = vunpack.i.h.bf16 %v9480_v6  ;;  %v3451_v22 = vld [vmem:[%s15249_s8 + $0x8] sm:$0xff] }
 0x422   : > { %3720 = vmatprep.mubr.f32.mxu1 %v9481_v31 }
 0x423   : > { %v9485_v25 = vpop.trf.xlu0  ;;  %3721 = vmatmul.mubr.f32.gmra.mrb[4].mxu1 %v9484_v59 }
 0x424   : > { %v9486_v5 = vunpack.i.l.bf16 %v9485_v25  ;;  %v9489_v48 = vunpack.i.h.bf16 %v9485_v25 }
 0x426   : > { %3725 = vmatprep.mubr.f32.mxu1 %v9486_v5 }
 0x427   : > { %3726 = vmatmul.mubr.f32.gmra.mrb[6].mxu1 %v9489_v48 }
 0x4ee   : > { %v8810_v43 = vpop.f32.mrb[0].mxu1 }
 0x4ef   : > { %v8811_v4 = vpop.f32.mrb[1].mxu1 }
 0x4f0   : > { %v8812_v50 = vadd.f32 %v8811_v4, %v8810_v43 }
 0x4f2   : > { %v8813_v37 = vpop.f32.mrb[2].mxu1  ;;  %v3713_v7 = vadd.f32 %v8812_v50, %v3450_v42 }
 0x4f3   : > { %v8814_v45 = vpop.f32.mrb[3].mxu1 }
 0x4f4   : > { %v8815_v1 = vadd.f32 %v8814_v45, %v8813_v37  ;;  %v3731_v18 = vsel %vm635_vm0, %v3713_v7, -inf }
 0x4f5   : > { %3732 = vmax.xlane.f32.xlu1 %v3731_v18 }
 0x4f6   : > { %v8816_v2 = vpop.f32.mrb[4].mxu1  ;;  %v3718_v39 = vadd.f32 %v8815_v1, %v3451_v22 }
 0x4f7   : > { %v8817_v38 = vpop.f32.mrb[5].mxu1 }
 0x4f8   : > { %v8818_v58 = vadd.f32 %v8817_v38, %v8816_v2  ;;  %v3734_v16 = vsel %vm635_vm0, %v3718_v39, -inf }
 0x4f9   : > { %3735 = vmax.xlane.f32.xlu1 %v3734_v16 }
 0x4fa   : > { %v8819_v34 = vpop.f32.mrb[6].mxu1  ;;  %v3723_v29 = vadd.f32 %v8818_v58, %v3452_v47 }
 0x4fb   : > { %v8820_v33 = vpop.f32.mrb[7].mxu1 }
 0x4fc   : > { %v8821_v15 = vadd.f32 %v8820_v33, %v8819_v34  ;;  %v3737_v49 = vsel %vm635_vm0, %v3723_v29, -inf }
 0x4fd   : > { %3738 = vmax.xlane.f32.xlu1 %v3737_v49 }
 0x4fe   : > { %v3728_v10 = vadd.f32 %v8821_v15, %v3453_v60 }
 0x500   : > { %v3740_v44 = vsel %vm635_vm0, %v3728_v10, -inf }
 0x501   : > { %3741 = vmax.xlane.f32.xlu1 %v3740_v44 }
 0x512   : > { %3807 = vrot.lane.b32.xlu1 %v15432_v19, %s9843_s21 }
 0x516   : > { %3809 = vrot.lane.b32.xlu1 %v15433_v52, %s9843_s21 }
 0x51a   : > { %3811 = vrot.lane.b32.xlu1 %v15438_v26, %s9843_s21 }
 0x51e   : > { %3815 = vrot.lane.b32.xlu1 %v15440_v0, %s9843_s21 }
 0x522   : > { %3817 = vrot.lane.b32.xlu1 %v12152_v12, %s9843_s21 }
 0x582   : > { %v3733_v54 = vpop.xlane.xlu1 %3732 }
 0x583   : > { %v3743_v32 = vsub.f32 %v3713_v7, %v3733_v54 }
 0x585   : > { %v3747_v23 = vmul.f32 1.442695, %v3743_v32 }
 0x586   : > { %v3736_v24 = vpop.xlane.xlu1 %3735 }
 0x587   : > { %9562 = vpow2.f32 %v3747_v23  ;;  %v3744_v63 = vsub.f32 %v3718_v39, %v3736_v24  ;;  %v3814_v39 = vpop.permute.xlu0 %3813 }
 0x589   : > { %v3749_v46 = vmul.f32 1.442695, %v3744_v63 }
 0x58a   : > { %v3739_v19 = vpop.xlane.xlu1 %3738 }
 0x58b   : > { %9564 = vpow2.f32 %v3749_v46  ;;  %v3745_v14 = vsub.f32 %v3723_v29, %v3739_v19  ;;  %v3836_v47 = vpop.permute.xlu0 %3835 }
 0x58d   : > { %v3751_v52 = vmul.f32 1.442695, %v3745_v14 }
 0x58e   : > { %v3742_v36 = vpop.xlane.xlu1 %3741 }
 0x58f   : > { %9566 = vpow2.f32 %v3751_v52  ;;  %v3746_v26 = vsub.f32 %v3728_v10, %v3742_v36  ;;  %v3840_v34 = vpop.permute.xlu0 %3839 }
 0x591   : > { %v9563_v62 = vpop.eup %9562  ;;  %v3753_v51 = vmul.f32 1.442695, %v3746_v26 }
 0x592   : > { %v3808_v0 = vpop.permute.xlu1 %3807  ;;  %v3755_v17 = vsel %vm635_vm0, %v9563_v62, 0.0 }
 0x593   : > { %9568 = vpow2.f32 %v3753_v51  ;;  %3756 = vadd.xlane.f32.xlu1 %v3755_v17  ;;  %9034 = vmatprep.mubr.msk.f32.mxu1 %vm635_vm0, %v3808_v0  ;;  %v3844_v33 = vpop.permute.xlu0 %3843 }
 0x595   : > { %v9565_v12 = vpop.eup %9564 }
 0x596   : > { %v3758_v56 = vsel %vm635_vm0, %v9565_v12, 0.0 }
 0x597   : > { %3759 = vadd.xlane.f32.xlu1 %v3758_v56  ;;  %v3848_v15 = vpop.permute.xlu0 %3847 }
 0x599   : > { %v9567_v6 = vpop.eup %9566 }
 0x59a   : > { %v3761_v31 = vsel %vm635_vm0, %v9567_v6, 0.0 }
 0x59b   : > { %3762 = vadd.xlane.f32.xlu1 %v3761_v31  ;;  %v3852_v10 = vpop.permute.xlu0 %3851 }
 0x59d   : > { %v9569_v59 = vpop.eup %9568 }
 0x59e   : > { %v3764_v25 = vsel %vm635_vm0, %v9569_v59, 0.0 }
 0x59f   : > { %3765 = vadd.xlane.f32.xlu1 %v3764_v25  ;;  %v3856_v54 = vpop.permute.xlu0 %3855 }
 0x5a3   : > { %v3860_v23 = vpop.permute.xlu0 %3859 }
 0x5a7   : > { %v3864_v63 = vpop.permute.xlu0 %3863 }
 0x5ab   : > { %v3868_v19 = vpop.permute.xlu0 %3867 }
 0x5b0   : > { %3819 = vrot.lane.b32.xlu1 %v15441_v53, %s9843_s21 }
 0x5b4   : > { %3821 = vrot.lane.b32.xlu1 %v15442_v8, %s9843_s21 }
 0x5b8   : > { %3823 = vrot.lane.b32.xlu1 %v15443_v28, %s9843_s21 }
 0x5bc   : > { %3825 = vrot.lane.b32.xlu1 %v15444_v40, %s9843_s21 }
 0x5c0   : > { %3827 = vrot.lane.b32.xlu1 %v12225_v35, %s9843_s21  ;;  %v4172_v35 = vld [vmem:[%s15250_s9] sm:$0xff] }
 0x5c4   : > { %3829 = vrot.lane.b32.xlu1 %v12228_v57, %s9843_s21  ;;  %v4173_v57 = vld [vmem:[%s15250_s9 + $0x8] sm:$0xff] }
 0x5c8   : > { %3831 = vrot.lane.b32.xlu1 %v12231_v30, %s9843_s21  ;;  %v4174_v30 = vld [vmem:[%s15250_s9 + $0x10] sm:$0xff] }
 0x5cc   : > { %3833 = vrot.lane.b32.xlu1 %v12238_v9, %s9843_s21  ;;  %v9310_v9 = vpack.c.bf16 %v4173_v57, %v4172_v35 }
 0x5ce   : > { %9311 = vmatprep.subr.bf16.mxu0 %v9310_v9 }
 0x5cf   : > { %9313 = vmatpush3.bf16.msra.mxu0 %v9310_v9 }
 0x5d0   : > { %3837 = vrot.lane.b32.xlu1 %v12350_v13, %s9843_s21  ;;  %v4175_v13 = vld [vmem:[%s15250_s9 + $0x18] sm:$0xff] }
 0x5d4   : > { %3841 = vrot.lane.b32.xlu1 %v12403_v21, %s9843_s21  ;;  %v9314_v21 = vpack.c.bf16 %v4175_v13, %v4174_v30 }
 0x5d6   : > { %9315 = vmatprep.subr.bf16.mxu0 %v9314_v21 }
 0x5d7   : > { %9317 = vmatpush3.bf16.msra.mxu0 %v9314_v21 }
 0x5d8   : > { %3845 = vrot.lane.b32.xlu1 %v12448_v41, %s9843_s21  ;;  %v3810_v41 = vpop.permute.xlu1 %3809 }
 0x5dc   : > { %3849 = vrot.lane.b32.xlu1 %v12465_v11, %s9843_s21  ;;  %v3812_v11 = vpop.permute.xlu1 %3811 }
 0x5e0   : > { %3853 = vrot.lane.b32.xlu1 %v12489_v55, %s9843_s21  ;;  %v3816_v55 = vpop.permute.xlu1 %3815 }
 0x5e4   : > { %3857 = vrot.lane.b32.xlu1 %v12500_v3, %s9843_s21  ;;  %v3818_v3 = vpop.permute.xlu1 %3817 }
 0x5e8   : > { %3861 = vrot.lane.b32.xlu1 %v12520_v27, %s9843_s21 }
 0x5ec   : > { %3865 = vrot.lane.b32.xlu1 %v12533_v61, %s9843_s21 }
 0x5f0   : > { %3869 = vrot.lane.b32.xlu1 %v12550_v20, %s9843_s21 }
 0x620   : > { %v3757_v27 = vpop.xlane.xlu1 %3756 }
 0x621   : > { %9570 = vrcp.f32 %v3757_v27 }
 0x624   : > { %v3760_v61 = vpop.xlane.xlu1 %3759 }
 0x625   : > { %9572 = vrcp.f32 %v3760_v61 }
 0x628   : > { %v3763_v20 = vpop.xlane.xlu1 %3762 }
 0x629   : > { %9574 = vrcp.f32 %v3763_v20 }
 0x62b   : > { %v9571_v8 = vpop.eup %9570 }
 0x62c   : > { %v3766_v53 = vpop.xlane.xlu1 %3765  ;;  %v3768_v5 = vmul.f32 %v9571_v8, %v9563_v62 }
 0x62d   : > { %9576 = vrcp.f32 %v3766_v53 }
 0x62f   : > { %v9573_v28 = vpop.eup %9572 }
 0x630   : > { %v3820_v40 = vpop.permute.xlu1 %3819  ;;  %v3770_v48 = vmul.f32 %v9573_v28, %v9565_v12 }
 0x632   : > { %v9298_v43 = vpack.c.bf16 %v3770_v48, %v3768_v5 }
 0x633   : > { %v9575_v42 = vpop.eup %9574 }
 0x634   : > { %9300 = vmatprep.subr.msk.bf16.mxu1 %vm9299_vm7, %v9298_v43  ;;  %v3822_v4 = vpop.permute.xlu1 %3821  ;;  %v3772_v7 = vmul.f32 %v9575_v42, %v9567_v6 }
 0x635   : > { %9303 = vmatpush3.bf16.xpose.msk.msra.mxu1 %vm9299_vm7, %v9298_v43  ;;  %v12916_v43 = vld [vmem:[%s15251_s10] ss:$0 sm:$0xff] }
 0x637   : > { %v9577_v50 = vpop.eup %9576 }
 0x638   : > { %v3824_v37 = vpop.permute.xlu1 %3823  ;;  %v3774_v45 = vmul.f32 %v9577_v50, %v9569_v59 }
 0x63a   : > { %v9304_v22 = vpack.c.bf16 %v3774_v45, %v3772_v7  ;;  %v9789_v7 = vld [vmem:[%s9961_s2 + $0x8] sm:$0xff] }
 0x63c   : > { %9306 = vmatprep.subr.msk.bf16.mxu1 %vm9299_vm7, %v9304_v22  ;;  %v3826_v1 = vpop.permute.xlu1 %3825 }
 0x63d   : > { %9309 = vmatpush3.bf16.xpose.msk.msra.mxu1 %vm9299_vm7, %v9304_v22  ;;  %v9790_v22 = vld [vmem:[%s9961_s2] sm:$0xff] }
 0x63e   : > { %9342 = vmatprep.subr.bf16.mxu1 %v9310_v9 }
 0x640   : > { %v3828_v18 = vpop.permute.xlu1 %3827 }
 0x644   : > { %9035 = vmatmul.mubr.msk.f32.vlgmr.msra.gmra.mrb[8].mxu1 %vm635_vm0, %v3810_v41  ;;  %v3830_v2 = vpop.permute.xlu1 %3829 }
 0x645   : > { %9037 = vmatprep.mubr.msk.f32.mxu1 %vm635_vm0, %v3812_v11  ;;  %9344 = vmatpush3.bf16.msra.mxu1 %v9310_v9 }
 0x646   : > { %9343 = vmatprep.subr.bf16.mxu1 %v9314_v21 }
 0x648   : > { %9038 = vmatmul.mubr.msk.f32.gmra.mrb[10].mxu1 %vm635_vm0, %v3814_v39  ;;  %v3832_v38 = vpop.permute.xlu1 %3831 }
 0x649   : > { %9040 = vmatprep.mubr.msk.f32.mxu1 %vm635_vm0, %v3816_v55  ;;  %9345 = vmatpush3.bf16.msra.mxu1 %v9314_v21 }
 0x64c   : > { %9041 = vmatmul.mubr.msk.f32.gmra.mrb[12].mxu1 %vm635_vm0, %v3818_v3  ;;  %v3834_v58 = vpop.permute.xlu1 %3833 }
 0x64d   : > { %9043 = vmatprep.mubr.msk.f32.mxu1 %vm635_vm0, %v3820_v40 }
 0x650   : > { %9044 = vmatmul.mubr.msk.f32.gmra.mrb[14].mxu1 %vm635_vm0, %v3822_v4  ;;  %v3838_v16 = vpop.permute.xlu1 %3837 }
 0x651   : > { %9046 = vmatprep.mubr.msk.f32.mxu1 %vm635_vm0, %v3824_v37 }
 0x654   : > { %9047 = vmatmul.mubr.msk.f32.gmra.mrb[16].mxu1 %vm635_vm0, %v3826_v1  ;;  %v3842_v29 = vpop.permute.xlu1 %3841 }
 0x655   : > { %9049 = vmatprep.mubr.msk.f32.mxu1 %vm635_vm0, %v3828_v18 }
 0x658   : > { %9050 = vmatmul.mubr.msk.f32.gmra.mrb[18].mxu1 %vm635_vm0, %v3830_v2  ;;  %v3846_v60 = vpop.permute.xlu1 %3845 }
 0x659   : > { %9052 = vmatprep.mubr.msk.f32.mxu1 %vm635_vm0, %v3832_v38 }
 0x65c   : > { %9053 = vmatmul.mubr.msk.f32.gmra.mrb[20].mxu1 %vm635_vm0, %v3834_v58  ;;  %v3850_v49 = vpop.permute.xlu1 %3849 }
 0x65d   : > { %9055 = vmatprep.mubr.msk.f32.mxu1 %vm635_vm0, %v3836_v47 }
 0x660   : > { %9056 = vmatmul.mubr.msk.f32.gmra.mrb[22].mxu1 %vm635_vm0, %v3838_v16  ;;  %v3854_v44 = vpop.permute.xlu1 %3853  ;;  %v9791_v16 = vld [vmem:[%s9961_s2 + $0x10] sm:$0xff] }
 0x661   : > { %9058 = vmatprep.mubr.msk.f32.mxu1 %vm635_vm0, %v3840_v34 }
 0x664   : > { %9059 = vmatmul.mubr.msk.f32.gmra.mrb[24].mxu1 %vm635_vm0, %v3842_v29  ;;  %v3858_v32 = vpop.permute.xlu1 %3857 }
 0x665   : > { %9061 = vmatprep.mubr.msk.f32.mxu1 %vm635_vm0, %v3844_v33 }
 0x668   : > { %9062 = vmatmul.mubr.msk.f32.gmra.mrb[26].mxu1 %vm635_vm0, %v3846_v60  ;;  %v3862_v24 = vpop.permute.xlu1 %3861  ;;  %v9792_v60 = vld [vmem:[%s9961_s2 + $0x18] sm:$0xff] }
 0x669   : > { %9064 = vmatprep.mubr.msk.f32.mxu1 %vm635_vm0, %v3848_v15 }
 0x66c   : > { %9065 = vmatmul.mubr.msk.f32.gmra.mrb[28].mxu1 %vm635_vm0, %v3850_v49  ;;  %v3866_v46 = vpop.permute.xlu1 %3865 }
 0x66d   : > { %9067 = vmatprep.mubr.msk.f32.mxu1 %vm635_vm0, %v3852_v10 }
 0x670   : > { %9068 = vmatmul.mubr.msk.f32.gmra.mrb[30].mxu1 %vm635_vm0, %v3854_v44  ;;  %v3870_v14 = vpop.permute.xlu1 %3869 }
 0x671   : > { %9070 = vmatprep.mubr.msk.f32.mxu1 %vm635_vm0, %v3856_v54  ;;  %v9793_v54 = vld [vmem:[%s9961_s2 + $0x20] sm:$0xff] }
 0x674   : > { %9071 = vmatmul.mubr.msk.f32.gmra.mrb[32].mxu1 %vm635_vm0, %v3858_v32 }
 0x675   : > { %9073 = vmatprep.mubr.msk.f32.mxu1 %vm635_vm0, %v3860_v23 }
 0x678   : > { %9074 = vmatmul.mubr.msk.f32.gmra.mrb[34].mxu1 %vm635_vm0, %v3862_v24 }
 0x679   : > { %9076 = vmatprep.mubr.msk.f32.mxu1 %vm635_vm0, %v3864_v63 }
 0x67c   : > { %9077 = vmatmul.mubr.msk.f32.gmra.mrb[36].mxu1 %vm635_vm0, %v3866_v46  ;;  %v9794_v46 = vld [vmem:[%s9961_s2 + $0x28] sm:$0xff] }
 0x67d   : > { %9079 = vmatprep.mubr.msk.f32.mxu1 %vm635_vm0, %v3868_v19 }
 0x680   : > { %9080 = vmatmul.mubr.msk.f32.gmra.mrb[38].mxu1 %vm635_vm0, %v3870_v14 }
 0x717   : > { %v9036_v52 = vpop.f32.mrb[8].mxu1 }
 0x718   : > { %v4013_v36 = vpop.f32.mrb[9].mxu1 }
 0x719   : > { %9090 = vmatprep.mubr.msk.f32.mxu0 %vm635_vm0, %v4013_v36 }
 0x71a   : > { %9091 = vmatmul.mubr.msk.f32.vlgmr.msra.gmra.mrb[32].mxu0 %vm635_vm0, %v9036_v52 }
 0x71b   : > { %v9039_v26 = vpop.f32.mrb[10].mxu1 }
 0x71c   : > { %v4023_v62 = vpop.f32.mrb[11].mxu1 }
 0x71d   : > { %9093 = vmatprep.mubr.msk.f32.mxu0 %vm635_vm0, %v4023_v62 }
 0x71e   : > { %9094 = vmatmul.mubr.msk.f32.gmra.mrb[34].mxu0 %vm635_vm0, %v9039_v26  ;;  %v9795_v26 = vld [vmem:[%s9961_s2 + $0x30] sm:$0xff] }
 0x71f   : > { %v9042_v51 = vpop.f32.mrb[12].mxu1 }
 0x720   : > { %v4033_v0 = vpop.f32.mrb[13].mxu1 }
 0x721   : > { %9096 = vmatprep.mubr.msk.f32.mxu0 %vm635_vm0, %v4033_v0  ;;  %v9796_v0 = vld [vmem:[%s9961_s2 + $0x38] sm:$0xff] }
 0x722   : > { %9097 = vmatmul.mubr.msk.f32.gmra.mrb[36].mxu0 %vm635_vm0, %v9042_v51 }
 0x723   : > { %v9045_v17 = vpop.f32.mrb[14].mxu1 }
 0x724   : > { %v4043_v12 = vpop.f32.mrb[15].mxu1 }
 0x725   : > { %9099 = vmatprep.mubr.msk.f32.mxu0 %vm635_vm0, %v4043_v12 }
 0x726   : > { %9100 = vmatmul.mubr.msk.f32.gmra.mrb[38].mxu0 %vm635_vm0, %v9045_v17 }
 0x727   : > { %v9048_v56 = vpop.f32.mrb[16].mxu1 }
 0x728   : > { %v4053_v6 = vpop.f32.mrb[17].mxu1 }
 0x729   : > { %9102 = vmatprep.mubr.msk.f32.mxu0 %vm635_vm0, %v4053_v6 }
 0x72a   : > { %9103 = vmatmul.mubr.msk.f32.gmra.mrb[40].mxu0 %vm635_vm0, %v9048_v56 }
 0x72b   : > { %v9051_v31 = vpop.f32.mrb[18].mxu1 }
 0x72c   : > { %v4063_v59 = vpop.f32.mrb[19].mxu1 }
 0x72d   : > { %9105 = vmatprep.mubr.msk.f32.mxu0 %vm635_vm0, %v4063_v59 }
 0x72e   : > { %9106 = vmatmul.mubr.msk.f32.gmra.mrb[42].mxu0 %vm635_vm0, %v9051_v31 }
 0x72f   : > { %v9054_v25 = vpop.f32.mrb[20].mxu1 }
 0x730   : > { %v4073_v35 = vpop.f32.mrb[21].mxu1 }
 0x731   : > { %9108 = vmatprep.mubr.msk.f32.mxu0 %vm635_vm0, %v4073_v35 }
 0x732   : > { %9109 = vmatmul.mubr.msk.f32.gmra.mrb[44].mxu0 %vm635_vm0, %v9054_v25  ;;  %v9797_v25 = vld [vmem:[%s9961_s2 + $0x40] sm:$0xff] }
 0x733   : > { %v9057_v57 = vpop.f32.mrb[22].mxu1 }
 0x734   : > { %v4083_v30 = vpop.f32.mrb[23].mxu1 }
 0x735   : > { %9111 = vmatprep.mubr.msk.f32.mxu0 %vm635_vm0, %v4083_v30 }
 0x736   : > { %9112 = vmatmul.mubr.msk.f32.gmra.mrb[46].mxu0 %vm635_vm0, %v9057_v57 }
 0x737   : > { %v9060_v9 = vpop.f32.mrb[24].mxu1 }
 0x738   : > { %v4093_v13 = vpop.f32.mrb[25].mxu1 }
 0x739   : > { %9114 = vmatprep.mubr.msk.f32.mxu0 %vm635_vm0, %v4093_v13  ;;  %v9798_v13 = vld [vmem:[%s9961_s2 + $0x48] sm:$0xff] }
 0x73a   : > { %9115 = vmatmul.mubr.msk.f32.gmra.mrb[48].mxu0 %vm635_vm0, %v9060_v9 }
 0x73b   : > { %v9063_v21 = vpop.f32.mrb[26].mxu1 }
 0x73c   : > { %v4103_v41 = vpop.f32.mrb[27].mxu1 }
 0x73d   : > { %9117 = vmatprep.mubr.msk.f32.mxu0 %vm635_vm0, %v4103_v41 }
 0x73e   : > { %9118 = vmatmul.mubr.msk.f32.gmra.mrb[50].mxu0 %vm635_vm0, %v9063_v21 }
 0x73f   : > { %v9066_v11 = vpop.f32.mrb[28].mxu1 }
 0x740   : > { %v4113_v55 = vpop.f32.mrb[29].mxu1 }
 0x741   : > { %9120 = vmatprep.mubr.msk.f32.mxu0 %vm635_vm0, %v4113_v55 }
 0x742   : > { %9121 = vmatmul.mubr.msk.f32.gmra.mrb[52].mxu0 %vm635_vm0, %v9066_v11 }
 0x743   : > { %v9069_v3 = vpop.f32.mrb[30].mxu1 }
 0x744   : > { %v4123_v27 = vpop.f32.mrb[31].mxu1 }
 0x745   : > { %9123 = vmatprep.mubr.msk.f32.mxu0 %vm635_vm0, %v4123_v27 }
 0x746   : > { %9124 = vmatmul.mubr.msk.f32.gmra.mrb[54].mxu0 %vm635_vm0, %v9069_v3  ;;  %v9799_v3 = vld [vmem:[%s9961_s2 + $0x50] sm:$0xff] }
 0x747   : > { %v9072_v61 = vpop.f32.mrb[32].mxu1 }
 0x748   : > { %v4133_v20 = vpop.f32.mrb[33].mxu1 }
 0x749   : > { %9126 = vmatprep.mubr.msk.f32.mxu0 %vm635_vm0, %v4133_v20 }
 0x74a   : > { %9127 = vmatmul.mubr.msk.f32.gmra.mrb[56].mxu0 %vm635_vm0, %v9072_v61 }
 0x74b   : > { %v9075_v53 = vpop.f32.mrb[34].mxu1 }
 0x74c   : > { %v4143_v8 = vpop.f32.mrb[35].mxu1 }
 0x74d   : > { %9129 = vmatprep.mubr.msk.f32.mxu1 %vm635_vm0, %v4143_v8  ;;  %v9800_v8 = vld [vmem:[%s9961_s2 + $0x58] sm:$0xff] }
 0x74e   : > { %9130 = vmatmul.mubr.msk.f32.vlgmr.msra.gmra.mrb[40].mxu1 %vm635_vm0, %v9075_v53 }
 0x74f   : > { %v9078_v28 = vpop.f32.mrb[36].mxu1 }
 0x750   : > { %v4153_v40 = vpop.f32.mrb[37].mxu1 }
 0x751   : > { %9132 = vmatprep.mubr.msk.f32.mxu1 %vm635_vm0, %v4153_v40 }
 0x752   : > { %9133 = vmatmul.mubr.msk.f32.gmra.mrb[42].mxu1 %vm635_vm0, %v9078_v28 }
 0x753   : > { %v9081_v5 = vpop.f32.mrb[38].mxu1 }
 0x754   : > { %v4163_v48 = vpop.f32.mrb[39].mxu1 }
 0x755   : > { %9135 = vmatprep.mubr.msk.f32.mxu1 %vm635_vm0, %v4163_v48 }
 0x756   : > { %9136 = vmatmul.mubr.msk.f32.gmra.mrb[44].mxu1 %vm635_vm0, %v9081_v5 }
 0x7ed   : > { %v9092_v4 = vpop.f32.mrb[32].mxu0 }
 0x7ee   : > { %v4351_v42 = vadd.f32 %v9092_v4, %v12916_v43  ;;  %v4345_v50 = vpop.f32.mrb[33].mxu0  ;;  %v9801_v4 = vld [vmem:[%s9961_s2 + $0x60] sm:$0xff] }
 0x7ef   : > { %v4346_v37 = vadd.f32 %v12916_v43, %v4345_v50 }
 0x7f0   : > { %v12921_v45 = vadd.f32 %v9789_v7, %v4351_v42 }
 0x7f1   : > { %v12924_v1 = vadd.f32 %v9790_v22, %v4346_v37  ;;  %v9095_v18 = vpop.f32.mrb[34].mxu0  ;;  %v9802_v37 = vld [vmem:[%s9961_s2 + $0x68] sm:$0xff] }
 0x7f2   : > { %15445 = vst [vmem:[#allocation16_spill] sm:$0xff] %v12921_v45  ;;  %v4355_v2 = vpop.f32.mrb[35].mxu0  ;;  %v4539_v39 = vsel %vm635_vm0, %v12921_v45, 0.0  ;;  %v4361_v38 = vadd.f32 %v9095_v18, %v12916_v43 }
 0x7f3   : > { %15446 = vst [vmem:[#allocation23_spill] sm:$0xff] %v12924_v1  ;;  %v4356_v47 = vadd.f32 %v12916_v43, %v4355_v2  ;;  %4540 = vadd.xlane.f32.xlu1 %v4539_v39  ;;  %v4536_v58 = vsel %vm635_vm0, %v12924_v1, 0.0 }
 0x7f4   : > { %4537 = vadd.xlane.f32.xlu0 %v4536_v58  ;;  %v12936_v15 = vadd.f32 %v9792_v60, %v4361_v38  ;;  %v9804_v60 = vld [vmem:[%s9961_s2 + $0x78] sm:$0xff] }
 0x7f5   : > { %v12933_v34 = vadd.f32 %v9791_v16, %v4356_v47  ;;  %v9098_v29 = vpop.f32.mrb[36].mxu0  ;;  %v9803_v47 = vld [vmem:[%s9961_s2 + $0x70] sm:$0xff] }
 0x7f6   : > { %v4365_v33 = vpop.f32.mrb[37].mxu0  ;;  %15448 = vst [vmem:[#allocation26_spill] sm:$0xff] %v12936_v15  ;;  %v4371_v49 = vadd.f32 %v9098_v29, %v12916_v43  ;;  %v4545_v52 = vsel %vm635_vm0, %v12936_v15, 0.0 }
 0x7f7   : > { %15447 = vst [vmem:[#allocation6_spill] sm:$0xff] %v12933_v34  ;;  %v4366_v10 = vadd.f32 %v12916_v43, %v4365_v33  ;;  %v4542_v44 = vsel %vm635_vm0, %v12933_v34, 0.0 }
 0x7f8   : > { %4543 = vadd.xlane.f32.xlu0 %v4542_v44  ;;  %v12947_v19 = vadd.f32 %v9794_v46, %v4371_v49 }
 0x7f9   : > { %v12943_v32 = vadd.f32 %v9793_v54, %v4366_v10  ;;  %v9101_v23 = vpop.f32.mrb[38].mxu0 }
 0x7fa   : > { %v4381_v24 = vadd.f32 %v9101_v23, %v12916_v43  ;;  %v4375_v63 = vpop.f32.mrb[39].mxu0  ;;  %15450 = vst [vmem:[#allocation10_spill] sm:$0xff] %v12947_v19  ;;  %v4551_v31 = vsel %vm635_vm0, %v12947_v19, 0.0  ;;  %v9805_v23 = vld [vmem:[%s9961_s2 + $0x80] sm:$0xff] }
 0x7fb   : > { %15449 = vst [vmem:[#allocation15_spill] sm:$0xff] %v12943_v32  ;;  %v4376_v14 = vadd.f32 %v12916_v43, %v4375_v63  ;;  %v4548_v36 = vsel %vm635_vm0, %v12943_v32, 0.0 }
 0x7fc   : > { %4546 = vadd.xlane.f32.xlu0 %v4545_v52  ;;  %4549 = vadd.xlane.f32.xlu1 %v4548_v36  ;;  %v12958_v17 = vadd.f32 %v9796_v0, %v4381_v24  ;;  %v9806_v52 = vld [vmem:[%s9961_s2 + $0x88] sm:$0xff] }
 0x7fd   : > { %v12955_v62 = vadd.f32 %v9795_v26, %v4376_v14  ;;  %v9104_v51 = vpop.f32.mrb[40].mxu0 }
 0x7fe   : > { %15452 = vst [vmem:[#allocation25_spill] sm:$0xff] %v12958_v17  ;;  %v4385_v12 = vpop.f32.mrb[41].mxu0  ;;  %v4391_v56 = vadd.f32 %v9104_v51, %v12916_v43  ;;  %v4557_v9 = vsel %vm635_vm0, %v12958_v17, 0.0 }
 0x7ff   : > { %15451 = vst [vmem:[#allocation28_spill] sm:$0xff] %v12955_v62  ;;  %v4386_v6 = vadd.f32 %v12916_v43, %v4385_v12  ;;  %v4554_v59 = vsel %vm635_vm0, %v12955_v62, 0.0  ;;  %v9807_v12 = vld [vmem:[%s9961_s2 + $0x90] sm:$0xff] }
 0x800   : > { %4552 = vadd.xlane.f32.xlu0 %v4551_v31  ;;  %4555 = vadd.xlane.f32.xlu1 %v4554_v59  ;;  %v12972_v21 = vadd.f32 %v9798_v13, %v4391_v56  ;;  %v9808_v31 = vld [vmem:[%s9961_s2 + $0x98] sm:$0xff] }
 0x801   : > { %v12967_v35 = vadd.f32 %v9797_v25, %v4386_v6  ;;  %v9107_v57 = vpop.f32.mrb[42].mxu0 }
 0x802   : > { %v4395_v30 = vpop.f32.mrb[43].mxu0  ;;  %15454 = vst [vmem:[#allocation29_spill] sm:$0xff] %v12972_v21  ;;  %v4401_v41 = vadd.f32 %v9107_v57, %v12916_v43  ;;  %v4563_v5 = vsel %vm635_vm0, %v12972_v21, 0.0 }
 0x803   : > { %15453 = vst [vmem:[#allocation24_spill] sm:$0xff] %v12967_v35  ;;  %v4396_v11 = vadd.f32 %v12916_v43, %v4395_v30  ;;  %v4560_v55 = vsel %vm635_vm0, %v12967_v35, 0.0 }
 0x804   : > { %4558 = vadd.xlane.f32.xlu0 %v4557_v9  ;;  %4561 = vadd.xlane.f32.xlu1 %v4560_v55  ;;  %v12983_v28 = vadd.f32 %v9800_v8, %v4401_v41  ;;  %v9809_v41 = vld [vmem:[%s9961_s2 + $0xa0] sm:$0xff] }
 0x805   : > { %v12979_v27 = vadd.f32 %v9799_v3, %v4396_v11  ;;  %v9110_v61 = vpop.f32.mrb[44].mxu0 }
 0x806   : > { %v4411_v20 = vadd.f32 %v9110_v61, %v12916_v43  ;;  %v4405_v53 = vpop.f32.mrb[45].mxu0  ;;  %15456 = vst [vmem:[#allocation20_spill] sm:$0xff] %v12983_v28  ;;  %v4569_v39 = vsel %vm635_vm0, %v12983_v28, 0.0 }
 0x807   : > { %15455 = vst [vmem:[#allocation30_spill] sm:$0xff] %v12979_v27  ;;  %v4406_v40 = vadd.f32 %v12916_v43, %v4405_v53  ;;  %v4566_v48 = vsel %vm635_vm0, %v12979_v27, 0.0 }
 0x808   : > { %4564 = vadd.xlane.f32.xlu0 %v4563_v5  ;;  %4567 = vadd.xlane.f32.xlu1 %v4566_v48  ;;  %v12994_v7 = vadd.f32 %v9802_v37, %v4411_v20  ;;  %v9810_v20 = vld [vmem:[%s9961_s2 + $0xa8] sm:$0xff]  ;;  %v9811_v48 = vld [vmem:[%s9961_s2 + $0xb0] sm:$0xff] }
 0x809   : > { %v12991_v42 = vadd.f32 %v9801_v4, %v4406_v40  ;;  %v9113_v50 = vpop.f32.mrb[46].mxu0 }
 0x80a   : > { %15458 = vst [vmem:[#allocation13_spill] sm:$0xff] %v12994_v7  ;;  %v4415_v22 = vpop.f32.mrb[47].mxu0  ;;  %v4421_v18 = vadd.f32 %v9113_v50, %v12916_v43  ;;  %v4575_v33 = vsel %vm635_vm0, %v12994_v7, 0.0 }
 0x80b   : > { %15457 = vst [vmem:[#allocation27_spill] sm:$0xff] %v12991_v42  ;;  %v4416_v2 = vadd.f32 %v12916_v43, %v4415_v22  ;;  %v4572_v38 = vsel %vm635_vm0, %v12991_v42, 0.0 }
 0x80c   : > { %4570 = vadd.xlane.f32.xlu0 %v4569_v39  ;;  %4573 = vadd.xlane.f32.xlu1 %v4572_v38  ;;  %v13008_v49 = vadd.f32 %v9804_v60, %v4421_v18  ;;  %v9812_v18 = vld [vmem:[%s9961_s2 + $0xb8] sm:$0xff]  ;;  %v9814_v60 = vld [vmem:[%s9961_s2 + $0xc8] sm:$0xff] }
 0x80d   : > { %v13003_v58 = vadd.f32 %v9803_v47, %v4416_v2  ;;  %v9116_v16 = vpop.f32.mrb[48].mxu0 }
 0x80e   : > { %v4425_v29 = vpop.f32.mrb[49].mxu0  ;;  %15460 = vst [vmem:[#allocation14_spill] sm:$0xff] %v13008_v49  ;;  %v4431_v10 = vadd.f32 %v9116_v16, %v12916_v43  ;;  %v4581_v51 = vsel %vm635_vm0, %v13008_v49, 0.0  ;;  %v9813_v16 = vld [vmem:[%s9961_s2 + $0xc0] sm:$0xff] }
 0x80f   : > { %15459 = vst [vmem:[#allocation7_spill] sm:$0xff] %v13003_v58  ;;  %v4426_v44 = vadd.f32 %v12916_v43, %v4425_v29  ;;  %v4578_v54 = vsel %vm635_vm0, %v13003_v58, 0.0 }
 0x810   : > { %4576 = vadd.xlane.f32.xlu0 %v4575_v33  ;;  %4579 = vadd.xlane.f32.xlu1 %v4578_v54  ;;  %v13019_v36 = vadd.f32 %v9806_v52, %v4431_v10 }
 0x811   : > { %v13015_v24 = vadd.f32 %v9805_v23, %v4426_v44  ;;  %v9119_v63 = vpop.f32.mrb[50].mxu0 }
 0x812   : > { %v4441_v46 = vadd.f32 %v9119_v63, %v12916_v43  ;;  %v4435_v14 = vpop.f32.mrb[51].mxu0  ;;  %15462 = vst [vmem:[#allocation11_spill] sm:$0xff] %v13019_v36  ;;  %v4587_v9 = vsel %vm635_vm0, %v13019_v36, 0.0 }
 0x813   : > { %15461 = vst [vmem:[#allocation8_spill] sm:$0xff] %v13015_v24  ;;  %v4436_v26 = vadd.f32 %v12916_v43, %v4435_v14  ;;  %v4584_v0 = vsel %vm635_vm0, %v13015_v24, 0.0  ;;  %v9815_v14 = vld [vmem:[%s9961_s2 + $0xd0] sm:$0xff] }
 0x814   : > { %4582 = vadd.xlane.f32.xlu0 %v4581_v51  ;;  %4585 = vadd.xlane.f32.xlu1 %v4584_v0  ;;  %v13030_v59 = vadd.f32 %v9808_v31, %v4441_v46 }
 0x815   : > { %v13027_v56 = vadd.f32 %v9807_v12, %v4436_v26  ;;  %v9122_v6 = vpop.f32.mrb[52].mxu0  ;;  %v9816_v12 = vld [vmem:[%s9961_s2 + $0xd8] sm:$0xff] }
 0x816   : > { %15464 = vst [vmem:[#allocation21_spill] sm:$0xff] %v13030_v59  ;;  %v4445_v25 = vpop.f32.mrb[53].mxu0  ;;  %v4451_v57 = vadd.f32 %v9122_v6, %v12916_v43  ;;  %v4593_v61 = vsel %vm635_vm0, %v13030_v59, 0.0 }
 0x817   : > { %15463 = vst [vmem:[#allocation19_spill] sm:$0xff] %v13027_v56  ;;  %v4446_v30 = vadd.f32 %v12916_v43, %v4445_v25  ;;  %v4590_v13 = vsel %vm635_vm0, %v13027_v56, 0.0 }
 0x818   : > { %4588 = vadd.xlane.f32.xlu0 %v4587_v9  ;;  %4591 = vadd.xlane.f32.xlu1 %v4590_v13  ;;  %v13044_v53 = vadd.f32 %v9810_v20, %v4451_v57 }
 0x819   : > { %v13039_v11 = vadd.f32 %v9809_v41, %v4446_v30  ;;  %v9125_v55 = vpop.f32.mrb[54].mxu0  ;;  %v9817_v30 = vld [vmem:[%s9961_s2 + $0xe0] sm:$0xff] }
 0x81a   : > { %v4455_v3 = vpop.f32.mrb[55].mxu0  ;;  %15466 = vst [vmem:[#allocation9_spill] sm:$0xff] %v13044_v53  ;;  %v4461_v8 = vadd.f32 %v9125_v55, %v12916_v43  ;;  %v4599_v38 = vsel %vm635_vm0, %v13044_v53, 0.0 }
 0x81b   : > { %15465 = vst [vmem:[#allocation12_spill] sm:$0xff] %v13039_v11  ;;  %v4456_v40 = vadd.f32 %v12916_v43, %v4455_v3  ;;  %v4596_v5 = vsel %vm635_vm0, %v13039_v11, 0.0  ;;  %v9818_v3 = vld [vmem:[%s9961_s2 + $0xe8] sm:$0xff] }
 0x81c   : > { %4594 = vadd.xlane.f32.xlu0 %v4593_v61  ;;  %4597 = vadd.xlane.f32.xlu1 %v4596_v5  ;;  %v13055_v2 = vadd.f32 %v9812_v18, %v4461_v8  ;;  %v9819_v5 = vld [vmem:[%s9961_s2 + $0xf0] sm:$0xff] }
 0x81d   : > { %v13051_v4 = vadd.f32 %v9811_v48, %v4456_v40  ;;  %v9128_v50 = vpop.f32.mrb[56].mxu0 }
 0x81e   : > { %v4471_v37 = vadd.f32 %v9128_v50, %v12916_v43  ;;  %v4465_v22 = vpop.f32.mrb[57].mxu0  ;;  %15468 = vst [vmem:[#allocation22_spill] sm:$0xff] %v13055_v2  ;;  %v4605_v63 = vsel %vm635_vm0, %v13055_v2, 0.0  ;;  %v9820_v50 = vld [vmem:[%s9961_s2 + $0xf8] sm:$0xff] }
 0x81f   : > { %15467 = vst [vmem:[#allocation17_spill] sm:$0xff] %v13051_v4  ;;  %v4466_v39 = vadd.f32 %v12916_v43, %v4465_v22  ;;  %v4602_v47 = vsel %vm635_vm0, %v13051_v4, 0.0 }
 0x820   : > { %4600 = vadd.xlane.f32.xlu0 %v4599_v38  ;;  %4603 = vadd.xlane.f32.xlu1 %v4602_v47  ;;  %v13066_v10 = vadd.f32 %v9814_v60, %v4471_v37 }
 0x821   : > { %v13063_v29 = vadd.f32 %v9813_v16, %v4466_v39  ;;  %v9131_v33 = vpop.f32.mrb[40].mxu1 }
 0x822   : > { %15470 = vst [vmem:[#allocation31_spill] sm:$0xff] %v13066_v10  ;;  %v4475_v44 = vpop.f32.mrb[41].mxu1  ;;  %v4481_v54 = vadd.f32 %v9131_v33, %v12916_v43  ;;  %v4611_v0 = vsel %vm635_vm0, %v13066_v10, 0.0 }
 0x823   : > { %15469 = vst [vmem:[#allocation18_spill] sm:$0xff] %v13063_v29  ;;  %v4476_v23 = vadd.f32 %v12916_v43, %v4475_v44  ;;  %v4608_v46 = vsel %vm635_vm0, %v13063_v29, 0.0 }
 0x824   : > { %4606 = vadd.xlane.f32.xlu0 %v4605_v63  ;;  %4609 = vadd.xlane.f32.xlu1 %v4608_v46  ;;  %v13080_v6 = vadd.f32 %v9816_v12, %v4481_v54 }
 0x825   : > { %v13075_v52 = vadd.f32 %v9815_v14, %v4476_v23  ;;  %v9134_v26 = vpop.f32.mrb[42].mxu1 }
 0x826   : > { %v4485_v51 = vpop.f32.mrb[43].mxu1  ;;  %15472 = vst [vmem:[#allocation33_spill] sm:$0xff] %v13080_v6  ;;  %v4491_v31 = vadd.f32 %v9134_v26, %v12916_v43  ;;  %v4617_v8 = vsel %vm635_vm0, %v13080_v6, 0.0 }
 0x827   : > { %15471 = vst [vmem:[#allocation32_spill] sm:$0xff] %v13075_v52  ;;  %v4486_v25 = vadd.f32 %v12916_v43, %v4485_v51  ;;  %v4614_v57 = vsel %vm635_vm0, %v13075_v52, 0.0 }
 0x828   : > { %4612 = vadd.xlane.f32.xlu0 %v4611_v0  ;;  %4615 = vadd.xlane.f32.xlu1 %v4614_v57  ;;  %v13091_v61 = vadd.f32 %v9818_v3, %v4491_v31 }
 0x829   : > { %v13087_v9 = vadd.f32 %v9817_v30, %v4486_v25  ;;  %v9137_v13 = vpop.f32.mrb[44].mxu1 }
 0x82a   : > { %v4501_v41 = vadd.f32 %v9137_v13, %v12916_v43  ;;  %v4495_v55 = vpop.f32.mrb[45].mxu1  ;;  %15474 = vst [vmem:[#allocation35_spill] sm:$0xff] %v13091_v61  ;;  %v4623_v22 = vsel %vm635_vm0, %v13091_v61, 0.0 }
 0x82b   : > { %15473 = vst [vmem:[#allocation34_spill] sm:$0xff] %v13087_v9  ;;  %v4496_v20 = vadd.f32 %v12916_v43, %v4495_v55  ;;  %v4620_v40 = vsel %vm635_vm0, %v13087_v9, 0.0 }
 0x82c   : > { %4618 = vadd.xlane.f32.xlu0 %v4617_v8  ;;  %4621 = vadd.xlane.f32.xlu1 %v4620_v40  ;;  %v13102_v37 = vadd.f32 %v9820_v50, %v4501_v41 }
 0x82d   : > { %v13099_v48 = vadd.f32 %v9819_v5, %v4496_v20 }
 0x82e   : > { %15476 = vst [vmem:[#allocation37_spill] sm:$0xff] %v13102_v37  ;;  %v4629_v18 = vsel %vm635_vm0, %v13102_v37, 0.0 }
 0x82f   : > { %15475 = vst [vmem:[#allocation36_spill] sm:$0xff] %v13099_v48  ;;  %v4626_v43 = vsel %vm635_vm0, %v13099_v48, 0.0 }
 0x830   : > { %4624 = vadd.xlane.f32.xlu0 %v4623_v22  ;;  %4627 = vadd.xlane.f32.xlu1 %v4626_v43 }
 0x834   : > { %4630 = vadd.xlane.f32.xlu0 %v4629_v18 }
 0x880   : > { %v4541_v39 = vpop.xlane.xlu1 %4540 }
 0x881   : > { %v4633_v38 = vmul.f32 0.03125, %v4541_v39  ;;  %v4538_v47 = vpop.xlane.xlu0 %4537 }
 0x882   : > { %v4632_v16 = vmul.f32 0.03125, %v4538_v47 }
 0x883   : > { %v13111_v33 = vsub.f32 %v12921_v45, %v4633_v38 }
 0x884   : > { %v13114_v60 = vsub.f32 %v12924_v1, %v4632_v16 }
 0x885   : > { %v4544_v44 = vpop.xlane.xlu0 %4543  ;;  %v4697_v54 = vmul.f32 %v13111_v33, %v13111_v33 }
 0x886   : > { %v4634_v23 = vmul.f32 0.03125, %v4544_v44  ;;  %v4696_v63 = vmul.f32 %v13114_v60, %v13114_v60 }
 0x887   : > { %v4731_v46 = vsel %vm635_vm0, %v4697_v54, 0.0 }
 0x888   : > { %v13122_v14 = vsub.f32 %v12933_v34, %v4634_v23  ;;  %4732 = vadd.xlane.f32.xlu0 %v4731_v46  ;;  %v4728_v26 = vsel %vm635_vm0, %v4696_v63, 0.0 }
 0x889   : > { %v4547_v51 = vpop.xlane.xlu0 %4546  ;;  %4729 = vadd.xlane.f32.xlu1 %v4728_v26  ;;  %v4550_v0 = vpop.xlane.xlu1 %4549 }
 0x88a   : > { %v4635_v12 = vmul.f32 0.03125, %v4547_v51  ;;  %v4636_v31 = vmul.f32 0.03125, %v4550_v0  ;;  %v4698_v25 = vmul.f32 %v13122_v14, %v13122_v14 }
 0x88c   : > { %v13128_v57 = vsub.f32 %v12936_v15, %v4635_v12  ;;  %v13131_v30 = vsub.f32 %v12943_v32, %v4636_v31  ;;  %v4734_v13 = vsel %vm635_vm0, %v4698_v25, 0.0 }
 0x88d   : > { %v4553_v41 = vpop.xlane.xlu0 %4552  ;;  %4735 = vadd.xlane.f32.xlu1 %v4734_v13  ;;  %v4556_v55 = vpop.xlane.xlu1 %4555 }
 0x88e   : > { %v4637_v3 = vmul.f32 0.03125, %v4553_v41  ;;  %v4638_v20 = vmul.f32 0.03125, %v4556_v55  ;;  %v4699_v8 = vmul.f32 %v13128_v57, %v13128_v57  ;;  %v4700_v40 = vmul.f32 %v13131_v30, %v13131_v30 }
 0x890   : > { %v13139_v5 = vsub.f32 %v12947_v19, %v4637_v3  ;;  %v13142_v50 = vsub.f32 %v12955_v62, %v4638_v20  ;;  %v4737_v22 = vsel %vm635_vm0, %v4699_v8, 0.0  ;;  %v4740_v43 = vsel %vm635_vm0, %v4700_v40, 0.0 }
 0x891   : > { %v4559_v18 = vpop.xlane.xlu0 %4558  ;;  %4738 = vadd.xlane.f32.xlu0 %v4737_v22  ;;  %4741 = vadd.xlane.f32.xlu1 %v4740_v43  ;;  %v4562_v39 = vpop.xlane.xlu1 %4561 }
 0x892   : > { %v4639_v38 = vmul.f32 0.03125, %v4559_v18  ;;  %v4640_v47 = vmul.f32 0.03125, %v4562_v39  ;;  %v4701_v16 = vmul.f32 %v13139_v5, %v13139_v5  ;;  %v4702_v44 = vmul.f32 %v13142_v50, %v13142_v50 }
 0x894   : > { %v13151_v54 = vsub.f32 %v12958_v17, %v4639_v38  ;;  %v13154_v23 = vsub.f32 %v12967_v35, %v4640_v47  ;;  %v4743_v63 = vsel %vm635_vm0, %v4701_v16, 0.0  ;;  %v4746_v46 = vsel %vm635_vm0, %v4702_v44, 0.0 }
 0x895   : > { %v4565_v26 = vpop.xlane.xlu0 %4564  ;;  %4744 = vadd.xlane.f32.xlu0 %v4743_v63  ;;  %4747 = vadd.xlane.f32.xlu1 %v4746_v46  ;;  %v4568_v51 = vpop.xlane.xlu1 %4567 }
 0x896   : > { %v4641_v0 = vmul.f32 0.03125, %v4565_v26  ;;  %v4642_v12 = vmul.f32 0.03125, %v4568_v51  ;;  %v4703_v31 = vmul.f32 %v13151_v54, %v13151_v54  ;;  %v4704_v25 = vmul.f32 %v13154_v23, %v13154_v23 }
 0x898   : > { %v13163_v13 = vsub.f32 %v12972_v21, %v4641_v0  ;;  %v13166_v41 = vsub.f32 %v12979_v27, %v4642_v12  ;;  %v4749_v55 = vsel %vm635_vm0, %v4703_v31, 0.0  ;;  %v4752_v3 = vsel %vm635_vm0, %v4704_v25, 0.0 }
 0x899   : > { %v4571_v20 = vpop.xlane.xlu0 %4570  ;;  %4750 = vadd.xlane.f32.xlu0 %v4749_v55  ;;  %4753 = vadd.xlane.f32.xlu1 %v4752_v3  ;;  %v4574_v8 = vpop.xlane.xlu1 %4573 }
 0x89a   : > { %v4643_v40 = vmul.f32 0.03125, %v4571_v20  ;;  %v4644_v22 = vmul.f32 0.03125, %v4574_v8  ;;  %v4705_v43 = vmul.f32 %v13163_v13, %v13163_v13  ;;  %v4706_v18 = vmul.f32 %v13166_v41, %v13166_v41 }
 0x89c   : > { %v13175_v39 = vsub.f32 %v12983_v28, %v4643_v40  ;;  %v13178_v38 = vsub.f32 %v12991_v42, %v4644_v22  ;;  %v4755_v47 = vsel %vm635_vm0, %v4705_v43, 0.0  ;;  %v4758_v16 = vsel %vm635_vm0, %v4706_v18, 0.0 }
 0x89d   : > { %v4577_v44 = vpop.xlane.xlu0 %4576  ;;  %4756 = vadd.xlane.f32.xlu0 %v4755_v47  ;;  %4759 = vadd.xlane.f32.xlu1 %v4758_v16  ;;  %v4580_v63 = vpop.xlane.xlu1 %4579 }
 0x89e   : > { %v4645_v46 = vmul.f32 0.03125, %v4577_v44  ;;  %v4646_v26 = vmul.f32 0.03125, %v4580_v63  ;;  %v4707_v51 = vmul.f32 %v13175_v39, %v13175_v39  ;;  %v4708_v0 = vmul.f32 %v13178_v38, %v13178_v38 }
 0x8a0   : > { %v13187_v12 = vsub.f32 %v12994_v7, %v4645_v46  ;;  %v13190_v31 = vsub.f32 %v13003_v58, %v4646_v26  ;;  %v4761_v25 = vsel %vm635_vm0, %v4707_v51, 0.0  ;;  %v4764_v55 = vsel %vm635_vm0, %v4708_v0, 0.0 }
 0x8a1   : > { %v4583_v3 = vpop.xlane.xlu0 %4582  ;;  %4762 = vadd.xlane.f32.xlu0 %v4761_v25  ;;  %4765 = vadd.xlane.f32.xlu1 %v4764_v55  ;;  %v4586_v20 = vpop.xlane.xlu1 %4585 }
 0x8a2   : > { %v4647_v8 = vmul.f32 0.03125, %v4583_v3  ;;  %v4648_v40 = vmul.f32 0.03125, %v4586_v20  ;;  %v4709_v22 = vmul.f32 %v13187_v12, %v13187_v12  ;;  %v4710_v43 = vmul.f32 %v13190_v31, %v13190_v31 }
 0x8a4   : > { %v13199_v18 = vsub.f32 %v13008_v49, %v4647_v8  ;;  %v13202_v47 = vsub.f32 %v13015_v24, %v4648_v40  ;;  %v4767_v16 = vsel %vm635_vm0, %v4709_v22, 0.0  ;;  %v4770_v44 = vsel %vm635_vm0, %v4710_v43, 0.0  ;;  %v5030_v43 = vld [vmem:[%s15254_s13] sm:$0xff] }
 0x8a5   : > { %v4589_v63 = vpop.xlane.xlu0 %4588  ;;  %4768 = vadd.xlane.f32.xlu0 %v4767_v16  ;;  %4771 = vadd.xlane.f32.xlu1 %v4770_v44  ;;  %v4592_v46 = vpop.xlane.xlu1 %4591  ;;  %v5031_v16 = vld [vmem:[%s15254_s13 + $0x8] sm:$0xff] }
 0x8a6   : > { %v4649_v26 = vmul.f32 0.03125, %v4589_v63  ;;  %v4650_v51 = vmul.f32 0.03125, %v4592_v46  ;;  %v4711_v0 = vmul.f32 %v13199_v18, %v13199_v18  ;;  %v4712_v25 = vmul.f32 %v13202_v47, %v13202_v47 }
 0x8a8   : > { %v13211_v55 = vsub.f32 %v13019_v36, %v4649_v26  ;;  %v13214_v3 = vsub.f32 %v13027_v56, %v4650_v51  ;;  %v4773_v20 = vsel %vm635_vm0, %v4711_v0, 0.0  ;;  %v4776_v8 = vsel %vm635_vm0, %v4712_v25, 0.0 }
 0x8a9   : > { %v4595_v40 = vpop.xlane.xlu0 %4594  ;;  %4774 = vadd.xlane.f32.xlu0 %v4773_v20  ;;  %4777 = vadd.xlane.f32.xlu1 %v4776_v8  ;;  %v4598_v22 = vpop.xlane.xlu1 %4597  ;;  %v9318_v51 = vpack.c.bf16 %v5031_v16, %v5030_v43 }
 0x8aa   : > { %v4651_v44 = vmul.f32 0.03125, %v4595_v40  ;;  %v4652_v63 = vmul.f32 0.03125, %v4598_v22  ;;  %v4713_v46 = vmul.f32 %v13211_v55, %v13211_v55  ;;  %v4714_v26 = vmul.f32 %v13214_v3, %v13214_v3  ;;  %v5032_v40 = vld [vmem:[%s15254_s13 + $0x10] sm:$0xff]  ;;  %v5033_v22 = vld [vmem:[%s15254_s13 + $0x18] sm:$0xff] }
 0x8ab   : > { %v9322_v16 = vpack.c.bf16 %v5033_v22, %v5032_v40  ;;  %9319 = vmatprep.subr.bf16.mxu1 %v9318_v51 }
 0x8ac   : > { %v13229_v0 = vsub.f32 %v13030_v59, %v4651_v44  ;;  %v13232_v25 = vsub.f32 %v13039_v11, %v4652_v63  ;;  %v4779_v20 = vsel %vm635_vm0, %v4713_v46, 0.0  ;;  %v4782_v8 = vsel %vm635_vm0, %v4714_v26, 0.0  ;;  %9321 = vmatpush3.bf16.msra.mxu1 %v9318_v51 }
 0x8ad   : > { %v4601_v56 = vpop.xlane.xlu0 %4600  ;;  %4780 = vadd.xlane.f32.xlu0 %v4779_v20  ;;  %4783 = vadd.xlane.f32.xlu1 %v4782_v8  ;;  %v4604_v43 = vpop.xlane.xlu1 %4603 }
 0x8ae   : > { %v4653_v44 = vmul.f32 0.03125, %v4601_v56  ;;  %v4654_v63 = vmul.f32 0.03125, %v4604_v43  ;;  %v4715_v46 = vmul.f32 %v13229_v0, %v13229_v0  ;;  %v4716_v26 = vmul.f32 %v13232_v25, %v13232_v25  ;;  %9323 = vmatprep.subr.bf16.mxu1 %v9322_v16 }
 0x8b0   : > { %v13247_v11 = vsub.f32 %v13044_v53, %v4653_v44  ;;  %v13250_v59 = vsub.f32 %v13051_v4, %v4654_v63  ;;  %v4785_v20 = vsel %vm635_vm0, %v4715_v46, 0.0  ;;  %v4788_v8 = vsel %vm635_vm0, %v4716_v26, 0.0  ;;  %9325 = vmatpush3.bf16.msra.mxu1 %v9322_v16 }
 0x8b1   : > { %v4607_v56 = vpop.xlane.xlu0 %4606  ;;  %4786 = vadd.xlane.f32.xlu0 %v4785_v20  ;;  %4789 = vadd.xlane.f32.xlu1 %v4788_v8  ;;  %v4610_v40 = vpop.xlane.xlu1 %4609 }
 0x8b2   : > { %v4655_v22 = vmul.f32 0.03125, %v4607_v56  ;;  %v4656_v43 = vmul.f32 0.03125, %v4610_v40  ;;  %v4717_v51 = vmul.f32 %v13247_v11, %v13247_v11  ;;  %v4718_v44 = vmul.f32 %v13250_v59, %v13250_v59 }
 0x8b4   : > { %v13259_v63 = vsub.f32 %v13055_v2, %v4655_v22  ;;  %v13262_v46 = vsub.f32 %v13063_v29, %v4656_v43  ;;  %v4791_v26 = vsel %vm635_vm0, %v4717_v51, 0.0  ;;  %v4794_v20 = vsel %vm635_vm0, %v4718_v44, 0.0 }
 0x8b5   : > { %v4613_v8 = vpop.xlane.xlu0 %4612  ;;  %4792 = vadd.xlane.f32.xlu0 %v4791_v26  ;;  %4795 = vadd.xlane.f32.xlu1 %v4794_v20  ;;  %v4616_v56 = vpop.xlane.xlu1 %4615 }
 0x8b6   : > { %v4657_v40 = vmul.f32 0.03125, %v4613_v8  ;;  %v4658_v4 = vmul.f32 0.03125, %v4616_v56  ;;  %v4719_v53 = vmul.f32 %v13259_v63, %v13259_v63  ;;  %v4720_v16 = vmul.f32 %v13262_v46, %v13262_v46 }
 0x8b8   : > { %v13271_v22 = vsub.f32 %v13066_v10, %v4657_v40  ;;  %v13274_v43 = vsub.f32 %v13075_v52, %v4658_v4  ;;  %v4797_v51 = vsel %vm635_vm0, %v4719_v53, 0.0  ;;  %v4800_v44 = vsel %vm635_vm0, %v4720_v16, 0.0 }
 0x8b9   : > { %v4619_v26 = vpop.xlane.xlu0 %4618  ;;  %4798 = vadd.xlane.f32.xlu0 %v4797_v51  ;;  %4801 = vadd.xlane.f32.xlu1 %v4800_v44  ;;  %v4622_v20 = vpop.xlane.xlu1 %4621 }
 0x8ba   : > { %v4659_v8 = vmul.f32 0.03125, %v4619_v26  ;;  %v4660_v56 = vmul.f32 0.03125, %v4622_v20  ;;  %v4721_v29 = vmul.f32 %v13271_v22, %v13271_v22  ;;  %v4722_v40 = vmul.f32 %v13274_v43, %v13274_v43 }
 0x8bc   : > { %v13283_v10 = vsub.f32 %v13080_v6, %v4659_v8  ;;  %v13286_v4 = vsub.f32 %v13087_v9, %v4660_v56  ;;  %v4803_v53 = vsel %vm635_vm0, %v4721_v29, 0.0  ;;  %v4806_v16 = vsel %vm635_vm0, %v4722_v40, 0.0 }
 0x8bd   : > { %v4625_v51 = vpop.xlane.xlu0 %4624  ;;  %4804 = vadd.xlane.f32.xlu0 %v4803_v53  ;;  %4807 = vadd.xlane.f32.xlu1 %v4806_v16  ;;  %v4628_v44 = vpop.xlane.xlu1 %4627 }
 0x8be   : > { %v4661_v26 = vmul.f32 0.03125, %v4625_v51  ;;  %v4662_v20 = vmul.f32 0.03125, %v4628_v44  ;;  %v4723_v52 = vmul.f32 %v13283_v10, %v13283_v10  ;;  %v4724_v8 = vmul.f32 %v13286_v4, %v13286_v4 }
 0x8c0   : > { %v13295_v6 = vsub.f32 %v13091_v61, %v4661_v26  ;;  %v13298_v56 = vsub.f32 %v13099_v48, %v4662_v20  ;;  %v4809_v29 = vsel %vm635_vm0, %v4723_v52, 0.0  ;;  %v4812_v40 = vsel %vm635_vm0, %v4724_v8, 0.0 }
 0x8c1   : > { %v4631_v53 = vpop.xlane.xlu0 %4630  ;;  %4810 = vadd.xlane.f32.xlu0 %v4809_v29  ;;  %4813 = vadd.xlane.f32.xlu1 %v4812_v40 }
 0x8c2   : > { %v4663_v16 = vmul.f32 0.03125, %v4631_v53  ;;  %v4725_v51 = vmul.f32 %v13295_v6, %v13295_v6  ;;  %v4726_v44 = vmul.f32 %v13298_v56, %v13298_v56 }
 0x8c4   : > { %v13307_v26 = vsub.f32 %v13102_v37, %v4663_v16  ;;  %v4815_v20 = vsel %vm635_vm0, %v4725_v51, 0.0  ;;  %v4818_v48 = vsel %vm635_vm0, %v4726_v44, 0.0 }
 0x8c5   : > { %4816 = vadd.xlane.f32.xlu0 %v4815_v20  ;;  %4819 = vadd.xlane.f32.xlu1 %v4818_v48 }
 0x8c6   : > { %v4727_v52 = vmul.f32 %v13307_v26, %v13307_v26 }
 0x8c8   : > { %v4821_v8 = vsel %vm635_vm0, %v4727_v52, 0.0 }
 0x8c9   : > { %4822 = vadd.xlane.f32.xlu0 %v4821_v8 }
 0x915   : > { %v4733_v29 = vpop.xlane.xlu0 %4732 }
 0x916   : > { %v4825_v40 = vmul.f32 0.03125, %v4733_v29  ;;  %v4730_v53 = vpop.xlane.xlu1 %4729 }
 0x917   : > { %v4824_v9 = vmul.f32 0.03125, %v4730_v53 }
 0x918   : > { %v4857_v61 = vadd.f32 1e-05, %v4825_v40 }
 0x919   : > { %v4856_v2 = vadd.f32 1e-05, %v4824_v9  ;;  %v13317_v9 = vld [vmem:[%s15252_s11] ss:$0 sm:$0xff] }
 0x91a   : > { %9578 = vrsqrt.f32 %v4857_v61  ;;  %v4736_v16 = vpop.xlane.xlu1 %4735 }
 0x91b   : > { %9580 = vrsqrt.f32 %v4856_v2  ;;  %v4826_v51 = vmul.f32 0.03125, %v4736_v16 }
 0x91d   : > { %v4858_v37 = vadd.f32 1e-05, %v4826_v51 }
 0x91e   : > { %v4739_v44 = vpop.xlane.xlu0 %4738  ;;  %v4742_v20 = vpop.xlane.xlu1 %4741 }
 0x91f   : > { %9582 = vrsqrt.f32 %v4858_v37  ;;  %v4827_v48 = vmul.f32 0.03125, %v4739_v44  ;;  %v4828_v24 = vmul.f32 0.03125, %v4742_v20 }
 0x921   : > { %v4859_v36 = vadd.f32 1e-05, %v4827_v48  ;;  %v4860_v58 = vadd.f32 1e-05, %v4828_v24 }
 0x922   : > { %v4745_v52 = vpop.xlane.xlu0 %4744  ;;  %v4748_v8 = vpop.xlane.xlu1 %4747 }
 0x923   : > { %9584 = vrsqrt.f32 %v4859_v36  ;;  %v4829_v29 = vmul.f32 0.03125, %v4745_v52  ;;  %v4830_v49 = vmul.f32 0.03125, %v4748_v8  ;;  %v13324_v36 = vld [vmem:[%s15253_s12] ss:$0 sm:$0xff] }
 0x924   : > { %v9579_v53 = vpop.eup %9578  ;;  %9586 = vrsqrt.f32 %v4860_v58 }
 0x925   : > { %v9581_v2 = vpop.eup %9580  ;;  %v4921_v61 = vmul.f32 %v9579_v53, %v13111_v33  ;;  %v4861_v37 = vadd.f32 1e-05, %v4829_v29  ;;  %v4862_v40 = vadd.f32 1e-05, %v4830_v49 }
 0x926   : > { %v4751_v16 = vpop.xlane.xlu0 %4750  ;;  %v4754_v51 = vpop.xlane.xlu1 %4753  ;;  %v4920_v24 = vmul.f32 %v9581_v2, %v13114_v60 }
 0x927   : > { %v4960_v44 = vmul.f32 %v13317_v9, %v4921_v61  ;;  %9588 = vrsqrt.f32 %v4861_v37  ;;  %v4831_v20 = vmul.f32 0.03125, %v4751_v16  ;;  %v4832_v48 = vmul.f32 0.03125, %v4754_v51 }
 0x928   : > { %9590 = vrsqrt.f32 %v4862_v40  ;;  %v4959_v58 = vmul.f32 %v13317_v9, %v4920_v24 }
 0x929   : > { %v9583_v33 = vpop.eup %9582  ;;  %v4863_v52 = vadd.f32 1e-05, %v4831_v20  ;;  %v4864_v49 = vadd.f32 1e-05, %v4832_v48  ;;  %v4999_v2 = vadd.f32 %v13324_v36, %v4960_v44 }
 0x92a   : > { %v4757_v8 = vpop.xlane.xlu0 %4756  ;;  %v4760_v29 = vpop.xlane.xlu1 %4759  ;;  %v4998_v60 = vadd.f32 %v13324_v36, %v4959_v58  ;;  %v4922_v53 = vmul.f32 %v9583_v33, %v13122_v14 }
 0x92b   : > { %9592 = vrsqrt.f32 %v4863_v52  ;;  %v4833_v42 = vmul.f32 0.03125, %v4757_v8  ;;  %v4834_v61 = vmul.f32 0.03125, %v4760_v29 }
 0x92c   : > { %9594 = vrsqrt.f32 %v4864_v49  ;;  %9146 = vmatprep.mubr.msk.f32.mxu1 %vm635_vm0, %v4998_v60  ;;  %v4961_v37 = vmul.f32 %v13317_v9, %v4922_v53 }
 0x92d   : > { %v9585_v40 = vpop.eup %9584  ;;  %v4865_v16 = vadd.f32 1e-05, %v4833_v42  ;;  %v4866_v51 = vadd.f32 1e-05, %v4834_v61  ;;  %9147 = vmatmul.mubr.msk.f32.vlgmr.msra.gmra.mrb[46].mxu1 %vm635_vm0, %v4999_v2 }
 0x92e   : > { %v9587_v24 = vpop.eup %9586  ;;  %v4763_v20 = vpop.xlane.xlu0 %4762  ;;  %v5000_v14 = vadd.f32 %v13324_v36, %v4961_v37  ;;  %v4923_v44 = vmul.f32 %v9585_v40, %v13128_v57 }
 0x92f   : > { %v4766_v48 = vpop.xlane.xlu1 %4765  ;;  %9596 = vrsqrt.f32 %v4865_v16  ;;  %v4835_v58 = vmul.f32 0.03125, %v4763_v20  ;;  %v4924_v52 = vmul.f32 %v9587_v24, %v13131_v30 }
 0x930   : > { %v4836_v33 = vmul.f32 0.03125, %v4766_v48  ;;  %9598 = vrsqrt.f32 %v4866_v51  ;;  %9149 = vmatprep.mubr.msk.f32.mxu1 %vm635_vm0, %v5000_v14  ;;  %v4962_v42 = vmul.f32 %v13317_v9, %v4923_v44 }
 0x931   : > { %v9589_v49 = vpop.eup %9588  ;;  %v4867_v8 = vadd.f32 1e-05, %v4835_v58  ;;  %v4963_v60 = vmul.f32 %v13317_v9, %v4924_v52 }
 0x932   : > { %v4868_v29 = vadd.f32 1e-05, %v4836_v33  ;;  %v9591_v53 = vpop.eup %9590  ;;  %v4769_v2 = vpop.xlane.xlu0 %4768  ;;  %v5001_v57 = vadd.f32 %v13324_v36, %v4962_v42  ;;  %v4925_v37 = vmul.f32 %v9589_v49, %v13139_v5 }
 0x933   : > { %v4772_v61 = vpop.xlane.xlu1 %4771  ;;  %9600 = vrsqrt.f32 %v4867_v8  ;;  %v4837_v40 = vmul.f32 0.03125, %v4769_v2  ;;  %v5002_v16 = vadd.f32 %v13324_v36, %v4963_v60  ;;  %v4926_v24 = vmul.f32 %v9591_v53, %v13142_v50 }
 0x934   : > { %v4838_v30 = vmul.f32 0.03125, %v4772_v61  ;;  %9602 = vrsqrt.f32 %v4868_v29  ;;  %9150 = vmatmul.mubr.msk.f32.gmra.mrb[48].mxu1 %vm635_vm0, %v5001_v57  ;;  %v4964_v51 = vmul.f32 %v13317_v9, %v4925_v37 }
 0x935   : > { %v9593_v20 = vpop.eup %9592  ;;  %v4869_v48 = vadd.f32 1e-05, %v4837_v40  ;;  %9152 = vmatprep.mubr.msk.f32.mxu1 %vm635_vm0, %v5002_v16  ;;  %v4965_v52 = vmul.f32 %v13317_v9, %v4926_v24 }
 0x936   : > { %v4870_v14 = vadd.f32 1e-05, %v4838_v30  ;;  %v9595_v44 = vpop.eup %9594  ;;  %v4775_v58 = vpop.xlane.xlu0 %4774  ;;  %v5003_v33 = vadd.f32 %v13324_v36, %v4964_v51  ;;  %v4927_v42 = vmul.f32 %v9593_v20, %v13151_v54 }
 0x937   : > { %v4778_v5 = vpop.xlane.xlu1 %4777  ;;  %9604 = vrsqrt.f32 %v4869_v48  ;;  %v4839_v49 = vmul.f32 0.03125, %v4775_v58  ;;  %v4928_v29 = vmul.f32 %v9595_v44, %v13154_v23  ;;  %v5004_v50 = vadd.f32 %v13324_v36, %v4965_v52 }
 0x938   : > { %v4840_v8 = vmul.f32 0.03125, %v4778_v5  ;;  %9606 = vrsqrt.f32 %v4870_v14  ;;  %9153 = vmatmul.mubr.msk.f32.gmra.mrb[50].mxu1 %vm635_vm0, %v5003_v33  ;;  %v4966_v60 = vmul.f32 %v13317_v9, %v4927_v42 }
 0x939   : > { %v9597_v53 = vpop.eup %9596  ;;  %v4871_v2 = vadd.f32 1e-05, %v4839_v49  ;;  %v4967_v57 = vmul.f32 %v13317_v9, %v4928_v29  ;;  %9155 = vmatprep.mubr.msk.f32.mxu1 %vm635_vm0, %v5004_v50 }
 0x93a   : > { %v4872_v61 = vadd.f32 1e-05, %v4840_v8  ;;  %v9599_v37 = vpop.eup %9598  ;;  %v4781_v54 = vpop.xlane.xlu0 %4780  ;;  %v5005_v30 = vadd.f32 %v13324_v36, %v4966_v60  ;;  %v4929_v23 = vmul.f32 %v9597_v53, %v13163_v13 }
 0x93b   : > { %v4784_v40 = vpop.xlane.xlu1 %4783  ;;  %9608 = vrsqrt.f32 %v4871_v2  ;;  %v4841_v16 = vmul.f32 0.03125, %v4781_v54  ;;  %v5006_v24 = vadd.f32 %v13324_v36, %v4967_v57  ;;  %v4930_v48 = vmul.f32 %v9599_v37, %v13166_v41 }
 0x93c   : > { %v4842_v51 = vmul.f32 0.03125, %v4784_v40  ;;  %9610 = vrsqrt.f32 %v4872_v61  ;;  %9156 = vmatmul.mubr.msk.f32.gmra.mrb[52].mxu1 %vm635_vm0, %v5005_v30  ;;  %v4968_v20 = vmul.f32 %v13317_v9, %v4929_v23 }
 0x93d   : > { %v9601_v14 = vpop.eup %9600  ;;  %v4873_v44 = vadd.f32 1e-05, %v4841_v16  ;;  %9158 = vmatprep.mubr.msk.f32.mxu1 %vm635_vm0, %v5006_v24  ;;  %v4969_v42 = vmul.f32 %v13317_v9, %v4930_v48 }
 0x93e   : > { %v4874_v58 = vadd.f32 1e-05, %v4842_v51  ;;  %v9603_v5 = vpop.eup %9602  ;;  %v4787_v33 = vpop.xlane.xlu0 %4786  ;;  %v5007_v52 = vadd.f32 %v13324_v36, %v4968_v20  ;;  %v4931_v49 = vmul.f32 %v9601_v14, %v13175_v39 }
 0x93f   : > { %v4790_v13 = vpop.xlane.xlu1 %4789  ;;  %9612 = vrsqrt.f32 %v4873_v44  ;;  %v4843_v8 = vmul.f32 0.03125, %v4787_v33  ;;  %v4932_v50 = vmul.f32 %v9603_v5, %v13178_v38  ;;  %v5008_v41 = vadd.f32 %v13324_v36, %v4969_v42 }
 0x940   : > { %v4844_v29 = vmul.f32 0.03125, %v4790_v13  ;;  %9614 = vrsqrt.f32 %v4874_v58  ;;  %9159 = vmatmul.mubr.msk.f32.gmra.mrb[54].mxu1 %vm635_vm0, %v5007_v52  ;;  %v4970_v60 = vmul.f32 %v13317_v9, %v4931_v49 }
 0x941   : > { %v9605_v53 = vpop.eup %9604  ;;  %v4875_v2 = vadd.f32 1e-05, %v4843_v8  ;;  %v4971_v57 = vmul.f32 %v13317_v9, %v4932_v50  ;;  %9161 = vmatprep.mubr.msk.f32.mxu1 %vm635_vm0, %v5008_v41 }
 0x942   : > { %v4876_v61 = vadd.f32 1e-05, %v4844_v29  ;;  %v9607_v37 = vpop.eup %9606  ;;  %v4793_v39 = vpop.xlane.xlu0 %4792  ;;  %v5009_v40 = vadd.f32 %v13324_v36, %v4970_v60  ;;  %v4933_v38 = vmul.f32 %v9605_v53, %v13187_v12 }
 0x943   : > { %v4796_v54 = vpop.xlane.xlu1 %4795  ;;  %9616 = vrsqrt.f32 %v4875_v2  ;;  %v4845_v30 = vmul.f32 0.03125, %v4793_v39  ;;  %v5010_v16 = vadd.f32 %v13324_v36, %v4971_v57  ;;  %v4934_v24 = vmul.f32 %v9607_v37, %v13190_v31 }
 0x944   : > { %v4846_v23 = vmul.f32 0.03125, %v4796_v54  ;;  %9618 = vrsqrt.f32 %v4876_v61  ;;  %9162 = vmatmul.mubr.msk.f32.gmra.mrb[56].mxu1 %vm635_vm0, %v5009_v40  ;;  %v4972_v51 = vmul.f32 %v13317_v9, %v4933_v38 }
 0x945   : > { %v9609_v20 = vpop.eup %9608  ;;  %v4877_v48 = vadd.f32 1e-05, %v4845_v30  ;;  %9164 = vmatprep.mubr.msk.f32.mxu1 %vm635_vm0, %v5010_v16  ;;  %v4973_v33 = vmul.f32 %v13317_v9, %v4934_v24 }
 0x946   : > { %v4878_v14 = vadd.f32 1e-05, %v4846_v23  ;;  %v9611_v44 = vpop.eup %9610  ;;  %v4799_v58 = vpop.xlane.xlu0 %4798  ;;  %v5011_v5 = vadd.f32 %v13324_v36, %v4972_v51  ;;  %v4935_v13 = vmul.f32 %v9609_v20, %v13199_v18 }
 0x947   : > { %v4802_v12 = vpop.xlane.xlu1 %4801  ;;  %9620 = vrsqrt.f32 %v4877_v48  ;;  %v4847_v52 = vmul.f32 0.03125, %v4799_v58  ;;  %v4936_v49 = vmul.f32 %v9611_v44, %v13202_v47  ;;  %v5012_v31 = vadd.f32 %v13324_v36, %v4973_v33 }
 0x948   : > { %v4848_v42 = vmul.f32 0.03125, %v4802_v12  ;;  %9622 = vrsqrt.f32 %v4878_v14  ;;  %9165 = vmatmul.mubr.msk.f32.gmra.mrb[58].mxu1 %vm635_vm0, %v5011_v5  ;;  %v4974_v8 = vmul.f32 %v13317_v9, %v4935_v13 }
 0x949   : > { %v9613_v29 = vpop.eup %9612  ;;  %v4879_v50 = vadd.f32 1e-05, %v4847_v52  ;;  %v4975_v60 = vmul.f32 %v13317_v9, %v4936_v49  ;;  %9167 = vmatprep.mubr.msk.f32.mxu1 %vm635_vm0, %v5012_v31 }
 0x94a   : > { %v4880_v41 = vadd.f32 1e-05, %v4848_v42  ;;  %v9615_v53 = vpop.eup %9614  ;;  %v4805_v18 = vpop.xlane.xlu0 %4804  ;;  %v5013_v61 = vadd.f32 %v13324_v36, %v4974_v8  ;;  %v4937_v47 = vmul.f32 %v9613_v29, %v13211_v55 }
 0x94b   : > { %v4808_v2 = vpop.xlane.xlu1 %4807  ;;  %9624 = vrsqrt.f32 %v4879_v50  ;;  %v4849_v57 = vmul.f32 0.03125, %v4805_v18  ;;  %v5014_v39 = vadd.f32 %v13324_v36, %v4975_v60  ;;  %v4938_v40 = vmul.f32 %v9615_v53, %v13214_v3 }
 0x94c   : > { %v4850_v37 = vmul.f32 0.03125, %v4808_v2  ;;  %9626 = vrsqrt.f32 %v4880_v41  ;;  %9168 = vmatmul.mubr.msk.f32.gmra.mrb[60].mxu1 %vm635_vm0, %v5013_v61  ;;  %v4976_v54 = vmul.f32 %v13317_v9, %v4937_v47 }
 0x94d   : > { %v9617_v38 = vpop.eup %9616  ;;  %v4881_v30 = vadd.f32 1e-05, %v4849_v57  ;;  %9170 = vmatprep.mubr.msk.f32.mxu1 %vm635_vm0, %v5014_v39  ;;  %v4977_v20 = vmul.f32 %v13317_v9, %v4938_v40 }
 0x94e   : > { %v4882_v23 = vadd.f32 1e-05, %v4850_v37  ;;  %v9619_v16 = vpop.eup %9618  ;;  %v4811_v51 = vpop.xlane.xlu0 %4810  ;;  %v5015_v24 = vadd.f32 %v13324_v36, %v4976_v54  ;;  %v4939_v48 = vmul.f32 %v9617_v38, %v13229_v0 }
 0x94f   : > { %v4814_v55 = vpop.xlane.xlu1 %4813  ;;  %9628 = vrsqrt.f32 %v4881_v30  ;;  %v4851_v14 = vmul.f32 0.03125, %v4811_v51  ;;  %v4940_v58 = vmul.f32 %v9619_v16, %v13232_v25  ;;  %v5016_v3 = vadd.f32 %v13324_v36, %v4977_v20 }
 0x950   : > { %v4852_v44 = vmul.f32 0.03125, %v4814_v55  ;;  %9630 = vrsqrt.f32 %v4882_v23  ;;  %9171 = vmatmul.mubr.msk.f32.gmra.mrb[62].mxu1 %vm635_vm0, %v5015_v24  ;;  %v4978_v12 = vmul.f32 %v13317_v9, %v4939_v48 }
 0x951   : > { %v9621_v5 = vpop.eup %9620  ;;  %v4883_v33 = vadd.f32 1e-05, %v4851_v14  ;;  %v4979_v52 = vmul.f32 %v13317_v9, %v4940_v58  ;;  %9173 = vmatprep.mubr.msk.f32.mxu1 %vm635_vm0, %v5016_v3 }
 0x952   : > { %v4884_v13 = vadd.f32 1e-05, %v4852_v44  ;;  %v9623_v42 = vpop.eup %9622  ;;  %v4817_v0 = vpop.xlane.xlu0 %4816  ;;  %v5017_v31 = vadd.f32 %v13324_v36, %v4978_v12  ;;  %v4941_v25 = vmul.f32 %v9621_v5, %v13247_v11 }
 0x953   : > { %v4820_v49 = vpop.xlane.xlu1 %4819  ;;  %9632 = vrsqrt.f32 %v4883_v33  ;;  %v4853_v8 = vmul.f32 0.03125, %v4817_v0  ;;  %v5018_v50 = vadd.f32 %v13324_v36, %v4979_v52  ;;  %v4942_v60 = vmul.f32 %v9623_v42, %v13250_v59 }
 0x954   : > { %v4854_v29 = vmul.f32 0.03125, %v4820_v49  ;;  %9634 = vrsqrt.f32 %v4884_v13  ;;  %9174 = vmatmul.mubr.msk.f32.gmra.mrb[64].mxu1 %vm635_vm0, %v5017_v31  ;;  %v4980_v41 = vmul.f32 %v13317_v9, %v4941_v25 }
 0x955   : > { %v9625_v53 = vpop.eup %9624  ;;  %v4885_v18 = vadd.f32 1e-05, %v4853_v8  ;;  %9176 = vmatprep.mubr.msk.f32.mxu1 %vm635_vm0, %v5018_v50  ;;  %v4981_v57 = vmul.f32 %v13317_v9, %v4942_v60  ;;  %v5533_v50 = vld [vmem:[#allocation4 + $0xf] sm:$0xff] }
 0x956   : > { %v4886_v2 = vadd.f32 1e-05, %v4854_v29  ;;  %v9627_v61 = vpop.eup %9626  ;;  %v4823_v47 = vpop.xlane.xlu0 %4822  ;;  %v5019_v11 = vadd.f32 %v13324_v36, %v4980_v41  ;;  %v4943_v37 = vmul.f32 %v9625_v53, %v13259_v63  ;;  %v13455_v29 = vld [vmem:[%s15255_s14] ss:$0 sm:$0xff]  ;;  %v5532_v41 = vld [vmem:[#allocation4 + $0x7] sm:$0xff] }
 0x957   : > { %9636 = vrsqrt.f32 %v4885_v18  ;;  %v4855_v39 = vmul.f32 0.03125, %v4823_v47  ;;  %v4944_v54 = vmul.f32 %v9627_v61, %v13262_v46  ;;  %v5020_v59 = vadd.f32 %v13324_v36, %v4981_v57  ;;  %v9821_v61 = vld [vmem:[#allocation4] sm:$0xff] }
 0x958   : > { %9638 = vrsqrt.f32 %v4886_v2  ;;  %9177 = vmatmul.mubr.msk.f32.gmra.mrb[66].mxu1 %vm635_vm0, %v5019_v11  ;;  %v4982_v40 = vmul.f32 %v13317_v9, %v4943_v37  ;;  %v13475_v57 = vld [vmem:[%s15256_s15 + $0x2] ss:$0 sm:$0xff]  ;;  %v5863_v37 = vld [vmem:[#allocation4 + $0x11] sm:$0xff] }
 0x959   : > { %v9629_v38 = vpop.eup %9628  ;;  %v4887_v30 = vadd.f32 1e-05, %v4855_v39  ;;  %v4983_v23 = vmul.f32 %v13317_v9, %v4944_v54  ;;  %9179 = vmatprep.mubr.msk.f32.mxu1 %vm635_vm0, %v5020_v59  ;;  %v5862_v39 = vld [vmem:[#allocation4 + $0x9] sm:$0xff]  ;;  %v5899_v59 = vmul.f32 %v13475_v57, %v5863_v37 }
 0x95a   : > { %v9631_v16 = vpop.eup %9630  ;;  %v5021_v63 = vadd.f32 %v13324_v36, %v4982_v40  ;;  %v4945_v51 = vmul.f32 %v9629_v38, %v13271_v22  ;;  %v5898_v38 = vmul.f32 %v13475_v57, %v5862_v39  ;;  %v13537_v39 = vld [vmem:[%s15256_s15 + $0x6] ss:$0 sm:$0xff] }
 0x95b   : > { %9640 = vrsqrt.f32 %v4887_v30  ;;  %v5022_v46 = vadd.f32 %v13324_v36, %v4983_v23  ;;  %v4946_v55 = vmul.f32 %v9631_v16, %v13274_v43  ;;  %v13482_v23 = vld [vmem:[%s15256_s15 + $0x4] ss:$0 sm:$0xff] }
 0x95c   : > { %9180 = vmatmul.mubr.msk.f32.gmra.mrb[68].mxu1 %vm635_vm0, %v5021_v63  ;;  %v4984_v24 = vmul.f32 %v13317_v9, %v4945_v51  ;;  %v13488_v51 = vld [vmem:[%s15256_s15 + $0x7] ss:$0 sm:$0xff] }
 0x95d   : > { %v9633_v20 = vpop.eup %9632  ;;  %9182 = vmatprep.mubr.msk.f32.mxu1 %vm635_vm0, %v5022_v46  ;;  %v4985_v48 = vmul.f32 %v13317_v9, %v4946_v55  ;;  %v13494_v55 = vld [vmem:[%s15256_s15 + $0x3] ss:$0 sm:$0xff] }
 0x95e   : > { %v9635_v14 = vpop.eup %9634  ;;  %v5023_v44 = vadd.f32 %v13324_v36, %v4984_v24  ;;  %v4947_v58 = vmul.f32 %v9633_v20, %v13283_v10 }
 0x95f   : > { %v5024_v22 = vadd.f32 %v13324_v36, %v4985_v48  ;;  %v4948_v3 = vmul.f32 %v9635_v14, %v13286_v4  ;;  %v13500_v48 = vld [vmem:[%s15256_s15 + $0x5] ss:$0 sm:$0xff] }
 0x960   : > { %9183 = vmatmul.mubr.msk.f32.gmra.mrb[70].mxu1 %vm635_vm0, %v5023_v44  ;;  %v4986_v43 = vmul.f32 %v13317_v9, %v4947_v58 }
 0x961   : > { %v9637_v12 = vpop.eup %9636  ;;  %9185 = vmatprep.mubr.msk.f32.mxu1 %vm635_vm0, %v5024_v22  ;;  %v4987_v5 = vmul.f32 %v13317_v9, %v4948_v3 }
 0x962   : > { %v9639_v33 = vpop.eup %9638  ;;  %v5025_v13 = vadd.f32 %v13324_v36, %v4986_v43  ;;  %v4949_v52 = vmul.f32 %v9637_v12, %v13295_v6 }
 0x963   : > { %v5026_v10 = vadd.f32 %v13324_v36, %v4987_v5  ;;  %v4950_v42 = vmul.f32 %v9639_v33, %v13298_v56 }
 0x964   : > { %9186 = vmatmul.mubr.msk.f32.gmra.mrb[72].mxu1 %vm635_vm0, %v5025_v13  ;;  %v4988_v4 = vmul.f32 %v13317_v9, %v4949_v52 }
 0x965   : > { %v9641_v0 = vpop.eup %9640  ;;  %9188 = vmatprep.mubr.msk.f32.mxu1 %vm635_vm0, %v5026_v10  ;;  %v4989_v49 = vmul.f32 %v13317_v9, %v4950_v42 }
 0x966   : > { %v5027_v31 = vadd.f32 %v13324_v36, %v4988_v4  ;;  %v4951_v25 = vmul.f32 %v9641_v0, %v13307_v26  ;;  %v13460_v26 = vld [vmem:[%s15256_s15] ss:$0 sm:$0xff] }
 0x967   : > { %v5028_v8 = vadd.f32 %v13324_v36, %v4989_v49  ;;  %v5569_v2 = vmul.f32 %v13460_v26, %v5533_v50  ;;  %v5568_v11 = vmul.f32 %v13460_v26, %v5532_v41 }
 0x968   : > { %9189 = vmatmul.mubr.msk.f32.gmra.mrb[74].mxu1 %vm635_vm0, %v5027_v31  ;;  %v4990_v6 = vmul.f32 %v13317_v9, %v4951_v25 }
 0x969   : > { %9191 = vmatprep.mubr.msk.f32.mxu1 %vm635_vm0, %v5028_v8 }
 0x96a   : > { %v5029_v56 = vadd.f32 %v13324_v36, %v4990_v6  ;;  %v13466_v36 = vld [vmem:[%s15256_s15 + $0x1] ss:$0 sm:$0xff] }
 0x96b   : > { %v5734_v47 = vmul.f32 %v9821_v61, %v13466_v36 }
 0x96c   : > { %9192 = vmatmul.mubr.msk.f32.gmra.mrb[76].mxu1 %vm635_vm0, %v5029_v56 }
 0x96d   : > { %v5766_v54 = vadd.f32 %v5734_v47, %v5569_v2  ;;  %v5765_v40 = vadd.f32 %v5734_v47, %v5568_v11 }
 0x96f   : > { %v5931_v24 = vadd.f32 %v5899_v59, %v5766_v54  ;;  %v5930_v44 = vadd.f32 %v5898_v38, %v5765_v40  ;;  %v13546_v38 = vld [vmem:[%s15256_s15 + $0x8] ss:$0 sm:$0xff] }
 0xa00   : > { %v9148_v60 = vpop.f32.mrb[46].mxu1 }
 0xa01   : > { %v5209_v9 = vadd.f32 %v9148_v60, %v13455_v29  ;;  %v5203_v53 = vpop.f32.mrb[47].mxu1 }
 0xa02   : > { %v5204_v18 = vadd.f32 %v13455_v29, %v5203_v53 }
 0xa03   : > { %5436 = vst [vmem:[#allocation4 + $0x30] sm:$0xff] %v5209_v9  ;;  %v6229_v20 = vmul.f32 %v13482_v23, %v5209_v9  ;;  %v5736_v58 = vmul.f32 %v13466_v36, %v5209_v9 }
 0xa04   : > { %5435 = vst [vmem:[#allocation4 + $0x28] sm:$0xff] %v5204_v18  ;;  %v6228_v5 = vmul.f32 %v13482_v23, %v5204_v18  ;;  %v5735_v33 = vmul.f32 %v13466_v36, %v5204_v18 }
 0xa07   : > { %v9151_v30 = vpop.f32.mrb[48].mxu1 }
 0xa08   : > { %v5219_v16 = vadd.f32 %v9151_v30, %v13455_v29  ;;  %v5213_v63 = vpop.f32.mrb[49].mxu1 }
 0xa09   : > { %v5214_v46 = vadd.f32 %v13455_v29, %v5213_v63 }
 0xa0a   : > { %5438 = vst [vmem:[#allocation4 + $0x50] sm:$0xff] %v5219_v16  ;;  %v6358_v14 = vld [vmem:[#allocation4 + $0x31] sm:$0xff]  ;;  %v13504_v43 = vmul.f32 %v13488_v51, %v5219_v16  ;;  %v13509_v13 = vmul.f32 %v13482_v23, %v5219_v16  ;;  %v13517_v49 = vmul.f32 %v13466_v36, %v5219_v16 }
 0xa0b   : > { %5437 = vst [vmem:[#allocation4 + $0x48] sm:$0xff] %v5214_v46  ;;  %v9154_v22 = vpop.f32.mrb[50].mxu1  ;;  %v6028_v3 = vld [vmem:[#allocation4 + $0x2f] sm:$0xff]  ;;  %v6027_v12 = vld [vmem:[#allocation4 + $0x27] sm:$0xff]  ;;  %v6394_v25 = vmul.f32 %v13500_v48, %v6358_v14  ;;  %v6724_v41 = vmul.f32 %v13488_v51, %v5214_v46  ;;  %v6230_v60 = vmul.f32 %v13482_v23, %v5214_v46  ;;  %v5901_v61 = vmul.f32 %v13475_v57, %v6358_v14 }
 0xa0c   : > { %v13512_v52 = vadd.f32 %v9154_v22, %v13455_v29  ;;  %v5223_v10 = vpop.f32.mrb[51].mxu1  ;;  %v6064_v42 = vmul.f32 %v13494_v55, %v6028_v3  ;;  %v6063_v4 = vmul.f32 %v13494_v55, %v6027_v12  ;;  %v6357_v0 = vld [vmem:[#allocation4 + $0x29] sm:$0xff]  ;;  %v5570_v8 = vmul.f32 %v13460_v26, %v6027_v12 }
 0xa0d   : > { %v13520_v31 = vadd.f32 %v13455_v29, %v5223_v10  ;;  %v5571_v6 = vmul.f32 %v13460_v26, %v6028_v3  ;;  %v6393_v53 = vmul.f32 %v13500_v48, %v6357_v0  ;;  %v5900_v59 = vmul.f32 %v13475_v57, %v6357_v0 }
 0xa0e   : > { %5440 = vst [vmem:[#allocation4 + $0x70] sm:$0xff] %v13512_v52  ;;  %v6096_v56 = vadd.f32 %v6064_v42, %v5931_v24  ;;  %v6095_v50 = vadd.f32 %v6063_v4, %v5930_v44  ;;  %v5767_v18 = vadd.f32 %v5735_v33, %v5570_v8  ;;  %v13556_v63 = vmul.f32 %v13488_v51, %v13512_v52 }
 0xa0f   : > { %5439 = vst [vmem:[#allocation4 + $0x68] sm:$0xff] %v13520_v31  ;;  %v9157_v9 = vpop.f32.mrb[52].mxu1  ;;  %v5768_v2 = vadd.f32 %v5736_v58, %v5571_v6  ;;  %v13552_v16 = vmul.f32 %v13488_v51, %v13520_v31  ;;  %v5737_v24 = vmul.f32 %v13466_v36, %v5214_v46  ;;  %v13564_v3 = vmul.f32 %v13482_v23, %v13520_v31 }
 0xa10   : > { %v13532_v47 = vadd.f32 %v9157_v9, %v13455_v29  ;;  %v5233_v11 = vpop.f32.mrb[53].mxu1  ;;  %v6261_v37 = vadd.f32 %v6229_v20, %v6096_v56  ;;  %v6260_v54 = vadd.f32 %v6228_v5, %v6095_v50  ;;  %v5932_v22 = vadd.f32 %v5900_v59, %v5767_v18 }
 0xa11   : > { %v13541_v40 = vadd.f32 %v13455_v29, %v5233_v11  ;;  %v13548_v30 = vld [vmem:[#allocation4 + $0x51] sm:$0xff]  ;;  %v5933_v42 = vadd.f32 %v5901_v61, %v5768_v2 }
 0xa12   : > { %5442 = vst [vmem:[#allocation4 + $0x90] sm:$0xff] %v13532_v47  ;;  %v6426_v20 = vadd.f32 %v6394_v25, %v6261_v37  ;;  %v13560_v14 = vld [vmem:[#allocation4 + $0x4f] sm:$0xff]  ;;  %v6425_v44 = vadd.f32 %v6393_v53, %v6260_v54  ;;  %v6523_v58 = vld [vmem:[#allocation4 + $0x47] sm:$0xff]  ;;  %v6890_v25 = vmul.f32 %v13546_v38, %v13548_v30  ;;  %v6396_v11 = vmul.f32 %v13500_v48, %v13548_v30 }
 0xa13   : > { %5441 = vst [vmem:[#allocation4 + $0x88] sm:$0xff] %v13541_v40  ;;  %v9160_v12 = vpop.f32.mrb[54].mxu1  ;;  %v6560_v5 = vmul.f32 %v13537_v39, %v13560_v14  ;;  %v6559_v46 = vmul.f32 %v13537_v39, %v6523_v58  ;;  %v6853_v33 = vld [vmem:[#allocation4 + $0x49] sm:$0xff]  ;;  %v6065_v10 = vmul.f32 %v13494_v55, %v6523_v58  ;;  %v6066_v8 = vmul.f32 %v13494_v55, %v13560_v14 }
 0xa14   : > { %v13572_v4 = vadd.f32 %v9160_v12, %v13455_v29  ;;  %v5243_v0 = vpop.f32.mrb[55].mxu1  ;;  %v5572_v6 = vmul.f32 %v13460_v26, %v6523_v58  ;;  %v6889_v18 = vmul.f32 %v13546_v38, %v6853_v33 }
 0xa15   : > { %v13580_v56 = vadd.f32 %v13455_v29, %v5243_v0  ;;  %v6592_v50 = vadd.f32 %v6560_v5, %v6426_v20  ;;  %v6591_v9 = vadd.f32 %v6559_v46, %v6425_v44  ;;  %v6097_v53 = vadd.f32 %v6065_v10, %v5932_v22  ;;  %v13599_v46 = vld [vmem:[%s15257_s16] ss:$0 sm:$0xff] }
 0xa16   : > { %5444 = vst [vmem:[#allocation4 + $0xb0] sm:$0xff] %v13572_v4  ;;  %v13584_v2 = vld [vmem:[#allocation4 + $0x67] sm:$0xff]  ;;  %v6098_v61 = vadd.f32 %v6066_v8, %v5933_v42  ;;  %v5769_v37 = vadd.f32 %v5737_v24, %v5572_v6  ;;  %v6395_v44 = vmul.f32 %v13500_v48, %v6853_v33  ;;  %v13591_v22 = vld [vmem:[#allocation4 + $0x6f] sm:$0xff] }
 0xa17   : > { %5443 = vst [vmem:[#allocation4 + $0xa8] sm:$0xff] %v13580_v56  ;;  %v9163_v54 = vpop.f32.mrb[56].mxu1  ;;  %v6757_v59 = vadd.f32 %v13504_v43, %v6592_v50  ;;  %v6756_v58 = vadd.f32 %v6724_v41, %v6591_v9  ;;  %v6262_v20 = vadd.f32 %v6230_v60, %v6097_v53  ;;  %v6561_v24 = vmul.f32 %v13537_v39, %v13584_v2  ;;  %v6855_v8 = vld [vmem:[#allocation4 + $0x69] sm:$0xff] }
 0xa18   : > { %v13594_v12 = vadd.f32 %v9163_v54, %v13455_v29  ;;  %v5253_v5 = vpop.f32.mrb[57].mxu1  ;;  %v6263_v43 = vadd.f32 %v13509_v13, %v6098_v61  ;;  %v5902_v41 = vmul.f32 %v13475_v57, %v6853_v33  ;;  %v6562_v50 = vmul.f32 %v13537_v39, %v13591_v22 }
 0xa19   : > { %v13606_v60 = vadd.f32 %v13455_v29, %v5253_v5  ;;  %v6922_v10 = vadd.f32 %v6890_v25, %v6757_v59  ;;  %v6921_v42 = vadd.f32 %v6889_v18, %v6756_v58  ;;  %v6427_v0 = vadd.f32 %v6395_v44, %v6262_v20  ;;  %v13625_v59 = vld [vmem:[#allocation4 + $0x71] sm:$0xff] }
 0xa1a   : > { %5446 = vst [vmem:[#allocation4 + $0xd0] sm:$0xff] %v13594_v12  ;;  %v6428_v6 = vadd.f32 %v6396_v11, %v6263_v43  ;;  %v5934_v9 = vadd.f32 %v5902_v41, %v5769_v37  ;;  %v6067_v53 = vmul.f32 %v13494_v55, %v13584_v2  ;;  %v6233_v61 = vmul.f32 %v13482_v23, %v13512_v52  ;;  %v13627_v20 = vld [vmem:[#allocation4 + $0x87] sm:$0xff] }
 0xa1b   : > { %5445 = vst [vmem:[#allocation4 + $0xc8] sm:$0xff] %v13606_v60  ;;  %v9166_v13 = vpop.f32.mrb[58].mxu1  ;;  %v13615_v33 = vadd.f32 %v13599_v46, %v6922_v10  ;;  %v13618_v25 = vadd.f32 %v13599_v46, %v6921_v42  ;;  %v6593_v18 = vadd.f32 %v6561_v24, %v6427_v0  ;;  %v5739_v44 = vmul.f32 %v13466_v36, %v13520_v31 }
 0xa1c   : > { %v13623_v11 = vadd.f32 %v9166_v13, %v13455_v29  ;;  %v5263_v37 = vpop.f32.mrb[59].mxu1  ;;  %v6594_v54 = vadd.f32 %v6562_v50, %v6428_v6  ;;  %v6099_v58 = vadd.f32 %v6067_v53, %v5934_v9  ;;  %v6891_v43 = vmul.f32 %v13546_v38, %v6855_v8  ;;  %v13651_v9 = vld [vmem:[#allocation4 + $0x89] sm:$0xff] }
 0xa1d   : > { %v13632_v5 = vadd.f32 %v13455_v29, %v5263_v37  ;;  %7954 = vrot.lane.b32.xlu0 %v13615_v33, %s9843_s21  ;;  %7952 = vrot.lane.b32.xlu1 %v13618_v25, %s9843_s21  ;;  %v6758_v24 = vadd.f32 %v13552_v16, %v6593_v18  ;;  %v6397_v31 = vmul.f32 %v13500_v48, %v6855_v8  ;;  %v13661_v37 = vld [vmem:[#allocation4 + $0x8f] sm:$0xff] }
 0xa1e   : > { %5448 = vst [vmem:[#allocation4 + $0xf0] sm:$0xff] %v13623_v11  ;;  %v6759_v41 = vadd.f32 %v13556_v63, %v6594_v54  ;;  %v6264_v10 = vadd.f32 %v13564_v3, %v6099_v58  ;;  %v5573_v42 = vmul.f32 %v13460_v26, %v13560_v14  ;;  %v6892_v16 = vmul.f32 %v13546_v38, %v13625_v59  ;;  %v13691_v7 = vld [vmem:[#allocation4 + $0xa7] sm:$0xff] }
 0xa1f   : > { %5447 = vst [vmem:[#allocation4 + $0xe8] sm:$0xff] %v13632_v5  ;;  %v9169_v0 = vpop.f32.mrb[60].mxu1  ;;  %v6923_v6 = vadd.f32 %v6891_v43, %v6758_v24  ;;  %v6563_v50 = vmul.f32 %v13537_v39, %v13627_v20  ;;  %v5903_v63 = vmul.f32 %v13475_v57, %v13548_v30  ;;  %v6068_v18 = vmul.f32 %v13494_v55, %v13591_v22 }
 0xa20   : > { %v13656_v3 = vadd.f32 %v9169_v0, %v13455_v29  ;;  %v5273_v53 = vpop.f32.mrb[61].mxu1  ;;  %v6429_v14 = vadd.f32 %v6397_v31, %v6264_v10  ;;  %v5770_v13 = vadd.f32 %v13517_v49, %v5573_v42  ;;  %v6924_v24 = vadd.f32 %v6892_v16, %v6759_v41  ;;  %v13674_v31 = vld [vmem:[#allocation4 + $0x91] sm:$0xff] }
 0xa21   : > { %v13664_v54 = vadd.f32 %v13455_v29, %v5273_v53  ;;  %v13667_v58 = vadd.f32 %v13599_v46, %v6923_v6  ;;  %v6728_v30 = vmul.f32 %v13488_v51, %v13541_v40  ;;  %v6893_v49 = vmul.f32 %v13546_v38, %v13651_v9 }
 0xa22   : > { %5450 = vst [vmem:[#allocation4 + $0x110] sm:$0xff] %v13656_v3  ;;  %v6595_v43 = vadd.f32 %v6563_v50, %v6429_v14  ;;  %v5935_v10 = vadd.f32 %v5903_v63, %v5770_v13  ;;  %v5574_v42 = vmul.f32 %v13460_v26, %v13584_v2  ;;  %v6398_v0 = vmul.f32 %v13500_v48, %v13625_v59 }
 0xa23   : > { %15477 = vst [vmem:[#allocation38_spill] sm:$0xff] %v13667_v58  ;;  %5449 = vst [vmem:[#allocation4 + $0x108] sm:$0xff] %v13664_v54  ;;  %7956 = vrot.lane.b32.xlu1 %v13667_v58, %s9843_s21  ;;  %v9172_v41 = vpop.f32.mrb[62].mxu1  ;;  %v6564_v6 = vmul.f32 %v13537_v39, %v13661_v37  ;;  %v5904_v16 = vmul.f32 %v13475_v57, %v6855_v8  ;;  %v6069_v50 = vmul.f32 %v13494_v55, %v13627_v20 }
 0xa24   : > { %v13689_v63 = vadd.f32 %v9172_v41, %v13455_v29  ;;  %v5283_v2 = vpop.f32.mrb[63].mxu1  ;;  %v6760_v53 = vadd.f32 %v6728_v30, %v6595_v43  ;;  %v6100_v14 = vadd.f32 %v6068_v18, %v5935_v10  ;;  %v5771_v13 = vadd.f32 %v5739_v44, %v5574_v42 }
 0xa25   : > { %v13694_v27 = vadd.f32 %v13455_v29, %v5283_v2  ;;  %v13697_v28 = vadd.f32 %v13599_v46, %v6924_v24  ;;  %v6729_v8 = vmul.f32 %v13488_v51, %v13532_v47  ;;  %v6894_v35 = vmul.f32 %v13546_v38, %v13674_v31 }
 0xa26   : > { %5452 = vst [vmem:[#allocation4 + $0x130] sm:$0xff] %v13689_v63  ;;  %v6925_v41 = vadd.f32 %v6893_v49, %v6760_v53  ;;  %v6265_v30 = vadd.f32 %v6233_v61, %v6100_v14  ;;  %v5936_v18 = vadd.f32 %v5904_v16, %v5771_v13  ;;  %v5575_v44 = vmul.f32 %v13460_v26, %v13591_v22  ;;  %v13715_v61 = vld [vmem:[#allocation4 + $0xa9] sm:$0xff] }
 0xa27   : > { %15478 = vst [vmem:[#allocation39_spill] sm:$0xff] %v13697_v28  ;;  %5451 = vst [vmem:[#allocation4 + $0x128] sm:$0xff] %v13694_v27  ;;  %7958 = vrot.lane.b32.xlu1 %v13697_v28, %s9843_s21  ;;  %v9175_v24 = vpop.f32.mrb[64].mxu1  ;;  %v6234_v43 = vmul.f32 %v13482_v23, %v13541_v40  ;;  %v6399_v10 = vmul.f32 %v13500_v48, %v13651_v9  ;;  %v6565_v49 = vmul.f32 %v13537_v39, %v13691_v7 }
 0xa28   : > { %v5740_v22 = vmul.f32 %v13466_v36, %v13512_v52  ;;  %v13720_v42 = vadd.f32 %v13599_v46, %v6925_v41  ;;  %v13723_v16 = vadd.f32 %v9175_v24, %v13455_v29  ;;  %v5293_v2 = vpop.f32.mrb[65].mxu1  ;;  %v6430_v53 = vadd.f32 %v6398_v0, %v6265_v30 }
 0xa29   : > { %v6101_v14 = vadd.f32 %v6069_v50, %v5936_v18  ;;  %v13726_v13 = vadd.f32 %v13455_v29, %v5293_v2  ;;  %v5905_v62 = vmul.f32 %v13475_v57, %v13625_v59  ;;  %v6070_v17 = vmul.f32 %v13494_v55, %v13661_v37 }
 0xa2a   : > { %15479 = vst [vmem:[#allocation40_spill] sm:$0xff] %v13720_v42  ;;  %v5772_v21 = vadd.f32 %v5740_v22, %v5575_v44  ;;  %7960 = vrot.lane.b32.xlu0 %v13720_v42, %s9843_s21  ;;  %5454 = vst [vmem:[#allocation4 + $0x150] sm:$0xff] %v13723_v16  ;;  %v6596_v52 = vadd.f32 %v6564_v6, %v6430_v53  ;;  %v6730_v0 = vmul.f32 %v13488_v51, %v13580_v56  ;;  %v13742_v44 = vld [vmem:[#allocation4 + $0xaf] sm:$0xff] }
 0xa2b   : > { %v6266_v41 = vadd.f32 %v6234_v43, %v6101_v14  ;;  %v6895_v50 = vmul.f32 %v13546_v38, %v13715_v61  ;;  %5453 = vst [vmem:[#allocation4 + $0x148] sm:$0xff] %v13726_v13  ;;  %v9178_v30 = vpop.f32.mrb[66].mxu1  ;;  %v6235_v18 = vmul.f32 %v13482_v23, %v13532_v47  ;;  %v5576_v24 = vmul.f32 %v13460_v26, %v13627_v20 }
 0xa2c   : > { %v5937_v59 = vadd.f32 %v5905_v62, %v5772_v21  ;;  %v5741_v6 = vmul.f32 %v13466_v36, %v13541_v40  ;;  %v6761_v43 = vadd.f32 %v6729_v8, %v6596_v52  ;;  %v13749_v2 = vadd.f32 %v9178_v30, %v13455_v29  ;;  %v5303_v53 = vpop.f32.mrb[67].mxu1 }
 0xa2d   : > { %v6431_v22 = vadd.f32 %v6399_v10, %v6266_v41  ;;  %v5906_v62 = vmul.f32 %v13475_v57, %v13651_v9  ;;  %v13754_v21 = vadd.f32 %v13455_v29, %v5303_v53  ;;  %v6071_v20 = vmul.f32 %v13494_v55, %v13691_v7  ;;  %v13766_v10 = vld [vmem:[#allocation4 + $0xb1] sm:$0xff] }
 0xa2e   : > { %v6102_v14 = vadd.f32 %v6070_v17, %v5937_v59  ;;  %v5773_v32 = vadd.f32 %v5741_v6, %v5576_v24  ;;  %v6926_v19 = vadd.f32 %v6894_v35, %v6761_v43  ;;  %5456 = vst [vmem:[#allocation4 + $0x170] sm:$0xff] %v13749_v2  ;;  %v6400_v40 = vmul.f32 %v13500_v48, %v13674_v31 }
 0xa2f   : > { %v6597_v34 = vadd.f32 %v6565_v49, %v6431_v22  ;;  %v6566_v8 = vmul.f32 %v13537_v39, %v13742_v44  ;;  %5455 = vst [vmem:[#allocation4 + $0x168] sm:$0xff] %v13754_v21  ;;  %v6731_v17 = vmul.f32 %v13488_v51, %v13572_v4  ;;  %v6236_v35 = vmul.f32 %v13482_v23, %v13580_v56  ;;  %v9181_v49 = vpop.f32.mrb[68].mxu1  ;;  %v13778_v22 = vld [vmem:[#allocation4 + $0xc7] sm:$0xff] }
 0xa30   : > { %v6267_v9 = vadd.f32 %v6235_v18, %v6102_v14  ;;  %v5938_v52 = vadd.f32 %v5906_v62, %v5773_v32  ;;  %v13771_v41 = vadd.f32 %v13599_v46, %v6926_v19  ;;  %v13774_v59 = vadd.f32 %v9181_v49, %v13455_v29  ;;  %v5313_v24 = vpop.f32.mrb[69].mxu1  ;;  %v13780_v32 = vld [vmem:[#allocation4 + $0xc9] sm:$0xff] }
 0xa31   : > { %v6762_v30 = vadd.f32 %v6730_v0, %v6597_v34  ;;  %v5577_v18 = vmul.f32 %v13460_v26, %v13661_v37  ;;  %v13783_v53 = vadd.f32 %v13455_v29, %v5313_v24  ;;  %v5742_v19 = vmul.f32 %v13466_v36, %v13532_v47 }
 0xa32   : > { %15480 = vst [vmem:[#allocation41_spill] sm:$0xff] %v13771_v41  ;;  %v6432_v6 = vadd.f32 %v6400_v40, %v6267_v9  ;;  %v6103_v43 = vadd.f32 %v6071_v20, %v5938_v52  ;;  %7962 = vrot.lane.b32.xlu1 %v13771_v41, %s9843_s21  ;;  %v6896_v0 = vmul.f32 %v13546_v38, %v13766_v10  ;;  %5458 = vst [vmem:[#allocation4 + $0x190] sm:$0xff] %v13774_v59 }
 0xa33   : > { %v6927_v34 = vadd.f32 %v6895_v50, %v6762_v30  ;;  %v6401_v37 = vmul.f32 %v13500_v48, %v13715_v61  ;;  %v5907_v62 = vmul.f32 %v13475_v57, %v13674_v31  ;;  %5457 = vst [vmem:[#allocation4 + $0x188] sm:$0xff] %v13783_v53  ;;  %v5774_v47 = vadd.f32 %v5742_v19, %v5577_v18  ;;  %v13799_v50 = vld [vmem:[#allocation4 + $0xcf] sm:$0xff]  ;;  %v9184_v9 = vpop.f32.mrb[70].mxu1 }
 0xa34   : > { %v6598_v14 = vadd.f32 %v6566_v8, %v6432_v6  ;;  %v6268_v20 = vadd.f32 %v6236_v35, %v6103_v43  ;;  %v6072_v40 = vmul.f32 %v13494_v55, %v13742_v44  ;;  %v6567_v49 = vmul.f32 %v13537_v39, %v13778_v22  ;;  %v5323_v35 = vpop.f32.mrb[71].mxu1  ;;  %v13810_v6 = vld [vmem:[#allocation4 + $0xd1] sm:$0xff] }
 0xa35   : > { %v13802_v52 = vadd.f32 %v13599_v46, %v6927_v34  ;;  %v6732_v31 = vmul.f32 %v13488_v51, %v13606_v60  ;;  %v6897_v8 = vmul.f32 %v13546_v38, %v13780_v32  ;;  %v5939_v18 = vadd.f32 %v5907_v62, %v5774_v47 }
 0xa36   : > { %v6763_v30 = vadd.f32 %v6731_v17, %v6598_v14  ;;  %v6433_v24 = vadd.f32 %v6401_v37, %v6268_v20  ;;  %v5578_v43 = vmul.f32 %v13460_v26, %v13691_v7  ;;  %v6237_v19 = vmul.f32 %v13482_v23, %v13572_v4 }
 0xa37   : > { %15481 = vst [vmem:[#allocation42_spill] sm:$0xff] %v13802_v52  ;;  %7964 = vrot.lane.b32.xlu0 %v13802_v52, %s9843_s21  ;;  %v6402_v34 = vmul.f32 %v13500_v48, %v13766_v10  ;;  %v6568_v15 = vmul.f32 %v13537_v39, %v13799_v50  ;;  %v5743_v17 = vmul.f32 %v13466_v36, %v13580_v56  ;;  %v9187_v20 = vpop.f32.mrb[72].mxu1 }
 0xa38   : > { %v6928_v37 = vadd.f32 %v6896_v0, %v6763_v30  ;;  %v6599_v62 = vadd.f32 %v6567_v49, %v6433_v24  ;;  %v6104_v14 = vadd.f32 %v6072_v40, %v5939_v18  ;;  %v6733_v7 = vmul.f32 %v13488_v51, %v13594_v12  ;;  %v5333_v52 = vpop.f32.mrb[73].mxu1  ;;  %v13838_v24 = vld [vmem:[#allocation4 + $0xe7] sm:$0xff] }
 0xa39   : > { %v6898_v47 = vmul.f32 %v13546_v38, %v13810_v6  ;;  %v5775_v1 = vadd.f32 %v5743_v17, %v5578_v43  ;;  %v5908_v45 = vmul.f32 %v13475_v57, %v13715_v61  ;;  %v6073_v41 = vmul.f32 %v13494_v55, %v13778_v22 }
 0xa3a   : > { %v13833_v56 = vadd.f32 %v13599_v46, %v6928_v37  ;;  %v6764_v0 = vadd.f32 %v6732_v31, %v6599_v62  ;;  %v6269_v40 = vadd.f32 %v6237_v19, %v6104_v14  ;;  %v13836_v49 = vadd.f32 %v9184_v9, %v13455_v29 }
 0xa3b   : > { %v5940_v30 = vadd.f32 %v5908_v45, %v5775_v1  ;;  %v13841_v18 = vadd.f32 %v13455_v29, %v5323_v35  ;;  %v5579_v61 = vmul.f32 %v13460_v26, %v13742_v44  ;;  %v5744_v43 = vmul.f32 %v13466_v36, %v13572_v4  ;;  %v13853_v1 = vld [vmem:[#allocation4 + $0xe9] sm:$0xff]  ;;  %v13856_v35 = vpop.f32.mrb[74].mxu1 }
 0xa3c   : > { %15482 = vst [vmem:[#allocation43_spill] sm:$0xff] %v13833_v56  ;;  %7966 = vrot.lane.b32.xlu1 %v13833_v56, %s9843_s21  ;;  %v6929_v31 = vadd.f32 %v6897_v8, %v6764_v0  ;;  %v6434_v19 = vadd.f32 %v6402_v34, %v6269_v40  ;;  %v6238_v9 = vmul.f32 %v13482_v23, %v13606_v60  ;;  %5460 = vst [vmem:[#allocation4 + $0x1b0] sm:$0xff] %v13836_v49  ;;  %v13863_v17 = vpop.f32.mrb[75].mxu1  ;;  %v13872_v0 = vld [vmem:[#allocation4 + $0xef] sm:$0xff] }
 0xa3d   : > { %v6403_v45 = vmul.f32 %v13500_v48, %v13780_v32  ;;  %v6105_v44 = vadd.f32 %v6073_v41, %v5940_v30  ;;  %5459 = vst [vmem:[#allocation4 + $0x1a8] sm:$0xff] %v13841_v18  ;;  %v5776_v4 = vadd.f32 %v5744_v43, %v5579_v61  ;;  %v5909_v8 = vmul.f32 %v13475_v57, %v13766_v10 }
 0xa3e   : > { %v6074_v34 = vmul.f32 %v13494_v55, %v13799_v50  ;;  %v13866_v37 = vadd.f32 %v13599_v46, %v6929_v31  ;;  %v6600_v62 = vadd.f32 %v6568_v15, %v6434_v19  ;;  %v6569_v14 = vmul.f32 %v13537_v39, %v13838_v24  ;;  %v13884_v19 = vld [vmem:[#allocation4 + $0xf1] sm:$0xff] }
 0xa3f   : > { %v6734_v41 = vmul.f32 %v13488_v51, %v13632_v5  ;;  %v6270_v40 = vadd.f32 %v6238_v9, %v6105_v44  ;;  %v6899_v10 = vmul.f32 %v13546_v38, %v13853_v1  ;;  %v5941_v30 = vadd.f32 %v5909_v8, %v5776_v4  ;;  %v13888_v44 = vpop.f32.mrb[76].mxu1 }
 0xa40   : > { %15483 = vst [vmem:[#allocation44_spill] sm:$0xff] %v13866_v37  ;;  %v5580_v61 = vmul.f32 %v13460_v26, %v13778_v22  ;;  %7968 = vrot.lane.b32.xlu0 %v13866_v37, %s9843_s21  ;;  %v6765_v15 = vadd.f32 %v6733_v7, %v6600_v62  ;;  %v6239_v43 = vmul.f32 %v13482_v23, %v13594_v12  ;;  %v13894_v62 = vpop.f32.mrb[77].mxu1 }
 0xa41   : > { %v6404_v31 = vmul.f32 %v13500_v48, %v13810_v6  ;;  %v5745_v9 = vmul.f32 %v13466_v36, %v13606_v60  ;;  %v6435_v4 = vadd.f32 %v6403_v45, %v6270_v40  ;;  %v6106_v8 = vadd.f32 %v6074_v34, %v5941_v30  ;;  %v13902_v34 = vld [vmem:[#allocation4 + $0x107] sm:$0xff] }
 0xa42   : > { %v6570_v22 = vmul.f32 %v13537_v39, %v13872_v0  ;;  %v6735_v7 = vmul.f32 %v13488_v51, %v13623_v11  ;;  %v6930_v56 = vadd.f32 %v6898_v47, %v6765_v15  ;;  %v5910_v28 = vmul.f32 %v13475_v57, %v13780_v32 }
 0xa43   : > { %v5777_v37 = vadd.f32 %v5745_v9, %v5580_v61  ;;  %v6075_v60 = vmul.f32 %v13494_v55, %v13838_v24  ;;  %v6601_v42 = vadd.f32 %v6569_v14, %v6435_v4  ;;  %v6271_v58 = vadd.f32 %v6239_v43, %v6106_v8  ;;  %v13917_v9 = vld [vmem:[#allocation4 + $0x109] sm:$0xff] }
 0xa44   : > { %v6900_v45 = vmul.f32 %v13546_v38, %v13884_v19  ;;  %v13905_v40 = vadd.f32 %v9187_v20, %v13455_v29  ;;  %v13908_v30 = vadd.f32 %v13599_v46, %v6930_v56  ;;  %v13911_v61 = vadd.f32 %v13455_v29, %v5333_v52 }
 0xa45   : > { %v5942_v47 = vadd.f32 %v5910_v28, %v5777_v37  ;;  %v5581_v32 = vmul.f32 %v13460_v26, %v13799_v50  ;;  %v6766_v14 = vadd.f32 %v6734_v41, %v6601_v42  ;;  %v6436_v15 = vadd.f32 %v6404_v31, %v6271_v58 }
 0xa46   : > { %v6240_v43 = vmul.f32 %v13482_v23, %v13632_v5  ;;  %5462 = vst [vmem:[#allocation4 + $0x1d0] sm:$0xff] %v13905_v40  ;;  %v5746_v20 = vmul.f32 %v13466_v36, %v13594_v12  ;;  %7970 = vrot.lane.b32.xlu1 %v13908_v30, %s9843_s21  ;;  %v6405_v52 = vmul.f32 %v13500_v48, %v13853_v1  ;;  %5461 = vst [vmem:[#allocation4 + $0x1c8] sm:$0xff] %v13911_v61 }
 0xa47   : > { %v6107_v28 = vadd.f32 %v6075_v60, %v5942_v47  ;;  %v6571_v58 = vmul.f32 %v13537_v39, %v13902_v34  ;;  %v5911_v42 = vmul.f32 %v13475_v57, %v13810_v6  ;;  %v6931_v50 = vadd.f32 %v6899_v10, %v6766_v14  ;;  %v13944_v47 = vld [vmem:[#allocation4 + $0x111] sm:$0xff] }
 0xa48   : > { %v6602_v56 = vadd.f32 %v6570_v22, %v6436_v15  ;;  %v5778_v37 = vadd.f32 %v5746_v20, %v5581_v32  ;;  %v6076_v12 = vmul.f32 %v13494_v55, %v13872_v0  ;;  %v6736_v31 = vmul.f32 %v13488_v51, %v13664_v54  ;;  %v13942_v22 = vld [vmem:[#allocation4 + $0x10f] sm:$0xff] }
 0xa49   : > { %v6272_v41 = vadd.f32 %v6240_v43, %v6107_v28  ;;  %v6901_v4 = vmul.f32 %v13546_v38, %v13917_v9  ;;  %v5582_v8 = vmul.f32 %v13460_v26, %v13838_v24  ;;  %v13940_v60 = vadd.f32 %v13599_v46, %v6931_v50 }
 0xa4a   : > { %v6767_v6 = vadd.f32 %v6735_v7, %v6602_v56  ;;  %v5943_v10 = vadd.f32 %v5911_v42, %v5778_v37  ;;  %v5747_v32 = vmul.f32 %v13466_v36, %v13632_v5  ;;  %v6241_v15 = vmul.f32 %v13482_v23, %v13623_v11 }
 0xa4b   : > { %v6437_v14 = vadd.f32 %v6405_v52, %v6272_v41  ;;  %v6406_v43 = vmul.f32 %v13500_v48, %v13884_v19  ;;  %v5912_v24 = vmul.f32 %v13475_v57, %v13853_v1  ;;  %7972 = vrot.lane.b32.xlu0 %v13940_v60, %s9843_s21  ;;  %v6077_v42 = vmul.f32 %v13494_v55, %v13902_v34 }
 0xa4c   : > { %v6932_v7 = vadd.f32 %v6900_v45, %v6767_v6  ;;  %v6108_v20 = vadd.f32 %v6076_v12, %v5943_v10  ;;  %v5779_v28 = vadd.f32 %v5747_v32, %v5582_v8  ;;  %v6572_v52 = vmul.f32 %v13537_v39, %v13942_v22 }
 0xa4d   : > { %v6603_v5 = vadd.f32 %v6571_v58, %v6437_v14  ;;  %v6737_v50 = vmul.f32 %v13488_v51, %v13656_v3  ;;  %v6902_v56 = vmul.f32 %v13546_v38, %v13944_v47  ;;  %v13969_v12 = vadd.f32 %v13856_v35, %v13455_v29  ;;  %v13971_v58 = vld [vmem:[#allocation4 + $0x127] sm:$0xff] }
 0xa4e   : > { %v13965_v1 = vadd.f32 %v13599_v46, %v6932_v7  ;;  %v6273_v37 = vadd.f32 %v6241_v15, %v6108_v20  ;;  %v5944_v45 = vadd.f32 %v5912_v24, %v5779_v28  ;;  %v13975_v8 = vadd.f32 %v13455_v29, %v13863_v17  ;;  %v13987_v15 = vld [vmem:[#allocation4 + $0x129] sm:$0xff] }
 0xa4f   : > { %v6768_v41 = vadd.f32 %v6736_v31, %v6603_v5  ;;  %v5583_v6 = vmul.f32 %v13460_v26, %v13872_v0  ;;  %v5748_v10 = vmul.f32 %v13466_v36, %v13623_v11  ;;  %v6242_v35 = vmul.f32 %v13482_v23, %v13664_v54  ;;  %5464 = vst [vmem:[#allocation4 + $0x1f0] sm:$0xff] %v13969_v12 }
 0xa50   : > { %7974 = vrot.lane.b32.xlu1 %v13965_v1, %s9843_s21  ;;  %v6438_v32 = vadd.f32 %v6406_v43, %v6273_v37  ;;  %v6109_v14 = vadd.f32 %v6077_v42, %v5944_v45  ;;  %v6407_v31 = vmul.f32 %v13500_v48, %v13917_v9  ;;  %5463 = vst [vmem:[#allocation4 + $0x1e8] sm:$0xff] %v13975_v8  ;;  %v13999_v42 = vld [vmem:[#allocation4 + $0x12f] sm:$0xff] }
 0xa51   : > { %v6933_v17 = vadd.f32 %v6901_v4, %v6768_v41  ;;  %v5780_v0 = vadd.f32 %v5748_v10, %v5583_v6  ;;  %v5913_v11 = vmul.f32 %v13475_v57, %v13884_v19  ;;  %v6078_v43 = vmul.f32 %v13494_v55, %v13942_v22  ;;  %v14010_v6 = vld [vmem:[#allocation4 + $0x131] sm:$0xff] }
 0xa52   : > { %v6604_v24 = vadd.f32 %v6572_v52, %v6438_v32  ;;  %v6274_v7 = vadd.f32 %v6242_v35, %v6109_v14  ;;  %v6573_v20 = vmul.f32 %v13537_v39, %v13971_v58  ;;  %v6738_v28 = vmul.f32 %v13488_v51, %v13694_v27 }
 0xa53   : > { %v14002_v4 = vadd.f32 %v13599_v46, %v6933_v17  ;;  %v6903_v5 = vmul.f32 %v13546_v38, %v13987_v15  ;;  %v5945_v19 = vadd.f32 %v5913_v11, %v5780_v0  ;;  %v5584_v37 = vmul.f32 %v13460_v26, %v13902_v34 }
 0xa54   : > { %v6769_v52 = vadd.f32 %v6737_v50, %v6604_v24  ;;  %v6439_v45 = vadd.f32 %v6407_v31, %v6274_v7  ;;  %v6243_v41 = vmul.f32 %v13482_v23, %v13656_v3  ;;  %v5749_v10 = vmul.f32 %v13466_v36, %v13664_v54  ;;  %v14028_v24 = vld [vmem:[#allocation4 + $0x147] sm:$0xff] }
 0xa55   : > { %7976 = vrot.lane.b32.xlu0 %v14002_v4, %s9843_s21  ;;  %v6110_v32 = vadd.f32 %v6078_v43, %v5945_v19  ;;  %v6408_v14 = vmul.f32 %v13500_v48, %v13944_v47  ;;  %v6574_v34 = vmul.f32 %v13537_v39, %v13999_v42  ;;  %v5914_v50 = vmul.f32 %v13475_v57, %v13917_v9 }
 0xa56   : > { %v6934_v35 = vadd.f32 %v6902_v56, %v6769_v52  ;;  %v6605_v31 = vadd.f32 %v6573_v20, %v6439_v45  ;;  %v5781_v17 = vadd.f32 %v5749_v10, %v5584_v37  ;;  %v6079_v0 = vmul.f32 %v13494_v55, %v13971_v58  ;;  %v14043_v45 = vld [vmem:[#allocation4 + $0x149] sm:$0xff] }
 0xa57   : > { %v6275_v54 = vadd.f32 %v6243_v41, %v6110_v32  ;;  %v6739_v11 = vmul.f32 %v13488_v51, %v13689_v63  ;;  %v6904_v43 = vmul.f32 %v13546_v38, %v14010_v6  ;;  %v14032_v7 = vadd.f32 %v13888_v44, %v13455_v29 }
 0xa58   : > { %v14035_v9 = vadd.f32 %v13599_v46, %v6934_v35  ;;  %v6770_v56 = vadd.f32 %v6738_v28, %v6605_v31  ;;  %v5946_v20 = vadd.f32 %v5914_v50, %v5781_v17  ;;  %v14039_v19 = vadd.f32 %v13455_v29, %v13894_v62 }
 0xa59   : > { %v6440_v37 = vadd.f32 %v6408_v14, %v6275_v54  ;;  %v6244_v52 = vmul.f32 %v13482_v23, %v13694_v27  ;;  %5466 = vst [vmem:[#allocation4 + $0x210] sm:$0xff] %v14032_v7  ;;  %v5585_v44 = vmul.f32 %v13460_v26, %v13942_v22  ;;  %v5750_v41 = vmul.f32 %v13466_v36, %v13656_v3  ;;  %v14070_v54 = vld [vmem:[#allocation4 + $0x151] sm:$0xff] }
 0xa5a   : > { %7978 = vrot.lane.b32.xlu1 %v14035_v9, %s9843_s21  ;;  %v6935_v28 = vadd.f32 %v6903_v5, %v6770_v56  ;;  %v6111_v29 = vadd.f32 %v6079_v0, %v5946_v20  ;;  %v6409_v62 = vmul.f32 %v13500_v48, %v13987_v15  ;;  %v6575_v10 = vmul.f32 %v13537_v39, %v14028_v24 }
 0xa5b   : > { %5465 = vst [vmem:[#allocation4 + $0x208] sm:$0xff] %v14039_v19  ;;  %v6606_v32 = vadd.f32 %v6574_v34, %v6440_v37  ;;  %v5782_v14 = vadd.f32 %v5750_v41, %v5585_v44  ;;  %v5915_v22 = vmul.f32 %v13475_v57, %v13944_v47  ;;  %v6080_v3 = vmul.f32 %v13494_v55, %v13999_v42  ;;  %v14068_v34 = vld [vmem:[#allocation4 + $0x14f] sm:$0xff] }
 0xa5c   : > { %v14062_v50 = vadd.f32 %v13599_v46, %v6935_v28  ;;  %v6276_v5 = vadd.f32 %v6244_v52, %v6111_v29  ;;  %v6740_v35 = vmul.f32 %v13488_v51, %v13726_v13  ;;  %v6905_v31 = vmul.f32 %v13546_v38, %v14043_v45 }
 0xa5d   : > { %v6771_v17 = vadd.f32 %v6739_v11, %v6606_v32  ;;  %v5947_v0 = vadd.f32 %v5915_v22, %v5782_v14  ;;  %v5586_v47 = vmul.f32 %v13460_v26, %v13971_v58  ;;  %v5751_v56 = vmul.f32 %v13466_v36, %v13694_v27  ;;  %v14092_v14 = vld [vmem:[#allocation4 + $0x167] sm:$0xff] }
 0xa5e   : > { %7980 = vrot.lane.b32.xlu0 %v14062_v50, %s9843_s21  ;;  %v6441_v20 = vadd.f32 %v6409_v62, %v6276_v5  ;;  %v6245_v37 = vmul.f32 %v13482_v23, %v13689_v63  ;;  %v6410_v11 = vmul.f32 %v13500_v48, %v14010_v6  ;;  %v5916_v52 = vmul.f32 %v13475_v57, %v13987_v15 }
 0xa5f   : > { %v6936_v44 = vadd.f32 %v6904_v43, %v6771_v17  ;;  %v6112_v41 = vadd.f32 %v6080_v3, %v5947_v0  ;;  %v5783_v28 = vadd.f32 %v5751_v56, %v5586_v47  ;;  %v6081_v58 = vmul.f32 %v13494_v55, %v14028_v24  ;;  %v14103_v0 = vld [vmem:[#allocation4 + $0x169] sm:$0xff] }
 0xa60   : > { %v6607_v27 = vadd.f32 %v6575_v10, %v6441_v20  ;;  %v6576_v29 = vmul.f32 %v13537_v39, %v14068_v34  ;;  %v6741_v62 = vmul.f32 %v13488_v51, %v13723_v16  ;;  %v6906_v32 = vmul.f32 %v13546_v38, %v14070_v54 }
 0xa61   : > { %v14095_v15 = vadd.f32 %v13599_v46, %v6936_v44  ;;  %v6277_v43 = vadd.f32 %v6245_v37, %v6112_v41  ;;  %v5948_v22 = vadd.f32 %v5916_v52, %v5783_v28  ;;  %v5587_v3 = vmul.f32 %v13460_v26, %v13999_v42 }
 0xa62   : > { %v6772_v10 = vadd.f32 %v6740_v35, %v6607_v27  ;;  %v6246_v5 = vmul.f32 %v13482_v23, %v13726_v13  ;;  %v6411_v17 = vmul.f32 %v13500_v48, %v14043_v45  ;;  %v5752_v47 = vmul.f32 %v13466_v36, %v13689_v63  ;;  %v14117_v63 = vld [vmem:[#allocation4 + $0x16f] sm:$0xff] }
 0xa63   : > { %7982 = vrot.lane.b32.xlu1 %v14095_v15, %s9843_s21  ;;  %v6442_v56 = vadd.f32 %v6410_v11, %v6277_v43  ;;  %v6113_v20 = vadd.f32 %v6081_v58, %v5948_v22  ;;  %v6577_v42 = vmul.f32 %v13537_v39, %v14092_v14  ;;  %v6742_v35 = vmul.f32 %v13488_v51, %v13754_v21  ;;  %v14128_v22 = vld [vmem:[#allocation4 + $0x171] sm:$0xff] }
 0xa64   : > { %v6937_v37 = vadd.f32 %v6905_v31, %v6772_v10  ;;  %v5784_v52 = vadd.f32 %v5752_v47, %v5587_v3  ;;  %v5917_v44 = vmul.f32 %v13475_v57, %v14010_v6  ;;  %v6082_v41 = vmul.f32 %v13494_v55, %v14068_v34 }
 0xa65   : > { %v6608_v28 = vadd.f32 %v6576_v29, %v6442_v56  ;;  %v6278_v27 = vadd.f32 %v6246_v5, %v6113_v20  ;;  %v6907_v11 = vmul.f32 %v13546_v38, %v14103_v0  ;;  %v5588_v58 = vmul.f32 %v13460_v26, %v14028_v24 }
 0xa66   : > { %v14124_v43 = vadd.f32 %v13599_v46, %v6937_v37  ;;  %v5949_v31 = vadd.f32 %v5917_v44, %v5784_v52  ;;  %v6247_v6 = vmul.f32 %v13482_v23, %v13723_v16  ;;  %v5753_v3 = vmul.f32 %v13466_v36, %v13726_v13  ;;  %v14146_v44 = vld [vmem:[#allocation4 + $0x187] sm:$0xff] }
 0xa67   : > { %v6773_v29 = vadd.f32 %v6741_v62, %v6608_v28  ;;  %v6443_v10 = vadd.f32 %v6411_v17, %v6278_v27  ;;  %v6412_v5 = vmul.f32 %v13500_v48, %v14070_v54  ;;  %v6578_v26 = vmul.f32 %v13537_v39, %v14117_v63  ;;  %v14167_v28 = vld [vmem:[#allocation4 + $0x189] sm:$0xff] }
 0xa68   : > { %7984 = vrot.lane.b32.xlu0 %v14124_v43, %s9843_s21  ;;  %v6114_v24 = vadd.f32 %v6082_v41, %v5949_v31  ;;  %v5785_v47 = vadd.f32 %v5753_v3, %v5588_v58  ;;  %v5918_v56 = vmul.f32 %v13475_v57, %v14043_v45  ;;  %v6083_v20 = vmul.f32 %v13494_v55, %v14092_v14  ;;  %v14151_v41 = vld [vmem:[%s15256_s15] ss:$0 sm:$0xff]  ;;  %v14158_v55 = vld [vmem:[%s15256_s15 + $0x1] ss:$0 sm:$0xff] }
 0xa69   : > { %v6938_v36 = vadd.f32 %v6906_v32, %v6773_v29  ;;  %v6609_v13 = vadd.f32 %v6577_v42, %v6443_v10  ;;  %v6743_v62 = vmul.f32 %v13488_v51, %v13749_v2  ;;  %v6908_v17 = vmul.f32 %v13546_v38, %v14128_v22  ;;  %v14192_v29 = vld [vmem:[%s15256_s15 + $0x7] ss:$0 sm:$0xff] }
 0xa6a   : > { %v6279_v37 = vadd.f32 %v6247_v6, %v6114_v24  ;;  %v5950_v52 = vadd.f32 %v5918_v56, %v5785_v47  ;;  %v5589_v57 = vmul.f32 %v14151_v41, %v14068_v34  ;;  %v5754_v51 = vmul.f32 %v14158_v55, %v13723_v16  ;;  %v14172_v34 = vld [vmem:[%s15256_s15 + $0x2] ss:$0 sm:$0xff]  ;;  %v14198_v56 = vld [vmem:[#allocation4 + $0x18f] sm:$0xff] }
 0xa6b   : > { %v14163_v45 = vadd.f32 %v13599_v46, %v6938_v36  ;;  %v6774_v32 = vadd.f32 %v6742_v35, %v6609_v13  ;;  %v6248_v42 = vmul.f32 %v13482_v23, %v13754_v21  ;;  %v5919_v27 = vmul.f32 %v14172_v34, %v14070_v54  ;;  %v14179_v35 = vld [vmem:[%s15256_s15 + $0x3] ss:$0 sm:$0xff] }
 0xa6c   : > { %v6444_v58 = vadd.f32 %v6412_v5, %v6279_v37  ;;  %v6115_v31 = vadd.f32 %v6083_v20, %v5950_v52  ;;  %v5786_v16 = vadd.f32 %v5754_v51, %v5589_v57  ;;  %v6084_v23 = vmul.f32 %v14179_v35, %v14117_v63  ;;  %v14206_v20 = vld [vmem:[%s15256_s15 + $0x4] ss:$0 sm:$0xff]  ;;  %v14217_v51 = vld [vmem:[%s15256_s15 + $0x5] ss:$0 sm:$0xff] }
 0xa6d   : > { %7986 = vrot.lane.b32.xlu1 %v14163_v45, %s9843_s21  ;;  %v6939_v6 = vadd.f32 %v6907_v11, %v6774_v32  ;;  %v6413_v3 = vmul.f32 %v13500_v48, %v14103_v0  ;;  %v6579_v54 = vmul.f32 %v13537_v39, %v14146_v44  ;;  %v6744_v10 = vmul.f32 %v14192_v29, %v13783_v53 }
 0xa6e   : > { %v6610_v5 = vadd.f32 %v6578_v26, %v6444_v58  ;;  %v6280_v24 = vadd.f32 %v6248_v42, %v6115_v31  ;;  %v6909_v47 = vmul.f32 %v13546_v38, %v14167_v28  ;;  %v5951_v11 = vadd.f32 %v5919_v27, %v5786_v16  ;;  %v14221_v42 = vld [vmem:[#allocation4 + $0x191] sm:$0xff] }
 0xa6f   : > { %v14201_v48 = vadd.f32 %v13599_v46, %v6939_v6  ;;  %v6249_v36 = vmul.f32 %v14206_v20, %v13749_v2  ;;  %v5590_v26 = vmul.f32 %v14151_v41, %v14092_v14  ;;  %v5755_v13 = vmul.f32 %v14158_v55, %v13754_v21 }
 0xa70   : > { %v6775_v37 = vadd.f32 %v6743_v62, %v6610_v5  ;;  %v6445_v52 = vadd.f32 %v6413_v3, %v6280_v24  ;;  %v6116_v57 = vadd.f32 %v6084_v23, %v5951_v11  ;;  %v6414_v32 = vmul.f32 %v14217_v51, %v14128_v22  ;;  %v14235_v5 = vld [vmem:[#allocation4 + $0x1a7] sm:$0xff] }
 0xa71   : > { %7988 = vrot.lane.b32.xlu0 %v14201_v48, %s9843_s21  ;;  %v6580_v14 = vmul.f32 %v13537_v39, %v14198_v56  ;;  %v5787_v21 = vadd.f32 %v5755_v13, %v5590_v26  ;;  %v5920_v62 = vmul.f32 %v14172_v34, %v14103_v0  ;;  %v6085_v27 = vmul.f32 %v14179_v35, %v14146_v44 }
 0xa72   : > { %v6940_v58 = vadd.f32 %v6908_v17, %v6775_v37  ;;  %v6611_v31 = vadd.f32 %v6579_v54, %v6445_v52  ;;  %v6281_v16 = vadd.f32 %v6249_v36, %v6116_v57  ;;  %v6745_v23 = vmul.f32 %v14192_v29, %v13774_v59  ;;  %v14246_v36 = vld [vmem:[#allocation4 + $0x1a9] sm:$0xff]  ;;  %v14259_v52 = vld [vmem:[%s15256_s15 + $0x6] ss:$0 sm:$0xff] }
 0xa73   : > { %v6910_v6 = vmul.f32 %v13546_v38, %v14221_v42  ;;  %v5952_v3 = vadd.f32 %v5920_v62, %v5787_v21  ;;  %v5591_v39 = vmul.f32 %v14151_v41, %v14117_v63  ;;  %v5756_v0 = vmul.f32 %v14158_v55, %v13749_v2 }
 0xa74   : > { %v14242_v24 = vadd.f32 %v13599_v46, %v6940_v58  ;;  %v6776_v17 = vadd.f32 %v6744_v10, %v6611_v31  ;;  %v6446_v54 = vadd.f32 %v6414_v32, %v6281_v16  ;;  %v6250_v11 = vmul.f32 %v14206_v20, %v13783_v53  ;;  %v14275_v58 = vld [vmem:[#allocation4 + $0x1af] sm:$0xff] }
 0xa75   : > { %v6117_v38 = vadd.f32 %v6085_v27, %v5952_v3  ;;  %v5788_v26 = vadd.f32 %v5756_v0, %v5591_v39  ;;  %v5921_v13 = vmul.f32 %v14172_v34, %v14128_v22  ;;  %v6086_v63 = vmul.f32 %v14179_v35, %v14198_v56 }
 0xa76   : > { %7990 = vrot.lane.b32.xlu1 %v14242_v24, %s9843_s21  ;;  %v6941_v2 = vadd.f32 %v6909_v47, %v6776_v17  ;;  %v6612_v37 = vadd.f32 %v6580_v14, %v6446_v54  ;;  %v6415_v10 = vmul.f32 %v14217_v51, %v14167_v28  ;;  %v6581_v57 = vmul.f32 %v14259_v52, %v14235_v5  ;;  %v14268_v47 = vld [vmem:[%s15256_s15 + $0x8] ss:$0 sm:$0xff]  ;;  %v14285_v54 = vld [vmem:[#allocation4 + $0x1b1] sm:$0xff] }
 0xa77   : > { %v6282_v22 = vadd.f32 %v6250_v11, %v6117_v38  ;;  %v6746_v32 = vmul.f32 %v14192_v29, %v13841_v18  ;;  %v6911_v14 = vmul.f32 %v14268_v47, %v14246_v36  ;;  %v5953_v21 = vadd.f32 %v5921_v13, %v5788_v26 }
 0xa78   : > { %v14273_v62 = vadd.f32 %v13599_v46, %v6941_v2  ;;  %v6777_v27 = vadd.f32 %v6745_v23, %v6612_v37  ;;  %v5592_v31 = vmul.f32 %v14151_v41, %v14146_v44  ;;  %v5757_v16 = vmul.f32 %v14158_v55, %v13783_v53  ;;  %v14297_v2 = vld [vmem:[#allocation4 + $0x1c7] sm:$0xff] }
 0xa79   : > { %v6447_v3 = vadd.f32 %v6415_v10, %v6282_v22  ;;  %v6118_v39 = vadd.f32 %v6086_v63, %v5953_v21  ;;  %v6251_v0 = vmul.f32 %v14206_v20, %v13774_v59  ;;  %v6416_v17 = vmul.f32 %v14217_v51, %v14221_v42 }
 0xa7a   : > { %7992 = vrot.lane.b32.xlu0 %v14273_v62, %s9843_s21  ;;  %v6942_v23 = vadd.f32 %v6910_v6, %v6777_v27  ;;  %v5789_v11 = vadd.f32 %v5757_v16, %v5592_v31  ;;  %v5922_v44 = vmul.f32 %v14172_v34, %v14167_v28  ;;  %v6087_v53 = vmul.f32 %v14179_v35, %v14235_v5  ;;  %v14308_v27 = vld [vmem:[#allocation4 + $0x1c9] sm:$0xff] }
 0xa7b   : > { %v6613_v38 = vadd.f32 %v6581_v57, %v6447_v3  ;;  %v6283_v26 = vadd.f32 %v6251_v0, %v6118_v39  ;;  %v6582_v13 = vmul.f32 %v14259_v52, %v14275_v58  ;;  %v6747_v63 = vmul.f32 %v14192_v29, %v13836_v49 }
 0xa7c   : > { %v14300_v37 = vadd.f32 %v13599_v46, %v6942_v23  ;;  %v6912_v6 = vmul.f32 %v14268_v47, %v14285_v54  ;;  %v5954_v28 = vadd.f32 %v5922_v44, %v5789_v11  ;;  %v5593_v10 = vmul.f32 %v14151_v41, %v14198_v56 }
 0xa7d   : > { %v6778_v57 = vadd.f32 %v6746_v32, %v6613_v38  ;;  %v6448_v22 = vadd.f32 %v6416_v17, %v6283_v26  ;;  %v6252_v21 = vmul.f32 %v14206_v20, %v13841_v18  ;;  %v5758_v31 = vmul.f32 %v14158_v55, %v13774_v59  ;;  %v6548_v26 = vld [vmem:[#allocation4 + $0x1cf] sm:$0xff] }
 0xa7e   : > { %7994 = vrot.lane.b32.xlu1 %v14300_v37, %s9843_s21  ;;  %v6119_v46 = vadd.f32 %v6087_v53, %v5954_v28  ;;  %v6417_v16 = vmul.f32 %v14217_v51, %v14246_v36  ;;  %v6583_v56 = vmul.f32 %v14259_v52, %v14297_v2  ;;  %v5923_v32 = vmul.f32 %v14172_v34, %v14221_v42  ;;  %v14331_v42 = vld [vmem:[%s15257_s16] ss:$0 sm:$0xff] }
 0xa7f   : > { %v6943_v3 = vadd.f32 %v6911_v14, %v6778_v57  ;;  %v6614_v39 = vadd.f32 %v6582_v13, %v6448_v22  ;;  %v5790_v0 = vadd.f32 %v5758_v31, %v5593_v10  ;;  %v6088_v17 = vmul.f32 %v14179_v35, %v14275_v58  ;;  %v14336_v13 = vld [vmem:[#allocation4 + $0x1d1] sm:$0xff] }
 0xa80   : > { %v6284_v59 = vadd.f32 %v6252_v21, %v6119_v46  ;;  %v6748_v23 = vmul.f32 %v14192_v29, %v13911_v61  ;;  %v6913_v11 = vmul.f32 %v14268_v47, %v14308_v27  ;;  %v5594_v44 = vmul.f32 %v14151_v41, %v14235_v5 }
 0xa81   : > { %v14334_v14 = vadd.f32 %v14331_v42, %v6943_v3  ;;  %v6779_v53 = vadd.f32 %v6747_v63, %v6614_v39  ;;  %v5955_v38 = vadd.f32 %v5923_v32, %v5790_v0  ;;  %v5759_v28 = vmul.f32 %v14158_v55, %v13841_v18  ;;  %v14355_v39 = vld [vmem:[#allocation4 + $0x1e7] sm:$0xff] }
 0xa82   : > { %v6449_v10 = vadd.f32 %v6417_v16, %v6284_v59  ;;  %v6253_v5 = vmul.f32 %v14206_v20, %v13836_v49  ;;  %v6418_v57 = vmul.f32 %v14217_v51, %v14285_v54  ;;  %v5924_v22 = vmul.f32 %v14172_v34, %v14246_v36 }
 0xa83   : > { %7996 = vrot.lane.b32.xlu0 %v14334_v14, %s9843_s21  ;;  %v6944_v63 = vadd.f32 %v6912_v6, %v6779_v53  ;;  %v6120_v21 = vadd.f32 %v6088_v17, %v5955_v38  ;;  %v5791_v31 = vadd.f32 %v5759_v28, %v5594_v44  ;;  %v6089_v46 = vmul.f32 %v14179_v35, %v14297_v2  ;;  %v14366_v53 = vld [vmem:[#allocation4 + $0x1e9] sm:$0xff] }
 0xa84   : > { %v6615_v18 = vadd.f32 %v6583_v56, %v6449_v10  ;;  %v6584_v16 = vmul.f32 %v14259_v52, %v6548_v26  ;;  %v6749_v32 = vmul.f32 %v14192_v29, %v13905_v40  ;;  %v6914_v3 = vmul.f32 %v14268_v47, %v14336_v13 }
 0xa85   : > { %v14358_v36 = vadd.f32 %v14331_v42, %v6944_v63  ;;  %v6285_v6 = vadd.f32 %v6253_v5, %v6120_v21  ;;  %v5956_v0 = vadd.f32 %v5924_v22, %v5791_v31  ;;  %v5595_v17 = vmul.f32 %v14151_v41, %v14275_v58  ;;  %v14379_v31 = vld [vmem:[#allocation4 + $0x1ef] sm:$0xff] }
 0xa86   : > { %v6780_v59 = vadd.f32 %v6748_v23, %v6615_v18  ;;  %v6254_v56 = vmul.f32 %v14206_v20, %v13911_v61  ;;  %v6419_v44 = vmul.f32 %v14217_v51, %v14308_v27  ;;  %v5760_v38 = vmul.f32 %v14158_v55, %v13836_v49 }
 0xa87   : > { %15484 = vst [vmem:[#allocation45_spill] sm:$0xff] %v14358_v36  ;;  %7998 = vrot.lane.b32.xlu1 %v14358_v36, %s9843_s21  ;;  %v6450_v28 = vadd.f32 %v6418_v57, %v6285_v6  ;;  %v6121_v10 = vadd.f32 %v6089_v46, %v5956_v0  ;;  %v6585_v58 = vmul.f32 %v14259_v52, %v14355_v39 }
 0xa88   : > { %v6750_v23 = vmul.f32 %v14192_v29, %v13975_v8  ;;  %v6945_v5 = vadd.f32 %v6913_v11, %v6780_v59  ;;  %v5792_v22 = vadd.f32 %v5760_v38, %v5595_v17  ;;  %v5925_v63 = vmul.f32 %v14172_v34, %v14285_v54  ;;  %v14390_v54 = vld [vmem:[#allocation4 + $0x1f1] sm:$0xff] }
 0xa89   : > { %v6090_v21 = vmul.f32 %v14179_v35, %v6548_v26  ;;  %v6616_v49 = vadd.f32 %v6584_v16, %v6450_v28  ;;  %v6286_v18 = vadd.f32 %v6254_v56, %v6121_v10  ;;  %v6915_v57 = vmul.f32 %v14268_v47, %v14366_v53 }
 0xa8a   : > { %v5596_v46 = vmul.f32 %v14151_v41, %v14297_v2  ;;  %v14386_v6 = vadd.f32 %v14331_v42, %v6945_v5  ;;  %v5957_v11 = vadd.f32 %v5925_v63, %v5792_v22  ;;  %v6255_v0 = vmul.f32 %v14206_v20, %v13905_v40 }
 0xa8b   : > { %v5761_v17 = vmul.f32 %v14158_v55, %v13911_v61  ;;  %v6781_v16 = vadd.f32 %v6749_v32, %v6616_v49  ;;  %v6451_v59 = vadd.f32 %v6419_v44, %v6286_v18  ;;  %v6420_v56 = vmul.f32 %v14217_v51, %v14336_v13  ;;  %v6551_v18 = vld [vmem:[#allocation4 + $0x207] sm:$0xff] }
 0xa8c   : > { %15485 = vst [vmem:[#allocation46_spill] sm:$0xff] %v14386_v6  ;;  %v6586_v2 = vmul.f32 %v14259_v52, %v14379_v31  ;;  %8000 = vrot.lane.b32.xlu0 %v14386_v6, %s9843_s21  ;;  %v6122_v38 = vadd.f32 %v6090_v21, %v5957_v11  ;;  %v5926_v10 = vmul.f32 %v14172_v34, %v14308_v27 }
 0xa8d   : > { %v5793_v28 = vadd.f32 %v5761_v17, %v5596_v46  ;;  %v6091_v5 = vmul.f32 %v14179_v35, %v14355_v39  ;;  %v6946_v61 = vadd.f32 %v6914_v3, %v6781_v16  ;;  %v6617_v32 = vadd.f32 %v6585_v58, %v6451_v59  ;;  %v6881_v58 = vld [vmem:[#allocation4 + $0x209] sm:$0xff] }
 0xa8e   : > { %v6751_v44 = vmul.f32 %v14192_v29, %v13969_v12  ;;  %v6916_v22 = vmul.f32 %v14268_v47, %v14390_v54  ;;  %v6287_v63 = vadd.f32 %v6255_v0, %v6122_v38  ;;  %v5597_v21 = vmul.f32 %v14151_v41, %v6548_v26 }
 0xa8f   : > { %v5958_v49 = vadd.f32 %v5926_v10, %v5793_v28  ;;  %v5762_v46 = vmul.f32 %v14158_v55, %v13905_v40  ;;  %v14412_v27 = vadd.f32 %v14331_v42, %v6946_v61  ;;  %v6782_v11 = vadd.f32 %v6750_v23, %v6617_v32  ;;  %v6552_v61 = vld [vmem:[#allocation4 + $0x20f] sm:$0xff]  ;;  %v7955_v6 = vpop.permute.xlu0 %7954 }
 0xa90   : > { %v6256_v3 = vmul.f32 %v14206_v20, %v13975_v8  ;;  %v5927_v17 = vmul.f32 %v14172_v34, %v14336_v13  ;;  %v6452_v16 = vadd.f32 %v6420_v56, %v6287_v63  ;;  %v6092_v26 = vmul.f32 %v14179_v35, %v14379_v31 }
 0xa91   : > { %15486 = vst [vmem:[#allocation47_spill] sm:$0xff] %v14412_v27  ;;  %v6123_v0 = vadd.f32 %v6091_v5, %v5958_v49  ;;  %v5794_v59 = vadd.f32 %v5762_v46, %v5597_v21  ;;  %8002 = vrot.lane.b32.xlu1 %v14412_v27, %s9843_s21  ;;  %v6947_v40 = vadd.f32 %v6915_v57, %v6782_v11 }
 0xa92   : > { %v6421_v23 = vmul.f32 %v14217_v51, %v14366_v53  ;;  %v6587_v38 = vmul.f32 %v14259_v52, %v6551_v18  ;;  %v6752_v28 = vmul.f32 %v14192_v29, %v14039_v19  ;;  %v6618_v10 = vadd.f32 %v6586_v2, %v6452_v16 }
 0xa93   : > { %v6288_v13 = vadd.f32 %v6256_v3, %v6123_v0  ;;  %v6917_v56 = vmul.f32 %v14268_v47, %v6881_v58  ;;  %v5959_v5 = vadd.f32 %v5927_v17, %v5794_v59  ;;  %v14429_v32 = vadd.f32 %v14331_v42, %v6947_v40  ;;  %v6882_v3 = vld [vmem:[#allocation4 + $0x211] sm:$0xff] }
 0xa94   : > { %v6257_v57 = vmul.f32 %v14206_v20, %v13969_v12  ;;  %v5598_v63 = vmul.f32 %v14151_v41, %v14355_v39  ;;  %v5763_v49 = vmul.f32 %v14158_v55, %v13975_v8  ;;  %v6783_v21 = vadd.f32 %v6751_v44, %v6618_v10  ;;  %v6553_v10 = vld [vmem:[#allocation4 + $0x227] sm:$0xff] }
 0xa95   : > { %15487 = vst [vmem:[#allocation48_spill] sm:$0xff] %v14429_v32  ;;  %v6453_v46 = vadd.f32 %v6421_v23, %v6288_v13  ;;  %v6124_v2 = vadd.f32 %v6092_v26, %v5959_v5  ;;  %v6422_v11 = vmul.f32 %v14217_v51, %v14390_v54  ;;  %8004 = vrot.lane.b32.xlu0 %v14429_v32, %s9843_s21 }
 0xa96   : > { %v6588_v17 = vmul.f32 %v14259_v52, %v6552_v61  ;;  %v5795_v16 = vadd.f32 %v5763_v49, %v5598_v63  ;;  %v5928_v0 = vmul.f32 %v14172_v34, %v14366_v53  ;;  %v6093_v39 = vmul.f32 %v14179_v35, %v6551_v18  ;;  %v8081_v63 = vld [vmem:[%s15258_s17 + $0x8] sm:$0xff] }
 0xa97   : > { %v6948_v59 = vadd.f32 %v6916_v22, %v6783_v21  ;;  %v6619_v8 = vadd.f32 %v6587_v38, %v6453_v46  ;;  %v6289_v44 = vadd.f32 %v6257_v57, %v6124_v2  ;;  %v6753_v26 = vmul.f32 %v14192_v29, %v14032_v7  ;;  %v8080_v57 = vld [vmem:[%s15258_s17] sm:$0xff] }
 0xa98   : > { %v6918_v40 = vmul.f32 %v14268_v47, %v6882_v3  ;;  %v5960_v23 = vadd.f32 %v5928_v0, %v5795_v16  ;;  %v5599_v13 = vmul.f32 %v14151_v41, %v14379_v31  ;;  %v5764_v5 = vmul.f32 %v14158_v55, %v13969_v12  ;;  %v6883_v31 = vld [vmem:[#allocation4 + $0x229] sm:$0xff] }
 0xa99   : > { %v14453_v53 = vadd.f32 %v14331_v42, %v6948_v59  ;;  %v6784_v18 = vadd.f32 %v6752_v28, %v6619_v8  ;;  %v6454_v22 = vadd.f32 %v6422_v11, %v6289_v44  ;;  %v6258_v38 = vmul.f32 %v14206_v20, %v14039_v19  ;;  %v8082_v19 = vld [vmem:[%s15258_s17 + $0x10] sm:$0xff]  ;;  %v8083_v28 = vld [vmem:[%s15258_s17 + $0x18] sm:$0xff] }
 0xa9a   : > { %v6125_v41 = vadd.f32 %v6093_v39, %v5960_v23  ;;  %v5796_v49 = vadd.f32 %v5764_v5, %v5599_v13  ;;  %v5929_v12 = vmul.f32 %v14172_v34, %v14390_v54  ;;  %v6094_v55 = vmul.f32 %v14179_v35, %v6552_v61  ;;  %v9832_v54 = vld [vmem:[#allocation4] sm:$0xff]  ;;  %v6554_v16 = vld [vmem:[#allocation4 + $0x22f] sm:$0xff] }
 0xa9b   : > { %15488 = vst [vmem:[#allocation49_spill] sm:$0xff] %v14453_v53  ;;  %8006 = vrot.lane.b32.xlu1 %v14453_v53, %s9843_s21  ;;  %v6949_v21 = vadd.f32 %v6917_v56, %v6784_v18  ;;  %v6620_v46 = vadd.f32 %v6588_v17, %v6454_v22  ;;  %v6423_v2 = vmul.f32 %v14217_v51, %v6881_v58  ;;  %v8084_v58 = vld [vmem:[%s15258_s17 + $0x20] sm:$0xff]  ;;  %v8085_v56 = vld [vmem:[%s15258_s17 + $0x28] sm:$0xff]  ;;  %v7088_v18 = vmul.f32 0.70710677, %v13618_v25 }
 0xa9c   : > { %v6589_v11 = vmul.f32 %v14259_v52, %v6553_v10  ;;  %v6290_v34 = vadd.f32 %v6258_v38, %v6125_v41  ;;  %v6754_v35 = vmul.f32 %v9832_v54, %v14192_v29  ;;  %v5961_v61 = vadd.f32 %v5929_v12, %v5796_v49 }
 0xa9d   : > { %v9326_v0 = vpack.c.bf16 %v8081_v63, %v8080_v57  ;;  %v14478_v39 = vadd.f32 %v14331_v42, %v6949_v21  ;;  %v6785_v59 = vadd.f32 %v6753_v26, %v6620_v46  ;;  %v6919_v8 = vmul.f32 %v14268_v47, %v6883_v31  ;;  %v6884_v57 = vld [vmem:[#allocation4 + $0x231] sm:$0xff] }
 0xa9e   : > { %v9330_v44 = vpack.c.bf16 %v8083_v28, %v8082_v19  ;;  %v6455_v17 = vadd.f32 %v6423_v2, %v6290_v34  ;;  %v6126_v29 = vadd.f32 %v6094_v55, %v5961_v61  ;;  %v6259_v23 = vmul.f32 %v14206_v20, %v14032_v7 }
 0xa9f   : > { %15489 = vst [vmem:[#allocation50_spill] sm:$0xff] %v14478_v39  ;;  %9327 = vmatprep.subr.bf16.mxu0 %v9326_v0  ;;  %v7089_v10 = vmul.f32 0.70710677, %v13615_v33  ;;  %8008 = vrot.lane.b32.xlu0 %v14478_v39, %s9843_s21  ;;  %v6950_v26 = vadd.f32 %v6918_v40, %v6785_v59  ;;  %v6424_v13 = vmul.f32 %v14217_v51, %v6882_v3  ;;  %v8086_v40 = vld [vmem:[%s15258_s17 + $0x30] sm:$0xff]  ;;  %v8087_v51 = vld [vmem:[%s15258_s17 + $0x38] sm:$0xff]  ;;  %vm7120_vm9 = vcmp.ge.f32.partialorder %v7088_v18, 0.0 }
 0xaa0   : > { %v6590_v5 = vmul.f32 %v14259_v52, %v6554_v16  ;;  %9329 = vmatpush3.bf16.msra.mxu0 %v9326_v0  ;;  %v6621_v22 = vadd.f32 %v6589_v11, %v6455_v17  ;;  %v6291_v38 = vadd.f32 %v6259_v23, %v6126_v29  ;;  %v9334_v63 = vpack.c.bf16 %v8085_v56, %v8084_v58  ;;  %v15491_v11 = vld [vmem:[#allocation38_spill] sm:$0xff]  ;;  %v15493_v59 = vld [vmem:[#allocation40_spill] sm:$0xff]  ;;  %v15495_v23 = vld [vmem:[#allocation39_spill] sm:$0xff] }
 0xaa1   : > { %9331 = vmatprep.subr.bf16.mxu0 %v9330_v44  ;;  %v7185_v7 = vand.u32 2147483647, %v7089_v10  ;;  %v14496_v20 = vadd.f32 %v14331_v42, %v6950_v26  ;;  %v7184_v52 = vand.u32 2147483647, %v7088_v18  ;;  %v6920_v49 = vmul.f32 %v14268_v47, %v6884_v57 }
 0xaa2   : > { %v6786_v3 = vadd.f32 %v6754_v35, %v6621_v22  ;;  %v6456_v41 = vadd.f32 %v6424_v13, %v6291_v38  ;;  %v9338_v28 = vpack.c.bf16 %v8087_v51, %v8086_v40  ;;  %v7090_v34 = vmul.f32 0.70710677, %v15491_v11 }
 0xaa3   : > { %15490 = vst [vmem:[#allocation51_spill] sm:$0xff] %v14496_v20  ;;  %v7217_v31 = vmul.f32 0.3275911, %v7185_v7  ;;  %8010 = vrot.lane.b32.xlu1 %v14496_v20, %s9843_s21  ;;  %v7216_v12 = vmul.f32 0.3275911, %v7184_v52  ;;  %v7633_v46 = vsub.f32 0.0, %v7185_v7 }
 0xaa4   : > { %9333 = vmatpush3.bf16.msra.mxu0 %v9330_v44  ;;  %v6951_v55 = vadd.f32 %v6919_v8, %v6786_v3  ;;  %v6622_v19 = vadd.f32 %v6590_v5, %v6456_v41  ;;  %v7632_v16 = vsub.f32 0.0, %v7184_v52  ;;  %v7186_v47 = vand.u32 2147483647, %v7090_v34 }
 0xaa5   : > { %9335 = vmatprep.subr.bf16.mxu0 %v9334_v63  ;;  %v7249_v21 = vadd.f32 1.0, %v7217_v31  ;;  %v7248_v2 = vadd.f32 1.0, %v7216_v12  ;;  %vm7121_vm8 = vcmp.ge.f32.partialorder %v7089_v10, 0.0  ;;  %v7092_v8 = vmul.f32 0.70710677, %v15493_v59 }
 0xaa6   : > { %v14509_v54 = vadd.f32 %v14331_v42, %v6951_v55  ;;  %v6787_v61 = vadd.f32 %v6754_v35, %v6622_v19  ;;  %v14515_v44 = vmul.f32 0.5, %v13615_v33  ;;  %v7665_v58 = vmul.f32 %v7633_v46, %v7185_v7 }
 0xaa7   : > { %9642 = vrcp.f32 %v7249_v21  ;;  %v7218_v56 = vmul.f32 0.3275911, %v7186_v47  ;;  %v14521_v17 = vmul.f32 0.5, %v13618_v25  ;;  %v7188_v29 = vand.u32 2147483647, %v7092_v8 }
 0xaa8   : > { %15492 = vst [vmem:[#allocation38_spill] sm:$0xff] %v14509_v54  ;;  %9337 = vmatpush3.bf16.msra.mxu0 %v9334_v63  ;;  %9644 = vrcp.f32 %v7248_v2  ;;  %8012 = vrot.lane.b32.xlu0 %v14509_v54, %s9843_s21  ;;  %v6952_v0 = vadd.f32 %v6920_v49, %v6787_v61  ;;  %v7091_v26 = vmul.f32 0.70710677, %v15495_v23  ;;  %v15343_v13 = vmov -1.0   ;;  %v15496_v63 = vld [vmem:[#allocation42_spill] sm:$0xff] }
 0xaa9   : > { %9339 = vmatprep.subr.bf16.mxu0 %v9338_v28  ;;  %v14525_v10 = vsel %vm7121_vm8, 1.0, %v15343_v13  ;;  %v14528_v5 = vsel %vm7120_vm9, 1.0, %v15343_v13  ;;  %v7664_v33 = vmul.f32 %v7632_v16, %v7184_v52  ;;  %v7250_v18 = vadd.f32 1.0, %v7218_v56 }
 0xaaa   : > { %v14518_v35 = vadd.f32 %v14331_v42, %v6952_v0  ;;  %v14533_v42 = vmul.f32 0.5, %v15491_v11  ;;  %v7634_v25 = vsub.f32 0.0, %v7186_v47  ;;  %v7220_v22 = vmul.f32 0.3275911, %v7188_v29  ;;  %v15497_v0 = vld [vmem:[#allocation41_spill] sm:$0xff] }
 0xaab   : > { %v7187_v38 = vand.u32 2147483647, %v7091_v26  ;;  %v7698_v57 = vmul.f32 1.442695, %v7665_v58  ;;  %vm7122_vm10 = vcmp.ge.f32.partialorder %v7090_v34, 0.0  ;;  %9646 = vrcp.f32 %v7250_v18 }
 0xaac   : > { %15494 = vst [vmem:[#allocation40_spill] sm:$0xff] %v14518_v35  ;;  %9341 = vmatpush3.bf16.msra.mxu0 %v9338_v28  ;;  %8014 = vrot.lane.b32.xlu1 %v14518_v35, %s9843_s21  ;;  %v14536_v7 = vmul.f32 0.70710677, %v15496_v63  ;;  %vm7124_vm11 = vcmp.ge.f32.partialorder %v7092_v8, 0.0  ;;  %v7252_v40 = vadd.f32 1.0, %v7220_v22  ;;  %v7636_v51 = vsub.f32 0.0, %v7188_v29 }
 0xaad   : > { %v7219_v52 = vmul.f32 0.3275911, %v7187_v38  ;;  %v7696_v3 = vmul.f32 1.442695, %v7664_v33  ;;  %v14539_v41 = vmul.f32 0.5, %v15493_v59  ;;  %v7635_v31 = vsub.f32 0.0, %v7187_v38 }
 0xaae   : > { %v7190_v49 = vand.u32 2147483647, %v14536_v7  ;;  %v14545_v55 = vsel %vm7122_vm10, 1.0, %v15343_v13  ;;  %v7666_v19 = vmul.f32 %v7634_v25, %v7186_v47  ;;  %9648 = vrcp.f32 %v7252_v40 }
 0xaaf   : > { %v7251_v28 = vadd.f32 1.0, %v7219_v52  ;;  %v14551_v2 = vsel %vm7124_vm11, 1.0, %v15343_v13  ;;  %v7668_v16 = vmul.f32 %v7636_v51, %v7188_v29  ;;  %vm7123_vm12 = vcmp.ge.f32.partialorder %v7091_v26, 0.0 }
 0xab0   : > { %v7222_v11 = vmul.f32 0.3275911, %v7190_v49  ;;  %v7638_v34 = vsub.f32 0.0, %v7190_v49  ;;  %v14555_v59 = vmul.f32 0.70710677, %v15497_v0  ;;  %v7667_v47 = vmul.f32 %v7635_v31, %v7187_v38  ;;  %v15498_v31 = vld [vmem:[#allocation44_spill] sm:$0xff] }
 0xab1   : > { %v14542_v12 = vpop.eup %9642  ;;  %9650 = vrcp.f32 %v7251_v28  ;;  %v7700_v33 = vmul.f32 1.442695, %v7666_v19  ;;  %v14560_v22 = vsel %vm7123_vm12, 1.0, %v15343_v13  ;;  %v7704_v40 = vmul.f32 1.442695, %v7668_v16 }
 0xab2   : > { %v14547_v21 = vpop.eup %9644  ;;  %v7345_v46 = vmul.f32 1.0614054, %v14542_v12  ;;  %v7254_v58 = vadd.f32 1.0, %v7222_v11  ;;  %9652 = vpow2.f32 %v7698_v57  ;;  %v7189_v18 = vand.u32 2147483647, %v14555_v59 }
 0xab3   : > { %v7344_v61 = vmul.f32 1.0614054, %v14547_v21  ;;  %v7670_v29 = vmul.f32 %v7638_v34, %v7190_v49  ;;  %v7702_v57 = vmul.f32 1.442695, %v7667_v47  ;;  %v14566_v19 = vmul.f32 0.70710677, %v15498_v31 }
 0xab4   : > { %v7377_v8 = vadd.f32 -1.4531521, %v7345_v46  ;;  %9654 = vrcp.f32 %v7254_v58  ;;  %v7221_v51 = vmul.f32 0.3275911, %v7189_v18  ;;  %v7637_v52 = vsub.f32 0.0, %v7189_v18 }
 0xab5   : > { %v7376_v56 = vadd.f32 -1.4531521, %v7344_v61  ;;  %v14563_v28 = vpop.eup %9646  ;;  %9656 = vpow2.f32 %v7696_v3  ;;  %v7708_v34 = vmul.f32 1.442695, %v7670_v29  ;;  %v7192_v16 = vand.u32 2147483647, %v14566_v19 }
 0xab6   : > { %v7409_v25 = vmul.f32 %v14542_v12, %v7377_v8  ;;  %v7346_v11 = vmul.f32 1.0614054, %v14563_v28  ;;  %v7253_v61 = vadd.f32 1.0, %v7221_v51  ;;  %v7669_v8 = vmul.f32 %v7637_v52, %v7189_v18 }
 0xab7   : > { %v7408_v26 = vmul.f32 %v14547_v21, %v7376_v56  ;;  %9658 = vpow2.f32 %v7700_v33  ;;  %v7640_v13 = vsub.f32 0.0, %v7192_v16  ;;  %v7224_v33 = vmul.f32 0.3275911, %v7192_v16 }
 0xab8   : > { %v7441_v38 = vadd.f32 1.4214138, %v7409_v25  ;;  %v14571_v58 = vpop.eup %9648  ;;  %v7378_v3 = vadd.f32 -1.4531521, %v7346_v11  ;;  %9660 = vrcp.f32 %v7253_v61  ;;  %v7706_v47 = vmul.f32 1.442695, %v7669_v8 }
 0xab9   : > { %v7440_v46 = vadd.f32 1.4214138, %v7408_v26  ;;  %v7348_v26 = vmul.f32 1.0614054, %v14571_v58  ;;  %9662 = vpow2.f32 %v7704_v40  ;;  %v7672_v20 = vmul.f32 %v7640_v13, %v7192_v16 }
 0xaba   : > { %v7473_v49 = vmul.f32 %v14542_v12, %v7441_v38  ;;  %v7410_v18 = vmul.f32 %v14563_v28, %v7378_v3  ;;  %9664 = vpow2.f32 %v7702_v57  ;;  %vm7126_vm14 = vcmp.ge.f32.partialorder %v14536_v7, 0.0 }
 0xabb   : > { %v7472_v56 = vmul.f32 %v14547_v21, %v7440_v46  ;;  %v14576_v29 = vpop.eup %9650  ;;  %v7380_v38 = vadd.f32 -1.4531521, %v7348_v26  ;;  %9666 = vpow2.f32 %v7708_v34  ;;  %v15499_v46 = vld [vmem:[#allocation43_spill] sm:$0xff]  ;;  %vm7125_vm15 = vcmp.ge.f32.partialorder %v14555_v59, 0.0 }
 0xabc   : > { %v7505_v25 = vadd.f32 -0.28449672, %v7473_v49  ;;  %v14580_v11 = vmul.f32 0.70710677, %v15499_v46  ;;  %v9653_v61 = vpop.eup %9652  ;;  %v7442_v49 = vadd.f32 1.4214138, %v7410_v18  ;;  %9668 = vpow2.f32 %v7706_v47 }
 0xabd   : > { %v7504_v51 = vadd.f32 -0.28449672, %v7472_v56  ;;  %v7347_v40 = vmul.f32 1.0614054, %v14576_v29  ;;  %v7256_v56 = vadd.f32 1.0, %v7224_v33  ;;  %v7412_v3 = vmul.f32 %v14571_v58, %v7380_v38 }
 0xabe   : > { %v7537_v52 = vmul.f32 %v14542_v12, %v7505_v25  ;;  %v14584_v35 = vpop.eup %9654  ;;  %v7474_v34 = vmul.f32 %v14563_v28, %v7442_v49  ;;  %v7191_v33 = vand.u32 2147483647, %v14580_v11  ;;  %v14594_v49 = vmul.f32 1.442695, %v7672_v20 }
 0xabf   : > { %v7536_v8 = vmul.f32 %v14547_v21, %v7504_v51  ;;  %v7379_v26 = vadd.f32 -1.4531521, %v7347_v40  ;;  %v7350_v54 = vmul.f32 1.0614054, %v14584_v35  ;;  %v9657_v53 = vpop.eup %9656  ;;  %v7444_v18 = vadd.f32 1.4214138, %v7412_v3 }
 0xac0   : > { %v7569_v57 = vadd.f32 0.2548296, %v7537_v52  ;;  %9670 = vrcp.f32 %v7256_v56  ;;  %v7506_v52 = vadd.f32 -0.28449672, %v7474_v34  ;;  %v7223_v40 = vmul.f32 0.3275911, %v7191_v33 }
 0xac1   : > { %v7568_v25 = vadd.f32 0.2548296, %v7536_v8  ;;  %v7411_v38 = vmul.f32 %v14576_v29, %v7379_v26  ;;  %v7382_v47 = vadd.f32 -1.4531521, %v7350_v54  ;;  %v9659_v13 = vpop.eup %9658  ;;  %v7476_v8 = vmul.f32 %v14571_v58, %v7444_v18 }
 0xac2   : > { %v7601_v51 = vmul.f32 %v14542_v12, %v7569_v57  ;;  %v14596_v27 = vpop.eup %9660  ;;  %v7538_v56 = vmul.f32 %v14563_v28, %v7506_v52  ;;  %vm7128_vm1 = vcmp.ge.f32.partialorder %v14566_v19, 0.0  ;;  %vm7127_vm2 = vcmp.ge.f32.partialorder %v14580_v11, 0.0 }
 0xac3   : > { %v7600_v39 = vmul.f32 %v14547_v21, %v7568_v25  ;;  %v7443_v57 = vadd.f32 1.4214138, %v7411_v38  ;;  %v7414_v3 = vmul.f32 %v14584_v35, %v7382_v47  ;;  %v9663_v21 = vpop.eup %9662  ;;  %v7508_v34 = vadd.f32 -0.28449672, %v7476_v8 }
 0xac4   : > { %v7761_v16 = vmul.f32 %v9653_v61, %v7601_v51  ;;  %v7349_v54 = vmul.f32 1.0614054, %v14596_v27  ;;  %v7255_v61 = vadd.f32 1.0, %v7223_v40  ;;  %v9665_v26 = vpop.eup %9664  ;;  %v7570_v20 = vadd.f32 0.2548296, %v7538_v56 }
 0xac5   : > { %v7760_v12 = vmul.f32 %v9657_v53, %v7600_v39  ;;  %v7475_v18 = vmul.f32 %v14576_v29, %v7443_v57  ;;  %v7446_v32 = vadd.f32 1.4214138, %v7414_v3  ;;  %v9667_v36 = vpop.eup %9666  ;;  %v7540_v39 = vmul.f32 %v14571_v58, %v7508_v34 }
 0xac6   : > { %v7793_v25 = vsub.f32 1.0, %v7761_v16  ;;  %v7381_v52 = vadd.f32 -1.4531521, %v7349_v54  ;;  %9672 = vrcp.f32 %v7255_v61  ;;  %v7602_v47 = vmul.f32 %v14563_v28, %v7570_v20  ;;  %v14607_v40 = vpop.eup %9668  ;;  %v7953_v28 = vpop.permute.xlu1 %7952 }
 0xac7   : > { %v7792_v51 = vsub.f32 1.0, %v7760_v12  ;;  %v7507_v16 = vadd.f32 -0.28449672, %v7475_v18  ;;  %v7478_v8 = vmul.f32 %v14584_v35, %v7446_v32  ;;  %v7572_v56 = vadd.f32 0.2548296, %v7540_v39 }
 0xac8   : > { %v7825_v53 = vmul.f32 %v7793_v25, %v14525_v10  ;;  %v7413_v57 = vmul.f32 %v14596_v27, %v7381_v52  ;;  %v7639_v3 = vsub.f32 0.0, %v7191_v33  ;;  %v7762_v25 = vmul.f32 %v9659_v13, %v7602_v47 }
 0xac9   : > { %v7824_v38 = vmul.f32 %v7792_v51, %v14528_v5  ;;  %v7539_v34 = vmul.f32 %v14576_v29, %v7507_v16  ;;  %v7510_v54 = vadd.f32 -0.28449672, %v7478_v8  ;;  %v7604_v32 = vmul.f32 %v14571_v58, %v7572_v56 }
 0xaca   : > { %v7857_v12 = vadd.f32 1.0, %v7825_v53  ;;  %v14611_v61 = vpop.eup %9670  ;;  %v7445_v51 = vadd.f32 1.4214138, %v7413_v57  ;;  %v7671_v20 = vmul.f32 %v7639_v3, %v7191_v33  ;;  %v7794_v53 = vsub.f32 1.0, %v7762_v25 }
 0xacb   : > { %v7856_v10 = vadd.f32 1.0, %v7824_v38  ;;  %v7571_v39 = vadd.f32 0.2548296, %v7539_v34  ;;  %v7542_v52 = vmul.f32 %v14584_v35, %v7510_v54  ;;  %v7764_v13 = vmul.f32 %v9663_v21, %v7604_v32 }
 0xacc   : > { %v7889_v5 = vmul.f32 %v7857_v12, %v14515_v44  ;;  %v7477_v47 = vmul.f32 %v14596_v27, %v7445_v51  ;;  %v7352_v16 = vmul.f32 1.0614054, %v14611_v61  ;;  %v7826_v44 = vmul.f32 %v7794_v53, %v14545_v55  ;;  %v7957_v55 = vpop.permute.xlu1 %7956 }
 0xacd   : > { %v7888_v18 = vmul.f32 %v7856_v10, %v14521_v17  ;;  %v7603_v12 = vmul.f32 %v14576_v29, %v7571_v39  ;;  %v7574_v58 = vadd.f32 0.2548296, %v7542_v52  ;;  %v7796_v56 = vsub.f32 1.0, %v7764_v13  ;;  %v7961_v13 = vpop.permute.xlu0 %7960 }
 0xace   : > { %v8049_v38 = vmul.f32 %v7955_v6, %v7889_v5  ;;  %v7509_v17 = vadd.f32 -0.28449672, %v7477_v47  ;;  %v7384_v33 = vadd.f32 -1.4531521, %v7352_v16  ;;  %v7858_v57 = vadd.f32 1.0, %v7826_v44 }
 0xacf   : > { %v8048_v8 = vmul.f32 %v7953_v28, %v7888_v18  ;;  %v7763_v6 = vmul.f32 %v9665_v26, %v7603_v12  ;;  %v7606_v21 = vmul.f32 %v14584_v35, %v7574_v58  ;;  %v7710_v3 = vmul.f32 1.442695, %v7671_v20 }
 0xad0   : > { %v14624_v10 = vpop.eup %9672  ;;  %v7828_v29 = vmul.f32 %v7796_v56, %v14551_v2  ;;  %v7541_v25 = vmul.f32 %v14596_v27, %v7509_v17  ;;  %v7416_v34 = vmul.f32 %v14611_v61, %v7384_v33  ;;  %v14631_v54 = vmul.f32 0.70710677, %v13940_v60  ;;  %v7959_v44 = vpop.permute.xlu1 %7958 }
 0xad1   : > { %9210 = vmatprep.mubr.msk.f32.mxu0 %vm8095_vm13, %v8048_v8  ;;  %v7890_v5 = vmul.f32 %v7858_v57, %v14533_v42  ;;  %v7795_v26 = vsub.f32 1.0, %v7763_v6  ;;  %v7766_v28 = vmul.f32 %v9667_v36, %v7606_v21  ;;  %v7351_v35 = vmul.f32 1.0614054, %v14624_v10 }
 0xad2   : > { %9211 = vmatmul.mubr.msk.f32.vlgmr.msra.gmra.mrb[58].mxu0 %vm8095_vm13, %v8049_v38  ;;  %v7860_v32 = vadd.f32 1.0, %v7828_v29  ;;  %v7573_v51 = vadd.f32 0.2548296, %v7541_v25  ;;  %v7448_v20 = vadd.f32 1.4214138, %v7416_v34  ;;  %9674 = vpow2.f32 %v14594_v49 }
 0xad3   : > { %v8050_v18 = vmul.f32 %v7957_v55, %v7890_v5  ;;  %v7827_v2 = vmul.f32 %v7795_v26, %v14560_v22  ;;  %v7798_v53 = vsub.f32 1.0, %v7766_v28  ;;  %v7383_v39 = vadd.f32 -1.4531521, %v7351_v35  ;;  %v7965_v35 = vpop.permute.xlu0 %7964 }
 0xad4   : > { %v15500_v52 = vmov -1.0   ;;  %v7605_v36 = vmul.f32 %v14596_v27, %v7573_v51  ;;  %v7480_v42 = vmul.f32 %v14611_v61, %v7448_v20  ;;  %v7059_v49 = vmul.f32 0.5, %v15495_v23 }
 0xad5   : > { %v7158_v38 = vsel %vm7126_vm14, 1.0, %v15500_v52  ;;  %9213 = vmatprep.mubr.msk.f32.mxu0 %vm8095_vm13, %v8050_v18  ;;  %v7859_v47 = vadd.f32 1.0, %v7827_v2  ;;  %v7415_v22 = vmul.f32 %v14624_v10, %v7383_v39  ;;  %v7892_v8 = vmul.f32 %v7860_v32, %v14539_v41  ;;  %v7963_v2 = vpop.permute.xlu1 %7962 }
 0xad6   : > { %v7830_v16 = vmul.f32 %v7798_v53, %v7158_v38  ;;  %v7765_v7 = vmul.f32 %v14607_v40, %v7605_v36  ;;  %v7512_v12 = vadd.f32 -0.28449672, %v7480_v42  ;;  %v7194_v59 = vand.u32 2147483647, %v14631_v54 }
 0xad7   : > { %v7891_v27 = vmul.f32 %v7859_v47, %v7059_v49  ;;  %v7157_v58 = vsel %vm7125_vm15, 1.0, %v15500_v52  ;;  %v7447_v56 = vadd.f32 1.4214138, %v7415_v22  ;;  %9676 = vpow2.f32 %v7710_v3 }
 0xad8   : > { %v8052_v17 = vmul.f32 %v7961_v13, %v7892_v8  ;;  %v7797_v33 = vsub.f32 1.0, %v7765_v7  ;;  %v7544_v23 = vmul.f32 %v14611_v61, %v7512_v12  ;;  %v7226_v57 = vmul.f32 0.3275911, %v7194_v59 }
 0xad9   : > { %v8051_v6 = vmul.f32 %v7959_v44, %v7891_v27  ;;  %v7862_v21 = vadd.f32 1.0, %v7830_v16  ;;  %v7479_v41 = vmul.f32 %v14624_v10, %v7447_v56  ;;  %v14653_v55 = vmul.f32 0.70710677, %v13908_v30 }
 0xada   : > { %v7829_v40 = vmul.f32 %v7797_v33, %v7157_v58  ;;  %v7576_v29 = vadd.f32 0.2548296, %v7544_v23  ;;  %v7258_v25 = vadd.f32 1.0, %v7226_v57  ;;  %v7642_v34 = vsub.f32 0.0, %v7194_v59 }
 0xadb   : > { %9214 = vmatmul.mubr.msk.f32.gmra.mrb[60].mxu0 %vm8095_vm13, %v8051_v6  ;;  %v7062_v3 = vmul.f32 0.5, %v15496_v63  ;;  %v7511_v5 = vadd.f32 -0.28449672, %v7479_v41  ;;  %v7193_v26 = vand.u32 2147483647, %v14653_v55  ;;  %v7061_v32 = vmul.f32 0.5, %v15497_v0 }
 0xadc   : > { %v9675_v28 = vpop.eup %9674  ;;  %9216 = vmatprep.mubr.msk.f32.mxu0 %vm8095_vm13, %v8052_v17  ;;  %v7861_v51 = vadd.f32 1.0, %v7829_v40  ;;  %v7608_v20 = vmul.f32 %v14611_v61, %v7576_v29  ;;  %9678 = vrcp.f32 %v7258_v25  ;;  %v7674_v36 = vmul.f32 %v7642_v34, %v7194_v59  ;;  %v7969_v34 = vpop.permute.xlu0 %7968 }
 0xadd   : > { %v7894_v18 = vmul.f32 %v7862_v21, %v7062_v3  ;;  %v7543_v53 = vmul.f32 %v14624_v10, %v7511_v5  ;;  %v7225_v39 = vmul.f32 0.3275911, %v7193_v26  ;;  %v14664_v47 = vmul.f32 0.70710677, %v14002_v4 }
 0xade   : > { %v7893_v38 = vmul.f32 %v7861_v51, %v7061_v32  ;;  %v7768_v63 = vmul.f32 %v9675_v28, %v7608_v20  ;;  %v14667_v61 = vmul.f32 0.70710677, %v13965_v1  ;;  %v7160_v8 = vsel %vm7128_vm1, 1.0, %v15500_v52 }
 0xadf   : > { %v8054_v42 = vmul.f32 %v7965_v35, %v7894_v18  ;;  %v7575_v13 = vadd.f32 0.2548296, %v7543_v53  ;;  %v7257_v49 = vadd.f32 1.0, %v7225_v39  ;;  %v7641_v7 = vsub.f32 0.0, %v7193_v26  ;;  %v7967_v35 = vpop.permute.xlu1 %7966 }
 0xae0   : > { %v8053_v0 = vmul.f32 %v7963_v2, %v7893_v38  ;;  %v7800_v16 = vsub.f32 1.0, %v7768_v63  ;;  %v7196_v12 = vand.u32 2147483647, %v14664_v47  ;;  %v7064_v59 = vmul.f32 0.5, %v15498_v31 }
 0xae1   : > { %v9677_v22 = vpop.eup %9676  ;;  %v7607_v19 = vmul.f32 %v14624_v10, %v7575_v13  ;;  %9680 = vrcp.f32 %v7257_v49  ;;  %v7716_v58 = vmul.f32 1.442695, %v7674_v36  ;;  %v7195_v56 = vand.u32 2147483647, %v14667_v61 }
 0xae2   : > { %9217 = vmatmul.mubr.msk.f32.gmra.mrb[62].mxu0 %vm8095_vm13, %v8053_v0  ;;  %v7832_v44 = vmul.f32 %v7800_v16, %v7160_v8  ;;  %v7063_v17 = vmul.f32 0.5, %v15499_v46  ;;  %v7159_v11 = vsel %vm7127_vm2, 1.0, %v15500_v52  ;;  %v14680_v10 = vmul.f32 0.5, %v13940_v60 }
 0xae3   : > { %9219 = vmatprep.mubr.msk.f32.mxu0 %vm8095_vm13, %v8054_v42  ;;  %v7767_v27 = vmul.f32 %v9677_v22, %v7607_v19  ;;  %v7228_v33 = vmul.f32 0.3275911, %v7196_v12  ;;  %vm7130_vm3 = vcmp.ge.f32.partialorder %v14631_v54, 0.0  ;;  %vm7129_vm4 = vcmp.ge.f32.partialorder %v14653_v55, 0.0 }
 0xae4   : > { %v7227_v31 = vmul.f32 0.3275911, %v7195_v56  ;;  %v7864_v6 = vadd.f32 1.0, %v7832_v44  ;;  %v7673_v21 = vmul.f32 %v7641_v7, %v7193_v26  ;;  %v14687_v40 = vmul.f32 0.70710677, %v14062_v50 }
 0xae5   : > { %v7799_v23 = vsub.f32 1.0, %v7767_v27  ;;  %v7260_v41 = vadd.f32 1.0, %v7228_v33  ;;  %9682 = vpow2.f32 %v7716_v58  ;;  %v14691_v25 = vsel %vm7130_vm3, 1.0, %v15500_v52 }
 0xae6   : > { %v14684_v57 = vpop.eup %9678  ;;  %v7259_v60 = vadd.f32 1.0, %v7227_v31  ;;  %v14694_v54 = vmul.f32 0.5, %v13908_v30  ;;  %v14697_v55 = vsel %vm7129_vm4, 1.0, %v15500_v52  ;;  %v14700_v26 = vmul.f32 0.5, %v14002_v4 }
 0xae7   : > { %v7831_v46 = vmul.f32 %v7799_v23, %v7159_v11  ;;  %v7354_v29 = vmul.f32 1.0614054, %v14684_v57  ;;  %9684 = vrcp.f32 %v7260_v41  ;;  %v7896_v28 = vmul.f32 %v7864_v6, %v7064_v59 }
 0xae8   : > { %9686 = vrcp.f32 %v7259_v60  ;;  %v7714_v32 = vmul.f32 1.442695, %v7673_v21  ;;  %v7198_v51 = vand.u32 2147483647, %v14687_v40  ;;  %v14704_v20 = vmul.f32 0.70710677, %v14035_v9 }
 0xae9   : > { %v7863_v3 = vadd.f32 1.0, %v7831_v46  ;;  %v7386_v5 = vadd.f32 -1.4531521, %v7354_v29  ;;  %vm7132_vm5 = vcmp.ge.f32.partialorder %v14664_v47, 0.0  ;;  %vm7131_vm6 = vcmp.ge.f32.partialorder %v14667_v61, 0.0 }
 0xaea   : > { %v8056_v4 = vmul.f32 %v7969_v34, %v7896_v28  ;;  %v7644_v39 = vsub.f32 0.0, %v7196_v12  ;;  %v7230_v38 = vmul.f32 0.3275911, %v7198_v51  ;;  %v7643_v42 = vsub.f32 0.0, %v7195_v56 }
 0xaeb   : > { %v14706_v30 = vpop.eup %9680  ;;  %v7895_v18 = vmul.f32 %v7863_v3, %v7063_v17  ;;  %v7418_v2 = vmul.f32 %v14684_v57, %v7386_v5  ;;  %v7197_v13 = vand.u32 2147483647, %v14704_v20  ;;  %v14714_v0 = vmul.f32 0.5, %v13965_v1 }
 0xaec   : > { %v7353_v53 = vmul.f32 1.0614054, %v14706_v30  ;;  %v7262_v16 = vadd.f32 1.0, %v7230_v38  ;;  %v14717_v22 = vmul.f32 0.70710677, %v14124_v43  ;;  %9688 = vpow2.f32 %v7714_v32 }
 0xaed   : > { %v8055_v63 = vmul.f32 %v7967_v35, %v7895_v18  ;;  %v7450_v36 = vadd.f32 1.4214138, %v7418_v2  ;;  %v14724_v19 = vsel %vm7132_vm5, 1.0, %v15500_v52  ;;  %v7229_v44 = vmul.f32 0.3275911, %v7197_v13 }
 0xaee   : > { %v7385_v49 = vadd.f32 -1.4531521, %v7353_v53  ;;  %v7676_v7 = vmul.f32 %v7644_v39, %v7196_v12  ;;  %v14731_v59 = vsel %vm7131_vm6, 1.0, %v15500_v52  ;;  %9690 = vrcp.f32 %v7262_v16 }
 0xaef   : > { %9220 = vmatmul.mubr.msk.f32.gmra.mrb[64].mxu0 %vm8095_vm13, %v8055_v63  ;;  %v7482_v8 = vmul.f32 %v14684_v57, %v7450_v36  ;;  %v9683_v27 = vpop.eup %9682  ;;  %v7675_v17 = vmul.f32 %v7643_v42, %v7195_v56  ;;  %v14734_v11 = vmul.f32 0.5, %v14062_v50  ;;  %v7261_v47 = vadd.f32 1.0, %v7229_v44 }
 0xaf0   : > { %9222 = vmatprep.mubr.msk.f32.mxu0 %vm8095_vm13, %v8056_v4  ;;  %v7417_v1 = vmul.f32 %v14706_v30, %v7385_v49  ;;  %v7646_v31 = vsub.f32 0.0, %v7198_v51  ;;  %v7645_v6 = vsub.f32 0.0, %v7197_v13  ;;  %v7200_v12 = vand.u32 2147483647, %v14717_v22 }
 0xaf1   : > { %v7514_v58 = vadd.f32 -0.28449672, %v7482_v8  ;;  %v14736_v33 = vpop.eup %9684  ;;  %9692 = vrcp.f32 %v7261_v47  ;;  %v14744_v56 = vmul.f32 0.70710677, %v14095_v15  ;;  %v7720_v46 = vmul.f32 1.442695, %v7676_v7 }
 0xaf2   : > { %v7449_v23 = vadd.f32 1.4214138, %v7417_v1  ;;  %v14739_v21 = vpop.eup %9686  ;;  %v7356_v41 = vmul.f32 1.0614054, %v14736_v33  ;;  %v7232_v60 = vmul.f32 0.3275911, %v7200_v12  ;;  %v7678_v32 = vmul.f32 %v7646_v31, %v7198_v51 }
 0xaf3   : > { %v7546_v61 = vmul.f32 %v14684_v57, %v7514_v58  ;;  %v7355_v29 = vmul.f32 1.0614054, %v14739_v21  ;;  %v7718_v5 = vmul.f32 1.442695, %v7675_v17  ;;  %v7677_v53 = vmul.f32 %v7645_v6, %v7197_v13 }
 0xaf4   : > { %v7481_v50 = vmul.f32 %v14706_v30, %v7449_v23  ;;  %v7388_v3 = vadd.f32 -1.4531521, %v7356_v41  ;;  %v7264_v18 = vadd.f32 1.0, %v7232_v60  ;;  %v7199_v39 = vand.u32 2147483647, %v14744_v56 }
 0xaf5   : > { %v7578_v34 = vadd.f32 0.2548296, %v7546_v61  ;;  %v7387_v35 = vadd.f32 -1.4531521, %v7355_v29  ;;  %v7648_v36 = vsub.f32 0.0, %v7200_v12  ;;  %vm7134_vm7 = vcmp.ge.f32.partialorder %v14687_v40, 0.0 }
 0xaf6   : > { %v7513_v28 = vadd.f32 -0.28449672, %v7481_v50  ;;  %v7420_v4 = vmul.f32 %v14736_v33, %v7388_v3  ;;  %9694 = vrcp.f32 %v7264_v18  ;;  %v9689_v42 = vpop.eup %9688  ;;  %v7231_v8 = vmul.f32 0.3275911, %v7199_v39 }
 0xaf7   : > { %v7610_v2 = vmul.f32 %v14684_v57, %v7578_v34  ;;  %v7419_v63 = vmul.f32 %v14739_v21, %v7387_v35  ;;  %9696 = vpow2.f32 %v7720_v46  ;;  %v7724_v1 = vmul.f32 1.442695, %v7678_v32 }
 0xaf8   : > { %v7545_v38 = vmul.f32 %v14706_v30, %v7513_v28  ;;  %v7452_v16 = vadd.f32 1.4214138, %v7420_v4  ;;  %v14753_v51 = vpop.eup %9690  ;;  %9698 = vpow2.f32 %v7718_v5  ;;  %v7263_v17 = vadd.f32 1.0, %v7231_v8 }
 0xaf9   : > { %v7770_v49 = vmul.f32 %v9683_v27, %v7610_v2  ;;  %v7451_v57 = vadd.f32 1.4214138, %v7419_v63  ;;  %v7358_v58 = vmul.f32 1.0614054, %v14753_v51  ;;  %v7722_v27 = vmul.f32 1.442695, %v7677_v53 }
 0xafa   : > { %v7577_v44 = vadd.f32 0.2548296, %v7545_v38  ;;  %v7484_v7 = vmul.f32 %v14736_v33, %v7452_v16  ;;  %v7680_v31 = vmul.f32 %v7648_v36, %v7200_v12  ;;  %9700 = vrcp.f32 %v7263_v17 }
 0xafb   : > { %v7802_v13 = vsub.f32 1.0, %v7770_v49  ;;  %v7483_v23 = vmul.f32 %v14739_v21, %v7451_v57  ;;  %v14759_v6 = vpop.eup %9692  ;;  %v7390_v50 = vadd.f32 -1.4531521, %v7358_v58  ;;  %v14764_v34 = vmul.f32 0.70710677, %v14201_v48 }
 0xafc   : > { %v7609_v47 = vmul.f32 %v14706_v30, %v7577_v44  ;;  %v7516_v41 = vadd.f32 -0.28449672, %v7484_v7  ;;  %v7357_v60 = vmul.f32 1.0614054, %v14759_v6  ;;  %9702 = vpow2.f32 %v7724_v1  ;;  %v7973_v1 = vpop.permute.xlu0 %7972 }
 0xafd   : > { %v7834_v61 = vmul.f32 %v7802_v13, %v14691_v25  ;;  %v7515_v29 = vadd.f32 -0.28449672, %v7483_v23  ;;  %v7422_v3 = vmul.f32 %v14753_v51, %v7390_v50  ;;  %v7647_v12 = vsub.f32 0.0, %v7199_v39 }
 0xafe   : > { %v7769_v46 = vmul.f32 %v9689_v42, %v7609_v47  ;;  %v7548_v30 = vmul.f32 %v14736_v33, %v7516_v41  ;;  %v7389_v25 = vadd.f32 -1.4531521, %v7357_v60  ;;  %v7728_v35 = vmul.f32 1.442695, %v7680_v31  ;;  %v7971_v47 = vpop.permute.xlu1 %7970 }
 0xaff   : > { %v7547_v28 = vmul.f32 %v14739_v21, %v7515_v29  ;;  %v7866_v32 = vadd.f32 1.0, %v7834_v61  ;;  %v7454_v2 = vadd.f32 1.4214138, %v7422_v3  ;;  %9704 = vpow2.f32 %v7722_v27 }
 0xb00   : > { %v7801_v5 = vsub.f32 1.0, %v7769_v46  ;;  %v7580_v18 = vadd.f32 0.2548296, %v7548_v30  ;;  %v14769_v4 = vpop.eup %9694  ;;  %v7421_v63 = vmul.f32 %v14759_v6, %v7389_v25  ;;  %v14774_v36 = vand.u32 2147483647, %v14764_v34 }
 0xb01   : > { %v7579_v38 = vadd.f32 0.2548296, %v7547_v28  ;;  %v9697_v42 = vpop.eup %9696  ;;  %v7486_v16 = vmul.f32 %v14753_v51, %v7454_v2  ;;  %v7360_v8 = vmul.f32 1.0614054, %v14769_v4  ;;  %v7679_v44 = vmul.f32 %v7647_v12, %v7199_v39 }
 0xb02   : > { %v7833_v53 = vmul.f32 %v7801_v5, %v14697_v55  ;;  %v7612_v49 = vmul.f32 %v14736_v33, %v7580_v18  ;;  %v9699_v57 = vpop.eup %9698  ;;  %v7453_v55 = vadd.f32 1.4214138, %v7421_v63  ;;  %v7234_v58 = vmul.f32 0.3275911, %v14774_v36 }
 0xb03   : > { %v7611_v7 = vmul.f32 %v14739_v21, %v7579_v38  ;;  %v7898_v17 = vmul.f32 %v7866_v32, %v14680_v10  ;;  %v7518_v27 = vadd.f32 -0.28449672, %v7486_v16  ;;  %v7392_v31 = vadd.f32 -1.4531521, %v7360_v8 }
 0xb04   : > { %v7865_v13 = vadd.f32 1.0, %v7833_v53  ;;  %v7772_v23 = vmul.f32 %v9697_v42, %v7612_v49  ;;  %v7485_v41 = vmul.f32 %v14759_v6, %v7453_v55  ;;  %v7266_v39 = vadd.f32 1.0, %v7234_v58  ;;  %v14784_v50 = vpop.eup %9700  ;;  %v7977_v49 = vpop.permute.xlu0 %7976 }
 0xb05   : > { %v7771_v61 = vmul.f32 %v9699_v57, %v7611_v7  ;;  %v8058_v46 = vmul.f32 %v7973_v1, %v7898_v17  ;;  %v7550_v21 = vmul.f32 %v14753_v51, %v7518_v27  ;;  %v7424_v60 = vmul.f32 %v14769_v4, %v7392_v31 }
 0xb06   : > { %v7897_v33 = vmul.f32 %v7865_v13, %v14694_v54  ;;  %v7804_v29 = vsub.f32 1.0, %v7772_v23  ;;  %v7517_v3 = vadd.f32 -0.28449672, %v7485_v41  ;;  %v7359_v12 = vmul.f32 1.0614054, %v14784_v50  ;;  %v9703_v5 = vpop.eup %9702 }
 0xb07   : > { %v7803_v10 = vsub.f32 1.0, %v7771_v61  ;;  %v7582_v28 = vadd.f32 0.2548296, %v7550_v21  ;;  %v7456_v25 = vadd.f32 1.4214138, %v7424_v60  ;;  %9706 = vrcp.f32 %v7266_v39 }
 0xb08   : > { %v8057_v30 = vmul.f32 %v7971_v47, %v7897_v33  ;;  %v7836_v54 = vmul.f32 %v7804_v29, %v14724_v19  ;;  %v7549_v18 = vmul.f32 %v14759_v6, %v7517_v3  ;;  %9708 = vpow2.f32 %v7728_v35  ;;  %v7975_v35 = vpop.permute.xlu1 %7974 }
 0xb09   : > { %v7835_v32 = vmul.f32 %v7803_v10, %v14731_v59  ;;  %v7391_v2 = vadd.f32 -1.4531521, %v7359_v12  ;;  %v9705_v53 = vpop.eup %9704  ;;  %v7614_v63 = vmul.f32 %v14753_v51, %v7582_v28  ;;  %v7488_v42 = vmul.f32 %v14769_v4, %v7456_v25 }
 0xb0a   : > { %9223 = vmatmul.mubr.msk.f32.gmra.mrb[66].mxu0 %vm8095_vm13, %v8057_v30  ;;  %v7868_v38 = vadd.f32 1.0, %v7836_v54  ;;  %v7726_v19 = vmul.f32 1.442695, %v7679_v44  ;;  %v7581_v8 = vadd.f32 0.2548296, %v7549_v18  ;;  %vm7133_vm8 = vcmp.ge.f32.partialorder %v14704_v20, 0.0 }
 0xb0b   : > { %9225 = vmatprep.mubr.msk.f32.mxu0 %vm8095_vm13, %v8058_v46  ;;  %v7867_v16 = vadd.f32 1.0, %v7835_v32  ;;  %v7423_v59 = vmul.f32 %v14784_v50, %v7391_v2  ;;  %v7774_v1 = vmul.f32 %v9703_v5, %v7614_v63  ;;  %v7520_v13 = vadd.f32 -0.28449672, %v7488_v42 }
 0xb0c   : > { %v7900_v57 = vmul.f32 %v7868_v38, %v14700_v26  ;;  %v14800_v7 = vmul.f32 0.70710677, %v14163_v45  ;;  %v7613_v44 = vmul.f32 %v14759_v6, %v7581_v8  ;;  %9710 = vpow2.f32 %v7726_v19  ;;  %v7979_v38 = vpop.permute.xlu1 %7978 }
 0xb0d   : > { %v7899_v51 = vmul.f32 %v7867_v16, %v14714_v0  ;;  %v7455_v55 = vadd.f32 1.4214138, %v7423_v59  ;;  %v7806_v17 = vsub.f32 1.0, %v7774_v1  ;;  %v7552_v47 = vmul.f32 %v14769_v4, %v7520_v13 }
 0xb0e   : > { %v8060_v58 = vmul.f32 %v7977_v49, %v7900_v57  ;;  %v7166_v26 = vsel %vm7134_vm7, 1.0, %v15500_v52  ;;  %v7773_v27 = vmul.f32 %v9705_v53, %v7613_v44  ;;  %v7650_v61 = vsub.f32 0.0, %v14774_v36 }
 0xb0f   : > { %v8059_v23 = vmul.f32 %v7975_v35, %v7899_v51  ;;  %v7487_v31 = vmul.f32 %v14784_v50, %v7455_v55  ;;  %v7838_v33 = vmul.f32 %v7806_v17, %v7166_v26  ;;  %v7584_v0 = vadd.f32 0.2548296, %v7552_v47 }
 0xb10   : > { %v14812_v6 = vand.u32 2147483647, %v14800_v7  ;;  %v7069_v41 = vmul.f32 0.5, %v14035_v9  ;;  %v7165_v39 = vsel %vm7133_vm8, 1.0, %v15500_v52  ;;  %v7805_v40 = vsub.f32 1.0, %v7773_v27 }
 0xb11   : > { %9226 = vmatmul.mubr.msk.f32.gmra.mrb[68].mxu0 %vm8095_vm13, %v8059_v23  ;;  %v7519_v46 = vadd.f32 -0.28449672, %v7487_v31  ;;  %v14819_v29 = vpop.eup %9706  ;;  %v7870_v21 = vadd.f32 1.0, %v7838_v33  ;;  %vm7136_vm9 = vcmp.ge.f32.partialorder %v14717_v22, 0.0  ;;  %v7616_v60 = vmul.f32 %v14769_v4, %v7584_v0  ;;  %v7981_v22 = vpop.permute.xlu0 %7980 }
 0xb12   : > { %9228 = vmatprep.mubr.msk.f32.mxu0 %vm8095_vm13, %v8060_v58  ;;  %v7233_v30 = vmul.f32 0.3275911, %v14812_v6  ;;  %v9709_v10 = vpop.eup %9708  ;;  %v7837_v3 = vmul.f32 %v7805_v40, %v7165_v39  ;;  %v7362_v20 = vmul.f32 1.0614054, %v14819_v29  ;;  %v14828_v12 = vmul.f32 0.70710677, %v14273_v62 }
 0xb13   : > { %v7551_v9 = vmul.f32 %v14784_v50, %v7519_v46  ;;  %v7776_v5 = vmul.f32 %v9709_v10, %v7616_v60  ;;  %v7682_v54 = vmul.f32 %v7650_v61, %v14774_v36  ;;  %v14832_v25 = vmul.f32 0.70710677, %v14242_v24 }
 0xb14   : > { %v7265_v28 = vadd.f32 1.0, %v7233_v30  ;;  %v7869_v4 = vadd.f32 1.0, %v7837_v3  ;;  %v7168_v32 = vsel %vm7136_vm9, 1.0, %v15500_v52  ;;  %v7394_v2 = vadd.f32 -1.4531521, %v7362_v20 }
 0xb15   : > { %v7583_v18 = vadd.f32 0.2548296, %v7551_v9  ;;  %v7902_v53 = vmul.f32 %v7870_v21, %v14734_v11  ;;  %v7808_v63 = vsub.f32 1.0, %v7776_v5  ;;  %vm7135_vm10 = vcmp.ge.f32.partialorder %v14744_v56, 0.0 }
 0xb16   : > { %9712 = vrcp.f32 %v7265_v28  ;;  %v7901_v42 = vmul.f32 %v7869_v4, %v7069_v41  ;;  %v7426_v19 = vmul.f32 %v14819_v29, %v7394_v2  ;;  %v7204_v49 = vand.u32 2147483647, %v14828_v12  ;;  %v9711_v16 = vpop.eup %9710  ;;  %v7985_v41 = vpop.permute.xlu0 %7984 }
 0xb17   : > { %v7615_v36 = vmul.f32 %v14784_v50, %v7583_v18  ;;  %v8062_v8 = vmul.f32 %v7981_v22, %v7902_v53  ;;  %v7840_v59 = vmul.f32 %v7808_v63, %v7168_v32  ;;  %v7732_v57 = vmul.f32 1.442695, %v7682_v54 }
 0xb18   : > { %v7203_v35 = vand.u32 2147483647, %v14832_v25  ;;  %v8061_v1 = vmul.f32 %v7979_v38, %v7901_v42  ;;  %v7458_v13 = vadd.f32 1.4214138, %v7426_v19  ;;  %v7236_v51 = vmul.f32 0.3275911, %v7204_v49 }
 0xb19   : > { %v7775_v11 = vmul.f32 %v9711_v16, %v7615_v36  ;;  %v7167_v56 = vsel %vm7135_vm10, 1.0, %v15500_v52  ;;  %v7649_v58 = vsub.f32 0.0, %v14812_v6  ;;  %v7872_v47 = vadd.f32 1.0, %v7840_v59 }
 0xb1a   : > { %v7235_v44 = vmul.f32 0.3275911, %v7203_v35  ;;  %9229 = vmatmul.mubr.msk.f32.gmra.mrb[70].mxu0 %vm8095_vm13, %v8061_v1  ;;  %v7490_v55 = vmul.f32 %v14819_v29, %v7458_v13  ;;  %v7268_v17 = vadd.f32 1.0, %v7236_v51  ;;  %vm7138_vm11 = vcmp.ge.f32.partialorder %v14764_v34, 0.0 }
 0xb1b   : > { %v7807_v50 = vsub.f32 1.0, %v7775_v11  ;;  %9231 = vmatprep.mubr.msk.f32.mxu0 %vm8095_vm13, %v8062_v8  ;;  %9714 = vpow2.f32 %v7732_v57  ;;  %v7072_v26 = vmul.f32 0.5, %v14124_v43  ;;  %v7071_v33 = vmul.f32 0.5, %v14095_v15  ;;  %v7983_v15 = vpop.permute.xlu1 %7982 }
 0xb1c   : > { %v7267_v23 = vadd.f32 1.0, %v7235_v44  ;;  %v7522_v31 = vadd.f32 -0.28449672, %v7490_v55  ;;  %9716 = vrcp.f32 %v7268_v17  ;;  %v14850_v0 = vmul.f32 0.5, %v14201_v48 }
 0xb1d   : > { %v7839_v27 = vmul.f32 %v7807_v50, %v7167_v56  ;;  %v14853_v61 = vmul.f32 0.70710677, %v14334_v14  ;;  %v14856_v34 = vsel %vm7138_vm11, 1.0, %v15500_v52  ;;  %v7681_v43 = vmul.f32 %v7649_v58, %v14812_v6 }
 0xb1e   : > { %9718 = vrcp.f32 %v7267_v23  ;;  %v7554_v40 = vmul.f32 %v14819_v29, %v7522_v31  ;;  %v7904_v21 = vmul.f32 %v7872_v47, %v7072_v26  ;;  %v7652_v60 = vsub.f32 0.0, %v7204_v49 }
 0xb1f   : > { %v7871_v39 = vadd.f32 1.0, %v7839_v27  ;;  %v7206_v48 = vand.u32 2147483647, %v14853_v61  ;;  %v14864_v30 = vmul.f32 0.70710677, %v14300_v37  ;;  %v7651_v20 = vsub.f32 0.0, %v7203_v35 }
 0xb20   : > { %v14860_v46 = vpop.eup %9712  ;;  %v7586_v3 = vadd.f32 0.2548296, %v7554_v40  ;;  %v8064_v5 = vmul.f32 %v7985_v41, %v7904_v21  ;;  %v14868_v54 = vmul.f32 0.5, %v14163_v45  ;;  %v14871_v6 = vmul.f32 0.5, %v14273_v62  ;;  %v15501_v62 = vld [vmem:[#allocation46_spill] sm:$0xff] }
 0xb21   : > { %v7903_v10 = vmul.f32 %v7871_v39, %v7071_v33  ;;  %v7361_v9 = vmul.f32 1.0614054, %v14860_v46  ;;  %v7238_v28 = vmul.f32 0.3275911, %v7206_v48  ;;  %vm7137_vm12 = vcmp.ge.f32.partialorder %v14800_v7, 0.0  ;;  %v15502_v33 = vld [vmem:[#allocation45_spill] sm:$0xff] }
 0xb22   : > { %v7618_v4 = vmul.f32 %v14819_v29, %v7586_v3  ;;  %v7730_v18 = vmul.f32 1.442695, %v7681_v43  ;;  %v7684_v2 = vmul.f32 %v7652_v60, %v7204_v49  ;;  %v7205_v38 = vand.u32 2147483647, %v14864_v30 }
 0xb23   : > { %v8063_v22 = vmul.f32 %v7983_v15, %v7903_v10  ;;  %v7393_v32 = vadd.f32 -1.4531521, %v7361_v9  ;;  %v7270_v53 = vadd.f32 1.0, %v7238_v28  ;;  %v7683_v63 = vmul.f32 %v7651_v20, %v7203_v35 }
 0xb24   : > { %v7654_v42 = vsub.f32 0.0, %v7206_v48  ;;  %v14879_v36 = vmul.f32 0.70710677, %v15501_v62  ;;  %v14883_v7 = vsel %vm7137_vm12, 1.0, %v15500_v52  ;;  %v14886_v29 = vmul.f32 0.5, %v14242_v24 }
 0xb25   : > { %9232 = vmatmul.mubr.msk.f32.gmra.mrb[72].mxu0 %vm8095_vm13, %v8063_v22  ;;  %v7425_v45 = vmul.f32 %v14860_v46, %v7393_v32  ;;  %v9715_v19 = vpop.eup %9714  ;;  %9720 = vrcp.f32 %v7270_v53  ;;  %v7237_v49 = vmul.f32 0.3275911, %v7205_v38  ;;  %vm7140_vm14 = vcmp.ge.f32.partialorder %v14828_v12, 0.0 }
 0xb26   : > { %9234 = vmatprep.mubr.msk.f32.mxu0 %vm8095_vm13, %v8064_v5  ;;  %v14888_v16 = vpop.eup %9716  ;;  %v7778_v8 = vmul.f32 %v9715_v19, %v7618_v4  ;;  %v7208_v57 = vand.u32 2147483647, %v14879_v36  ;;  %9722 = vpow2.f32 %v7730_v18  ;;  %v7736_v11 = vmul.f32 1.442695, %v7684_v2  ;;  %v15503_v19 = vld [vmem:[#allocation48_spill] sm:$0xff] }
 0xb27   : > { %v7457_v59 = vadd.f32 1.4214138, %v7425_v45  ;;  %v7364_v1 = vmul.f32 1.0614054, %v14888_v16  ;;  %v7269_v13 = vadd.f32 1.0, %v7237_v49  ;;  %v7686_v44 = vmul.f32 %v7654_v42, %v7206_v48 }
 0xb28   : > { %v14892_v35 = vpop.eup %9718  ;;  %v7734_v56 = vmul.f32 1.442695, %v7683_v63  ;;  %v7653_v55 = vsub.f32 0.0, %v7205_v38  ;;  %v7240_v58 = vmul.f32 0.3275911, %v7208_v57  ;;  %v7810_v17 = vsub.f32 1.0, %v7778_v8 }
 0xb29   : > { %v7489_v24 = vmul.f32 %v14860_v46, %v7457_v59  ;;  %v7363_v51 = vmul.f32 1.0614054, %v14892_v35  ;;  %v7396_v50 = vadd.f32 -1.4531521, %v7364_v1  ;;  %9724 = vrcp.f32 %v7269_v13 }
 0xb2a   : > { %vm7139_vm15 = vcmp.ge.f32.partialorder %v14832_v25, 0.0  ;;  %v7272_v27 = vadd.f32 1.0, %v7240_v58  ;;  %v7656_v31 = vsub.f32 0.0, %v7208_v57  ;;  %v14900_v41 = vmul.f32 0.70710677, %v15502_v33 }
 0xb2b   : > { %v7521_v47 = vadd.f32 -0.28449672, %v7489_v24  ;;  %v7395_v23 = vadd.f32 -1.4531521, %v7363_v51  ;;  %v7428_v26 = vmul.f32 %v14888_v16, %v7396_v50  ;;  %9726 = vpow2.f32 %v7736_v11 }
 0xb2c   : > { %v7740_v43 = vmul.f32 1.442695, %v7686_v44  ;;  %v7685_v15 = vmul.f32 %v7653_v55, %v7205_v38  ;;  %9728 = vrcp.f32 %v7272_v27  ;;  %v7207_v60 = vand.u32 2147483647, %v14900_v41 }
 0xb2d   : > { %v7553_v39 = vmul.f32 %v14860_v46, %v7521_v47  ;;  %v7427_v40 = vmul.f32 %v14892_v35, %v7395_v23  ;;  %v7460_v21 = vadd.f32 1.4214138, %v7428_v26  ;;  %v14908_v10 = vsel %vm7140_vm14, 1.0, %v15500_v52 }
 0xb2e   : > { %9730 = vpow2.f32 %v7734_v56  ;;  %v7842_v20 = vmul.f32 %v7810_v17, %v14856_v34  ;;  %v7688_v28 = vmul.f32 %v7656_v31, %v7208_v57  ;;  %v7239_v22 = vmul.f32 0.3275911, %v7207_v60 }
 0xb2f   : > { %v7585_v48 = vadd.f32 0.2548296, %v7553_v39  ;;  %v7459_v3 = vadd.f32 1.4214138, %v7427_v40  ;;  %v14910_v9 = vpop.eup %9720  ;;  %v7492_v5 = vmul.f32 %v14888_v16, %v7460_v21  ;;  %v14918_v32 = vsel %vm7139_vm15, 1.0, %v15500_v52  ;;  %v7989_v39 = vpop.permute.xlu0 %7988 }
 0xb30   : > { %v7366_v18 = vmul.f32 1.0614054, %v14910_v9  ;;  %v9723_v2 = vpop.eup %9722  ;;  %9732 = vpow2.f32 %v7740_v43  ;;  %v7738_v38 = vmul.f32 1.442695, %v7685_v15  ;;  %v7271_v34 = vadd.f32 1.0, %v7239_v22  ;;  %v7987_v15 = vpop.permute.xlu1 %7986 }
 0xb31   : > { %v7617_v4 = vmul.f32 %v14860_v46, %v7585_v48  ;;  %v7491_v12 = vmul.f32 %v14892_v35, %v7459_v3  ;;  %v7524_v53 = vadd.f32 -0.28449672, %v7492_v5  ;;  %v14923_v49 = vmul.f32 0.70710677, %v15503_v19 }
 0xb32   : > { %v7398_v42 = vadd.f32 -1.4531521, %v7366_v18  ;;  %v7874_v25 = vadd.f32 1.0, %v7842_v20  ;;  %v7744_v59 = vmul.f32 1.442695, %v7688_v28  ;;  %9734 = vrcp.f32 %v7271_v34 }
 0xb33   : > { %v7777_v45 = vmul.f32 %v9723_v2, %v7617_v4  ;;  %v7523_v63 = vadd.f32 -0.28449672, %v7491_v12  ;;  %v14925_v46 = vpop.eup %9724  ;;  %v7556_v8 = vmul.f32 %v14888_v16, %v7524_v53  ;;  %9736 = vpow2.f32 %v7738_v38 }
 0xb34   : > { %v7430_v11 = vmul.f32 %v14910_v9, %v7398_v42  ;;  %v7365_v13 = vmul.f32 1.0614054, %v14925_v46  ;;  %v7655_v51 = vsub.f32 0.0, %v7207_v60  ;;  %v14932_v56 = vand.u32 2147483647, %v14923_v49  ;;  %v15504_v42 = vld [vmem:[#allocation47_spill] sm:$0xff] }
 0xb35   : > { %v7809_v57 = vsub.f32 1.0, %v7777_v45  ;;  %v7555_v1 = vmul.f32 %v14892_v35, %v7523_v63  ;;  %v7588_v24 = vadd.f32 0.2548296, %v7556_v8  ;;  %v9727_v44 = vpop.eup %9726  ;;  %v7906_v23 = vmul.f32 %v7874_v25, %v14850_v0 }
 0xb36   : > { %v7462_v58 = vadd.f32 1.4214138, %v7430_v11  ;;  %v7397_v17 = vadd.f32 -1.4531521, %v7365_v13  ;;  %v14935_v47 = vpop.eup %9728  ;;  %9738 = vpow2.f32 %v7744_v59  ;;  %v7242_v27 = vmul.f32 0.3275911, %v14932_v56 }
 0xb37   : > { %v7841_v50 = vmul.f32 %v7809_v57, %v14883_v7  ;;  %v7587_v55 = vadd.f32 0.2548296, %v7555_v1  ;;  %v7620_v26 = vmul.f32 %v14888_v16, %v7588_v24  ;;  %v7368_v3 = vmul.f32 1.0614054, %v14935_v47 }
 0xb38   : > { %v9731_v31 = vpop.eup %9730  ;;  %v7494_v21 = vmul.f32 %v14910_v9, %v7462_v58  ;;  %v7429_v7 = vmul.f32 %v14925_v46, %v7397_v17  ;;  %v7687_v20 = vmul.f32 %v7655_v51, %v7207_v60  ;;  %v7274_v0 = vadd.f32 1.0, %v7242_v27 }
 0xb39   : > { %v7873_v40 = vadd.f32 1.0, %v7841_v50  ;;  %v7619_v43 = vmul.f32 %v14892_v35, %v7587_v55  ;;  %v7780_v48 = vmul.f32 %v9727_v44, %v7620_v26  ;;  %vm7142_vm1 = vcmp.ge.f32.partialorder %v14853_v61, 0.0  ;;  %v7993_v44 = vpop.permute.xlu0 %7992  ;;  %v7991_v26 = vpop.permute.xlu1 %7990 }
 0xb3a   : > { %v7526_v28 = vadd.f32 -0.28449672, %v7494_v21  ;;  %vm7141_vm2 = vcmp.ge.f32.partialorder %v14864_v30, 0.0  ;;  %v7461_v22 = vadd.f32 1.4214138, %v7429_v7  ;;  %v9733_v35 = vpop.eup %9732  ;;  %v8066_v4 = vmul.f32 %v7989_v39, %v7906_v23 }
 0xb3b   : > { %v7905_v16 = vmul.f32 %v7873_v40, %v14868_v54  ;;  %v7779_v5 = vmul.f32 %v9731_v31, %v7619_v43  ;;  %v7812_v12 = vsub.f32 1.0, %v7780_v48  ;;  %v7400_v18 = vadd.f32 -1.4531521, %v7368_v3 }
 0xb3c   : > { %9740 = vrcp.f32 %v7274_v0  ;;  %v7558_v38 = vmul.f32 %v14910_v9, %v7526_v28  ;;  %v7493_v60 = vmul.f32 %v14925_v46, %v7461_v22  ;;  %v14949_v34 = vpop.eup %9734  ;;  %v7742_v63 = vmul.f32 1.442695, %v7687_v20 }
 0xb3d   : > { %v8065_v2 = vmul.f32 %v7987_v15, %v7905_v16  ;;  %v7811_v53 = vsub.f32 1.0, %v7779_v5  ;;  %v7844_v54 = vmul.f32 %v7812_v12, %v14908_v10  ;;  %v7432_v45 = vmul.f32 %v14935_v47, %v7400_v18  ;;  %v9737_v11 = vpop.eup %9736  ;;  %v15505_v12 = vld [vmem:[#allocation50_spill] sm:$0xff] }
 0xb3e   : > { %v14954_v25 = vmul.f32 0.70710677, %v15504_v42  ;;  %v7590_v59 = vadd.f32 0.2548296, %v7558_v38  ;;  %v7525_v57 = vadd.f32 -0.28449672, %v7493_v60  ;;  %9742 = vpow2.f32 %v7742_v63 }
 0xb3f   : > { %9235 = vmatmul.mubr.msk.f32.gmra.mrb[74].mxu0 %vm8095_vm13, %v8065_v2  ;;  %v7843_v8 = vmul.f32 %v7811_v53, %v14918_v32  ;;  %v7367_v1 = vmul.f32 1.0614054, %v14949_v34  ;;  %v7876_v13 = vadd.f32 1.0, %v7844_v54  ;;  %v7464_v24 = vadd.f32 1.4214138, %v7432_v45 }
 0xb40   : > { %9237 = vmatprep.mubr.msk.f32.mxu0 %vm8095_vm13, %v8066_v4  ;;  %v7658_v10 = vsub.f32 0.0, %v14932_v56  ;;  %v14962_v51 = vand.u32 2147483647, %v14954_v25  ;;  %v7622_v55 = vmul.f32 %v14910_v9, %v7590_v59  ;;  %v7557_v32 = vmul.f32 %v14925_v46, %v7525_v57  ;;  %v9739_v17 = vpop.eup %9738 }
 0xb41   : > { %v7875_v50 = vadd.f32 1.0, %v7843_v8  ;;  %v7399_v58 = vadd.f32 -1.4531521, %v7367_v1  ;;  %v7908_v23 = vmul.f32 %v7876_v13, %v14871_v6  ;;  %v7496_v27 = vmul.f32 %v14935_v47, %v7464_v24  ;;  %v7997_v24 = vpop.permute.xlu0 %7996 }
 0xb42   : > { %v7241_v31 = vmul.f32 0.3275911, %v14962_v51  ;;  %v7782_v40 = vmul.f32 %v9733_v35, %v7622_v55  ;;  %v7589_v43 = vadd.f32 0.2548296, %v7557_v32  ;;  %v7690_v15 = vmul.f32 %v7658_v10, %v14932_v56 }
 0xb43   : > { %v7907_v39 = vmul.f32 %v7875_v50, %v14886_v29  ;;  %v7431_v21 = vmul.f32 %v14949_v34, %v7399_v58  ;;  %v8068_v7 = vmul.f32 %v7993_v44, %v7908_v23  ;;  %v7528_v9 = vadd.f32 -0.28449672, %v7496_v27 }
 0xb44   : > { %v7273_v48 = vadd.f32 1.0, %v7241_v31  ;;  %v7814_v20 = vsub.f32 1.0, %v7782_v40  ;;  %v7621_v6 = vmul.f32 %v14925_v46, %v7589_v43  ;;  %v7174_v29 = vsel %vm7142_vm1, 1.0, %v15500_v52  ;;  %v15506_v31 = vld [vmem:[#allocation49_spill] sm:$0xff] }
 0xb45   : > { %v8067_v3 = vmul.f32 %v7991_v26, %v7907_v39  ;;  %v7463_v0 = vadd.f32 1.4214138, %v7431_v21  ;;  %v7173_v5 = vsel %vm7141_vm2, 1.0, %v15500_v52  ;;  %v7560_v28 = vmul.f32 %v14935_v47, %v7528_v9 }
 0xb46   : > { %v14973_v16 = vpop.eup %9740  ;;  %9744 = vrcp.f32 %v7273_v48  ;;  %v7846_v56 = vmul.f32 %v7814_v20, %v7174_v29  ;;  %v7781_v22 = vmul.f32 %v9737_v11, %v7621_v6  ;;  %v7748_v61 = vmul.f32 1.442695, %v7690_v15  ;;  %v15507_v29 = vld [vmem:[#allocation38_spill] sm:$0xff] }
 0xb47   : > { %9238 = vmatmul.mubr.msk.f32.gmra.mrb[76].mxu0 %vm8095_vm13, %v8067_v3  ;;  %v7495_v46 = vmul.f32 %v14949_v34, %v7463_v0  ;;  %v7370_v35 = vmul.f32 1.0614054, %v14973_v16  ;;  %v7592_v4 = vadd.f32 0.2548296, %v7560_v28  ;;  %v14987_v18 = vmul.f32 0.70710677, %v15505_v12 }
 0xb48   : > { %9240 = vmatprep.mubr.msk.f32.mxu0 %vm8095_vm13, %v8068_v7  ;;  %v7813_v30 = vsub.f32 1.0, %v7781_v22  ;;  %vm7144_vm3 = vcmp.ge.f32.partialorder %v14879_v36, 0.0  ;;  %v7878_v38 = vadd.f32 1.0, %v7846_v56  ;;  %v7657_v54 = vsub.f32 0.0, %v14962_v51  ;;  %v9743_v1 = vpop.eup %9742 }
 0xb49   : > { %v7527_v2 = vadd.f32 -0.28449672, %v7495_v46  ;;  %v7402_v53 = vadd.f32 -1.4531521, %v7370_v35  ;;  %v7624_v60 = vmul.f32 %v14935_v47, %v7592_v4  ;;  %v14993_v45 = vand.u32 2147483647, %v14987_v18 }
 0xb4a   : > { %v7078_v63 = vmul.f32 0.5, %v14334_v14  ;;  %v7845_v8 = vmul.f32 %v7813_v30, %v7173_v5  ;;  %v7077_v36 = vmul.f32 0.5, %v14300_v37  ;;  %v7176_v11 = vsel %vm7144_vm3, 1.0, %v15500_v52  ;;  %v7995_v14 = vpop.permute.xlu1 %7994 }
 0xb4b   : > { %v7559_v59 = vmul.f32 %v14949_v34, %v7527_v2  ;;  %v7434_v57 = vmul.f32 %v14973_v16, %v7402_v53  ;;  %v7784_v13 = vmul.f32 %v9739_v17, %v7624_v60  ;;  %v7244_v47 = vmul.f32 0.3275911, %v14993_v45  ;;  %v8001_v2 = vpop.permute.xlu0 %8000 }
 0xb4c   : > { %v7877_v10 = vadd.f32 1.0, %v7845_v8  ;;  %9746 = vpow2.f32 %v7748_v61  ;;  %v7910_v55 = vmul.f32 %v7878_v38, %v7078_v63  ;;  %v7689_v58 = vmul.f32 %v7657_v54, %v14962_v51 }
 0xb4d   : > { %v7591_v44 = vadd.f32 0.2548296, %v7559_v59  ;;  %v7466_v50 = vadd.f32 1.4214138, %v7434_v57  ;;  %v7816_v32 = vsub.f32 1.0, %v7784_v13  ;;  %v7276_v23 = vadd.f32 1.0, %v7244_v47 }
 0xb4e   : > { %v7909_v26 = vmul.f32 %v7877_v10, %v7077_v36  ;;  %v15005_v17 = vmul.f32 0.70710677, %v15506_v31  ;;  %v8070_v40 = vmul.f32 %v7997_v24, %v7910_v55  ;;  %vm7143_vm4 = vcmp.ge.f32.partialorder %v14900_v41, 0.0  ;;  %v7999_v63 = vpop.permute.xlu1 %7998  ;;  %v15508_v59 = vld [vmem:[#allocation51_spill] sm:$0xff] }
 0xb4f   : > { %v7623_v27 = vmul.f32 %v14949_v34, %v7591_v44  ;;  %v7498_v37 = vmul.f32 %v14973_v16, %v7466_v50  ;;  %v7848_v43 = vmul.f32 %v7816_v32, %v7176_v11  ;;  %9748 = vrcp.f32 %v7276_v23  ;;  %v15509_v32 = vld [vmem:[#allocation40_spill] sm:$0xff] }
 0xb50   : > { %v15007_v39 = vpop.eup %9744  ;;  %v8069_v21 = vmul.f32 %v7995_v14, %v7909_v26  ;;  %v15012_v15 = vand.u32 2147483647, %v15005_v17  ;;  %v7746_v20 = vmul.f32 1.442695, %v7689_v58  ;;  %v7175_v41 = vsel %vm7143_vm4, 1.0, %v15500_v52 }
 0xb51   : > { %v7783_v7 = vmul.f32 %v9743_v1, %v7623_v27  ;;  %v7530_v9 = vadd.f32 -0.28449672, %v7498_v37  ;;  %v7369_v51 = vmul.f32 1.0614054, %v15007_v39  ;;  %v7880_v6 = vadd.f32 1.0, %v7848_v43 }
 0xb52   : > { %9241 = vmatmul.mubr.msk.f32.gmra.mrb[78].mxu0 %vm8095_vm13, %v8069_v21  ;;  %v7243_v0 = vmul.f32 0.3275911, %v15012_v15  ;;  %v15020_v5 = vmul.f32 0.70710677, %v15507_v29  ;;  %v7660_v46 = vsub.f32 0.0, %v14993_v45  ;;  %v7080_v35 = vmul.f32 0.5, %v15501_v62 }
 0xb53   : > { %v7815_v34 = vsub.f32 1.0, %v7783_v7  ;;  %v7562_v48 = vmul.f32 %v14973_v16, %v7530_v9  ;;  %v7401_v3 = vadd.f32 -1.4531521, %v7369_v51  ;;  %9243 = vmatprep.mubr.msk.f32.mxu0 %vm8095_vm13, %v8070_v40  ;;  %v7079_v4 = vmul.f32 0.5, %v15502_v33 }
 0xb54   : > { %v7275_v61 = vadd.f32 1.0, %v7243_v0  ;;  %9750 = vpow2.f32 %v7746_v20  ;;  %v7912_v54 = vmul.f32 %v7880_v6, %v7080_v35  ;;  %v7214_v8 = vand.u32 2147483647, %v15020_v5 }
 0xb55   : > { %v7847_v28 = vmul.f32 %v7815_v34, %v7175_v41  ;;  %v7594_v56 = vadd.f32 0.2548296, %v7562_v48  ;;  %v7433_v22 = vmul.f32 %v15007_v39, %v7401_v3  ;;  %v15029_v57 = vmul.f32 0.70710677, %v15508_v59 }
 0xb56   : > { %v9747_v30 = vpop.eup %9746  ;;  %9752 = vrcp.f32 %v7275_v61  ;;  %v7692_v33 = vmul.f32 %v7660_v46, %v14993_v45  ;;  %v8072_v11 = vmul.f32 %v8001_v2, %v7912_v54  ;;  %vm7146_vm5 = vcmp.ge.f32.partialorder %v14923_v49, 0.0  ;;  %v8005_v54 = vpop.permute.xlu0 %8004 }
 0xb57   : > { %v7879_v53 = vadd.f32 1.0, %v7847_v28  ;;  %v7626_v38 = vmul.f32 %v14973_v16, %v7594_v56  ;;  %v7465_v60 = vadd.f32 1.4214138, %v7433_v22  ;;  %v7246_v16 = vmul.f32 0.3275911, %v7214_v8 }
 0xb58   : > { %v7213_v50 = vand.u32 2147483647, %v15029_v57  ;;  %v7752_v45 = vmul.f32 1.442695, %v7692_v33  ;;  %v15041_v58 = vmul.f32 0.70710677, %v15509_v32 }
 0xb59   : > { %v7911_v1 = vmul.f32 %v7879_v53, %v7079_v4  ;;  %v7497_v62 = vmul.f32 %v15007_v39, %v7465_v60  ;;  %v15033_v36 = vpop.eup %9748  ;;  %v7786_v13 = vmul.f32 %v9747_v30, %v7626_v38  ;;  %v7278_v44 = vadd.f32 1.0, %v7246_v16 }
 0xb5a   : > { %v7372_v10 = vmul.f32 1.0614054, %v15033_v36  ;;  %v7659_v26 = vsub.f32 0.0, %v15012_v15  ;;  %v7245_v27 = vmul.f32 0.3275911, %v7213_v50  ;;  %v7178_v40 = vsel %vm7146_vm5, 1.0, %v15500_v52 }
 0xb5b   : > { %v8071_v47 = vmul.f32 %v7999_v63, %v7911_v1  ;;  %v7529_v24 = vadd.f32 -0.28449672, %v7497_v62  ;;  %v7818_v23 = vsub.f32 1.0, %v7786_v13  ;;  %9754 = vrcp.f32 %v7278_v44  ;;  %v8003_v13 = vpop.permute.xlu1 %8002 }
 0xb5c   : > { %v7404_v14 = vadd.f32 -1.4531521, %v7372_v10  ;;  %v7277_v43 = vadd.f32 1.0, %v7245_v27  ;;  %9756 = vpow2.f32 %v7752_v45  ;;  %v15049_v51 = vand.u32 2147483647, %v15041_v58 }
 0xb5d   : > { %9244 = vmatmul.mubr.msk.f32.gmra.mrb[80].mxu0 %vm8095_vm13, %v8071_v47  ;;  %v7561_v55 = vmul.f32 %v15007_v39, %v7529_v24  ;;  %v7850_v48 = vmul.f32 %v7818_v23, %v7178_v40  ;;  %v7691_v3 = vmul.f32 %v7659_v26, %v15012_v15  ;;  %vm7145_vm6 = vcmp.ge.f32.partialorder %v14954_v25, 0.0 }
 0xb5e   : > { %9246 = vmatprep.mubr.msk.f32.mxu0 %vm8095_vm13, %v8072_v11  ;;  %v7436_v37 = vmul.f32 %v15033_v36, %v7404_v14  ;;  %v9751_v21 = vpop.eup %9750  ;;  %9758 = vrcp.f32 %v7277_v43  ;;  %v7662_v0 = vsub.f32 0.0, %v7214_v8  ;;  %v7177_v35 = vsel %vm7145_vm6, 1.0, %v15500_v52 }
 0xb5f   : > { %v7593_v49 = vadd.f32 0.2548296, %v7561_v55  ;;  %v7882_v46 = vadd.f32 1.0, %v7850_v48  ;;  %v7750_v4 = vmul.f32 1.442695, %v7691_v3  ;;  %v7082_v53 = vmul.f32 0.5, %v15503_v19 }
 0xb60   : > { %v7468_v9 = vadd.f32 1.4214138, %v7436_v37  ;;  %v15051_v34 = vpop.eup %9752  ;;  %v7694_v38 = vmul.f32 %v7662_v0, %v7214_v8  ;;  %v7661_v60 = vsub.f32 0.0, %v7213_v50  ;;  %v7081_v63 = vmul.f32 0.5, %v15504_v42 }
 0xb61   : > { %v7625_v7 = vmul.f32 %v15007_v39, %v7593_v49  ;;  %v7371_v41 = vmul.f32 1.0614054, %v15051_v34  ;;  %v7247_v39 = vmul.f32 0.3275911, %v15049_v51  ;;  %v7914_v11 = vmul.f32 %v7882_v46, %v7082_v53 }
 0xb62   : > { %v7500_v6 = vmul.f32 %v15033_v36, %v7468_v9  ;;  %v7756_v14 = vmul.f32 1.442695, %v7694_v38  ;;  %v7693_v45 = vmul.f32 %v7661_v60, %v7213_v50  ;;  %v7663_v37 = vsub.f32 0.0, %v15049_v51 }
 0xb63   : > { %v7785_v20 = vmul.f32 %v9751_v21, %v7625_v7  ;;  %v7403_v22 = vadd.f32 -1.4531521, %v7371_v41  ;;  %v7279_v61 = vadd.f32 1.0, %v7247_v39  ;;  %v8074_v44 = vmul.f32 %v8005_v54, %v7914_v11 }
 0xb64   : > { %v7532_v56 = vadd.f32 -0.28449672, %v7500_v6  ;;  %vm7148_vm7 = vcmp.ge.f32.partialorder %v14987_v18, 0.0  ;;  %v7754_v50 = vmul.f32 1.442695, %v7693_v45  ;;  %vm7147_vm8 = vcmp.ge.f32.partialorder %v15005_v17, 0.0 }
 0xb65   : > { %v7817_v28 = vsub.f32 1.0, %v7785_v20  ;;  %v7435_v25 = vmul.f32 %v15051_v34, %v7403_v22  ;;  %v15061_v2 = vpop.eup %9754  ;;  %9760 = vrcp.f32 %v7279_v61  ;;  %v7695_v20 = vmul.f32 %v7663_v37, %v15049_v51 }
 0xb66   : > { %v7564_v30 = vmul.f32 %v15033_v36, %v7532_v56  ;;  %9762 = vpow2.f32 %v7750_v4  ;;  %v7374_v16 = vmul.f32 1.0614054, %v15061_v2  ;;  %v9757_v47 = vpop.eup %9756  ;;  %v7180_v6 = vsel %vm7148_vm7, 1.0, %v15500_v52 }
 0xb67   : > { %v7849_v15 = vmul.f32 %v7817_v28, %v7177_v35  ;;  %v7467_v33 = vadd.f32 1.4214138, %v7435_v25  ;;  %9764 = vpow2.f32 %v7756_v14  ;;  %v7758_v61 = vmul.f32 1.442695, %v7695_v20 }
 0xb68   : > { %v7596_v62 = vadd.f32 0.2548296, %v7564_v30  ;;  %v9759_v8 = vpop.eup %9758  ;;  %v7406_v55 = vadd.f32 -1.4531521, %v7374_v16  ;;  %9766 = vpow2.f32 %v7754_v50  ;;  %v7083_v17 = vmul.f32 0.5, %v15506_v31 }
 0xb69   : > { %v7881_v1 = vadd.f32 1.0, %v7849_v15  ;;  %v7499_v19 = vmul.f32 %v15051_v34, %v7467_v33  ;;  %v7373_v27 = vmul.f32 1.0614054, %v9759_v8  ;;  %9768 = vpow2.f32 %v7758_v61  ;;  %v8009_v33 = vpop.permute.xlu0 %8008  ;;  %v15511_v61 = vld [vmem:[#allocation23_spill] sm:$0xff] }
 0xb6a   : > { %v7628_v10 = vmul.f32 %v15033_v36, %v7596_v62  ;;  %v7438_v49 = vmul.f32 %v15061_v2, %v7406_v55  ;;  %vm7150_vm9 = vcmp.ge.f32.partialorder %v15020_v5, 0.0  ;;  %vm7149_vm10 = vcmp.ge.f32.partialorder %v15029_v57, 0.0 }
 0xb6b   : > { %v7913_v24 = vmul.f32 %v7881_v1, %v7081_v63  ;;  %v7531_v26 = vadd.f32 -0.28449672, %v7499_v19  ;;  %v7405_v36 = vadd.f32 -1.4531521, %v7373_v27  ;;  %v7084_v63 = vmul.f32 0.5, %v15505_v12 }
 0xb6c   : > { %v7788_v23 = vmul.f32 %v9757_v47, %v7628_v10  ;;  %v7470_v21 = vadd.f32 1.4214138, %v7438_v49  ;;  %v7182_v31 = vsel %vm7150_vm9, 1.0, %v15500_v52  ;;  %v7085_v57 = vmul.f32 0.5, %v15508_v59 }
 0xb6d   : > { %v8073_v42 = vmul.f32 %v8003_v13, %v7913_v24  ;;  %v7563_v40 = vmul.f32 %v15051_v34, %v7531_v26  ;;  %v7437_v9 = vmul.f32 %v9759_v8, %v7405_v36  ;;  %v8007_v24 = vpop.permute.xlu1 %8006  ;;  %vm7151_vm11 = vcmp.ge.f32.partialorder %v15041_v58, 0.0 }
 0xb6e   : > { %v7820_v43 = vsub.f32 1.0, %v7788_v23  ;;  %v7502_v3 = vmul.f32 %v15061_v2, %v7470_v21  ;;  %v8013_v21 = vpop.permute.xlu0 %8012 }
 0xb6f   : > { %9247 = vmatmul.mubr.msk.f32.gmra.mrb[82].mxu0 %vm8095_vm13, %v8073_v42  ;;  %v7595_v7 = vadd.f32 0.2548296, %v7563_v40  ;;  %v9761_v48 = vpop.eup %9760  ;;  %v7469_v0 = vadd.f32 1.4214138, %v7437_v9 }
 0xb70   : > { %9249 = vmatprep.mubr.msk.f32.mxu0 %vm8095_vm13, %v8074_v44  ;;  %v7375_v39 = vmul.f32 1.0614054, %v9761_v48  ;;  %v9763_v18 = vpop.eup %9762  ;;  %v7852_v28 = vmul.f32 %v7820_v43, %v7180_v6  ;;  %v7534_v56 = vadd.f32 -0.28449672, %v7502_v3  ;;  %v7086_v43 = vmul.f32 0.5, %v15507_v29 }
 0xb71   : > { %v7627_v41 = vmul.f32 %v15051_v34, %v7595_v7  ;;  %v7501_v46 = vmul.f32 %v9759_v8, %v7469_v0  ;;  %v7179_v34 = vsel %vm7147_vm8, 1.0, %v15500_v52  ;;  %v9765_v62 = vpop.eup %9764  ;;  %v8011_v3 = vpop.permute.xlu1 %8010  ;;  %v7183_v0 = vsel %vm7151_vm11, 1.0, %v15500_v52 }
 0xb72   : > { %v7407_v35 = vadd.f32 -1.4531521, %v7375_v39  ;;  %v7566_v4 = vmul.f32 %v15061_v2, %v7534_v56  ;;  %v7884_v25 = vadd.f32 1.0, %v7852_v28  ;;  %v9767_v14 = vpop.eup %9766  ;;  %v7087_v29 = vmul.f32 0.5, %v15509_v32  ;;  %v15101_v56 = vld [vmem:[%s15259_s18] ss:$0 sm:$0xff] }
 0xb73   : > { %v7787_v22 = vmul.f32 %v9763_v18, %v7627_v41  ;;  %v7533_v51 = vadd.f32 -0.28449672, %v7501_v46  ;;  %v9769_v36 = vpop.eup %9768 }
 0xb74   : > { %v7439_v30 = vmul.f32 %v9761_v48, %v7407_v35  ;;  %v7598_v53 = vadd.f32 0.2548296, %v7566_v4  ;;  %v7916_v47 = vmul.f32 %v7884_v25, %v7084_v63  ;;  %v15510_v35 = vld [vmem:[#allocation16_spill] sm:$0xff] }
 0xb75   : > { %v7819_v15 = vsub.f32 1.0, %v7787_v22  ;;  %v7565_v60 = vmul.f32 %v9759_v8, %v7533_v51  ;;  %v8015_v59 = vpop.permute.xlu1 %8014 }
 0xb76   : > { %v7471_v54 = vadd.f32 1.4214138, %v7439_v30  ;;  %v7630_v1 = vmul.f32 %v15061_v2, %v7598_v53  ;;  %v8076_v12 = vmul.f32 %v8009_v33, %v7916_v47  ;;  %v15512_v53 = vld [vmem:[#allocation26_spill] sm:$0xff] }
 0xb77   : > { %v7851_v38 = vmul.f32 %v7819_v15, %v7179_v34  ;;  %v7597_v13 = vadd.f32 0.2548296, %v7565_v60  ;;  %v15513_v60 = vld [vmem:[#allocation6_spill] sm:$0xff] }
 0xb78   : > { %v7503_v16 = vmul.f32 %v9761_v48, %v7471_v54  ;;  %v7790_v10 = vmul.f32 %v9765_v62, %v7630_v1  ;;  %v15514_v33 = vld [vmem:[#allocation10_spill] sm:$0xff] }
 0xb79   : > { %v7883_v11 = vadd.f32 1.0, %v7851_v38  ;;  %v7629_v44 = vmul.f32 %v9759_v8, %v7597_v13  ;;  %v7181_v8 = vsel %vm7149_vm10, 1.0, %v15500_v52  ;;  %v15515_v13 = vld [vmem:[#allocation15_spill] sm:$0xff] }
 0xb7a   : > { %v7535_v55 = vadd.f32 -0.28449672, %v7503_v16  ;;  %v7822_v45 = vsub.f32 1.0, %v7790_v10 }
 0xb7b   : > { %v7915_v19 = vmul.f32 %v7883_v11, %v7083_v17  ;;  %v7789_v42 = vmul.f32 %v9767_v14, %v7629_v44  ;;  %v15516_v44 = vld [vmem:[#allocation25_spill] sm:$0xff]  ;;  %v15517_v14 = vld [vmem:[#allocation28_spill] sm:$0xff] }
 0xb7c   : > { %v7567_v23 = vmul.f32 %v9761_v48, %v7535_v55  ;;  %v7854_v26 = vmul.f32 %v7822_v45, %v7182_v31 }
 0xb7d   : > { %v8075_v2 = vmul.f32 %v8007_v24, %v7915_v19  ;;  %v7821_v5 = vsub.f32 1.0, %v7789_v42 }
 0xb7e   : > { %v7599_v27 = vadd.f32 0.2548296, %v7567_v23  ;;  %v7886_v49 = vadd.f32 1.0, %v7854_v26  ;;  %v15518_v23 = vld [vmem:[#allocation29_spill] sm:$0xff] }
 0xb7f   : > { %9250 = vmatmul.mubr.msk.f32.gmra.mrb[84].mxu0 %vm8095_vm13, %v8075_v2  ;;  %v7853_v37 = vmul.f32 %v7821_v5, %v7181_v8  ;;  %v15519_v5 = vld [vmem:[#allocation24_spill] sm:$0xff] }
 0xb80   : > { %9252 = vmatprep.mubr.msk.f32.mxu0 %vm8095_vm13, %v8076_v12  ;;  %v7631_v40 = vmul.f32 %v9761_v48, %v7599_v27  ;;  %v7918_v9 = vmul.f32 %v7886_v49, %v7086_v43 }
 0xb81   : > { %v7885_v50 = vadd.f32 1.0, %v7853_v37 }
 0xb82   : > { %v7791_v7 = vmul.f32 %v9769_v36, %v7631_v40  ;;  %v8078_v41 = vmul.f32 %v8013_v21, %v7918_v9  ;;  %v15520_v36 = vld [vmem:[#allocation20_spill] sm:$0xff]  ;;  %v15521_v21 = vld [vmem:[#allocation30_spill] sm:$0xff] }
 0xb83   : > { %v7917_v20 = vmul.f32 %v7885_v50, %v7085_v57 }
 0xb84   : > { %v7823_v6 = vsub.f32 1.0, %v7791_v7 }
 0xb85   : > { %v8077_v39 = vmul.f32 %v8011_v3, %v7917_v20  ;;  %v15522_v20 = vld [vmem:[#allocation13_spill] sm:$0xff] }
 0xb86   : > { %v7855_v48 = vmul.f32 %v7823_v6, %v7183_v0 }
 0xb87   : > { %9253 = vmatmul.mubr.msk.f32.gmra.mrb[86].mxu0 %vm8095_vm13, %v8077_v39 }
 0xb88   : > { %v7887_v18 = vadd.f32 1.0, %v7855_v48  ;;  %9255 = vmatprep.mubr.msk.f32.mxu0 %vm8095_vm13, %v8078_v41  ;;  %v15523_v41 = vld [vmem:[#allocation27_spill] sm:$0xff] }
 0xb8a   : > { %v7919_v58 = vmul.f32 %v7887_v18, %v7087_v29 }
 0xb8c   : > { %v8079_v28 = vmul.f32 %v8015_v59, %v7919_v58  ;;  %v15524_v59 = vld [vmem:[#allocation14_spill] sm:$0xff] }
 0xb8e   : > { %9256 = vmatmul.mubr.msk.f32.gmra.mrb[88].mxu0 %vm8095_vm13, %v8079_v28  ;;  %v15525_v28 = vld [vmem:[#allocation7_spill] sm:$0xff] }
 0xba5   : > { %v9212_v52 = vpop.f32.mrb[58].mxu0 }
 0xba6   : > { %v8264_v22 = vadd.f32 %v9212_v52, %v15101_v56  ;;  %v8258_v46 = vpop.f32.mrb[59].mxu0 }
 0xba7   : > { %v8259_v32 = vadd.f32 %v15101_v56, %v8258_v46 }
 0xba8   : > { %v8418_v4 = vadd.f32 %v8264_v22, %v15510_v35 }
 0xba9   : > { %v8417_v15 = vadd.f32 %v8259_v32, %v15511_v61 }
 0xbaa   : > { %8450 = vst.msk [vmem:[%s15109_s23 + $0x8] sm:$0xff] %vm635_vm0, %v8418_v4  ;;  %v15526_v4 = vld [vmem:[#allocation11_spill] sm:$0xff] }
 0xbab   : > { %8449 = vst.msk [vmem:[%s15109_s23] sm:$0xff] %vm635_vm0, %v8417_v15  ;;  %v15527_v15 = vld [vmem:[#allocation8_spill] sm:$0xff] }
 0xbae   : > { %v9215_v51 = vpop.f32.mrb[60].mxu0 }
 0xbaf   : > { %v8274_v30 = vadd.f32 %v9215_v51, %v15101_v56  ;;  %v8268_v25 = vpop.f32.mrb[61].mxu0 }
 0xbb0   : > { %v8269_v34 = vadd.f32 %v15101_v56, %v8268_v25 }
 0xbb1   : > { %v8420_v38 = vadd.f32 %v8274_v30, %v15512_v53 }
 0xbb2   : > { %v8419_v54 = vadd.f32 %v8269_v34, %v15513_v60 }
 0xbb3   : > { %8452 = vst.msk [vmem:[%s15109_s23 + $0x18] sm:$0xff] %vm635_vm0, %v8420_v38  ;;  %v15528_v38 = vld [vmem:[#allocation21_spill] sm:$0xff] }
 0xbb4   : > { %8451 = vst.msk [vmem:[%s15109_s23 + $0x10] sm:$0xff] %vm635_vm0, %v8419_v54  ;;  %v15529_v54 = vld [vmem:[#allocation19_spill] sm:$0xff] }
 0xbb5   : > { %v9218_v63 = vpop.f32.mrb[62].mxu0 }
 0xbb6   : > { %v8284_v17 = vadd.f32 %v9218_v63, %v15101_v56  ;;  %v8278_v1 = vpop.f32.mrb[63].mxu0 }
 0xbb7   : > { %v8279_v62 = vadd.f32 %v15101_v56, %v8278_v1 }
 0xbb8   : > { %v8422_v11 = vadd.f32 %v8284_v17, %v15514_v33 }
 0xbb9   : > { %v8421_v16 = vadd.f32 %v8279_v62, %v15515_v13 }
 0xbba   : > { %8454 = vst.msk [vmem:[%s15109_s23 + $0x28] sm:$0xff] %vm635_vm0, %v8422_v11  ;;  %v15530_v11 = vld [vmem:[#allocation9_spill] sm:$0xff] }
 0xbbb   : > { %8453 = vst.msk [vmem:[%s15109_s23 + $0x20] sm:$0xff] %vm635_vm0, %v8421_v16  ;;  %v15531_v16 = vld [vmem:[#allocation12_spill] sm:$0xff] }
 0xbc2   : > { %v9221_v47 = vpop.f32.mrb[64].mxu0 }
 0xbc3   : > { %v8294_v24 = vadd.f32 %v9221_v47, %v15101_v56  ;;  %v8288_v10 = vpop.f32.mrb[65].mxu0 }
 0xbc4   : > { %v8289_v19 = vadd.f32 %v15101_v56, %v8288_v10 }
 0xbc5   : > { %v8424_v55 = vadd.f32 %v8294_v24, %v15516_v44 }
 0xbc6   : > { %v8423_v12 = vadd.f32 %v8289_v19, %v15517_v14 }
 0xbc7   : > { %8456 = vst.msk [vmem:[%s15109_s23 + $0x38] sm:$0xff] %vm635_vm0, %v8424_v55  ;;  %v15532_v55 = vld [vmem:[#allocation22_spill] sm:$0xff] }
 0xbc8   : > { %8455 = vst.msk [vmem:[%s15109_s23 + $0x30] sm:$0xff] %vm635_vm0, %v8423_v12  ;;  %v15533_v12 = vld [vmem:[#allocation17_spill] sm:$0xff] }
 0xbdd   : > { %v9224_v31 = vpop.f32.mrb[66].mxu0 }
 0xbde   : > { %v8304_v45 = vadd.f32 %v9224_v31, %v15101_v56  ;;  %v8298_v2 = vpop.f32.mrb[67].mxu0 }
 0xbdf   : > { %v8299_v42 = vadd.f32 %v15101_v56, %v8298_v2 }
 0xbe0   : > { %v8426_v26 = vadd.f32 %v8304_v45, %v15518_v23 }
 0xbe1   : > { %v8425_v27 = vadd.f32 %v8299_v42, %v15519_v5 }
 0xbe2   : > { %8458 = vst.msk [vmem:[%s15109_s23 + $0x48] sm:$0xff] %vm635_vm0, %v8426_v26  ;;  %v15534_v26 = vld [vmem:[#allocation31_spill] sm:$0xff] }
 0xbe3   : > { %8457 = vst.msk [vmem:[%s15109_s23 + $0x40] sm:$0xff] %vm635_vm0, %v8425_v27  ;;  %v15535_v27 = vld [vmem:[#allocation18_spill] sm:$0xff] }
 0xbe4   : > { %v9227_v49 = vpop.f32.mrb[68].mxu0 }
 0xbe5   : > { %v8314_v8 = vadd.f32 %v9227_v49, %v15101_v56  ;;  %v8308_v37 = vpop.f32.mrb[69].mxu0 }
 0xbe6   : > { %v8309_v40 = vadd.f32 %v15101_v56, %v8308_v37 }
 0xbe7   : > { %v8428_v43 = vadd.f32 %v8314_v8, %v15520_v36 }
 0xbe8   : > { %v8427_v57 = vadd.f32 %v8309_v40, %v15521_v21 }
 0xbe9   : > { %8460 = vst.msk [vmem:[%s15109_s23 + $0x58] sm:$0xff] %vm635_vm0, %v8428_v43  ;;  %v15536_v43 = vld [vmem:[#allocation33_spill] sm:$0xff] }
 0xbea   : > { %8459 = vst.msk [vmem:[%s15109_s23 + $0x50] sm:$0xff] %vm635_vm0, %v8427_v57  ;;  %v15537_v57 = vld [vmem:[#allocation32_spill] sm:$0xff] }
 0xbed   : > { %v9230_v50 = vpop.f32.mrb[70].mxu0 }
 0xbee   : > { %v8324_v7 = vadd.f32 %v9230_v50, %v15101_v56  ;;  %v8318_v9 = vpop.f32.mrb[71].mxu0 }
 0xbef   : > { %v8319_v3 = vadd.f32 %v15101_v56, %v8318_v9 }
 0xbf0   : > { %v8430_v6 = vadd.f32 %v8324_v7, %v15522_v20 }
 0xbf1   : > { %v8429_v0 = vadd.f32 %v8319_v3, %v15523_v41 }
 0xbf2   : > { %8462 = vst.msk [vmem:[%s15109_s23 + $0x68] sm:$0xff] %vm635_vm0, %v8430_v6  ;;  %v15538_v6 = vld [vmem:[#allocation35_spill] sm:$0xff] }
 0xbf3   : > { %8461 = vst.msk [vmem:[%s15109_s23 + $0x60] sm:$0xff] %vm635_vm0, %v8429_v0  ;;  %v15539_v0 = vld [vmem:[#allocation34_spill] sm:$0xff] }
 0xbf8   : > { %v9233_v39 = vpop.f32.mrb[72].mxu0 }
 0xbf9   : > { %v8334_v48 = vadd.f32 %v9233_v39, %v15101_v56  ;;  %v8328_v29 = vpop.f32.mrb[73].mxu0 }
 0xbfa   : > { %v8329_v18 = vadd.f32 %v15101_v56, %v8328_v29 }
 0xbfb   : > { %v8432_v58 = vadd.f32 %v8334_v48, %v15524_v59 }
 0xbfc   : > { %v8431_v52 = vadd.f32 %v8329_v18, %v15525_v28 }
 0xbfd   : > { %8464 = vst.msk [vmem:[%s15109_s23 + $0x78] sm:$0xff] %vm635_vm0, %v8432_v58  ;;  %v15540_v58 = vld [vmem:[#allocation37_spill] sm:$0xff] }
 0xbfe   : > { %8463 = vst.msk [vmem:[%s15109_s23 + $0x70] sm:$0xff] %vm635_vm0, %v8431_v52  ;;  %v15541_v52 = vld [vmem:[#allocation36_spill] sm:$0xff] }
 0xc12   : > { %v9236_v22 = vpop.f32.mrb[74].mxu0 }
 0xc13   : > { %v8344_v46 = vadd.f32 %v9236_v22, %v15101_v56  ;;  %v8338_v32 = vpop.f32.mrb[75].mxu0 }
 0xc14   : > { %v8339_v35 = vadd.f32 %v15101_v56, %v8338_v32 }
 0xc15   : > { %v8434_v61 = vadd.f32 %v8344_v46, %v15526_v4 }
 0xc16   : > { %v8433_v51 = vadd.f32 %v8339_v35, %v15527_v15 }
 0xc17   : > { %8466 = vst.msk [vmem:[%s15109_s23 + $0x88] sm:$0xff] %vm635_vm0, %v8434_v61 }
 0xc18   : > { %8465 = vst.msk [vmem:[%s15109_s23 + $0x80] sm:$0xff] %vm635_vm0, %v8433_v51 }
 0xc1a   : > { %v9239_v30 = vpop.f32.mrb[76].mxu0 }
 0xc1b   : > { %v8354_v25 = vadd.f32 %v9239_v30, %v15101_v56  ;;  %v8348_v34 = vpop.f32.mrb[77].mxu0 }
 0xc1c   : > { %v8349_v53 = vadd.f32 %v15101_v56, %v8348_v34 }
 0xc1d   : > { %v8436_v60 = vadd.f32 %v8354_v25, %v15528_v38 }
 0xc1e   : > { %v8435_v63 = vadd.f32 %v8349_v53, %v15529_v54 }
 0xc1f   : > { %8468 = vst.msk [vmem:[%s15109_s23 + $0x98] sm:$0xff] %vm635_vm0, %v8436_v60 }
 0xc20   : > { %8467 = vst.msk [vmem:[%s15109_s23 + $0x90] sm:$0xff] %vm635_vm0, %v8435_v63 }
 0xc25   : > { %v9242_v17 = vpop.f32.mrb[78].mxu0 }
 0xc26   : > { %v8364_v1 = vadd.f32 %v9242_v17, %v15101_v56  ;;  %v8358_v62 = vpop.f32.mrb[79].mxu0 }
 0xc27   : > { %v8359_v33 = vadd.f32 %v15101_v56, %v8358_v62 }
 0xc28   : > { %v8438_v13 = vadd.f32 %v8364_v1, %v15530_v11 }
 0xc29   : > { %v8437_v47 = vadd.f32 %v8359_v33, %v15531_v16 }
 0xc2a   : > { %8470 = vst.msk [vmem:[%s15109_s23 + $0xa8] sm:$0xff] %vm635_vm0, %v8438_v13 }
 0xc2b   : > { %8469 = vst.msk [vmem:[%s15109_s23 + $0xa0] sm:$0xff] %vm635_vm0, %v8437_v47 }
 0xc30   : > { %v9245_v24 = vpop.f32.mrb[80].mxu0 }
 0xc31   : > { %v8374_v10 = vadd.f32 %v9245_v24, %v15101_v56  ;;  %v8368_v19 = vpop.f32.mrb[81].mxu0 }
 0xc32   : > { %v8369_v44 = vadd.f32 %v15101_v56, %v8368_v19 }
 0xc33   : > { %v8440_v14 = vadd.f32 %v8374_v10, %v15532_v55 }
 0xc34   : > { %v8439_v31 = vadd.f32 %v8369_v44, %v15533_v12 }
 0xc35   : > { %8472 = vst.msk [vmem:[%s15109_s23 + $0xb8] sm:$0xff] %vm635_vm0, %v8440_v14 }
 0xc36   : > { %8471 = vst.msk [vmem:[%s15109_s23 + $0xb0] sm:$0xff] %vm635_vm0, %v8439_v31 }
 0xc42   : > { %v9248_v45 = vpop.f32.mrb[82].mxu0 }
 0xc43   : > { %v8384_v2 = vadd.f32 %v9248_v45, %v15101_v56  ;;  %v8378_v42 = vpop.f32.mrb[83].mxu0 }
 0xc44   : > { %v8379_v23 = vadd.f32 %v15101_v56, %v8378_v42 }
 0xc45   : > { %v8442_v5 = vadd.f32 %v8384_v2, %v15534_v26 }
 0xc46   : > { %v8441_v49 = vadd.f32 %v8379_v23, %v15535_v27 }
 0xc47   : > { %8474 = vst.msk [vmem:[%s15109_s23 + $0xc8] sm:$0xff] %vm635_vm0, %v8442_v5 }
 0xc48   : > { %8473 = vst.msk [vmem:[%s15109_s23 + $0xc0] sm:$0xff] %vm635_vm0, %v8441_v49 }
 0xc52   : > { %v9251_v8 = vpop.f32.mrb[84].mxu0 }
 0xc53   : > { %v8394_v37 = vadd.f32 %v9251_v8, %v15101_v56  ;;  %v8388_v40 = vpop.f32.mrb[85].mxu0 }
 0xc54   : > { %v8389_v36 = vadd.f32 %v15101_v56, %v8388_v40 }
 0xc55   : > { %v8444_v21 = vadd.f32 %v8394_v37, %v15536_v43 }
 0xc56   : > { %v8443_v50 = vadd.f32 %v8389_v36, %v15537_v57 }
 0xc57   : > { %8476 = vst.msk [vmem:[%s15109_s23 + $0xd8] sm:$0xff] %vm635_vm0, %v8444_v21 }
 0xc58   : > { %8475 = vst.msk [vmem:[%s15109_s23 + $0xd0] sm:$0xff] %vm635_vm0, %v8443_v50 }
 0xc5a   : > { %v9254_v7 = vpop.f32.mrb[86].mxu0 }
 0xc5b   : > { %v8404_v9 = vadd.f32 %v9254_v7, %v15101_v56  ;;  %v8398_v3 = vpop.f32.mrb[87].mxu0 }
 0xc5c   : > { %v8399_v20 = vadd.f32 %v15101_v56, %v8398_v3 }
 0xc5d   : > { %v8446_v41 = vadd.f32 %v8404_v9, %v15538_v6 }
 0xc5e   : > { %v8445_v39 = vadd.f32 %v8399_v20, %v15539_v0 }
 0xc5f   : > { %8478 = vst.msk [vmem:[%s15109_s23 + $0xe8] sm:$0xff] %vm635_vm0, %v8446_v41 }
 0xc60   : > { %8477 = vst.msk [vmem:[%s15109_s23 + $0xe0] sm:$0xff] %vm635_vm0, %v8445_v39 }
 0xc61   : > { %v9257_v48 = vpop.f32.mrb[88].mxu0 }
 0xc62   : > { %v8414_v29 = vadd.f32 %v9257_v48, %v15101_v56  ;;  %v8408_v18 = vpop.f32.mrb[89].mxu0 }
 0xc63   : > { %v8409_v59 = vadd.f32 %v15101_v56, %v8408_v18 }
 0xc64   : > { %v8448_v28 = vadd.f32 %v8414_v29, %v15540_v58 }
 0xc65   : > { %v8447_v22 = vadd.f32 %v8409_v59, %v15541_v52 }
 0xc66   : > { %8480 = vst.msk [vmem:[%s15109_s23 + $0xf8] sm:$0xff] %vm635_vm0, %v8448_v28 }
 0xc67   : > { %8479 = vst.msk [vmem:[%s15109_s23 + $0xf0] sm:$0xff] %vm635_vm0, %v8447_v22 }
 0xc68 PF: > { %s29_s0 = sadd.s32 1, %s9839_s0  }
 0xc69   : > { %p26_p4 = scmp.ge.s32.totalorder %s29_s0, 4  }
 0xc6b   :  { %28 = sbr.rel (!%p26_p4) target bundleno = 5 (0x5), region = 130 }

</bundles_post_ra>
